<compile_context>
chip_gen: v5e
topology: v5e:2x2
jax: 0.10.0
libtpu: 0.0.40
codegen_flags: <defaults>
</compile_context>

<pallas_src>
import math
import functools

import jax
import jax.numpy as jnp
from jax.experimental import pallas as pl
from jax.experimental.pallas import tpu as pltpu


def _round_up(x, m):
    return ((x + m - 1) // m) * m


def _vmem_capacity_bytes():
    try:
        return int(pltpu.get_tpu_info().vmem_capacity_bytes)
    except Exception:
        return 64 << 20            # conservative fallback (v7x per-core)


# ----------------------------- Pallas kernel --------------------------------
def _q2l_cross_kernel(
    a_ref,        # [C_pad, D_pad]  (tgt @ Wq @ Wk^T) * scale      (compute dtype)
    tgt_ref,      # [C_pad, D_pad]  post-self-attention queries     (f32)
    mem_ref,      # [TB, D_pad, S_pad]  memory block                (compute dtype)
    wvo_ref,      # [D_pad, D_pad]  Wv @ Wo                         (compute dtype)
    w1_ref,       # [D_pad, F_pad]  FFN in                          (compute dtype)
    w2_ref,       # [F_pad, D_pad]  FFN out                         (compute dtype)
    fcw_ref,      # [C_pad, D_pad]  GroupWiseLinear W               (f32)
    small_ref,    # [8, P]          packed LN/bias params           (f32)
    out_ref,      # [1, TB, C_pad]
    ctx_scratch,  # [TB, C_pad, D_pad] VMEM scratch                 (compute dtype)
    *, tb, d, c_pad, d_pad, f_pad, s_real, s_pad, approx_recip,
):
    f32 = jnp.float32
    cdt = mem_ref.dtype

    # packed small params: one DMA instead of seven tiny lane-sparse ones
    ln2_g = small_ref[0:1, 0:d_pad]
    ln2_b = small_ref[1:2, 0:d_pad]
    ln3_g = small_ref[2:3, 0:d_pad]
    ln3_b = small_ref[3:4, 0:d_pad]
    b2    = small_ref[4:5, 0:d_pad]
    fc_b  = small_ref[5:6, 0:c_pad]
    b1    = small_ref[6:7, 0:f_pad]

    a_mat = a_ref[...]                                  # [C_pad, D_pad]

    # ---- per-batch work: scores -> softmax -> attended context only --------
    # pl.loop (scf.for) bounds live ranges: each iteration's temporaries die
    # at the ctx_scratch store (no cross-iteration vreg spills).
    @pl.loop(0, tb)
    def _(b):
        mem_b = mem_ref[b]                              # [D_pad, S_pad]
        s = jnp.dot(a_mat, mem_b, preferred_element_type=f32)   # [C_pad, S_pad]
        if s_pad != s_real:                             # mask zero-padded keys
            col = jax.lax.broadcasted_iota(jnp.int32, (c_pad, s_pad), 1)
            s = jnp.where(col < s_real, s, f32(-1e30))
        s = s - jnp.max(s, axis=-1, keepdims=True)
        p = jnp.exp(s)
        denom = jnp.sum(p, axis=-1, keepdims=True)
        if approx_recip:
            p = p * pl.reciprocal(denom, approx=True)   # EUP slot (bf16 path)
        else:
            p = p / denom                               # exact on the f32 path
        # p @ mem_b^T: NT dimension numbers (same as the official Pallas flash
        # attention) -> MXU-native transposed-RHS load, no XLU [D,S] transpose.
        ctx = jax.lax.dot_general(
            p.astype(cdt), mem_b,
            dimension_numbers=(((1,), (1,)), ((), ())),
            preferred_element_type=f32)                 # [C_pad, D_pad]
        ctx_scratch[b] = ctx.astype(cdt)

    # ---- batch-stacked weight-side matmuls: M = tb*C_pad fills the MXU -----
    def layernorm(x, g, b):
        # masked LN over the real d columns (padded x columns are exactly 0)
        mu = jnp.sum(x, axis=-1, keepdims=True) * f32(1.0 / d)
        xc = x - mu
        if d_pad != d:
            dmask = (jax.lax.broadcasted_iota(jnp.int32, (1, d_pad), 1) < d
                     ).astype(f32)
            xc = xc * dmask
        var = jnp.sum(xc * xc, axis=-1, keepdims=True) * f32(1.0 / d)
        return xc * jax.lax.rsqrt(var + f32(1e-5)) * g + b

    m = tb * c_pad
    tgt = tgt_ref[...]                                  # [C_pad, D_pad] f32
    tgt_all = tgt if tb == 1 else jnp.concatenate([tgt] * tb, axis=0)
    ctx_all = ctx_scratch[...].reshape(m, d_pad)

    ca = jnp.dot(ctx_all, wvo_ref[...], preferred_element_type=f32)   # [M, D_pad]
    tgt2 = layernorm(tgt_all + ca, ln2_g, ln2_b)
    h = jnp.dot(tgt2.astype(cdt), w1_ref[...], preferred_element_type=f32) + b1
    h = jnp.maximum(h, f32(0.0))
    ffn = jnp.dot(h.astype(cdt), w2_ref[...], preferred_element_type=f32) + b2
    hs = layernorm(tgt2 + ffn, ln3_g, ln3_b)                          # [M, D_pad]

    # GroupWiseLinear (W shared across the batch): (W * hs).sum(-1) + b
    fcw = fcw_ref[...]                                  # [C_pad, D_pad] f32
    gw = jnp.sum(hs.reshape(tb, c_pad, d_pad) * fcw[None], axis=-1)   # [tb, C_pad]
    out_ref[...] = (gw + fc_b).astype(out_ref.dtype)[None]


# ------------------------------ wrapper --------------------------------------
def q2l_decoder_forward(x_nchw, params, *, compute_dtype=jnp.bfloat16,
                        batch_block=None):
    """x_nchw: [B, d_model, H, W] float32. Returns logits [B, num_class] f32."""
    B, D, H, W = x_nchw.shape
    S = H * W
    C = params["query_embed"].shape[0]
    F = params["w1"].shape[1]
    f32 = jnp.float32

    # ---- batch-independent query self-attention, hoisted out of the grid ----
    def ln(x, g, b):
        mu = jnp.mean(x, -1, keepdims=True)
        var = jnp.mean((x - mu) ** 2, -1, keepdims=True)
        return (x - mu) * jax.lax.rsqrt(var + 1e-5) * g + b

    q = params["query_embed"].astype(f32)
    scale = 1.0 / math.sqrt(D)
    qs, ks, vs = q @ params["wq_sa"], q @ params["wk_sa"], q @ params["wv_sa"]
    attn = jax.nn.softmax(qs @ ks.T * scale, axis=-1)
    tgt = ln(q + (attn @ vs) @ params["wo_sa"], params["ln1_g"], params["ln1_b"])

    # fold the cross-attention K projection into the (hoisted) query side and
    # V/O projections into one matrix -- both batch independent.
    a_mat = (tgt @ params["wq"]) @ params["wk"].T * scale     # [C, D]
    wvo = params["wv"] @ params["wo"]                         # [D, D]

    # ---- pad C / D / F / S to multiples of 128 (lane-dense, full MXU K/M) ---
    c_pad, d_pad, f_pad, s_pad = (_round_up(v, 128) for v in (C, D, F, S))
    pc, pd, pf = c_pad - C, d_pad - D, f_pad - F

    tgt_p = jnp.pad(tgt, ((0, pc), (0, pd)))
    a_p = jnp.pad(a_mat, ((0, pc), (0, pd))).astype(compute_dtype)
    wvo_p = jnp.pad(wvo, ((0, pd), (0, pd))).astype(compute_dtype)
    w1_p = jnp.pad(params["w1"], ((0, pd), (0, pf))).astype(compute_dtype)
    w2_p = jnp.pad(params["w2"], ((0, pf), (0, pd))).astype(compute_dtype)
    fcw_p = jnp.pad(params["fc_W"].astype(f32), ((0, pc), (0, pd)))

    # packed tiny per-channel params into one [8, P] tile (single DMA); LN
    # gammas/betas are zero-padded so padded d_model columns stay exactly 0.
    P = max(d_pad, f_pad, c_pad)

    def _row(v, n):
        return jnp.pad(v.reshape(1, -1).astype(f32), ((0, 0), (0, P - n)))

    small = jnp.concatenate(
        [_row(params["ln2_g"], D), _row(params["ln2_b"], D),
         _row(params["ln3_g"], D), _row(params["ln3_b"], D),
         _row(params["b2"], D), _row(params["fc_b"], C), _row(params["b1"], F),
         jnp.zeros((1, P), f32)], axis=0)                     # [8, P]

    # memory stays in NC(HW) layout [B, D, S]: no HBM transpose; pads are
    # no-ops whenever D and H*W are already 128-multiples.
    mem = jnp.pad(x_nchw.reshape(B, D, S),
                  ((0, 0), (0, pd), (0, s_pad - S))).astype(compute_dtype)

    # ---- VMEM-aware batch blocking + per-chip scoped VMEM limit -------------
    cdt_sz = jnp.dtype(compute_dtype).itemsize
    cap = _vmem_capacity_bytes()

    weight_bytes = (c_pad * d_pad * (cdt_sz + 4 + 4)    # A + tgt + fcW
                    + d_pad * d_pad * cdt_sz            # Wv@Wo
                    + 2 * d_pad * f_pad * cdt_sz        # W1 + W2
                    + 8 * P * 4)                        # packed small params

    def _step_bytes(tb_):
        mem_blk = 2 * tb_ * d_pad * s_pad * cdt_sz      # double-buffered memory
        out_blk = 2 * tb_ * c_pad * 4
        ctx_scr = tb_ * c_pad * d_pad * cdt_sz
        temps = (tb_ * c_pad * (4 * d_pad * 4 + f_pad * (4 + cdt_sz))
                 + 2 * c_pad * s_pad * 4)               # stacked f32 temporaries
        return mem_blk + out_blk + ctx_scr + temps

    if batch_block is None:
        tb = 1 if B <= 2 else max(1, min(8, B // 2))
    else:
        tb = int(batch_block)
    budget = int(cap * 0.75)
    while tb > 1 and weight_bytes + _step_bytes(tb) > budget:
        tb -= 1                                         # v7x 64 MiB safety

    b_pad = _round_up(B, tb)
    if b_pad != B:
        mem = jnp.pad(mem, ((0, b_pad - B), (0, 0), (0, 0)))
    n_steps = b_pad // tb

    est = weight_bytes + _step_bytes(tb)
    vmem_limit = None
    if est > (24 << 20):
        vmem_limit = int(min(cap - (2 << 20), est + (16 << 20)))
    # TODO(synk): when W1/W2 exceed VMEM even single-buffered (huge d_model/FFN
    #             on v7x), K-tile them with pltpu.emit_pipeline and prefetch
    #             the weight slab in a prior pallas_call to hide the prologue.

    kernel = functools.partial(
        _q2l_cross_kernel, tb=tb, d=D, c_pad=c_pad, d_pad=d_pad, f_pad=f_pad,
        s_real=S, s_pad=s_pad,
        approx_recip=(jnp.dtype(compute_dtype) != jnp.dtype(jnp.float32)))

    def _run(single_buffer_weights):
        def const2(shp):
            if single_buffer_weights:
                # constant-index weights never change: single-buffer them
                return pl.BlockSpec(shp, lambda i: (0, 0),
                                    pipeline_mode=pl.Buffered(1))
            return pl.BlockSpec(shp, lambda i: (0, 0))

        in_specs = [
            const2((c_pad, d_pad)),                              # A
            const2((c_pad, d_pad)),                              # tgt
            pl.BlockSpec((tb, d_pad, s_pad), lambda i: (i, 0, 0)),  # memory
            const2((d_pad, d_pad)),                              # Wv @ Wo
            const2((d_pad, f_pad)),                              # W1
            const2((f_pad, d_pad)),                              # W2
            const2((c_pad, d_pad)),                              # GroupWiseLinear W
            const2((8, P)),                                      # packed smalls
        ]
        out_specs = pl.BlockSpec((1, tb, c_pad), lambda i: (i, 0, 0))

        return pl.pallas_call(
            kernel,
            out_shape=jax.ShapeDtypeStruct((n_steps, tb, c_pad), jnp.float32),
            grid=(n_steps,),
            in_specs=in_specs,
            out_specs=out_specs,
            scratch_shapes=[pltpu.VMEM((tb, c_pad, d_pad), compute_dtype)],
            compiler_params=pltpu.CompilerParams(
                dimension_semantics=("parallel",),
                vmem_limit_bytes=vmem_limit),
        )(a_p, tgt_p, mem, wvo_p, w1_p, w2_p, fcw_p, small)

    try:
        out = _run(True)
    except Exception:
        # pl.Buffered(1) unsupported on this jax version -> default buffering
        out = _run(False)

    return out.reshape(b_pad, c_pad)[:B, :C]


# --------------------------- pure-JAX reference -------------------------------
def q2l_decoder_reference(x_nchw, p):
    B, D, H, W = x_nchw.shape
    mem = jnp.transpose(x_nchw.reshape(B, D, H * W), (0, 2, 1))   # [B,S,D]
    q = p["query_embed"]                                          # [C,D]
    scale = 1.0 / math.sqrt(D)

    def ln(x, g, b):
        mu = jnp.mean(x, -1, keepdims=True)
        var = jnp.mean((x - mu) ** 2, -1, keepdims=True)
        return (x - mu) * jax.lax.rsqrt(var + 1e-5) * g + b

    def one_batch(m):
        qs, ks, vs = q @ p["wq_sa"], q @ p["wk_sa"], q @ p["wv_sa"]
        a = jax.nn.softmax(qs @ ks.T * scale, -1)
        tgt = ln(q + (a @ vs) @ p["wo_sa"], p["ln1_g"], p["ln1_b"])
        qc, kc, vc = tgt @ p["wq"], m @ p["wk"], m @ p["wv"]
        a2 = jax.nn.softmax(qc @ kc.T * scale, -1)
        tgt = ln(tgt + (a2 @ vc) @ p["wo"], p["ln2_g"], p["ln2_b"])
        h = jnp.maximum(tgt @ p["w1"] + p["b1"], 0.0)
        hs = ln(tgt + h @ p["w2"] + p["b2"], p["ln3_g"], p["ln3_b"])
        return jnp.sum(p["fc_W"] * hs, -1) + p["fc_b"][0]

    return jax.vmap(one_batch)(mem)


# ------------------------------ param init -----------------------------------
def init_params(key, num_class, d_model, ffn_dim):
    ks = jax.random.split(key, 16)
    u = lambda k, shp, s: jax.random.uniform(k, shp, jnp.float32, -s, s)
    stdv_fc = 1.0 / math.sqrt(d_model)
    sd = 1.0 / math.sqrt(d_model)
    sf = 1.0 / math.sqrt(ffn_dim)
    return dict(
        query_embed=jax.random.normal(ks[0], (num_class, d_model), jnp.float32),
        wq_sa=u(ks[1], (d_model, d_model), sd), wk_sa=u(ks[2], (d_model, d_model), sd),
        wv_sa=u(ks[3], (d_model, d_model), sd), wo_sa=u(ks[4], (d_model, d_model), sd),
        ln1_g=jnp.ones((1, d_model), jnp.float32), ln1_b=jnp.zeros((1, d_model), jnp.float32),
        wq=u(ks[5], (d_model, d_model), sd), wk=u(ks[6], (d_model, d_model), sd),
        wv=u(ks[7], (d_model, d_model), sd), wo=u(ks[8], (d_model, d_model), sd),
        ln2_g=jnp.ones((1, d_model), jnp.float32), ln2_b=jnp.zeros((1, d_model), jnp.float32),
        w1=u(ks[9], (d_model, ffn_dim), sd), b1=u(ks[10], (1, ffn_dim), sd),
        w2=u(ks[11], (ffn_dim, d_model), sf), b2=u(ks[12], (1, d_model), sf),
        ln3_g=jnp.ones((1, d_model), jnp.float32), ln3_b=jnp.zeros((1, d_model), jnp.float32),
        fc_W=u(ks[13], (num_class, d_model), stdv_fc),   # GroupWiseLinear W
        fc_b=u(ks[14], (1, num_class), stdv_fc),         # GroupWiseLinear b
    )


if __name__ == "__main__":
    B, d_model, H, W = 2, 32, 16, 16
    num_class, ffn_dim = 8, 64

    key = jax.random.PRNGKey(0)
    kx, kp, kx2 = jax.random.split(key, 3)
    x = jax.random.normal(kx, (B, d_model, H, W), jnp.float32)   # NCHW like PyTorch
    params = init_params(kp, num_class, d_model, ffn_dim)

    ref = jax.block_until_ready(q2l_decoder_reference(x, params))

    # bf16 fast path (default)
    out = jax.block_until_ready(q2l_decoder_forward(x, params))
    assert out.shape == (B, num_class), out.shape
    assert jnp.allclose(out, ref, atol=3e-2, rtol=3e-2), (out, ref)

    # f32 path: tight structural check of the kernel math (exact softmax div)
    out32 = jax.block_until_ready(
        q2l_decoder_forward(x, params, compute_dtype=jnp.float32))
    assert jnp.allclose(out32, ref, atol=5e-4, rtol=5e-4), (out32, ref)

    # multi-batch-block path + non-128-multiple spatial size (masked softmax)
    x2 = jax.random.normal(kx2, (4, d_model, 12, 11), jnp.float32)
    ref2 = jax.block_until_ready(q2l_decoder_reference(x2, params))
    out2 = jax.block_until_ready(q2l_decoder_forward(x2, params, batch_block=2))
    assert jnp.allclose(out2, ref2, atol=3e-2, rtol=3e-2), (out2, ref2)

    print("KERNEL_OK")
</pallas_src>

<mosaic_0001>
module attributes {stable_mosaic.version = 11 : i64} {
  func.func @_q2l_cross_kernel(%arg0: i32, %arg1: memref<128x128xbf16, #tpu.memory_space<vmem>>, %arg2: memref<128x128xf32, #tpu.memory_space<vmem>>, %arg3: memref<1x128x256xbf16, #tpu.memory_space<vmem>>, %arg4: memref<128x128xbf16, #tpu.memory_space<vmem>>, %arg5: memref<128x128xbf16, #tpu.memory_space<vmem>>, %arg6: memref<128x128xbf16, #tpu.memory_space<vmem>>, %arg7: memref<128x128xf32, #tpu.memory_space<vmem>>, %arg8: memref<8x128xf32, #tpu.memory_space<vmem>>, %arg9: memref<1x1x128xf32, #tpu.memory_space<vmem>>, %arg10: memref<1x128x128xbf16, #tpu.memory_space<vmem>>) attributes {dimension_semantics = [#tpu.dimension_semantics<parallel>], iteration_bounds = array<i64: 2>, scalar_prefetch = 0 : i64, scratch_operands = 1 : i64, tpu.core_type = #tpu.core_type<tc>, window_params = [{pipeline_mode = #tpu.pipeline_mode<synchronous>, transform_indices = @transform_0, window_bounds = array<i64: 128, 128>}, {pipeline_mode = #tpu.pipeline_mode<synchronous>, transform_indices = @transform_1, window_bounds = array<i64: 128, 128>}, {transform_indices = @transform_2, window_bounds = array<i64: 1, 128, 256>}, {pipeline_mode = #tpu.pipeline_mode<synchronous>, transform_indices = @transform_3, window_bounds = array<i64: 128, 128>}, {pipeline_mode = #tpu.pipeline_mode<synchronous>, transform_indices = @transform_4, window_bounds = array<i64: 128, 128>}, {pipeline_mode = #tpu.pipeline_mode<synchronous>, transform_indices = @transform_5, window_bounds = array<i64: 128, 128>}, {pipeline_mode = #tpu.pipeline_mode<synchronous>, transform_indices = @transform_6, window_bounds = array<i64: 128, 128>}, {pipeline_mode = #tpu.pipeline_mode<synchronous>, transform_indices = @transform_7, window_bounds = array<i64: 8, 128>}, {transform_indices = @transform_8, window_bounds = array<i64: 1, 1, 128>}]} {
    %c0 = arith.constant 0 : index
    %c0_0 = arith.constant 0 : index
    %0 = vector.load %arg8[%c0, %c0_0] : memref<8x128xf32, #tpu.memory_space<vmem>>, vector<1x128xf32>
    %c1 = arith.constant 1 : index
    %c0_1 = arith.constant 0 : index
    %1 = vector.load %arg8[%c1, %c0_1] : memref<8x128xf32, #tpu.memory_space<vmem>>, vector<1x128xf32>
    %c2 = arith.constant 2 : index
    %c0_2 = arith.constant 0 : index
    %2 = vector.load %arg8[%c2, %c0_2] : memref<8x128xf32, #tpu.memory_space<vmem>>, vector<1x128xf32>
    %c3 = arith.constant 3 : index
    %c0_3 = arith.constant 0 : index
    %3 = vector.load %arg8[%c3, %c0_3] : memref<8x128xf32, #tpu.memory_space<vmem>>, vector<1x128xf32>
    %c4 = arith.constant 4 : index
    %c0_4 = arith.constant 0 : index
    %4 = vector.load %arg8[%c4, %c0_4] : memref<8x128xf32, #tpu.memory_space<vmem>>, vector<1x128xf32>
    %c5 = arith.constant 5 : index
    %c0_5 = arith.constant 0 : index
    %5 = vector.load %arg8[%c5, %c0_5] : memref<8x128xf32, #tpu.memory_space<vmem>>, vector<1x128xf32>
    %c6 = arith.constant 6 : index
    %c0_6 = arith.constant 0 : index
    %6 = vector.load %arg8[%c6, %c0_6] : memref<8x128xf32, #tpu.memory_space<vmem>>, vector<1x128xf32>
    %c0_7 = arith.constant 0 : index
    %c0_8 = arith.constant 0 : index
    %7 = vector.load %arg1[%c0_7, %c0_8] : memref<128x128xbf16, #tpu.memory_space<vmem>>, vector<128x128xbf16>
    %c0_i32 = arith.constant 0 : i32
    %c1_i32 = arith.constant 1 : i32
    %8 = arith.muli %c0_i32, %c1_i32 : i32
    %c0_i32_9 = arith.constant 0 : i32
    %9 = arith.addi %c0_i32_9, %8 : i32
    %10 = arith.index_cast %9 : i32 to index
    %c0_10 = arith.constant 0 : index
    %c0_11 = arith.constant 0 : index
    %11 = vector.load %arg3[%10, %c0_10, %c0_11] : memref<1x128x256xbf16, #tpu.memory_space<vmem>>, vector<1x128x256xbf16>
    %12 = vector.shape_cast %11 : vector<1x128x256xbf16> to vector<128x256xbf16>
    %cst = arith.constant dense<0.000000e+00> : vector<128x256xf32>
    %13 = tpu.matmul %7, %12, %cst {dimension_numbers = #tpu.dot_dimension_numbers<[1], [0], [0], [1], [0, 0, 1, 1], [], []>} : vector<128x128xbf16>, vector<128x256xbf16>, vector<128x256xf32> -> vector<128x256xf32>
    %cst_12 = arith.constant dense<0xFF800000> : vector<128xf32>
    %14 = vector.multi_reduction <maximumf>, %13, %cst_12 [1] : vector<128x256xf32> to vector<128xf32>
    %15 = vector.shape_cast %14 : vector<128xf32> to vector<128x1xf32>
    %16 = vector.broadcast %15 : vector<128x1xf32> to vector<128x256xf32>
    %17 = arith.subf %13, %16 : vector<128x256xf32>
    %18 = math.exp %17 : vector<128x256xf32>
    %cst_13 = arith.constant dense<0.000000e+00> : vector<128xf32>
    %19 = vector.multi_reduction <add>, %18, %cst_13 [1] : vector<128x256xf32> to vector<128xf32>
    %20 = vector.shape_cast %19 : vector<128xf32> to vector<128x1xf32>
    %21 = tpu.reciprocal %20 {approx = true} : vector<128x1xf32> -> vector<128x1xf32>
    %22 = vector.broadcast %21 : vector<128x1xf32> to vector<128x256xf32>
    %23 = arith.mulf %18, %22 : vector<128x256xf32>
    %24 = arith.truncf %23 : vector<128x256xf32> to vector<128x256xbf16>
    %cst_14 = arith.constant dense<0.000000e+00> : vector<128x128xf32>
    %25 = tpu.matmul %24, %12, %cst_14 {dimension_numbers = #tpu.dot_dimension_numbers<[1], [1], [0], [0], [0, 0, 1, 0], [], []>} : vector<128x256xbf16>, vector<128x256xbf16>, vector<128x128xf32> -> vector<128x128xf32>
    %26 = arith.truncf %25 : vector<128x128xf32> to vector<128x128xbf16>
    %27 = arith.index_cast %9 : i32 to index
    %c0_15 = arith.constant 0 : index
    %c0_16 = arith.constant 0 : index
    %28 = vector.load %arg10[%27, %c0_15, %c0_16] : memref<1x128x128xbf16, #tpu.memory_space<vmem>>, vector<1x128x128xbf16>
    %29 = vector.shape_cast %28 : vector<1x128x128xbf16> to vector<128x128xbf16>
    %30 = vector.shape_cast %26 : vector<128x128xbf16> to vector<1x128x128xbf16>
    tpu.vector_store %arg10[%27, %c0_15, %c0_16], %30 {strides = array<i32>} : memref<1x128x128xbf16, #tpu.memory_space<vmem>>, vector<1x128x128xbf16>,
    %c1_i32_17 = arith.constant 1 : i32
    %c0_18 = arith.constant 0 : index
    %c0_19 = arith.constant 0 : index
    %31 = vector.load %arg2[%c0_18, %c0_19] : memref<128x128xf32, #tpu.memory_space<vmem>>, vector<128x128xf32>
    %c0_20 = arith.constant 0 : index
    %c0_21 = arith.constant 0 : index
    %c0_22 = arith.constant 0 : index
    %32 = vector.load %arg10[%c0_20, %c0_21, %c0_22] : memref<1x128x128xbf16, #tpu.memory_space<vmem>>, vector<1x128x128xbf16>
    %33 = vector.shape_cast %32 : vector<1x128x128xbf16> to vector<128x128xbf16>
    %c0_23 = arith.constant 0 : index
    %c0_24 = arith.constant 0 : index
    %34 = vector.load %arg4[%c0_23, %c0_24] : memref<128x128xbf16, #tpu.memory_space<vmem>>, vector<128x128xbf16>
    %cst_25 = arith.constant dense<0.000000e+00> : vector<128x128xf32>
    %35 = tpu.matmul %33, %34, %cst_25 {dimension_numbers = #tpu.dot_dimension_numbers<[1], [0], [0], [1], [0, 0, 1, 1], [], []>} : vector<128x128xbf16>, vector<128x128xbf16>, vector<128x128xf32> -> vector<128x128xf32>
    %36 = arith.addf %31, %35 : vector<128x128xf32>
    %cst_26 = arith.constant dense<0.000000e+00> : vector<128xf32>
    %37 = vector.multi_reduction <add>, %36, %cst_26 [1] : vector<128x128xf32> to vector<128xf32>
    %38 = vector.shape_cast %37 : vector<128xf32> to vector<128x1xf32>
    %cst_27 = arith.constant 3.125000e-02 : f32
    %39 = vector.broadcast %cst_27 : f32 to vector<128x1xf32>
    %40 = arith.mulf %38, %39 : vector<128x1xf32>
    %41 = vector.broadcast %40 : vector<128x1xf32> to vector<128x128xf32>
    %42 = arith.subf %36, %41 : vector<128x128xf32>
    %43 = tpu.iota {dimensions = array<i32: 1>} : vector<1x128xi32>
    %c32_i32 = arith.constant 32 : i32
    %44 = vector.broadcast %c32_i32 : i32 to vector<1x128xi32>
    %45 = arith.cmpi slt, %43, %44 : vector<1x128xi32>
    %46 = arith.extui %45 : vector<1x128xi1> to vector<1x128xi32>
    %47 = arith.sitofp %46 : vector<1x128xi32> to vector<1x128xf32>
    %48 = vector.broadcast %47 : vector<1x128xf32> to vector<128x128xf32>
    %49 = arith.mulf %42, %48 : vector<128x128xf32>
    %50 = arith.mulf %49, %49 : vector<128x128xf32>
    %cst_28 = arith.constant dense<0.000000e+00> : vector<128xf32>
    %51 = vector.multi_reduction <add>, %50, %cst_28 [1] : vector<128x128xf32> to vector<128xf32>
    %52 = vector.shape_cast %51 : vector<128xf32> to vector<128x1xf32>
    %cst_29 = arith.constant 3.125000e-02 : f32
    %53 = vector.broadcast %cst_29 : f32 to vector<128x1xf32>
    %54 = arith.mulf %52, %53 : vector<128x1xf32>
    %cst_30 = arith.constant 9.99999974E-6 : f32
    %55 = vector.broadcast %cst_30 : f32 to vector<128x1xf32>
    %56 = arith.addf %54, %55 : vector<128x1xf32>
    %57 = math.rsqrt %56 : vector<128x1xf32>
    %58 = vector.broadcast %57 : vector<128x1xf32> to vector<128x128xf32>
    %59 = arith.mulf %49, %58 : vector<128x128xf32>
    %60 = vector.broadcast %0 : vector<1x128xf32> to vector<128x128xf32>
    %61 = arith.mulf %59, %60 : vector<128x128xf32>
    %62 = vector.broadcast %1 : vector<1x128xf32> to vector<128x128xf32>
    %63 = arith.addf %61, %62 : vector<128x128xf32>
    %64 = arith.truncf %63 : vector<128x128xf32> to vector<128x128xbf16>
    %c0_31 = arith.constant 0 : index
    %c0_32 = arith.constant 0 : index
    %65 = vector.load %arg5[%c0_31, %c0_32] : memref<128x128xbf16, #tpu.memory_space<vmem>>, vector<128x128xbf16>
    %cst_33 = arith.constant dense<0.000000e+00> : vector<128x128xf32>
    %66 = tpu.matmul %64, %65, %cst_33 {dimension_numbers = #tpu.dot_dimension_numbers<[1], [0], [0], [1], [0, 0, 1, 1], [], []>} : vector<128x128xbf16>, vector<128x128xbf16>, vector<128x128xf32> -> vector<128x128xf32>
    %67 = vector.broadcast %6 : vector<1x128xf32> to vector<128x128xf32>
    %68 = arith.addf %66, %67 : vector<128x128xf32>
    %cst_34 = arith.constant 0.000000e+00 : f32
    %69 = vector.broadcast %cst_34 : f32 to vector<128x128xf32>
    %70 = arith.maximumf %68, %69 : vector<128x128xf32>
    %71 = arith.truncf %70 : vector<128x128xf32> to vector<128x128xbf16>
    %c0_35 = arith.constant 0 : index
    %c0_36 = arith.constant 0 : index
    %72 = vector.load %arg6[%c0_35, %c0_36] : memref<128x128xbf16, #tpu.memory_space<vmem>>, vector<128x128xbf16>
    %cst_37 = arith.constant dense<0.000000e+00> : vector<128x128xf32>
    %73 = tpu.matmul %71, %72, %cst_37 {dimension_numbers = #tpu.dot_dimension_numbers<[1], [0], [0], [1], [0, 0, 1, 1], [], []>} : vector<128x128xbf16>, vector<128x128xbf16>, vector<128x128xf32> -> vector<128x128xf32>
    %74 = vector.broadcast %4 : vector<1x128xf32> to vector<128x128xf32>
    %75 = arith.addf %73, %74 : vector<128x128xf32>
    %76 = arith.addf %63, %75 : vector<128x128xf32>
    %cst_38 = arith.constant dense<0.000000e+00> : vector<128xf32>
    %77 = vector.multi_reduction <add>, %76, %cst_38 [1] : vector<128x128xf32> to vector<128xf32>
    %78 = vector.shape_cast %77 : vector<128xf32> to vector<128x1xf32>
    %cst_39 = arith.constant 3.125000e-02 : f32
    %79 = vector.broadcast %cst_39 : f32 to vector<128x1xf32>
    %80 = arith.mulf %78, %79 : vector<128x1xf32>
    %81 = vector.broadcast %80 : vector<128x1xf32> to vector<128x128xf32>
    %82 = arith.subf %76, %81 : vector<128x128xf32>
    %83 = tpu.iota {dimensions = array<i32: 1>} : vector<1x128xi32>
    %c32_i32_40 = arith.constant 32 : i32
    %84 = vector.broadcast %c32_i32_40 : i32 to vector<1x128xi32>
    %85 = arith.cmpi slt, %83, %84 : vector<1x128xi32>
    %86 = arith.extui %85 : vector<1x128xi1> to vector<1x128xi32>
    %87 = arith.sitofp %86 : vector<1x128xi32> to vector<1x128xf32>
    %88 = vector.broadcast %87 : vector<1x128xf32> to vector<128x128xf32>
    %89 = arith.mulf %82, %88 : vector<128x128xf32>
    %90 = arith.mulf %89, %89 : vector<128x128xf32>
    %cst_41 = arith.constant dense<0.000000e+00> : vector<128xf32>
    %91 = vector.multi_reduction <add>, %90, %cst_41 [1] : vector<128x128xf32> to vector<128xf32>
    %92 = vector.shape_cast %91 : vector<128xf32> to vector<128x1xf32>
    %cst_42 = arith.constant 3.125000e-02 : f32
    %93 = vector.broadcast %cst_42 : f32 to vector<128x1xf32>
    %94 = arith.mulf %92, %93 : vector<128x1xf32>
    %cst_43 = arith.constant 9.99999974E-6 : f32
    %95 = vector.broadcast %cst_43 : f32 to vector<128x1xf32>
    %96 = arith.addf %94, %95 : vector<128x1xf32>
    %97 = math.rsqrt %96 : vector<128x1xf32>
    %98 = vector.broadcast %97 : vector<128x1xf32> to vector<128x128xf32>
    %99 = arith.mulf %89, %98 : vector<128x128xf32>
    %100 = vector.broadcast %2 : vector<1x128xf32> to vector<128x128xf32>
    %101 = arith.mulf %99, %100 : vector<128x128xf32>
    %102 = vector.broadcast %3 : vector<1x128xf32> to vector<128x128xf32>
    %103 = arith.addf %101, %102 : vector<128x128xf32>
    %c0_44 = arith.constant 0 : index
    %c0_45 = arith.constant 0 : index
    %104 = vector.load %arg7[%c0_44, %c0_45] : memref<128x128xf32, #tpu.memory_space<vmem>>, vector<128x128xf32>
    %105 = vector.shape_cast %103 : vector<128x128xf32> to vector<1x128x128xf32>
    %106 = vector.shape_cast %104 : vector<128x128xf32> to vector<1x128x128xf32>
    %107 = arith.mulf %105, %106 : vector<1x128x128xf32>
    %cst_46 = arith.constant dense<0.000000e+00> : vector<1x128xf32>
    %108 = vector.multi_reduction <add>, %107, %cst_46 [2] : vector<1x128x128xf32> to vector<1x128xf32>
    %109 = arith.addf %108, %5 : vector<1x128xf32>
    %110 = vector.shape_cast %109 : vector<1x128xf32> to vector<1x1x128xf32>
    %c0_47 = arith.constant 0 : index
    %c0_48 = arith.constant 0 : index
    %c0_49 = arith.constant 0 : index
    %111 = vector.load %arg9[%c0_47, %c0_48, %c0_49] : memref<1x1x128xf32, #tpu.memory_space<vmem>>, vector<1x1x128xf32>
    tpu.vector_store %arg9[%c0_47, %c0_48, %c0_49], %110 {strides = array<i32>} : memref<1x1x128xf32, #tpu.memory_space<vmem>>, vector<1x1x128xf32>,
    return
  }
  func.func @transform_0(%arg0: i32) -> (i32, i32) {
    %c0_i32 = arith.constant 0 : i32
    %c0_i32_0 = arith.constant 0 : i32
    %c0_i32_1 = arith.constant 0 : i32
    return %c0_i32, %c0_i32_0 : i32, i32
  }
  func.func @transform_1(%arg0: i32) -> (i32, i32) {
    %c0_i32 = arith.constant 0 : i32
    %c0_i32_0 = arith.constant 0 : i32
    %c0_i32_1 = arith.constant 0 : i32
    return %c0_i32, %c0_i32_0 : i32, i32
  }
  func.func @transform_2(%arg0: i32) -> (i32, i32, i32) {
    %c0_i32 = arith.constant 0 : i32
    %c0_i32_0 = arith.constant 0 : i32
    %c0_i32_1 = arith.constant 0 : i32
    return %arg0, %c0_i32, %c0_i32_0 : i32, i32, i32
  }
  func.func @transform_3(%arg0: i32) -> (i32, i32) {
    %c0_i32 = arith.constant 0 : i32
    %c0_i32_0 = arith.constant 0 : i32
    %c0_i32_1 = arith.constant 0 : i32
    return %c0_i32, %c0_i32_0 : i32, i32
  }
  func.func @transform_4(%arg0: i32) -> (i32, i32) {
    %c0_i32 = arith.constant 0 : i32
    %c0_i32_0 = arith.constant 0 : i32
    %c0_i32_1 = arith.constant 0 : i32
    return %c0_i32, %c0_i32_0 : i32, i32
  }
  func.func @transform_5(%arg0: i32) -> (i32, i32) {
    %c0_i32 = arith.constant 0 : i32
    %c0_i32_0 = arith.constant 0 : i32
    %c0_i32_1 = arith.constant 0 : i32
    return %c0_i32, %c0_i32_0 : i32, i32
  }
  func.func @transform_6(%arg0: i32) -> (i32, i32) {
    %c0_i32 = arith.constant 0 : i32
    %c0_i32_0 = arith.constant 0 : i32
    %c0_i32_1 = arith.constant 0 : i32
    return %c0_i32, %c0_i32_0 : i32, i32
  }
  func.func @transform_7(%arg0: i32) -> (i32, i32) {
    %c0_i32 = arith.constant 0 : i32
    %c0_i32_0 = arith.constant 0 : i32
    %c0_i32_1 = arith.constant 0 : i32
    return %c0_i32, %c0_i32_0 : i32, i32
  }
  func.func @transform_8(%arg0: i32) -> (i32, i32, i32) {
    %c0_i32 = arith.constant 0 : i32
    %c0_i32_0 = arith.constant 0 : i32
    %c0_i32_1 = arith.constant 0 : i32
    return %arg0, %c0_i32, %c0_i32_0 : i32, i32, i32
  }
}

module attributes {stable_mosaic.version = 11 : i64} {
  func.func @_q2l_cross_kernel(%arg0: i32, %arg1: memref<128x128xbf16, #tpu.memory_space<vmem>>, %arg2: memref<128x128xf32, #tpu.memory_space<vmem>>, %arg3: memref<1x128x256xbf16, #tpu.memory_space<vmem>>, %arg4: memref<128x128xbf16, #tpu.memory_space<vmem>>, %arg5: memref<128x128xbf16, #tpu.memory_space<vmem>>, %arg6: memref<128x128xbf16, #tpu.memory_space<vmem>>, %arg7: memref<128x128xf32, #tpu.memory_space<vmem>>, %arg8: memref<8x128xf32, #tpu.memory_space<vmem>>, %arg9: memref<1x1x128xf32, #tpu.memory_space<vmem>>, %arg10: memref<1x128x128xbf16, #tpu.memory_space<vmem>>) attributes {dimension_semantics = [#tpu.dimension_semantics<parallel>], iteration_bounds = array<i64: 2>, scalar_prefetch = 0 : i64, scratch_operands = 1 : i64, tpu.core_type = #tpu.core_type<tc>, window_params = [{pipeline_mode = #tpu.pipeline_mode<synchronous>, transform_indices = @transform_0, window_bounds = array<i64: 128, 128>}, {pipeline_mode = #tpu.pipeline_mode<synchronous>, transform_indices = @transform_1, window_bounds = array<i64: 128, 128>}, {transform_indices = @transform_2, window_bounds = array<i64: 1, 128, 256>}, {pipeline_mode = #tpu.pipeline_mode<synchronous>, transform_indices = @transform_3, window_bounds = array<i64: 128, 128>}, {pipeline_mode = #tpu.pipeline_mode<synchronous>, transform_indices = @transform_4, window_bounds = array<i64: 128, 128>}, {pipeline_mode = #tpu.pipeline_mode<synchronous>, transform_indices = @transform_5, window_bounds = array<i64: 128, 128>}, {pipeline_mode = #tpu.pipeline_mode<synchronous>, transform_indices = @transform_6, window_bounds = array<i64: 128, 128>}, {pipeline_mode = #tpu.pipeline_mode<synchronous>, transform_indices = @transform_7, window_bounds = array<i64: 8, 128>}, {transform_indices = @transform_8, window_bounds = array<i64: 1, 1, 128>}]} {
    %c0 = arith.constant 0 : index
    %c0_0 = arith.constant 0 : index
    %0 = vector.load %arg8[%c0, %c0_0] : memref<8x128xf32, #tpu.memory_space<vmem>>, vector<1x128xf32>
    %c1 = arith.constant 1 : index
    %c0_1 = arith.constant 0 : index
    %1 = vector.load %arg8[%c1, %c0_1] : memref<8x128xf32, #tpu.memory_space<vmem>>, vector<1x128xf32>
    %c2 = arith.constant 2 : index
    %c0_2 = arith.constant 0 : index
    %2 = vector.load %arg8[%c2, %c0_2] : memref<8x128xf32, #tpu.memory_space<vmem>>, vector<1x128xf32>
    %c3 = arith.constant 3 : index
    %c0_3 = arith.constant 0 : index
    %3 = vector.load %arg8[%c3, %c0_3] : memref<8x128xf32, #tpu.memory_space<vmem>>, vector<1x128xf32>
    %c4 = arith.constant 4 : index
    %c0_4 = arith.constant 0 : index
    %4 = vector.load %arg8[%c4, %c0_4] : memref<8x128xf32, #tpu.memory_space<vmem>>, vector<1x128xf32>
    %c5 = arith.constant 5 : index
    %c0_5 = arith.constant 0 : index
    %5 = vector.load %arg8[%c5, %c0_5] : memref<8x128xf32, #tpu.memory_space<vmem>>, vector<1x128xf32>
    %c6 = arith.constant 6 : index
    %c0_6 = arith.constant 0 : index
    %6 = vector.load %arg8[%c6, %c0_6] : memref<8x128xf32, #tpu.memory_space<vmem>>, vector<1x128xf32>
    %c0_7 = arith.constant 0 : index
    %c0_8 = arith.constant 0 : index
    %7 = vector.load %arg1[%c0_7, %c0_8] : memref<128x128xbf16, #tpu.memory_space<vmem>>, vector<128x128xbf16>
    %c0_i32 = arith.constant 0 : i32
    %c1_i32 = arith.constant 1 : i32
    %8 = arith.muli %c0_i32, %c1_i32 : i32
    %c0_i32_9 = arith.constant 0 : i32
    %9 = arith.addi %c0_i32_9, %8 : i32
    %10 = arith.index_cast %9 : i32 to index
    %c0_10 = arith.constant 0 : index
    %c0_11 = arith.constant 0 : index
    %11 = vector.load %arg3[%10, %c0_10, %c0_11] : memref<1x128x256xbf16, #tpu.memory_space<vmem>>, vector<1x128x256xbf16>
    %12 = vector.shape_cast %11 : vector<1x128x256xbf16> to vector<128x256xbf16>
    %cst = arith.constant dense<0.000000e+00> : vector<128x256xf32>
    %13 = tpu.matmul %7, %12, %cst {dimension_numbers = #tpu.dot_dimension_numbers<[1], [0], [0], [1], [0, 0, 1, 1], [], []>} : vector<128x128xbf16>, vector<128x256xbf16>, vector<128x256xf32> -> vector<128x256xf32>
    %cst_12 = arith.constant dense<0xFF800000> : vector<128xf32>
    %14 = vector.multi_reduction <maximumf>, %13, %cst_12 [1] : vector<128x256xf32> to vector<128xf32>
    %15 = vector.shape_cast %14 : vector<128xf32> to vector<128x1xf32>
    %16 = vector.broadcast %15 : vector<128x1xf32> to vector<128x256xf32>
    %17 = arith.subf %13, %16 : vector<128x256xf32>
    %18 = math.exp %17 : vector<128x256xf32>
    %cst_13 = arith.constant dense<0.000000e+00> : vector<128xf32>
    %19 = vector.multi_reduction <add>, %18, %cst_13 [1] : vector<128x256xf32> to vector<128xf32>
    %20 = vector.shape_cast %19 : vector<128xf32> to vector<128x1xf32>
    %21 = tpu.reciprocal %20 {approx = true} : vector<128x1xf32> -> vector<128x1xf32>
    %22 = vector.broadcast %21 : vector<128x1xf32> to vector<128x256xf32>
    %23 = arith.mulf %18, %22 : vector<128x256xf32>
    %24 = arith.truncf %23 : vector<128x256xf32> to vector<128x256xbf16>
    %cst_14 = arith.constant dense<0.000000e+00> : vector<128x128xf32>
    %25 = tpu.matmul %24, %12, %cst_14 {dimension_numbers = #tpu.dot_dimension_numbers<[1], [1], [0], [0], [0, 0, 1, 0], [], []>} : vector<128x256xbf16>, vector<128x256xbf16>, vector<128x128xf32> -> vector<128x128xf32>
    %26 = arith.truncf %25 : vector<128x128xf32> to vector<128x128xbf16>
    %27 = arith.index_cast %9 : i32 to index
    %c0_15 = arith.constant 0 : index
    %c0_16 = arith.constant 0 : index
    %28 = vector.load %arg10[%27, %c0_15, %c0_16] : memref<1x128x128xbf16, #tpu.memory_space<vmem>>, vector<1x128x128xbf16>
    %29 = vector.shape_cast %28 : vector<1x128x128xbf16> to vector<128x128xbf16>
    %30 = vector.shape_cast %26 : vector<128x128xbf16> to vector<1x128x128xbf16>
    tpu.vector_store %arg10[%27, %c0_15, %c0_16], %30 {strides = array<i32>} : memref<1x128x128xbf16, #tpu.memory_space<vmem>>, vector<1x128x128xbf16>,
    %c1_i32_17 = arith.constant 1 : i32
    %c0_18 = arith.constant 0 : index
    %c0_19 = arith.constant 0 : index
    %31 = vector.load %arg2[%c0_18, %c0_19] : memref<128x128xf32, #tpu.memory_space<vmem>>, vector<128x128xf32>
    %c0_20 = arith.constant 0 : index
    %c0_21 = arith.constant 0 : index
    %c0_22 = arith.constant 0 : index
    %32 = vector.load %arg10[%c0_20, %c0_21, %c0_22] : memref<1x128x128xbf16, #tpu.memory_space<vmem>>, vector<1x128x128xbf16>
    %33 = vector.shape_cast %32 : vector<1x128x128xbf16> to vector<128x128xbf16>
    %c0_23 = arith.constant 0 : index
    %c0_24 = arith.constant 0 : index
    %34 = vector.load %arg4[%c0_23, %c0_24] : memref<128x128xbf16, #tpu.memory_space<vmem>>, vector<128x128xbf16>
    %cst_25 = arith.constant dense<0.000000e+00> : vector<128x128xf32>
    %35 = tpu.matmul %33, %34, %cst_25 {dimension_numbers = #tpu.dot_dimension_numbers<[1], [0], [0], [1], [0, 0, 1, 1], [], []>} : vector<128x128xbf16>, vector<128x128xbf16>, vector<128x128xf32> -> vector<128x128xf32>
    %36 = arith.addf %31, %35 : vector<128x128xf32>
    %cst_26 = arith.constant dense<0.000000e+00> : vector<128xf32>
    %37 = vector.multi_reduction <add>, %36, %cst_26 [1] : vector<128x128xf32> to vector<128xf32>
    %38 = vector.shape_cast %37 : vector<128xf32> to vector<128x1xf32>
    %cst_27 = arith.constant 3.125000e-02 : f32
    %39 = vector.broadcast %cst_27 : f32 to vector<128x1xf32>
    %40 = arith.mulf %38, %39 : vector<128x1xf32>
    %41 = vector.broadcast %40 : vector<128x1xf32> to vector<128x128xf32>
    %42 = arith.subf %36, %41 : vector<128x128xf32>
    %43 = tpu.iota {dimensions = array<i32: 1>} : vector<1x128xi32>
    %c32_i32 = arith.constant 32 : i32
    %44 = vector.broadcast %c32_i32 : i32 to vector<1x128xi32>
    %45 = arith.cmpi slt, %43, %44 : vector<1x128xi32>
    %46 = arith.extui %45 : vector<1x128xi1> to vector<1x128xi32>
    %47 = arith.sitofp %46 : vector<1x128xi32> to vector<1x128xf32>
    %48 = vector.broadcast %47 : vector<1x128xf32> to vector<128x128xf32>
    %49 = arith.mulf %42, %48 : vector<128x128xf32>
    %50 = arith.mulf %49, %49 : vector<128x128xf32>
    %cst_28 = arith.constant dense<0.000000e+00> : vector<128xf32>
    %51 = vector.multi_reduction <add>, %50, %cst_28 [1] : vector<128x128xf32> to vector<128xf32>
    %52 = vector.shape_cast %51 : vector<128xf32> to vector<128x1xf32>
    %cst_29 = arith.constant 3.125000e-02 : f32
    %53 = vector.broadcast %cst_29 : f32 to vector<128x1xf32>
    %54 = arith.mulf %52, %53 : vector<128x1xf32>
    %cst_30 = arith.constant 9.99999974E-6 : f32
    %55 = vector.broadcast %cst_30 : f32 to vector<128x1xf32>
    %56 = arith.addf %54, %55 : vector<128x1xf32>
    %57 = math.rsqrt %56 : vector<128x1xf32>
    %58 = vector.broadcast %57 : vector<128x1xf32> to vector<128x128xf32>
    %59 = arith.mulf %49, %58 : vector<128x128xf32>
    %60 = vector.broadcast %0 : vector<1x128xf32> to vector<128x128xf32>
    %61 = arith.mulf %59, %60 : vector<128x128xf32>
    %62 = vector.broadcast %1 : vector<1x128xf32> to vector<128x128xf32>
    %63 = arith.addf %61, %62 : vector<128x128xf32>
    %64 = arith.truncf %63 : vector<128x128xf32> to vector<128x128xbf16>
    %c0_31 = arith.constant 0 : index
    %c0_32 = arith.constant 0 : index
    %65 = vector.load %arg5[%c0_31, %c0_32] : memref<128x128xbf16, #tpu.memory_space<vmem>>, vector<128x128xbf16>
    %cst_33 = arith.constant dense<0.000000e+00> : vector<128x128xf32>
    %66 = tpu.matmul %64, %65, %cst_33 {dimension_numbers = #tpu.dot_dimension_numbers<[1], [0], [0], [1], [0, 0, 1, 1], [], []>} : vector<128x128xbf16>, vector<128x128xbf16>, vector<128x128xf32> -> vector<128x128xf32>
    %67 = vector.broadcast %6 : vector<1x128xf32> to vector<128x128xf32>
    %68 = arith.addf %66, %67 : vector<128x128xf32>
    %cst_34 = arith.constant 0.000000e+00 : f32
    %69 = vector.broadcast %cst_34 : f32 to vector<128x128xf32>
    %70 = arith.maximumf %68, %69 : vector<128x128xf32>
    %71 = arith.truncf %70 : vector<128x128xf32> to vector<128x128xbf16>
    %c0_35 = arith.constant 0 : index
    %c0_36 = arith.constant 0 : index
    %72 = vector.load %arg6[%c0_35, %c0_36] : memref<128x128xbf16, #tpu.memory_space<vmem>>, vector<128x128xbf16>
    %cst_37 = arith.constant dense<0.000000e+00> : vector<128x128xf32>
    %73 = tpu.matmul %71, %72, %cst_37 {dimension_numbers = #tpu.dot_dimension_numbers<[1], [0], [0], [1], [0, 0, 1, 1], [], []>} : vector<128x128xbf16>, vector<128x128xbf16>, vector<128x128xf32> -> vector<128x128xf32>
    %74 = vector.broadcast %4 : vector<1x128xf32> to vector<128x128xf32>
    %75 = arith.addf %73, %74 : vector<128x128xf32>
    %76 = arith.addf %63, %75 : vector<128x128xf32>
    %cst_38 = arith.constant dense<0.000000e+00> : vector<128xf32>
    %77 = vector.multi_reduction <add>, %76, %cst_38 [1] : vector<128x128xf32> to vector<128xf32>
    %78 = vector.shape_cast %77 : vector<128xf32> to vector<128x1xf32>
    %cst_39 = arith.constant 3.125000e-02 : f32
    %79 = vector.broadcast %cst_39 : f32 to vector<128x1xf32>
    %80 = arith.mulf %78, %79 : vector<128x1xf32>
    %81 = vector.broadcast %80 : vector<128x1xf32> to vector<128x128xf32>
    %82 = arith.subf %76, %81 : vector<128x128xf32>
    %83 = tpu.iota {dimensions = array<i32: 1>} : vector<1x128xi32>
    %c32_i32_40 = arith.constant 32 : i32
    %84 = vector.broadcast %c32_i32_40 : i32 to vector<1x128xi32>
    %85 = arith.cmpi slt, %83, %84 : vector<1x128xi32>
    %86 = arith.extui %85 : vector<1x128xi1> to vector<1x128xi32>
    %87 = arith.sitofp %86 : vector<1x128xi32> to vector<1x128xf32>
    %88 = vector.broadcast %87 : vector<1x128xf32> to vector<128x128xf32>
    %89 = arith.mulf %82, %88 : vector<128x128xf32>
    %90 = arith.mulf %89, %89 : vector<128x128xf32>
    %cst_41 = arith.constant dense<0.000000e+00> : vector<128xf32>
    %91 = vector.multi_reduction <add>, %90, %cst_41 [1] : vector<128x128xf32> to vector<128xf32>
    %92 = vector.shape_cast %91 : vector<128xf32> to vector<128x1xf32>
    %cst_42 = arith.constant 3.125000e-02 : f32
    %93 = vector.broadcast %cst_42 : f32 to vector<128x1xf32>
    %94 = arith.mulf %92, %93 : vector<128x1xf32>
    %cst_43 = arith.constant 9.99999974E-6 : f32
    %95 = vector.broadcast %cst_43 : f32 to vector<128x1xf32>
    %96 = arith.addf %94, %95 : vector<128x1xf32>
    %97 = math.rsqrt %96 : vector<128x1xf32>
    %98 = vector.broadcast %97 : vector<128x1xf32> to vector<128x128xf32>
    %99 = arith.mulf %89, %98 : vector<128x128xf32>
    %100 = vector.broadcast %2 : vector<1x128xf32> to vector<128x128xf32>
    %101 = arith.mulf %99, %100 : vector<128x128xf32>
    %102 = vector.broadcast %3 : vector<1x128xf32> to vector<128x128xf32>
    %103 = arith.addf %101, %102 : vector<128x128xf32>
    %c0_44 = arith.constant 0 : index
    %c0_45 = arith.constant 0 : index
    %104 = vector.load %arg7[%c0_44, %c0_45] : memref<128x128xf32, #tpu.memory_space<vmem>>, vector<128x128xf32>
    %105 = vector.shape_cast %103 : vector<128x128xf32> to vector<1x128x128xf32>
    %106 = vector.shape_cast %104 : vector<128x128xf32> to vector<1x128x128xf32>
    %107 = arith.mulf %105, %106 : vector<1x128x128xf32>
    %cst_46 = arith.constant dense<0.000000e+00> : vector<1x128xf32>
    %108 = vector.multi_reduction <add>, %107, %cst_46 [2] : vector<1x128x128xf32> to vector<1x128xf32>
    %109 = arith.addf %108, %5 : vector<1x128xf32>
    %110 = vector.shape_cast %109 : vector<1x128xf32> to vector<1x1x128xf32>
    %c0_47 = arith.constant 0 : index
    %c0_48 = arith.constant 0 : index
    %c0_49 = arith.constant 0 : index
    %111 = vector.load %arg9[%c0_47, %c0_48, %c0_49] : memref<1x1x128xf32, #tpu.memory_space<vmem>>, vector<1x1x128xf32>
    tpu.vector_store %arg9[%c0_47, %c0_48, %c0_49], %110 {strides = array<i32>} : memref<1x1x128xf32, #tpu.memory_space<vmem>>, vector<1x1x128xf32>,
    return
  }
  func.func @transform_0(%arg0: i32) -> (i32, i32) {
    %c0_i32 = arith.constant 0 : i32
    %c0_i32_0 = arith.constant 0 : i32
    %c0_i32_1 = arith.constant 0 : i32
    return %c0_i32, %c0_i32_0 : i32, i32
  }
  func.func @transform_1(%arg0: i32) -> (i32, i32) {
    %c0_i32 = arith.constant 0 : i32
    %c0_i32_0 = arith.constant 0 : i32
    %c0_i32_1 = arith.constant 0 : i32
    return %c0_i32, %c0_i32_0 : i32, i32
  }
  func.func @transform_2(%arg0: i32) -> (i32, i32, i32) {
    %c0_i32 = arith.constant 0 : i32
    %c0_i32_0 = arith.constant 0 : i32
    %c0_i32_1 = arith.constant 0 : i32
    return %arg0, %c0_i32, %c0_i32_0 : i32, i32, i32
  }
  func.func @transform_3(%arg0: i32) -> (i32, i32) {
    %c0_i32 = arith.constant 0 : i32
    %c0_i32_0 = arith.constant 0 : i32
    %c0_i32_1 = arith.constant 0 : i32
    return %c0_i32, %c0_i32_0 : i32, i32
  }
  func.func @transform_4(%arg0: i32) -> (i32, i32) {
    %c0_i32 = arith.constant 0 : i32
    %c0_i32_0 = arith.constant 0 : i32
    %c0_i32_1 = arith.constant 0 : i32
    return %c0_i32, %c0_i32_0 : i32, i32
  }
  func.func @transform_5(%arg0: i32) -> (i32, i32) {
    %c0_i32 = arith.constant 0 : i32
    %c0_i32_0 = arith.constant 0 : i32
    %c0_i32_1 = arith.constant 0 : i32
    return %c0_i32, %c0_i32_0 : i32, i32
  }
  func.func @transform_6(%arg0: i32) -> (i32, i32) {
    %c0_i32 = arith.constant 0 : i32
    %c0_i32_0 = arith.constant 0 : i32
    %c0_i32_1 = arith.constant 0 : i32
    return %c0_i32, %c0_i32_0 : i32, i32
  }
  func.func @transform_7(%arg0: i32) -> (i32, i32) {
    %c0_i32 = arith.constant 0 : i32
    %c0_i32_0 = arith.constant 0 : i32
    %c0_i32_1 = arith.constant 0 : i32
    return %c0_i32, %c0_i32_0 : i32, i32
  }
  func.func @transform_8(%arg0: i32) -> (i32, i32, i32) {
    %c0_i32 = arith.constant 0 : i32
    %c0_i32_0 = arith.constant 0 : i32
    %c0_i32_1 = arith.constant 0 : i32
    return %arg0, %c0_i32, %c0_i32_0 : i32, i32, i32
  }
}

</mosaic_0001>

<bundles_post_ra>
// kernel: tpu_custom_call.1
= control target key start
LH: loop header
LB: loop body
LE: loop exit
PB: predicated region body
PF: predicated region fallthrough
CT: control target
= control target key end

     0   :  { %s4996_s0 = inlined_call_operand.hbm [shape: bf16[128,128], index: 0, kind: input, shape index: {}]   ;;  %s4997_s1 = inlined_call_operand.hbm [shape: f32[128,128], index: 1, kind: input, shape index: {}]   ;;  %s4998_s2 = inlined_call_operand.hbm [shape: bf16[2,128,256], index: 2, kind: input, shape index: {}]   ;;  %s4999_s3 = inlined_call_operand.hbm [shape: bf16[128,128], index: 3, kind: input, shape index: {}]   ;;  %s5000_s4 = inlined_call_operand.hbm [shape: bf16[128,128], index: 4, kind: input, shape index: {}]   ;;  %s5001_s5 = inlined_call_operand.hbm [shape: bf16[128,128], index: 5, kind: input, shape index: {}]   ;;  %s5002_s6 = inlined_call_operand.hbm [shape: f32[128,128], index: 6, kind: input, shape index: {}]   ;;  %s5003_s7 = inlined_call_operand.hbm [shape: f32[8,128], index: 7, kind: input, shape index: {}]   ;;  %s5004_s8 = inlined_call_operand.hbm [shape: f32[2,1,128], index: 8, kind: output, shape index: {}]  }
   0x1   :  { %5007 = sst [smem:[#allocation24_spill]] %s4996_s0 }
   0x2   :  { %5008 = sst [smem:[#allocation25_spill]] %s4997_s1 }
   0x3   :  { %5009 = sst [smem:[#allocation26_spill]] %s4999_s3 }
   0x4   :  { %5010 = sst [smem:[#allocation27_spill]] %s5000_s4 }
   0x5   :  { %13 = vsyncpa [#allocation4], 0 }
   0x6   :  { %14 = vsyncpa [#allocation7], 0 }
   0x7   :  { %15 = vsyncpa [#allocation11], 0 }
   0x8   :  { %16 = vsyncpa [#allocation14], 0 }
   0x9   :  { %17 = vsyncpa [#allocation5], 0 }
   0xa   :  { %19 = vsyncpa [#allocation5 + $0x1], 0  ;;  %s3839_s27 = smov 0   ;;  %s3841_s28 = smov 0  }
   0xb   :  { %s3843_s29 = smov 0   ;;  %s3845_s30 = smov 0  }
   0xc LB: > { %s5011_s0 = sld [smem:[#allocation24_spill]]  ;;  %s3863_s12 = sadd.s32 4294967295, %s3779_s30   ;;  %s3779_s30 = sphi %s3845_s30, %s5036_s30   ;;  %s3775_s29 = sphi %s3843_s29, %s5035_s29   ;;  %s3771_s28 = sphi %s3841_s28, %s5034_s28   ;;  %s3767_s27 = sphi %s3839_s27, %s5033_s27  }
   0xd   : > { %p2784_p0 = scmp.ge.s32.totalorder %s3779_s30, 1  ;;  %p88_p1 = scmp.eq.s32.totalorder %s3863_s12, 0 }
   0xe   : > { %p229_p2 = scmp.lt.s32.totalorder %s3779_s30, 3  ;;  %s3781_s14 = smov [#allocation3]  }
   0xf   : > { %s242_s15 = sshll.u32 %s3781_s14, 4  ;;  %s5013_s1 = sld [smem:[#allocation25_spill]]  ;;  %s243_s15 = int_to_ptr.vmem [resolvable:$true] %s242_s15 }
  0x10   : > { %p3868_p3 = pnand %p2784_p0, %p229_p2  ;;  %s3782_s20 = smov [#allocation6]  }
  0x11   : > { %s256_s21 = sshll.u32 %s3782_s20, 4  ;;  %s3783_s22 = smov 64   ;;  %s257_s21 = int_to_ptr.vmem [resolvable:$true] %s256_s21 }
  0x12   : > { %s240_s11 = sshll.u32 %s5011_s0, 4  ;;  %p3176_p4 = pneg %p3868_p3  ;;  %s241_s11 = int_to_ptr.hbm [resolvable:$true] %s240_s11 }
  0x13   : > { %s3784_s23 = smov 4   ;;  %s5005_s24 = smov 128  }
  0x14   : > { %p3880_p6 = pnand %p3176_p4, %p88_p1  ;;  %s5006_s25 = smov 8  }
  0x15   : > { %s254_s18 = sshll.u32 %s5013_s1, 4  ;;  %s5015_s4 = sld [smem:[#allocation27_spill]]  ;;  %s255_s18 = int_to_ptr.hbm [resolvable:$true] %s254_s18 }
  0x16   : > { %3179 = dma.hbm_to_vmem [thread:$0]  (!%p3880_p6), %s241_s11, 1024, %s243_s15, [#allocation4], %s3783_s22, %s3783_s22, %s3784_s23  }
  0x17   : > { %3182 = dma.hbm_to_vmem [thread:$0]  (!%p3880_p6), %s255_s18, 2048, %s257_s21, [#allocation7], %s5005_s24, %s5005_s24, %s5006_s25  }
  0x18   : > { %s3787_s14 = smov [#allocation10]   ;;  %s310_s15 = sshll.u32 %s5002_s6, 4  ;;  %s311_s15 = int_to_ptr.hbm [resolvable:$true] %s310_s15 }
  0x19   : > { %s284_s16 = sshll.u32 %s3787_s14, 4  ;;  %s3788_s18 = smov [#allocation13]   ;;  %s285_s16 = int_to_ptr.vmem [resolvable:$true] %s284_s16 }
  0x1a   : > { %s312_s20 = sshll.u32 %s3788_s18, 4  ;;  %s5016_s3 = sld [smem:[#allocation26_spill]]  ;;  %s313_s20 = int_to_ptr.vmem [resolvable:$true] %s312_s20 }
  0x1b   : > { %s282_s10 = sshll.u32 %s5015_s4, 4  ;;  %s325_s26 = sshll.u32 %s5003_s7, 4  ;;  %s283_s10 = int_to_ptr.hbm [resolvable:$true] %s282_s10  ;;  %s326_s26 = int_to_ptr.hbm [resolvable:$true] %s325_s26 }
  0x1c   : > { %3188 = dma.hbm_to_vmem [thread:$0]  (!%p3880_p6), %s283_s10, 1024, %s285_s16, [#allocation11], %s3783_s22, %s3783_s22, %s3784_s23  }
  0x1d   : > { %3194 = dma.hbm_to_vmem [thread:$0]  (!%p3880_p6), %s311_s15, 2048, %s313_s20, [#allocation14], %s5005_s24, %s5005_s24, %s5006_s25  }
  0x1e   : > { %s296_s10 = sshll.u32 %s5001_s5, 4  ;;  %s3789_s16 = smov [#allocation9]   ;;  %s297_s10 = int_to_ptr.hbm [resolvable:$true] %s296_s10 }
  0x1f   : > { %s270_s11 = sshll.u32 %s3789_s16, 4  ;;  %s3790_s15 = smov [#allocation12]   ;;  %s271_s11 = int_to_ptr.vmem [resolvable:$true] %s270_s11 }
  0x20   : > { %s268_s9 = sshll.u32 %s5016_s3, 4  ;;  %s298_s18 = sshll.u32 %s3790_s15, 4  ;;  %s269_s9 = int_to_ptr.hbm [resolvable:$true] %s268_s9  ;;  %s299_s18 = int_to_ptr.vmem [resolvable:$true] %s298_s18 }
  0x21   : > { %3185 = dma.hbm_to_vmem [thread:$0]  (!%p3880_p6), %s269_s9, 1024, %s271_s11, [#allocation7], %s3783_s22, %s3783_s22, %s3784_s23  }
  0x22   : > { %3191 = dma.hbm_to_vmem [thread:$0]  (!%p3880_p6), %s297_s10, 1024, %s299_s18, [#allocation11], %s3783_s22, %s3783_s22, %s3784_s23  }
  0x23   : > { %s3791_s9 = smov [#allocation15]   ;;  %s2783_s17 = sadd.s32 4294967294, %s3779_s30  }
  0x24   : > { %s327_s14 = sshll.u32 %s3791_s9, 4  ;;  %s3933_s16 = sadd.s32 1, %s3779_s30   ;;  %s328_s14 = int_to_ptr.vmem [resolvable:$true] %s327_s14 }
  0x25   : > { %3197 = dma.hbm_to_vmem [thread:$0]  (!%p3880_p6), %s326_s26, 128, %s328_s14, [#allocation14]  }
  0x26   : > { %s74_s11 = sadd.s32 1, %s3775_s29  ;;  %s71_s15 = ssub.s32 %s3779_s30, %s3933_s16 }
  0x27   : > { %p81_p7 = scmp.ne.s32.totalorder %s3775_s29, %s3771_s28  ;;  %p72_p8 = scmp.eq.s32.totalorder %s71_s15, 0 }
  0x28   : > { %p82_p9 = scmp.eq.s32.totalorder %s3779_s30, 0  ;;  %p87_p10 = scmp.ne.s32.totalorder %s3771_s28, %s3767_s27 }
  0x29   : > { %p216_p11 = scmp.eq.s32.totalorder %s3863_s12, 1  ;;  %p222_p2 = scmp.eq.s32.totalorder %s2783_s17, 1 }
  0x2a   : > { %s3945_s22 = scalar_select %p72_p8, %s3775_s29, %s74_s11  }
  0x2b   : > { %p3947_p12 = por %p82_p9, %p81_p7  ;;  %p3953_p13 = por %p88_p1, %p87_p10 }
  0x2c   : > { %p3957_p0 = por %p216_p11, %p81_p7  ;;  %p3213_p4 = scmp.lt.s32.totalorder %s3779_s30, 2 }
  0x2d   : > { %s338_s18 = sand.u32 1, %s3779_s30   ;;  %p3963_p6 = por %p222_p2, %p87_p10 }
  0x2e   : > { %s340_s21 = sand.u32 1, %s3775_s29   ;;  %s3032_s26 = sshll.u32 %s3779_s30, 7 }
  0x2f   : > { %s2793_s9 = sshll.u32 %s340_s21, 7  ;;  %s347_s15 = scalar_lea.hbm %s4998_s2, %s3032_s26 }
  0x30   : > { %s348_s24 = sshll.u32 %s347_s15, 4  ;;  %s342_s25 = scalar_lea.vmem [#allocation8], %s2793_s9  ;;  %s349_s24 = int_to_ptr.hbm [resolvable:$true] %s348_s24 }
  0x31   : > { %s350_s0 = sshll.u32 %s342_s25, 4  ;;  %p3974_p7 = pnand %p3213_p4, %p3947_p12  ;;  %s351_s0 = int_to_ptr.vmem [resolvable:$true] %s350_s0 }
  0x32   : > { %s339_s1 = scalar_lea.sflag [#allocation4], %s338_s18  ;;  %s3663_s3 = sshra.s32 %s349_s24, 4  ;;  %s3664_s3 = int_to_ptr.hbm [resolvable:$true] %s3663_s3 }
  0x33   : > { %s3665_s4 = scalar_lea.hbm %s3664_s3, 128  ;;  %p3667_p9 = pneg %p3974_p7 }
  0x34   : > { %p3666_p8 = scmp.ne.s32.totalorder %s3664_s3, %s3665_s4  ;;  %s3670_s25 = scalar_lea.hbm %s4998_s2, 256 }
  0x35   : > { %p3671_p12 = scmp.lt.s32.totalorder %s3664_s3, %s4998_s2  ;;  %p3672_p2 = scmp.lt.s32.totalorder %s3670_s25, %s3665_s4 }
  0x36   : > { %p3668_p10 = pnand %p3667_p9, %p3666_p8 }
  0x37   : > { %p3673_p4 = por %p3672_p2, %p3671_p12 }
  0x38   : > { %p3669_p11 = pneg %p3668_p10 }
  0x3a   : > { %p3674_p5 = pnand %p3673_p4, %p3669_p11 }
  0x3c   : > { %3677 = shalt.err (!%p3674_p5)
}
  0x3d   : > { %s5022_s18 = smov 8   ;;  %s5023_s14 = smov 128  }
  0x3e   : > { %3201 = dma.hbm_to_vmem [thread:$0]  (!%p3974_p7), %s349_s24, 2048, %s351_s0, %s339_s1, %s5023_s14, %s5023_s14, %s5022_s18  }
  0x3f   : > { %362 = sbr.rel (%p3868_p3) target bundleno = 2031 (0x7ef), region = 52 }
  0x44   : > { %3738 = dma.done.wait (%p88_p1), [#allocation4], 1024  }
  0x45   : > { %3740 = vsyncadd (%p88_p1), [#allocation4], 4294966272 }
  0x46   : > { %3742 = dma.done.wait (%p88_p1), [#allocation7], 2048  }
  0x47   : > { %3744 = vsyncadd (%p88_p1), [#allocation7], 4294965248  ;;  %s374_s3 = sand.u32 1, %s3863_s12   ;;  %s4003_s0 = sand.u32 1, %s3771_s28  }
  0x48   : > { %s2799_s1 = sshll.u32 %s4003_s0, 7  ;;  %s375_s4 = scalar_lea.sflag [#allocation4], %s374_s3 }
  0x49   : > { %s4006_s13 = scalar_lea.vmem [#allocation8], %s2799_s1 }
  0x4a   : > { %3746 = dma.done.wait (%p3953_p13), %s375_s4, 2048  }
  0x4b   : > { %3748 = vsyncadd (%p3953_p13), %s375_s4, 4294965248 }
  0x4c   : > { %3750 = dma.done.wait (%p88_p1), [#allocation7], 1024  }
  0x4d   : > { %3752 = vsyncadd (%p88_p1), [#allocation7], 4294966272 }
  0x4e   : > { %3754 = dma.done.wait (%p88_p1), [#allocation11], 2048  }
  0x4f   : > { %3756 = vsyncadd (%p88_p1), [#allocation11], 4294965248 }
  0x50   : > { %3758 = dma.done.wait (%p88_p1), [#allocation14], 2176  }
  0x51   : > { %3760 = vsyncadd (%p88_p1), [#allocation14], 4294965120  ;;  %v2895_v0 = vld [vmem:[%s4006_s13 + $0x70] sm:$0xf]  ;;  %v3056_v1 = vld [vmem:[%s4006_s13 + $0x74] sm:$0xf0]  ;;  %s2647_s11 = scalar_lea.hbm %s5004_s8, %s3863_s12 }
  0x52   : > { %v3055_v2 = vld [vmem:[%s4006_s13 + $0x74] sm:$0xf]  ;;  %v2896_v3 = vor.u32 %v3056_v1, %v2895_v0  ;;  %v2897_v4 = vld [vmem:[%s4006_s13 + $0x78] sm:$0xf0]  ;;  %v2887_v5 = vld [vmem:[%s4006_s13 + $0x60] sm:$0xf] }
  0x53   : > { %v3054_v6 = vld [vmem:[%s4006_s13 + $0x64] sm:$0xf0]  ;;  %v2900_v7 = vor.u32 %v3055_v2, %v2897_v4  ;;  %v3053_v8 = vld [vmem:[%s4006_s13 + $0x64] sm:$0xf]  ;;  %v2889_v9 = vld [vmem:[%s4006_s13 + $0x68] sm:$0xf0] }
  0x54   : > { %603 = vmatpush.bf16.msra.mxu0 %v2896_v3  ;;  %v2888_v10 = vor.u32 %v3054_v6, %v2887_v5  ;;  %957 = vmatpush.bf16.xpose.msra.mxu2 %v2896_v3  ;;  %v2892_v11 = vor.u32 %v3053_v8, %v2889_v9  ;;  %v2879_v12 = vld [vmem:[%s4006_s13 + $0x50] sm:$0xf]  ;;  %v3052_v13 = vld [vmem:[%s4006_s13 + $0x54] sm:$0xf0]  ;;  %v3051_v14 = vld [vmem:[%s4006_s13 + $0x54] sm:$0xf] }
  0x55   : > { %652 = vmatpush.bf16.msra.mxu1 %v2900_v7  ;;  %1006 = vmatpush.bf16.xpose.msra.mxu3 %v2900_v7  ;;  %v2881_v15 = vld [vmem:[%s4006_s13 + $0x58] sm:$0xf0]  ;;  %v2880_v16 = vor.u32 %v3052_v13, %v2879_v12  ;;  %v2871_v18 = vld [vmem:[%s4006_s13 + $0x40] sm:$0xf]  ;;  %v3050_v19 = vld [vmem:[%s4006_s13 + $0x44] sm:$0xf0] }
  0x56   : > { %v2884_v17 = vor.u32 %v3051_v14, %v2881_v15  ;;  %v3049_v20 = vld [vmem:[%s4006_s13 + $0x44] sm:$0xf]  ;;  %v2873_v21 = vld [vmem:[%s4006_s13 + $0x48] sm:$0xf0]  ;;  %v2863_v22 = vld [vmem:[%s4006_s13 + $0x30] sm:$0xf]  ;;  %v2872_v24 = vor.u32 %v3050_v19, %v2871_v18 }
  0x57   : > { %v3048_v23 = vld [vmem:[%s4006_s13 + $0x34] sm:$0xf0]  ;;  %v3047_v25 = vld [vmem:[%s4006_s13 + $0x34] sm:$0xf]  ;;  %v2876_v26 = vor.u32 %v3049_v20, %v2873_v21  ;;  %v2865_v27 = vld [vmem:[%s4006_s13 + $0x38] sm:$0xf0] }
  0x58   : > { %604 = vmatpush.bf16.msra.mxu0 %v2888_v10  ;;  %v2864_v28 = vor.u32 %v3048_v23, %v2863_v22  ;;  %v2868_v29 = vor.u32 %v3047_v25, %v2865_v27  ;;  %v2855_v30 = vld [vmem:[%s4006_s13 + $0x20] sm:$0xf]  ;;  %v3046_v31 = vld [vmem:[%s4006_s13 + $0x24] sm:$0xf0]  ;;  %v3045_v32 = vld [vmem:[%s4006_s13 + $0x24] sm:$0xf] }
  0x59   : > { %653 = vmatpush.bf16.msra.mxu1 %v2892_v11  ;;  %v2857_v33 = vld [vmem:[%s4006_s13 + $0x28] sm:$0xf0]  ;;  %v2856_v34 = vor.u32 %v3046_v31, %v2855_v30  ;;  %v2847_v36 = vld [vmem:[%s4006_s13 + $0x10] sm:$0xf]  ;;  %v3044_v37 = vld [vmem:[%s4006_s13 + $0x14] sm:$0xf0] }
  0x5a   : > { %v2860_v35 = vor.u32 %v3045_v32, %v2857_v33  ;;  %v3043_v38 = vld [vmem:[%s4006_s13 + $0x14] sm:$0xf]  ;;  %v2849_v39 = vld [vmem:[%s4006_s13 + $0x18] sm:$0xf0]  ;;  %v2848_v40 = vor.u32 %v3044_v37, %v2847_v36  ;;  %v2839_v42 = vld [vmem:[%s4006_s13] sm:$0xf] }
  0x5b   : > { %v2852_v41 = vor.u32 %v3043_v38, %v2849_v39  ;;  %v3042_v43 = vld [vmem:[%s4006_s13 + $0x4] sm:$0xf0]  ;;  %v3041_v44 = vld [vmem:[%s4006_s13 + $0x4] sm:$0xf]  ;;  %v2841_v45 = vld [vmem:[%s4006_s13 + $0x8] sm:$0xf0] }
  0x5c   : > { %605 = vmatpush.bf16.msra.mxu0 %v2880_v16  ;;  %958 = vmatpush.bf16.xpose.msra.mxu2 %v2888_v10  ;;  %v2840_v46 = vor.u32 %v3042_v43, %v2839_v42  ;;  %v2844_v47 = vor.u32 %v3041_v44, %v2841_v45  ;;  %v3033_v48 = vld [vmem:[#allocation3] sm:$0xff]  ;;  %v3034_v49 = vld [vmem:[#allocation3 + $0x8] sm:$0xff]  ;;  %v3035_v50 = vld [vmem:[#allocation3 + $0x10] sm:$0xff]  ;;  %s435_s15 = scalar_lea.vmem [#allocation16], %s4003_s0  ;;  %s2651_s21 = sshll.u32 %s2647_s11, 4  ;;  %s2652_s21 = int_to_ptr.hbm [resolvable:$true] %s2651_s21 }
  0x5d   : > { %654 = vmatpush.bf16.msra.mxu1 %v2884_v17  ;;  %1007 = vmatpush.bf16.xpose.msra.mxu3 %v2892_v11  ;;  %v3036_v51 = vld [vmem:[#allocation3 + $0x18] sm:$0xff]  ;;  %v3037_v52 = vld [vmem:[#allocation3 + $0x20] sm:$0xff]  ;;  %v3038_v53 = vld [vmem:[#allocation3 + $0x28] sm:$0xff]  ;;  %s2649_s17 = sshll.u32 %s435_s15, 4  ;;  %s2639_s12 = scalar_lea.sflag [#allocation5], %s4003_s0  ;;  %s2650_s17 = int_to_ptr.vmem [resolvable:$true] %s2649_s17 }
  0x5e   : > { %v3039_v54 = vld [vmem:[#allocation3 + $0x30] sm:$0xff]  ;;  %v3040_v61 = vld [vmem:[#allocation3 + $0x38] sm:$0xff]  ;;  %s3707_s26 = sshra.s32 %s2652_s21, 4  ;;  %s3713_s18 = scalar_lea.hbm %s5004_s8, 2  ;;  %s3708_s26 = int_to_ptr.hbm [resolvable:$true] %s3707_s26 }
  0x5f   : > { %s3709_s25 = scalar_lea.hbm %s3708_s26, 1  ;;  %p3714_p13 = scmp.lt.s32.totalorder %s3708_s26, %s5004_s8 }
  0x60   : > { %606 = vmatpush.bf16.msra.mxu0 %v2872_v24  ;;  %p3710_p1 = scmp.ne.s32.totalorder %s3708_s26, %s3709_s25  ;;  %p3715_p7 = scmp.lt.s32.totalorder %s3713_s18, %s3709_s25 }
  0x61   : > { %655 = vmatpush.bf16.msra.mxu1 %v2876_v26 }
  0x62   : > { %p3711_p3 = pnand %p3710_p1, %p3957_p0  ;;  %p3716_p8 = por %p3715_p7, %p3714_p13 }
  0x64   : > { %607 = vmatpush.bf16.msra.mxu0 %v2864_v28  ;;  %959 = vmatpush.bf16.xpose.msra.mxu2 %v2880_v16  ;;  %p3712_p5 = pneg %p3711_p3 }
  0x65   : > { %656 = vmatpush.bf16.msra.mxu1 %v2868_v29  ;;  %1008 = vmatpush.bf16.xpose.msra.mxu3 %v2884_v17 }
  0x66   : > { %p3717_p9 = pnand %p3716_p8, %p3712_p5 }
  0x68   : > { %608 = vmatpush.bf16.msra.mxu0 %v2856_v34 }
  0x69   : > { %657 = vmatpush.bf16.msra.mxu1 %v2860_v35 }
  0x6c   : > { %609 = vmatpush.bf16.msra.mxu0 %v2848_v40  ;;  %960 = vmatpush.bf16.xpose.msra.mxu2 %v2872_v24 }
  0x6d   : > { %658 = vmatpush.bf16.msra.mxu1 %v2852_v41  ;;  %1009 = vmatpush.bf16.xpose.msra.mxu3 %v2876_v26 }
  0x70   : > { %610 = vmatpush.bf16.msra.mxu0 %v2840_v46 }
  0x71   : > { %659 = vmatpush.bf16.msra.mxu1 %v2844_v47 }
  0x73   : > { %611 = vmatmul.bf16.vlgmr.msra.gmra.mxu0 %v3033_v48 }
  0x74   : > { %660 = vmatmul.bf16.vlgmr.msra.gmra.mxu1 %v3033_v48  ;;  %961 = vmatpush.bf16.xpose.msra.mxu2 %v2864_v28 }
  0x75   : > { %1010 = vmatpush.bf16.xpose.msra.mxu3 %v2868_v29 }
  0x7c   : > { %962 = vmatpush.bf16.xpose.msra.mxu2 %v2856_v34 }
  0x7d   : > { %1011 = vmatpush.bf16.xpose.msra.mxu3 %v2860_v35 }
  0x83   : > { %616 = vmatmul.bf16.gmra.mxu0 %v3034_v49 }
  0x84   : > { %665 = vmatmul.bf16.gmra.mxu1 %v3034_v49  ;;  %963 = vmatpush.bf16.xpose.msra.mxu2 %v2848_v40 }
  0x85   : > { %1012 = vmatpush.bf16.xpose.msra.mxu3 %v2852_v41 }
  0x8c   : > { %964 = vmatpush.bf16.xpose.msra.mxu2 %v2840_v46 }
  0x8d   : > { %1013 = vmatpush.bf16.xpose.msra.mxu3 %v2844_v47 }
  0x93   : > { %621 = vmatmul.bf16.gmra.mxu0 %v3035_v50 }
  0x94   : > { %670 = vmatmul.bf16.gmra.mxu1 %v3035_v50 }
  0xa3   : > { %626 = vmatmul.bf16.gmra.mxu0 %v3036_v51 }
  0xa4   : > { %675 = vmatmul.bf16.gmra.mxu1 %v3036_v51 }
  0xb3   : > { %631 = vmatmul.bf16.gmra.mxu0 %v3037_v52 }
  0xb4   : > { %680 = vmatmul.bf16.gmra.mxu1 %v3037_v52 }
  0xc3   : > { %636 = vmatmul.bf16.gmra.mxu0 %v3038_v53 }
  0xc4   : > { %685 = vmatmul.bf16.gmra.mxu1 %v3038_v53 }
  0xd3   : > { %641 = vmatmul.bf16.gmra.mxu0 %v3039_v54 }
  0xd4   : > { %690 = vmatmul.bf16.gmra.mxu1 %v3039_v54 }
  0xe3   : > { %646 = vmatmul.bf16.gmra.mxu0 %v3040_v61 }
  0xe4   : > { %695 = vmatmul.bf16.gmra.mxu1 %v3040_v61 }
  0xf0   : > { %v612_v55 = vpop.f32.mrf.mxu0 }
  0xf1   : > { %v661_v56 = vpop.f32.mrf.mxu1 }
  0xf2   : > { %v701_v57 = vmax.f32 %v612_v55, %v661_v56 }
  0xf4   : > { %702 = vmax.xlane.f32.xlu0 %v701_v57 }
  0xf8   : > { %v614_v58 = vpop.f32.mrf.mxu0 }
  0xf9   : > { %v663_v59 = vpop.f32.mrf.mxu1 }
  0xfa   : > { %v704_v60 = vmax.f32 %v614_v58, %v663_v59 }
  0xfc   : > { %705 = vmax.xlane.f32.xlu0 %v704_v60 }
 0x100   : > { %v617_v62 = vpop.f32.mrf.mxu0 }
 0x101   : > { %v666_v63 = vpop.f32.mrf.mxu1 }
 0x102   : > { %v707_v0 = vmax.f32 %v617_v62, %v666_v63 }
 0x104   : > { %708 = vmax.xlane.f32.xlu1 %v707_v0 }
 0x108   : > { %v4056_v1 = vpop.f32.mrf.mxu0 }
 0x109   : > { %v4058_v2 = vpop.f32.mrf.mxu1 }
 0x10a   : > { %v710_v3 = vmax.f32 %v4056_v1, %v4058_v2 }
 0x10c   : > { %711 = vmax.xlane.f32.xlu1 %v710_v3 }
 0x110   : > { %v4062_v4 = vpop.f32.mrf.mxu0 }
 0x111   : > { %v4064_v5 = vpop.f32.mrf.mxu1 }
 0x112   : > { %v713_v6 = vmax.f32 %v4062_v4, %v4064_v5 }
 0x114   : > { %714 = vmax.xlane.f32.xlu2 %v713_v6 }
 0x118   : > { %v4068_v7 = vpop.f32.mrf.mxu0 }
 0x119   : > { %v4070_v8 = vpop.f32.mrf.mxu1 }
 0x11a   : > { %v716_v9 = vmax.f32 %v4068_v7, %v4070_v8 }
 0x11c   : > { %717 = vmax.xlane.f32.xlu2 %v716_v9 }
 0x120   : > { %v4074_v10 = vpop.f32.mrf.mxu0 }
 0x121   : > { %v4076_v11 = vpop.f32.mrf.mxu1 }
 0x122   : > { %v719_v12 = vmax.f32 %v4074_v10, %v4076_v11 }
 0x124   : > { %720 = vmax.xlane.f32.xlu0 %v719_v12 }
 0x128   : > { %v4080_v13 = vpop.f32.mrf.mxu0 }
 0x129   : > { %v4082_v14 = vpop.f32.mrf.mxu1 }
 0x12a   : > { %v722_v15 = vmax.f32 %v4080_v13, %v4082_v14 }
 0x12c   : > { %723 = vmax.xlane.f32.xlu1 %v722_v15 }
 0x130   : > { %v4086_v16 = vpop.f32.mrf.mxu0 }
 0x131   : > { %v4088_v17 = vpop.f32.mrf.mxu1 }
 0x132   : > { %v725_v18 = vmax.f32 %v4086_v16, %v4088_v17 }
 0x134   : > { %726 = vmax.xlane.f32.xlu1 %v725_v18 }
 0x138   : > { %v4092_v24 = vpop.f32.mrf.mxu0 }
 0x139   : > { %v4094_v25 = vpop.f32.mrf.mxu1 }
 0x13a   : > { %v728_v44 = vmax.f32 %v4092_v24, %v4094_v25 }
 0x140   : > { %v4102_v34 = vpop.f32.mrf.mxu0 }
 0x141   : > { %v4104_v36 = vpop.f32.mrf.mxu1 }
 0x142   : > { %v731_v53 = vmax.f32 %v4102_v34, %v4104_v36 }
 0x148   : > { %v4116_v48 = vpop.f32.mrf.mxu0 }
 0x149   : > { %v4118_v49 = vpop.f32.mrf.mxu1 }
 0x151   : > { %v4136_v0 = vpop.f32.mrf.mxu1 }
 0x167   : > { %v703_v19 = vpop.xlane.xlu0 %702 }
 0x168   : > { %v749_v20 = vsub.f32 %v612_v55, %v703_v19  ;;  %v750_v21 = vsub.f32 %v661_v56, %v703_v19 }
 0x16a   : > { %v781_v22 = vmul.f32 1.442695, %v749_v20  ;;  %v783_v23 = vmul.f32 1.442695, %v750_v21  ;;  %v4154_v21 = vpop.f32.mrf.mxu1 }
 0x16c   : > { %3293 = vpow2.f32 %v781_v22 }
 0x16d   : > { %3295 = vpow2.f32 %v783_v23 }
 0x16f   : > { %v706_v26 = vpop.xlane.xlu0 %705 }
 0x170   : > { %v751_v27 = vsub.f32 %v614_v58, %v706_v26  ;;  %v752_v28 = vsub.f32 %v663_v59, %v706_v26 }
 0x172   : > { %v4096_v29 = vpop.eup %3293  ;;  %v785_v30 = vmul.f32 1.442695, %v751_v27  ;;  %v787_v31 = vmul.f32 1.442695, %v752_v28 }
 0x173   : > { %v4098_v32 = vpop.eup %3295 }
 0x174   : > { %3297 = vpow2.f32 %v785_v30  ;;  %v845_v33 = vadd.f32 %v4098_v32, %v4096_v29 }
 0x175   : > { %3299 = vpow2.f32 %v787_v31 }
 0x176   : > { %846 = vadd.xlane.f32.xlu2 %v845_v33 }
 0x177   : > { %v709_v35 = vpop.xlane.xlu1 %708 }
 0x178   : > { %v753_v37 = vsub.f32 %v617_v62, %v709_v35  ;;  %v754_v38 = vsub.f32 %v666_v63, %v709_v35  ;;  %v4132_v62 = vpop.f32.mrf.mxu0 }
 0x179   : > { %v737_v15 = vmax.f32 %v4132_v62, %v4136_v0 }
 0x17a   : > { %v4106_v39 = vpop.eup %3297  ;;  %v789_v40 = vmul.f32 1.442695, %v753_v37  ;;  %v791_v41 = vmul.f32 1.442695, %v754_v38 }
 0x17b   : > { %v4108_v42 = vpop.eup %3299 }
 0x17c   : > { %3301 = vpow2.f32 %v789_v40  ;;  %v848_v43 = vadd.f32 %v4108_v42, %v4106_v39 }
 0x17d   : > { %3303 = vpow2.f32 %v791_v41 }
 0x17e   : > { %849 = vadd.xlane.f32.xlu0 %v848_v43  ;;  %729 = vmax.xlane.f32.xlu2 %v728_v44 }
 0x17f   : > { %v712_v45 = vpop.xlane.xlu1 %711 }
 0x180   : > { %v755_v46 = vsub.f32 %v4056_v1, %v712_v45  ;;  %v756_v47 = vsub.f32 %v4058_v2, %v712_v45  ;;  %v734_v2 = vmax.f32 %v4116_v48, %v4118_v49  ;;  %v4150_v19 = vpop.f32.mrf.mxu0 }
 0x181   : > { %v740_v31 = vmax.f32 %v4150_v19, %v4154_v21 }
 0x182   : > { %v4120_v50 = vpop.eup %3301  ;;  %v793_v51 = vmul.f32 1.442695, %v755_v46  ;;  %v795_v52 = vmul.f32 1.442695, %v756_v47 }
 0x183   : > { %v4124_v54 = vpop.eup %3303 }
 0x184   : > { %3305 = vpow2.f32 %v793_v51  ;;  %v851_v55 = vadd.f32 %v4124_v54, %v4120_v50 }
 0x185   : > { %3307 = vpow2.f32 %v795_v52 }
 0x186   : > { %852 = vadd.xlane.f32.xlu0 %v851_v55  ;;  %732 = vmax.xlane.f32.xlu2 %v731_v53 }
 0x187   : > { %v715_v56 = vpop.xlane.xlu2 %714 }
 0x188   : > { %v757_v57 = vsub.f32 %v4062_v4, %v715_v56  ;;  %v758_v58 = vsub.f32 %v4064_v5, %v715_v56  ;;  %v4166_v33 = vpop.f32.mrf.mxu0 }
 0x18a   : > { %v4130_v59 = vpop.eup %3305  ;;  %v797_v60 = vmul.f32 1.442695, %v757_v57  ;;  %v799_v61 = vmul.f32 1.442695, %v758_v58 }
 0x18b   : > { %v4134_v63 = vpop.eup %3307 }
 0x18c   : > { %3309 = vpow2.f32 %v797_v60  ;;  %v854_v1 = vadd.f32 %v4134_v63, %v4130_v59 }
 0x18d   : > { %3311 = vpow2.f32 %v799_v61 }
 0x18e   : > { %855 = vadd.xlane.f32.xlu1 %v854_v1  ;;  %735 = vmax.xlane.f32.xlu0 %v734_v2 }
 0x18f   : > { %v718_v3 = vpop.xlane.xlu2 %717 }
 0x190   : > { %v759_v4 = vsub.f32 %v4068_v7, %v718_v3  ;;  %v760_v5 = vsub.f32 %v4070_v8, %v718_v3  ;;  %v4182_v47 = vpop.f32.mrf.mxu0 }
 0x192   : > { %v4144_v6 = vpop.eup %3309  ;;  %v801_v9 = vmul.f32 1.442695, %v759_v4  ;;  %v803_v12 = vmul.f32 1.442695, %v760_v5 }
 0x193   : > { %v4148_v18 = vpop.eup %3311 }
 0x194   : > { %3313 = vpow2.f32 %v801_v9  ;;  %v857_v20 = vadd.f32 %v4148_v18, %v4144_v6 }
 0x195   : > { %3315 = vpow2.f32 %v803_v12 }
 0x196   : > { %858 = vadd.xlane.f32.xlu1 %v857_v20  ;;  %738 = vmax.xlane.f32.xlu0 %v737_v15 }
 0x197   : > { %v721_v7 = vpop.xlane.xlu0 %720 }
 0x198   : > { %v761_v8 = vsub.f32 %v4074_v10, %v721_v7  ;;  %v762_v22 = vsub.f32 %v4076_v11, %v721_v7  ;;  %v4168_v10 = vpop.f32.mrf.mxu1 }
 0x199   : > { %v743_v43 = vmax.f32 %v4166_v33, %v4168_v10 }
 0x19a   : > { %v4158_v23 = vpop.eup %3313  ;;  %v805_v26 = vmul.f32 1.442695, %v761_v8  ;;  %v807_v27 = vmul.f32 1.442695, %v762_v22 }
 0x19b   : > { %v4160_v28 = vpop.eup %3315 }
 0x19c   : > { %3317 = vpow2.f32 %v805_v26  ;;  %v860_v30 = vadd.f32 %v4160_v28, %v4158_v23 }
 0x19d   : > { %3319 = vpow2.f32 %v807_v27 }
 0x19e   : > { %861 = vadd.xlane.f32.xlu2 %v860_v30  ;;  %741 = vmax.xlane.f32.xlu1 %v740_v31 }
 0x19f   : > { %v724_v11 = vpop.xlane.xlu1 %723 }
 0x1a0   : > { %v763_v35 = vsub.f32 %v4080_v13, %v724_v11  ;;  %v764_v37 = vsub.f32 %v4082_v14, %v724_v11  ;;  %v4184_v51 = vpop.f32.mrf.mxu1 }
 0x1a1   : > { %v746_v58 = vmax.f32 %v4182_v47, %v4184_v51 }
 0x1a2   : > { %v4172_v38 = vpop.eup %3317  ;;  %v809_v40 = vmul.f32 1.442695, %v763_v35  ;;  %v811_v41 = vmul.f32 1.442695, %v764_v37 }
 0x1a3   : > { %v4176_v44 = vpop.eup %3319 }
 0x1a4   : > { %3321 = vpow2.f32 %v809_v40  ;;  %v863_v45 = vadd.f32 %v4176_v44, %v4172_v38 }
 0x1a5   : > { %3323 = vpow2.f32 %v811_v41 }
 0x1a6   : > { %864 = vadd.xlane.f32.xlu2 %v863_v45  ;;  %744 = vmax.xlane.f32.xlu1 %v743_v43 }
 0x1a7   : > { %v727_v46 = vpop.xlane.xlu1 %726 }
 0x1a8   : > { %v765_v13 = vsub.f32 %v4086_v16, %v727_v46  ;;  %v766_v14 = vsub.f32 %v4088_v17, %v727_v46 }
 0x1aa   : > { %v4186_v52 = vpop.eup %3321  ;;  %v813_v53 = vmul.f32 1.442695, %v765_v13  ;;  %v815_v55 = vmul.f32 1.442695, %v766_v14 }
 0x1ab   : > { %v4188_v56 = vpop.eup %3323 }
 0x1ac   : > { %3325 = vpow2.f32 %v813_v53  ;;  %v866_v57 = vadd.f32 %v4188_v56, %v4186_v52 }
 0x1ad   : > { %3327 = vpow2.f32 %v815_v55 }
 0x1ae   : > { %867 = vadd.xlane.f32.xlu0 %v866_v57  ;;  %747 = vmax.xlane.f32.xlu2 %v746_v58 }
 0x1b2   : > { %v4194_v16 = vpop.eup %3325 }
 0x1b3   : > { %v4196_v17 = vpop.eup %3327 }
 0x1b4   : > { %v869_v60 = vadd.f32 %v4196_v17, %v4194_v16 }
 0x1b6   : > { %870 = vadd.xlane.f32.xlu0 %v869_v60 }
 0x1e9   : > { %v847_v61 = vpop.xlane.xlu2 %846 }
 0x1ea   : > { %3329 = vrcp.f32 %v847_v61 }
 0x1f0   : > { %v3330_v12 = vpop.eup %3329 }
 0x1f1   : > { %v850_v1 = vpop.xlane.xlu0 %849  ;;  %v730_v2 = vpop.xlane.xlu2 %729  ;;  %v909_v8 = vmul.f32 %v3330_v12, %v4096_v29  ;;  %v910_v26 = vmul.f32 %v3330_v12, %v4098_v32  ;;  %v3072_v32 = vld [vmem:[#allocation9 + $0x38] sm:$0xff] }
 0x1f2   : > { %3331 = vrcp.f32 %v850_v1  ;;  %v767_v3 = vsub.f32 %v4092_v24, %v730_v2  ;;  %v768_v4 = vsub.f32 %v4094_v25, %v730_v2  ;;  %1231 = vmatpush.bf16.msrb.mxu0 %v3072_v32  ;;  %v3071_v2 = vld [vmem:[#allocation9 + $0x30] sm:$0xff] }
 0x1f4   : > { %v817_v5 = vmul.f32 1.442695, %v767_v3  ;;  %v819_v9 = vmul.f32 1.442695, %v768_v4 }
 0x1f6   : > { %3333 = vpow2.f32 %v817_v5  ;;  %1232 = vmatpush.bf16.msrb.mxu0 %v3071_v2 }
 0x1f7   : > { %3335 = vpow2.f32 %v819_v9 }
 0x1f8   : > { %v3332_v15 = vpop.eup %3331 }
 0x1f9   : > { %v853_v20 = vpop.xlane.xlu0 %852  ;;  %v733_v7 = vpop.xlane.xlu2 %732  ;;  %v911_v22 = vmul.f32 %v3332_v15, %v4106_v39  ;;  %v912_v27 = vmul.f32 %v3332_v15, %v4108_v42 }
 0x1fa   : > { %v769_v24 = vsub.f32 %v4102_v34, %v733_v7  ;;  %v770_v25 = vsub.f32 %v4104_v36, %v733_v7 }
 0x1fb   : > { %v941_v30 = vpack.c.bf16 %v911_v22, %v909_v8  ;;  %v942_v31 = vpack.c.bf16 %v912_v27, %v910_v26 }
 0x1fc   : > { %v4208_v11 = vpop.eup %3333  ;;  %v821_v35 = vmul.f32 1.442695, %v769_v24  ;;  %v823_v37 = vmul.f32 1.442695, %v770_v25  ;;  %v3068_v25 = vld [vmem:[#allocation9 + $0x18] sm:$0xff] }
 0x1fd   : > { %v4210_v40 = vpop.eup %3335  ;;  %965 = vmatmul.bf16.vlgmr.msra.gmra.mxu2 %v941_v30  ;;  %1014 = vmatmul.bf16.vlgmr.msra.gmra.mxu3 %v942_v31 }
 0x1fe   : > { %3337 = vpow2.f32 %v821_v35  ;;  %v872_v29 = vadd.f32 %v4210_v40, %v4208_v11 }
 0x1ff   : > { %3339 = vpow2.f32 %v823_v37 }
 0x200   : > { %3341 = vrcp.f32 %v853_v20  ;;  %873 = vadd.xlane.f32.xlu1 %v872_v29  ;;  %v3069_v20 = vld [vmem:[#allocation9 + $0x20] sm:$0xff] }
 0x201   : > { %v856_v34 = vpop.xlane.xlu1 %855  ;;  %v736_v36 = vpop.xlane.xlu0 %735 }
 0x202   : > { %3343 = vrcp.f32 %v856_v34  ;;  %v771_v39 = vsub.f32 %v4116_v48, %v736_v36  ;;  %v772_v42 = vsub.f32 %v4118_v49, %v736_v36  ;;  %v3067_v36 = vld [vmem:[#allocation9 + $0x10] sm:$0xff] }
 0x204   : > { %v4216_v41 = vpop.eup %3337  ;;  %v825_v43 = vmul.f32 1.442695, %v771_v39  ;;  %v827_v45 = vmul.f32 1.442695, %v772_v42 }
 0x205   : > { %v4218_v46 = vpop.eup %3339 }
 0x206   : > { %v3342_v13 = vpop.eup %3341  ;;  %3345 = vpow2.f32 %v825_v43  ;;  %v875_v14 = vadd.f32 %v4218_v46, %v4216_v41 }
 0x207   : > { %3347 = vpow2.f32 %v827_v45  ;;  %v913_v48 = vmul.f32 %v3342_v13, %v4120_v50  ;;  %v914_v58 = vmul.f32 %v3342_v13, %v4124_v54  ;;  %v3070_v54 = vld [vmem:[#allocation9 + $0x28] sm:$0xff] }
 0x208   : > { %v3344_v53 = vpop.eup %3343  ;;  %876 = vadd.xlane.f32.xlu2 %v875_v14  ;;  %1233 = vmatpush.bf16.msrb.mxu0 %v3070_v54 }
 0x209   : > { %v859_v55 = vpop.xlane.xlu1 %858  ;;  %v739_v57 = vpop.xlane.xlu0 %738  ;;  %v915_v49 = vmul.f32 %v3344_v53, %v4130_v59  ;;  %v916_v60 = vmul.f32 %v3344_v53, %v4134_v63 }
 0x20a   : > { %v773_v61 = vsub.f32 %v4132_v62, %v739_v57  ;;  %v774_v1 = vsub.f32 %v4136_v0, %v739_v57 }
 0x20b   : > { %v943_v3 = vpack.c.bf16 %v915_v49, %v913_v48  ;;  %v944_v4 = vpack.c.bf16 %v916_v60, %v914_v58 }
 0x20c   : > { %v4228_v5 = vpop.eup %3345  ;;  %v829_v9 = vmul.f32 1.442695, %v773_v61  ;;  %v831_v12 = vmul.f32 1.442695, %v774_v1  ;;  %1234 = vmatpush.bf16.msrb.mxu0 %v3069_v20 }
 0x20d   : > { %v4230_v15 = vpop.eup %3347  ;;  %970 = vmatmul.bf16.gmra.mxu2 %v943_v3  ;;  %1019 = vmatmul.bf16.gmra.mxu3 %v944_v4 }
 0x20e   : > { %3349 = vpow2.f32 %v829_v9  ;;  %v878_v50 = vadd.f32 %v4230_v15, %v4228_v5 }
 0x20f   : > { %3351 = vpow2.f32 %v831_v12  ;;  %v3066_v12 = vld [vmem:[#allocation9 + $0x8] sm:$0xff] }
 0x210   : > { %3353 = vrcp.f32 %v859_v55  ;;  %879 = vadd.xlane.f32.xlu0 %v878_v50  ;;  %1235 = vmatpush.bf16.msrb.mxu0 %v3068_v25 }
 0x211   : > { %v862_v59 = vpop.xlane.xlu2 %861  ;;  %v742_v62 = vpop.xlane.xlu1 %741 }
 0x212   : > { %3355 = vrcp.f32 %v862_v59  ;;  %v775_v63 = vsub.f32 %v4150_v19, %v742_v62  ;;  %v776_v0 = vsub.f32 %v4154_v21, %v742_v62 }
 0x214   : > { %v4236_v7 = vpop.eup %3349  ;;  %v833_v8 = vmul.f32 1.442695, %v775_v63  ;;  %v835_v22 = vmul.f32 1.442695, %v776_v0  ;;  %1236 = vmatpush.bf16.msrb.mxu0 %v3067_v36 }
 0x215   : > { %v4238_v26 = vpop.eup %3351 }
 0x216   : > { %v3354_v27 = vpop.eup %3353  ;;  %3357 = vpow2.f32 %v833_v8  ;;  %v881_v24 = vadd.f32 %v4238_v26, %v4236_v7 }
 0x217   : > { %3359 = vpow2.f32 %v835_v22  ;;  %v917_v31 = vmul.f32 %v3354_v27, %v4144_v6  ;;  %v918_v37 = vmul.f32 %v3354_v27, %v4148_v18 }
 0x218   : > { %v3356_v30 = vpop.eup %3355  ;;  %882 = vadd.xlane.f32.xlu1 %v881_v24  ;;  %1237 = vmatpush.bf16.msrb.mxu0 %v3066_v12 }
 0x219   : > { %v865_v19 = vpop.xlane.xlu2 %864  ;;  %v745_v21 = vpop.xlane.xlu1 %744  ;;  %v919_v35 = vmul.f32 %v3356_v30, %v4158_v23  ;;  %v920_v29 = vmul.f32 %v3356_v30, %v4160_v28 }
 0x21a   : > { %v777_v32 = vsub.f32 %v4166_v33, %v745_v21  ;;  %v778_v34 = vsub.f32 %v4168_v10, %v745_v21 }
 0x21b   : > { %v945_v39 = vpack.c.bf16 %v919_v35, %v917_v31  ;;  %v946_v42 = vpack.c.bf16 %v920_v29, %v918_v37 }
 0x21c   : > { %v4248_v43 = vpop.eup %3357  ;;  %v837_v45 = vmul.f32 1.442695, %v777_v32  ;;  %v839_v13 = vmul.f32 1.442695, %v778_v34 }
 0x21d   : > { %v4250_v14 = vpop.eup %3359  ;;  %975 = vmatmul.bf16.gmra.mxu2 %v945_v39  ;;  %1024 = vmatmul.bf16.gmra.mxu3 %v946_v42 }
 0x21e   : > { %3361 = vpow2.f32 %v837_v45  ;;  %v884_v6 = vadd.f32 %v4250_v14, %v4248_v43 }
 0x21f   : > { %3363 = vpow2.f32 %v839_v13 }
 0x220   : > { %3365 = vrcp.f32 %v865_v19  ;;  %885 = vadd.xlane.f32.xlu2 %v884_v6 }
 0x221   : > { %v868_v18 = vpop.xlane.xlu0 %867  ;;  %v748_v23 = vpop.xlane.xlu2 %747 }
 0x222   : > { %3367 = vrcp.f32 %v868_v18  ;;  %v779_v28 = vsub.f32 %v4182_v47, %v748_v23  ;;  %v780_v33 = vsub.f32 %v4184_v51, %v748_v23 }
 0x224   : > { %v4256_v10 = vpop.eup %3361  ;;  %v841_v53 = vmul.f32 1.442695, %v779_v28  ;;  %v843_v55 = vmul.f32 1.442695, %v780_v33 }
 0x225   : > { %v4258_v57 = vpop.eup %3363 }
 0x226   : > { %v3366_v48 = vpop.eup %3365  ;;  %3369 = vpow2.f32 %v841_v53  ;;  %v887_v49 = vadd.f32 %v4258_v57, %v4256_v10 }
 0x227   : > { %3371 = vpow2.f32 %v843_v55  ;;  %v921_v60 = vmul.f32 %v3366_v48, %v4172_v38  ;;  %v922_v51 = vmul.f32 %v3366_v48, %v4176_v44  ;;  %v3065_v38 = vld [vmem:[#allocation9] sm:$0xff] }
 0x228   : > { %v3368_v58 = vpop.eup %3367  ;;  %888 = vadd.xlane.f32.xlu0 %v887_v49  ;;  %1238 = vmatpush.bf16.msrb.mxu0 %v3065_v38 }
 0x229   : > { %v923_v47 = vmul.f32 %v3368_v58, %v4186_v52  ;;  %v924_v61 = vmul.f32 %v3368_v58, %v4188_v56  ;;  %v871_v52 = vpop.xlane.xlu0 %870 }
 0x22a   : > { %3373 = vrcp.f32 %v871_v52 }
 0x22b   : > { %v947_v1 = vpack.c.bf16 %v923_v47, %v921_v60  ;;  %v948_v2 = vpack.c.bf16 %v924_v61, %v922_v51 }
 0x22c   : > { %v4266_v3 = vpop.eup %3369 }
 0x22d   : > { %v4268_v4 = vpop.eup %3371  ;;  %980 = vmatmul.bf16.gmra.mxu2 %v947_v1  ;;  %1029 = vmatmul.bf16.gmra.mxu3 %v948_v2 }
 0x22e   : > { %v890_v9 = vadd.f32 %v4268_v4, %v4266_v3 }
 0x230   : > { %891 = vadd.xlane.f32.xlu1 %v890_v9  ;;  %v3374_v56 = vpop.eup %3373 }
 0x231   : > { %v925_v54 = vmul.f32 %v3374_v56, %v4194_v16  ;;  %v926_v62 = vmul.f32 %v3374_v56, %v4196_v17 }
 0x273   : > { %v874_v44 = vpop.xlane.xlu1 %873 }
 0x274   : > { %3375 = vrcp.f32 %v874_v44 }
 0x27a   : > { %v3376_v50 = vpop.eup %3375 }
 0x27b   : > { %v927_v59 = vmul.f32 %v3376_v50, %v4208_v11  ;;  %v928_v63 = vmul.f32 %v3376_v50, %v4210_v40  ;;  %v877_v8 = vpop.xlane.xlu2 %876 }
 0x27c   : > { %3377 = vrcp.f32 %v877_v8 }
 0x27d   : > { %v949_v0 = vpack.c.bf16 %v927_v59, %v925_v54  ;;  %v950_v20 = vpack.c.bf16 %v928_v63, %v926_v62 }
 0x27f   : > { %985 = vmatmul.bf16.gmra.mxu2 %v949_v0  ;;  %1034 = vmatmul.bf16.gmra.mxu3 %v950_v20 }
 0x280   : > { %v966_v22 = vpop.f32.mrf.mxu2  ;;  %v1015_v27 = vpop.f32.mrf.mxu3 }
 0x281   : > { %v1016_v16 = vadd.f32 %v1015_v27, %v966_v22 }
 0x282   : > { %v3378_v25 = vpop.eup %3377 }
 0x283   : > { %v880_v24 = vpop.xlane.xlu0 %879  ;;  %v929_v17 = vmul.f32 %v3378_v25, %v4216_v41  ;;  %v930_v35 = vmul.f32 %v3378_v25, %v4218_v46 }
 0x284   : > { %3379 = vrcp.f32 %v880_v24 }
 0x288   : > { %v968_v30 = vpop.f32.mrf.mxu2  ;;  %v1017_v19 = vpop.f32.mrf.mxu3 }
 0x289   : > { %v1018_v21 = vadd.f32 %v1017_v19, %v968_v30  ;;  %v1087_v30 = vld [vmem:[#allocation6] sm:$0xff] }
 0x28a   : > { %v3380_v11 = vpop.eup %3379 }
 0x28b   : > { %v3092_v31 = vpack.c.bf16 %v1018_v21, %v1016_v16  ;;  %v931_v40 = vmul.f32 %v3380_v11, %v4228_v5  ;;  %v932_v37 = vmul.f32 %v3380_v11, %v4230_v15  ;;  %v883_v34 = vpop.xlane.xlu1 %882 }
 0x28c   : > { %3381 = vrcp.f32 %v883_v34 }
 0x28d   : > { %3093 = vst [vmem:[#allocation2 + $0x30] sm:$0xff] %v3092_v31   ;;  %v951_v29 = vpack.c.bf16 %v931_v40, %v929_v17  ;;  %v952_v32 = vpack.c.bf16 %v932_v37, %v930_v35  ;;  %v1088_v31 = vld [vmem:[#allocation6 + $0x8] sm:$0xff] }
 0x28f   : > { %990 = vmatmul.bf16.gmra.mxu2 %v951_v29  ;;  %1039 = vmatmul.bf16.gmra.mxu3 %v952_v32 }
 0x290   : > { %v971_v36 = vpop.f32.mrf.mxu2  ;;  %v1020_v39 = vpop.f32.mrf.mxu3 }
 0x291   : > { %v1021_v6 = vadd.f32 %v1020_v39, %v971_v36  ;;  %v1089_v39 = vld [vmem:[#allocation6 + $0x10] sm:$0xff] }
 0x292   : > { %v3382_v41 = vpop.eup %3381 }
 0x293   : > { %v886_v42 = vpop.xlane.xlu2 %885  ;;  %v933_v15 = vmul.f32 %v3382_v41, %v4236_v7  ;;  %v934_v33 = vmul.f32 %v3382_v41, %v4238_v26 }
 0x294   : > { %3383 = vrcp.f32 %v886_v42  ;;  %v3057_v45 = vld [vmem:[#allocation2 + $0x30] sm:$0xff] }
 0x295   : > { %1239 = vmatmul.bf16.vlgmr.msrb.gmra.mxu0 %v3057_v45 }
 0x298   : > { %v973_v13 = vpop.f32.mrf.mxu2  ;;  %v1022_v5 = vpop.f32.mrf.mxu3 }
 0x299   : > { %v1023_v46 = vadd.f32 %v1022_v5, %v973_v13 }
 0x29a   : > { %v3384_v18 = vpop.eup %3383 }
 0x29b   : > { %v3097_v23 = vpack.c.bf16 %v1023_v46, %v1021_v6  ;;  %v935_v28 = vmul.f32 %v3384_v18, %v4248_v43  ;;  %v936_v53 = vmul.f32 %v3384_v18, %v4250_v14  ;;  %v889_v49 = vpop.xlane.xlu0 %888  ;;  %v1090_v6 = vld [vmem:[#allocation6 + $0x18] sm:$0xff] }
 0x29c   : > { %3385 = vrcp.f32 %v889_v49 }
 0x29d   : > { %3129 = vst [vmem:[#allocation2] sm:$0xff] %v3097_v23   ;;  %v953_v55 = vpack.c.bf16 %v935_v28, %v933_v15  ;;  %v954_v48 = vpack.c.bf16 %v936_v53, %v934_v33 }
 0x29f   : > { %995 = vmatmul.bf16.gmra.mxu2 %v953_v55  ;;  %1044 = vmatmul.bf16.gmra.mxu3 %v954_v48  ;;  %v1091_v55 = vld [vmem:[#allocation6 + $0x20] sm:$0xff] }
 0x2a0   : > { %v976_v58 = vpop.f32.mrf.mxu2  ;;  %v1025_v60 = vpop.f32.mrf.mxu3 }
 0x2a1   : > { %v1026_v1 = vadd.f32 %v1025_v60, %v976_v58 }
 0x2a2   : > { %v3386_v7 = vpop.eup %3385 }
 0x2a3   : > { %v892_v47 = vpop.xlane.xlu1 %891  ;;  %v937_v14 = vmul.f32 %v3386_v7, %v4256_v10  ;;  %v938_v38 = vmul.f32 %v3386_v7, %v4258_v57 }
 0x2a4   : > { %3387 = vrcp.f32 %v892_v47  ;;  %v3058_v51 = vld [vmem:[#allocation2] sm:$0xff] }
 0x2a5   : > { %1244 = vmatmul.bf16.gmra.mxu0 %v3058_v51  ;;  %v1092_v51 = vld [vmem:[#allocation6 + $0x28] sm:$0xff] }
 0x2a8   : > { %v978_v61 = vpop.f32.mrf.mxu2  ;;  %v1027_v43 = vpop.f32.mrf.mxu3 }
 0x2a9   : > { %v1028_v26 = vadd.f32 %v1027_v43, %v978_v61 }
 0x2aa   : > { %v3388_v2 = vpop.eup %3387 }
 0x2ab   : > { %v3102_v9 = vpack.c.bf16 %v1028_v26, %v1026_v1  ;;  %v939_v12 = vmul.f32 %v3388_v2, %v4266_v3  ;;  %v940_v52 = vmul.f32 %v3388_v2, %v4268_v4 }
 0x2ad   : > { %3130 = vst [vmem:[#allocation2 + $0x18] sm:$0xff] %v3102_v9   ;;  %v955_v44 = vpack.c.bf16 %v939_v12, %v937_v14  ;;  %v956_v56 = vpack.c.bf16 %v940_v52, %v938_v38  ;;  %v1093_v9 = vld [vmem:[#allocation6 + $0x30] sm:$0xff] }
 0x2af   : > { %1000 = vmatmul.bf16.gmra.mxu2 %v955_v44  ;;  %1049 = vmatmul.bf16.gmra.mxu3 %v956_v56  ;;  %v1094_v44 = vld [vmem:[#allocation6 + $0x38] sm:$0xff] }
 0x2b0   : > { %v981_v50 = vpop.f32.mrf.mxu2  ;;  %v1030_v54 = vpop.f32.mrf.mxu3 }
 0x2b1   : > { %v1031_v0 = vadd.f32 %v1030_v54, %v981_v50  ;;  %v1360_v54 = vlaneseq }
 0x2b4   : > { %v3059_v59 = vld [vmem:[#allocation2 + $0x18] sm:$0xff] }
 0x2b5   : > { %1249 = vmatmul.bf16.gmra.mxu0 %v3059_v59  ;;  %v4313_v59 = vand.u32 127, %v1360_v54 }
 0x2b7   : > { %vm1362_vm0 = vcmp.lt.s32.totalorder %v4313_v59, 32 }
 0x2b8   : > { %v983_v62 = vpop.f32.mrf.mxu2  ;;  %v1032_v63 = vpop.f32.mrf.mxu3 }
 0x2b9   : > { %v1033_v10 = vadd.f32 %v1032_v63, %v983_v62 }
 0x2bb   : > { %v3107_v20 = vpack.c.bf16 %v1033_v10, %v1031_v0  ;;  %v3792_v0 = vmov 0.0  }
 0x2bc   : > { %v4316_v10 = vsel %vm1362_vm0, 1.0, %v3792_v0 }
 0x2bd   : > { %3131 = vst [vmem:[#allocation2 + $0x10] sm:$0xff] %v3107_v20  }
 0x2c4   : > { %v3060_v3 = vld [vmem:[#allocation2 + $0x10] sm:$0xff] }
 0x2c5   : > { %1254 = vmatmul.bf16.gmra.mxu0 %v3060_v3 }
 0x302   : > { %v986_v57 = vpop.f32.mrf.mxu2  ;;  %v1035_v8 = vpop.f32.mrf.mxu3 }
 0x303   : > { %v1036_v27 = vadd.f32 %v1035_v8, %v986_v57 }
 0x30a   : > { %v988_v4 = vpop.f32.mrf.mxu2  ;;  %v1037_v22 = vpop.f32.mrf.mxu3 }
 0x30b   : > { %v1038_v24 = vadd.f32 %v1037_v22, %v988_v4  ;;  %v1095_v22 = vld [vmem:[#allocation6 + $0x40] sm:$0xff] }
 0x30d   : > { %v3112_v25 = vpack.c.bf16 %v1038_v24, %v1036_v27 }
 0x30f   : > { %3132 = vst [vmem:[#allocation2 + $0x8] sm:$0xff] %v3112_v25  }
 0x312   : > { %v991_v19 = vpop.f32.mrf.mxu2  ;;  %v1040_v16 = vpop.f32.mrf.mxu3 }
 0x313   : > { %v1240_v21 = vpop.f32.mrf.mxu0  ;;  %v1041_v37 = vadd.f32 %v1040_v16, %v991_v19 }
 0x314   : > { %v4288_v11 = vadd.f32 %v1240_v21, %v1087_v30 }
 0x316   : > { %1296 = vadd.xlane.f32.xlu2 %v4288_v11  ;;  %v3061_v17 = vld [vmem:[#allocation2 + $0x8] sm:$0xff] }
 0x317   : > { %1259 = vmatmul.bf16.gmra.mxu0 %v3061_v17 }
 0x31a   : > { %v993_v40 = vpop.f32.mrf.mxu2  ;;  %v1042_v35 = vpop.f32.mrf.mxu3 }
 0x31b   : > { %v1043_v29 = vadd.f32 %v1042_v35, %v993_v40  ;;  %v1242_v32 = vpop.f32.mrf.mxu0 }
 0x31c   : > { %v4291_v34 = vadd.f32 %v1242_v32, %v1088_v31 }
 0x31d   : > { %v3117_v36 = vpack.c.bf16 %v1043_v29, %v1041_v37 }
 0x31e   : > { %1298 = vadd.xlane.f32.xlu0 %v4291_v34 }
 0x31f   : > { %3133 = vst [vmem:[#allocation2 + $0x20] sm:$0xff] %v3117_v36  }
 0x322   : > { %v996_v42 = vpop.f32.mrf.mxu2  ;;  %v1045_v45 = vpop.f32.mrf.mxu3 }
 0x323   : > { %v1245_v41 = vpop.f32.mrf.mxu0  ;;  %v1046_v15 = vadd.f32 %v1045_v45, %v996_v42 }
 0x324   : > { %v4294_v13 = vadd.f32 %v1245_v41, %v1089_v39 }
 0x326   : > { %1300 = vadd.xlane.f32.xlu1 %v4294_v13  ;;  %v3062_v5 = vld [vmem:[#allocation2 + $0x20] sm:$0xff] }
 0x327   : > { %1264 = vmatmul.bf16.gmra.mxu0 %v3062_v5 }
 0x32a   : > { %v998_v46 = vpop.f32.mrf.mxu2  ;;  %v1047_v18 = vpop.f32.mrf.mxu3 }
 0x32b   : > { %v1048_v23 = vadd.f32 %v1047_v18, %v998_v46  ;;  %v1247_v28 = vpop.f32.mrf.mxu0 }
 0x32c   : > { %v4297_v33 = vadd.f32 %v1247_v28, %v1090_v6  ;;  %v1098_v6 = vld [vmem:[#allocation6 + $0x58] sm:$0xff] }
 0x32d   : > { %v3122_v53 = vpack.c.bf16 %v1048_v23, %v1046_v15 }
 0x32e   : > { %1302 = vadd.xlane.f32.xlu2 %v4297_v33 }
 0x32f   : > { %3134 = vst [vmem:[#allocation2 + $0x28] sm:$0xff] %v3122_v53  }
 0x332   : > { %v1001_v48 = vpop.f32.mrf.mxu2  ;;  %v1050_v49 = vpop.f32.mrf.mxu3 }
 0x333   : > { %v1250_v58 = vpop.f32.mrf.mxu0  ;;  %v1051_v43 = vadd.f32 %v1050_v49, %v1001_v48  ;;  %v3079_v48 = vld [vmem:[#allocation10 + $0x30] sm:$0xff]  ;;  %v1099_v49 = vld [vmem:[#allocation6 + $0x60] sm:$0xff] }
 0x334   : > { %v4300_v60 = vadd.f32 %v1250_v58, %v1091_v55 }
 0x336   : > { %1304 = vadd.xlane.f32.xlu0 %v4300_v60  ;;  %v3063_v47 = vld [vmem:[#allocation2 + $0x28] sm:$0xff] }
 0x337   : > { %1269 = vmatmul.bf16.gmra.mxu0 %v3063_v47 }
 0x33a   : > { %v1003_v7 = vpop.f32.mrf.mxu2  ;;  %v1052_v61 = vpop.f32.mrf.mxu3 }
 0x33b   : > { %v1053_v1 = vadd.f32 %v1052_v61, %v1003_v7  ;;  %v1252_v26 = vpop.f32.mrf.mxu0 }
 0x33c   : > { %v4303_v2 = vadd.f32 %v1252_v26, %v1092_v51 }
 0x33d   : > { %v3127_v14 = vpack.c.bf16 %v1053_v1, %v1051_v43  ;;  %v1100_v1 = vld [vmem:[#allocation6 + $0x68] sm:$0xff] }
 0x33e   : > { %1306 = vadd.xlane.f32.xlu1 %v4303_v2 }
 0x33f   : > { %3135 = vst [vmem:[#allocation2 + $0x38] sm:$0xff] %v3127_v14  }
 0x343   : > { %v1255_v12 = vpop.f32.mrf.mxu0 }
 0x344   : > { %v4306_v38 = vadd.f32 %v1255_v12, %v1093_v9 }
 0x346   : > { %1308 = vadd.xlane.f32.xlu2 %v4306_v38  ;;  %v3064_v52 = vld [vmem:[#allocation2 + $0x38] sm:$0xff] }
 0x347   : > { %1274 = vmatmul.bf16.gmra.mxu0 %v3064_v52 }
 0x34b   : > { %v1257_v56 = vpop.f32.mrf.mxu0 }
 0x34c   : > { %v4309_v50 = vadd.f32 %v1257_v56, %v1094_v44  ;;  %v1101_v56 = vld [vmem:[#allocation6 + $0x70] sm:$0xff] }
 0x34e   : > { %1310 = vadd.xlane.f32.xlu0 %v4309_v50 }
 0x389   : > { %v1297_v62 = vpop.xlane.xlu2 %1296 }
 0x38a   : > { %v1328_v63 = vmul.f32 0.03125, %v1297_v62 }
 0x38c   : > { %v1344_v20 = vsub.f32 %v4288_v11, %v1328_v63  ;;  %v1096_v11 = vld [vmem:[#allocation6 + $0x48] sm:$0xff] }
 0x38e   : > { %v4320_v3 = vmul.f32 %v4316_v10, %v1344_v20 }
 0x390   : > { %v1381_v57 = vmul.f32 %v4320_v3, %v4320_v3 }
 0x391   : > { %v1299_v8 = vpop.xlane.xlu0 %1298 }
 0x392   : > { %v1329_v4 = vmul.f32 0.03125, %v1299_v8  ;;  %1397 = vadd.xlane.f32.xlu1 %v1381_v57  ;;  %v1102_v57 = vld [vmem:[#allocation6 + $0x78] sm:$0xff] }
 0x394   : > { %v1345_v27 = vsub.f32 %v4291_v34, %v1329_v4  ;;  %v1260_v24 = vpop.f32.mrf.mxu0  ;;  %v1097_v34 = vld [vmem:[#allocation6 + $0x50] sm:$0xff] }
 0x395   : > { %v4325_v25 = vadd.f32 %v1260_v24, %v1095_v22  ;;  %v3078_v22 = vld [vmem:[#allocation10 + $0x28] sm:$0xff]  ;;  %v3075_v24 = vld [vmem:[#allocation10 + $0x10] sm:$0xff] }
 0x396   : > { %v4328_v30 = vmul.f32 %v4316_v10, %v1345_v27  ;;  %v3076_v27 = vld [vmem:[#allocation10 + $0x18] sm:$0xff] }
 0x397   : > { %1312 = vadd.xlane.f32.xlu0 %v4325_v25 }
 0x398   : > { %v1382_v19 = vmul.f32 %v4328_v30, %v4328_v30 }
 0x399   : > { %v1301_v16 = vpop.xlane.xlu1 %1300 }
 0x39a   : > { %v1330_v21 = vmul.f32 0.03125, %v1301_v16  ;;  %1399 = vadd.xlane.f32.xlu2 %v1382_v19  ;;  %v3074_v19 = vld [vmem:[#allocation10 + $0x8] sm:$0xff] }
 0x39c   : > { %v1346_v17 = vsub.f32 %v4294_v13, %v1330_v21  ;;  %v1262_v31 = vpop.f32.mrf.mxu0 }
 0x39d   : > { %v4334_v40 = vadd.f32 %v1262_v31, %v1096_v11 }
 0x39e   : > { %v4337_v35 = vmul.f32 %v4316_v10, %v1346_v17  ;;  %v3073_v17 = vld [vmem:[#allocation10] sm:$0xff] }
 0x39f   : > { %1314 = vadd.xlane.f32.xlu1 %v4334_v40 }
 0x3a0   : > { %v1383_v37 = vmul.f32 %v4337_v35, %v4337_v35 }
 0x3a1   : > { %v1303_v29 = vpop.xlane.xlu2 %1302 }
 0x3a2   : > { %v1331_v32 = vmul.f32 0.03125, %v1303_v29  ;;  %1401 = vadd.xlane.f32.xlu2 %v1383_v37 }
 0x3a4   : > { %v1347_v36 = vsub.f32 %v4297_v33, %v1331_v32  ;;  %v1265_v39 = vpop.f32.mrf.mxu0  ;;  %v3080_v33 = vld [vmem:[#allocation10 + $0x38] sm:$0xff] }
 0x3a5   : > { %v4343_v42 = vadd.f32 %v1265_v39, %v1097_v34  ;;  %1744 = vmatpush.bf16.msrb.mxu1 %v3080_v33 }
 0x3a6   : > { %v4346_v45 = vmul.f32 %v4316_v10, %v1347_v36 }
 0x3a7   : > { %1316 = vadd.xlane.f32.xlu1 %v4343_v42 }
 0x3a8   : > { %v1384_v41 = vmul.f32 %v4346_v45, %v4346_v45 }
 0x3a9   : > { %v1305_v13 = vpop.xlane.xlu0 %1304  ;;  %1745 = vmatpush.bf16.msrb.mxu1 %v3079_v48 }
 0x3aa   : > { %v1332_v5 = vmul.f32 0.03125, %v1305_v13  ;;  %1403 = vadd.xlane.f32.xlu0 %v1384_v41 }
 0x3ac   : > { %v1348_v46 = vsub.f32 %v4300_v60, %v1332_v5  ;;  %v1267_v18 = vpop.f32.mrf.mxu0 }
 0x3ad   : > { %v4352_v15 = vadd.f32 %v1267_v18, %v1098_v6  ;;  %1746 = vmatpush.bf16.msrb.mxu1 %v3078_v22 }
 0x3ae   : > { %v4355_v23 = vmul.f32 %v4316_v10, %v1348_v46 }
 0x3af   : > { %1318 = vadd.xlane.f32.xlu2 %v4352_v15 }
 0x3b0   : > { %v1385_v28 = vmul.f32 %v4355_v23, %v4355_v23 }
 0x3b1   : > { %v1307_v53 = vpop.xlane.xlu1 %1306 }
 0x3b2   : > { %v1333_v55 = vmul.f32 0.03125, %v1307_v53  ;;  %1405 = vadd.xlane.f32.xlu0 %v1385_v28 }
 0x3b4   : > { %v1349_v58 = vsub.f32 %v4303_v2, %v1333_v55  ;;  %v1270_v60 = vpop.f32.mrf.mxu0 }
 0x3b5   : > { %v4361_v47 = vadd.f32 %v1270_v60, %v1099_v49 }
 0x3b6   : > { %v4364_v51 = vmul.f32 %v4316_v10, %v1349_v58 }
 0x3b7   : > { %1320 = vadd.xlane.f32.xlu2 %v4361_v47 }
 0x3b8   : > { %v1386_v7 = vmul.f32 %v4364_v51, %v4364_v51 }
 0x3b9   : > { %v1309_v61 = vpop.xlane.xlu2 %1308 }
 0x3ba   : > { %v1334_v43 = vmul.f32 0.03125, %v1309_v61  ;;  %1407 = vadd.xlane.f32.xlu1 %v1386_v7 }
 0x3bc   : > { %v1350_v26 = vsub.f32 %v4306_v38, %v1334_v43  ;;  %v1272_v14 = vpop.f32.mrf.mxu0 }
 0x3bd   : > { %v4370_v2 = vadd.f32 %v1272_v14, %v1100_v1 }
 0x3be   : > { %v4373_v9 = vmul.f32 %v4316_v10, %v1350_v26 }
 0x3bf   : > { %1322 = vadd.xlane.f32.xlu0 %v4370_v2 }
 0x3c0   : > { %v1387_v12 = vmul.f32 %v4373_v9, %v4373_v9 }
 0x3c1   : > { %v1311_v52 = vpop.xlane.xlu0 %1310 }
 0x3c2   : > { %v1335_v44 = vmul.f32 0.03125, %v1311_v52  ;;  %1409 = vadd.xlane.f32.xlu1 %v1387_v12 }
 0x3c4   : > { %v1351_v62 = vsub.f32 %v4309_v50, %v1335_v44  ;;  %v1275_v63 = vpop.f32.mrf.mxu0  ;;  %v3077_v50 = vld [vmem:[#allocation10 + $0x20] sm:$0xff] }
 0x3c5   : > { %v4379_v0 = vadd.f32 %v1275_v63, %v1101_v56  ;;  %1747 = vmatpush.bf16.msrb.mxu1 %v3077_v50 }
 0x3c6   : > { %v4382_v38 = vmul.f32 %v4316_v10, %v1351_v62 }
 0x3c7   : > { %1324 = vadd.xlane.f32.xlu0 %v4379_v0 }
 0x3c8   : > { %v1388_v20 = vmul.f32 %v4382_v38, %v4382_v38 }
 0x3c9   : > { %1748 = vmatpush.bf16.msrb.mxu1 %v3076_v27 }
 0x3ca   : > { %1411 = vadd.xlane.f32.xlu2 %v1388_v20 }
 0x3cc   : > { %v1277_v8 = vpop.f32.mrf.mxu0 }
 0x3cd   : > { %v4387_v4 = vadd.f32 %v1277_v8, %v1102_v57  ;;  %1749 = vmatpush.bf16.msrb.mxu1 %v3075_v24  ;;  %v4407_v8 = vld [vmem:[#allocation15] ss:$0 sm:$0xff] }
 0x3cf   : > { %1326 = vadd.xlane.f32.xlu1 %v4387_v4 }
 0x3d1   : > { %1750 = vmatpush.bf16.msrb.mxu1 %v3074_v19 }
 0x3d5   : > { %1751 = vmatpush.bf16.msrb.mxu1 %v3073_v17 }
 0x405   : > { %v1398_v16 = vpop.xlane.xlu1 %1397 }
 0x406   : > { %v1429_v21 = vmul.f32 0.03125, %v1398_v16 }
 0x408   : > { %v1445_v11 = vadd.f32 1e-05, %v1429_v21 }
 0x40a   : > { %3389 = vrsqrt.f32 %v1445_v11  ;;  %v1313_v31 = vpop.xlane.xlu0 %1312  ;;  %vm1467_vm2 = vweird.f32 %v1445_v11 }
 0x40b   : > { %v1336_v37 = vmul.f32 0.03125, %v1313_v31 }
 0x40d   : > { %v1400_v29 = vpop.xlane.xlu2 %1399  ;;  %v1352_v32 = vsub.f32 %v4325_v25, %v1336_v37 }
 0x40e   : > { %v1430_v34 = vmul.f32 0.03125, %v1400_v29 }
 0x40f   : > { %v4392_v41 = vmul.f32 %v4316_v10, %v1352_v32 }
 0x410   : > { %v3390_v36 = vpop.eup %3389  ;;  %v1446_v39 = vadd.f32 1e-05, %v1430_v34 }
 0x411   : > { %v1462_v13 = vmul.f32 %v3390_v36, %v1445_v11  ;;  %v1389_v5 = vmul.f32 %v4392_v41, %v4392_v41  ;;  %vm1468_vm1 = vweird.f32 %v3390_v36  ;;  %v4413_v11 = vld [vmem:[#allocation15 + $0x1] ss:$0 sm:$0xff] }
 0x412   : > { %3391 = vrsqrt.f32 %v1446_v39  ;;  %v1315_v46 = vpop.xlane.xlu1 %1314  ;;  %vm1469_vm3 = vmor %vm1467_vm2, %vm1468_vm1  ;;  %vm1477_vm5 = vweird.f32 %v1446_v39 }
 0x413   : > { %v1463_v6 = vmul.f32 %v3390_v36, %v1462_v13  ;;  %v1337_v18 = vmul.f32 0.03125, %v1315_v46  ;;  %1413 = vadd.xlane.f32.xlu2 %v1389_v5 }
 0x415   : > { %v1464_v28 = vmul.f32 0.5, %v1463_v6  ;;  %v1402_v33 = vpop.xlane.xlu2 %1401  ;;  %v1353_v53 = vsub.f32 %v4334_v40, %v1337_v18 }
 0x416   : > { %v1431_v25 = vmul.f32 0.03125, %v1402_v33 }
 0x417   : > { %v1465_v55 = vsub.f32 1.5, %v1464_v28  ;;  %v4398_v58 = vmul.f32 %v4316_v10, %v1353_v53 }
 0x418   : > { %v3392_v48 = vpop.eup %3391  ;;  %v1447_v49 = vadd.f32 1e-05, %v1431_v25 }
 0x419   : > { %v1466_v60 = vmul.f32 %v3390_v36, %v1465_v55  ;;  %v1472_v7 = vmul.f32 %v3392_v48, %v1446_v39  ;;  %v1390_v61 = vmul.f32 %v4398_v58, %v4398_v58  ;;  %vm1478_vm4 = vweird.f32 %v3392_v48 }
 0x41a   : > { %3393 = vrsqrt.f32 %v1447_v49  ;;  %v1317_v1 = vpop.xlane.xlu1 %1316  ;;  %vm1479_vm6 = vmor %vm1477_vm5, %vm1478_vm4  ;;  %vm1487_vm8 = vweird.f32 %v1447_v49 }
 0x41b   : > { %v1473_v43 = vmul.f32 %v3392_v48, %v1472_v7  ;;  %v1338_v26 = vmul.f32 0.03125, %v1317_v1  ;;  %1415 = vadd.xlane.f32.xlu0 %v1390_v61  ;;  %v1470_v40 = vsel %vm1469_vm3, %v3390_v36, %v1466_v60 }
 0x41c   : > { %v1621_v63 = vmul.f32 %v1470_v40, %v4320_v3 }
 0x41d   : > { %v1474_v14 = vmul.f32 0.5, %v1473_v43  ;;  %v1404_v12 = vpop.xlane.xlu0 %1403  ;;  %v1354_v52 = vsub.f32 %v4343_v42, %v1338_v26 }
 0x41e   : > { %v1432_v44 = vmul.f32 0.03125, %v1404_v12  ;;  %v1638_v21 = vmul.f32 %v4407_v8, %v1621_v63 }
 0x41f   : > { %v1475_v56 = vsub.f32 1.5, %v1474_v14  ;;  %v4405_v57 = vmul.f32 %v4316_v10, %v1354_v52 }
 0x420   : > { %v3394_v62 = vpop.eup %3393  ;;  %v1448_v20 = vadd.f32 1e-05, %v1432_v44 }
 0x421   : > { %v1476_v22 = vmul.f32 %v3392_v48, %v1475_v56  ;;  %v1482_v50 = vmul.f32 %v3394_v62, %v1447_v49  ;;  %v1391_v42 = vmul.f32 %v4405_v57, %v4405_v57  ;;  %vm1488_vm7 = vweird.f32 %v3394_v62 }
 0x422   : > { %3395 = vrsqrt.f32 %v1448_v20  ;;  %v1319_v19 = vpop.xlane.xlu2 %1318  ;;  %vm1489_vm9 = vmor %vm1487_vm8, %vm1488_vm7  ;;  %vm1497_vm11 = vweird.f32 %v1448_v20 }
 0x423   : > { %v1480_v27 = vsel %vm1479_vm6, %v3392_v48, %v1476_v22  ;;  %v1483_v24 = vmul.f32 %v3394_v62, %v1482_v50  ;;  %v1339_v3 = vmul.f32 0.03125, %v1319_v19  ;;  %1417 = vadd.xlane.f32.xlu1 %v1391_v42 }
 0x424   : > { %v1622_v16 = vmul.f32 %v1480_v27, %v4328_v30  ;;  %v4421_v30 = vadd.f32 %v4413_v11, %v1638_v21 }
 0x425   : > { %v1484_v17 = vmul.f32 0.5, %v1483_v24  ;;  %v1406_v31 = vpop.xlane.xlu0 %1405  ;;  %v1355_v37 = vsub.f32 %v4352_v15, %v1339_v3 }
 0x426   : > { %v1433_v29 = vmul.f32 0.03125, %v1406_v31  ;;  %v1639_v32 = vmul.f32 %v4407_v8, %v1622_v16 }
 0x427   : > { %v1485_v34 = vsub.f32 1.5, %v1484_v17  ;;  %v4418_v13 = vmul.f32 %v4316_v10, %v1355_v37 }
 0x428   : > { %v3396_v36 = vpop.eup %3395  ;;  %v1449_v39 = vadd.f32 1e-05, %v1433_v29  ;;  %v4424_v5 = vadd.f32 %v4413_v11, %v1639_v32 }
 0x429   : > { %v1486_v6 = vmul.f32 %v3394_v62, %v1485_v34  ;;  %v1492_v46 = vmul.f32 %v3396_v36, %v1448_v20  ;;  %v1392_v15 = vmul.f32 %v4418_v13, %v4418_v13  ;;  %vm1498_vm10 = vweird.f32 %v3396_v36 }
 0x42a   : > { %3397 = vrsqrt.f32 %v1449_v39  ;;  %v1671_v18 = vpack.c.bf16 %v4424_v5, %v4421_v30  ;;  %v1321_v33 = vpop.xlane.xlu2 %1320  ;;  %vm1499_vm12 = vmor %vm1497_vm11, %vm1498_vm10  ;;  %vm1507_vm14 = vweird.f32 %v1449_v39 }
 0x42b   : > { %v1493_v28 = vmul.f32 %v3396_v36, %v1492_v46  ;;  %v1340_v53 = vmul.f32 0.03125, %v1321_v33  ;;  %1419 = vadd.xlane.f32.xlu2 %v1392_v15  ;;  %v1490_v48 = vsel %vm1489_vm9, %v3394_v62, %v1486_v6 }
 0x42c   : > { %1752 = vmatmul.bf16.vlgmr.msrb.gmra.mxu1 %v1671_v18  ;;  %v1623_v49 = vmul.f32 %v1490_v48, %v4337_v35 }
 0x42d   : > { %v1494_v25 = vmul.f32 0.5, %v1493_v28  ;;  %v1408_v55 = vpop.xlane.xlu1 %1407  ;;  %v1356_v60 = vsub.f32 %v4361_v47, %v1340_v53 }
 0x42e   : > { %v1434_v7 = vmul.f32 0.03125, %v1408_v55  ;;  %v1640_v63 = vmul.f32 %v4407_v8, %v1623_v49 }
 0x42f   : > { %v1495_v61 = vsub.f32 1.5, %v1494_v25  ;;  %v4432_v26 = vmul.f32 %v4316_v10, %v1356_v60 }
 0x430   : > { %v3398_v43 = vpop.eup %3397  ;;  %v1450_v1 = vadd.f32 1e-05, %v1434_v7  ;;  %v4445_v3 = vadd.f32 %v4413_v11, %v1640_v63 }
 0x431   : > { %v1496_v40 = vmul.f32 %v3396_v36, %v1495_v61  ;;  %v1502_v14 = vmul.f32 %v3398_v43, %v1449_v39  ;;  %v1393_v12 = vmul.f32 %v4432_v26, %v4432_v26  ;;  %vm1508_vm13 = vweird.f32 %v3398_v43 }
 0x432   : > { %3399 = vrsqrt.f32 %v1450_v1  ;;  %v1323_v47 = vpop.xlane.xlu0 %1322  ;;  %vm1509_vm15 = vmor %vm1507_vm14, %vm1508_vm13  ;;  %vm1517_vm1 = vweird.f32 %v1450_v1 }
 0x433   : > { %v1503_v52 = vmul.f32 %v3398_v43, %v1502_v14  ;;  %v1500_v44 = vsel %vm1499_vm12, %v3396_v36, %v1496_v40  ;;  %v1341_v56 = vmul.f32 0.03125, %v1323_v47  ;;  %1421 = vadd.xlane.f32.xlu0 %v1393_v12 }
 0x434   : > { %v1624_v62 = vmul.f32 %v1500_v44, %v4346_v45 }
 0x435   : > { %v1504_v22 = vmul.f32 0.5, %v1503_v52  ;;  %v1410_v50 = vpop.xlane.xlu1 %1409  ;;  %v1357_v35 = vsub.f32 %v4370_v2, %v1341_v56 }
 0x436   : > { %v1435_v20 = vmul.f32 0.03125, %v1410_v50  ;;  %v1641_v42 = vmul.f32 %v4407_v8, %v1624_v62 }
 0x437   : > { %v1505_v27 = vsub.f32 1.5, %v1504_v22  ;;  %v4442_v16 = vmul.f32 %v4316_v10, %v1357_v35 }
 0x438   : > { %v3400_v24 = vpop.eup %3399  ;;  %v1451_v19 = vadd.f32 1e-05, %v1435_v20  ;;  %v4448_v45 = vadd.f32 %v4413_v11, %v1641_v42 }
 0x439   : > { %v1506_v21 = vmul.f32 %v3398_v43, %v1505_v27  ;;  %v1512_v17 = vmul.f32 %v3400_v24, %v1450_v1  ;;  %v1394_v2 = vmul.f32 %v4442_v16, %v4442_v16  ;;  %vm1518_vm0 = vweird.f32 %v3400_v24 }
 0x43a   : > { %3401 = vrsqrt.f32 %v1451_v19  ;;  %v1672_v31 = vpack.c.bf16 %v4448_v45, %v4445_v3  ;;  %v1325_v29 = vpop.xlane.xlu0 %1324  ;;  %vm1519_vm2 = vmor %vm1517_vm1, %vm1518_vm0  ;;  %vm1527_vm4 = vweird.f32 %v1451_v19 }
 0x43b   : > { %v1513_v37 = vmul.f32 %v3400_v24, %v1512_v17  ;;  %v1342_v32 = vmul.f32 0.03125, %v1325_v29  ;;  %1423 = vadd.xlane.f32.xlu1 %v1394_v2  ;;  %v1510_v6 = vsel %vm1509_vm15, %v3398_v43, %v1506_v21  ;;  %v3085_v29 = vld [vmem:[#allocation12 + $0x20] sm:$0xff] }
 0x43c   : > { %1757 = vmatmul.bf16.gmra.mxu1 %v1672_v31  ;;  %v1625_v39 = vmul.f32 %v1510_v6, %v4355_v23 }
 0x43d   : > { %v1514_v34 = vmul.f32 0.5, %v1513_v37  ;;  %v1412_v36 = vpop.xlane.xlu2 %1411  ;;  %v1358_v46 = vsub.f32 %v4379_v0, %v1342_v32  ;;  %v3087_v37 = vld [vmem:[#allocation12 + $0x30] sm:$0xff] }
 0x43e   : > { %v1436_v15 = vmul.f32 0.03125, %v1412_v36  ;;  %v1642_v49 = vmul.f32 %v4407_v8, %v1625_v39  ;;  %v3084_v36 = vld [vmem:[#allocation12 + $0x18] sm:$0xff] }
 0x43f   : > { %v1515_v18 = vsub.f32 1.5, %v1514_v34  ;;  %v4456_v53 = vmul.f32 %v4316_v10, %v1358_v46  ;;  %v3083_v46 = vld [vmem:[#allocation12 + $0x10] sm:$0xff] }
 0x440   : > { %v3402_v28 = vpop.eup %3401  ;;  %v1452_v33 = vadd.f32 1e-05, %v1436_v15  ;;  %v4469_v47 = vadd.f32 %v4413_v11, %v1642_v49 }
 0x441   : > { %v1516_v25 = vmul.f32 %v3400_v24, %v1515_v18  ;;  %v1522_v55 = vmul.f32 %v3402_v28, %v1451_v19  ;;  %v1395_v48 = vmul.f32 %v4456_v53, %v4456_v53  ;;  %vm1528_vm3 = vweird.f32 %v3402_v28 }
 0x442   : > { %3403 = vrsqrt.f32 %v1452_v33  ;;  %v1327_v0 = vpop.xlane.xlu1 %1326  ;;  %vm1529_vm5 = vmor %vm1527_vm4, %vm1528_vm3  ;;  %vm1537_vm7 = vweird.f32 %v1452_v33 }
 0x443   : > { %v1523_v60 = vmul.f32 %v3402_v28, %v1522_v55  ;;  %v1520_v7 = vsel %vm1519_vm2, %v3400_v24, %v1516_v25  ;;  %v1343_v61 = vmul.f32 0.03125, %v1327_v0  ;;  %1425 = vadd.xlane.f32.xlu2 %v1395_v48  ;;  %v3081_v55 = vld [vmem:[#allocation12] sm:$0xff] }
 0x444   : > { %v1626_v43 = vmul.f32 %v1520_v7, %v4364_v51 }
 0x445   : > { %v1524_v40 = vmul.f32 0.5, %v1523_v60  ;;  %v1359_v23 = vsub.f32 %v4387_v4, %v1343_v61 }
 0x446   : > { %v1643_v1 = vmul.f32 %v4407_v8, %v1626_v43 }
 0x447   : > { %v1525_v14 = vsub.f32 1.5, %v1524_v40  ;;  %v4466_v52 = vmul.f32 %v4316_v10, %v1359_v23 }
 0x448   : > { %v3404_v12 = vpop.eup %3403  ;;  %v4472_v44 = vadd.f32 %v4413_v11, %v1643_v1 }
 0x449   : > { %v1526_v56 = vmul.f32 %v3402_v28, %v1525_v14  ;;  %v1532_v51 = vmul.f32 %v3404_v12, %v1452_v33  ;;  %v1396_v62 = vmul.f32 %v4466_v52, %v4466_v52  ;;  %vm1538_vm6 = vweird.f32 %v3404_v12 }
 0x44a   : > { %v1673_v4 = vpack.c.bf16 %v4472_v44, %v4469_v47  ;;  %vm1539_vm8 = vmor %vm1537_vm7, %vm1538_vm6  ;;  %v4491_v14 = vshrl.u32 %v1360_v54, 7 }
 0x44b   : > { %v1533_v63 = vmul.f32 %v3404_v12, %v1532_v51  ;;  %1427 = vadd.xlane.f32.xlu0 %v1396_v62  ;;  %v1530_v50 = vsel %vm1529_vm5, %v3402_v28, %v1526_v56  ;;  %v3082_v28 = vld [vmem:[#allocation12 + $0x8] sm:$0xff] }
 0x44c   : > { %1762 = vmatmul.bf16.gmra.mxu1 %v1673_v4  ;;  %v1627_v20 = vmul.f32 %v1530_v50, %v4373_v9  ;;  %v3088_v9 = vld [vmem:[#allocation12 + $0x38] sm:$0xff]  ;;  %3267 = vset.pattern.permute.xlu1 %v4491_v14 }
 0x44d   : > { %v1534_v22 = vmul.f32 0.5, %v1533_v63  ;;  %1882 = vmatpush.bf16.msrb.mxu2 %v3088_v9  ;;  %3136 = vmatpush.bf16.msrb.mxu3 %v3088_v9 }
 0x44e   : > { %v1644_v21 = vmul.f32 %v4407_v8, %v1627_v20 }
 0x44f   : > { %v1535_v35 = vsub.f32 1.5, %v1534_v22 }
 0x450   : > { %v4483_v17 = vadd.f32 %v4413_v11, %v1644_v21 }
 0x451   : > { %v1536_v42 = vmul.f32 %v3404_v12, %v1535_v35  ;;  %1883 = vmatpush.bf16.msrb.mxu2 %v3087_v37  ;;  %3137 = vmatpush.bf16.msrb.mxu3 %v3087_v37 }
 0x453   : > { %v1540_v27 = vsel %vm1539_vm8, %v3404_v12, %v1536_v42 }
 0x454   : > { %v1628_v24 = vmul.f32 %v1540_v27, %v4382_v38  ;;  %v3086_v38 = vld [vmem:[#allocation12 + $0x28] sm:$0xff]  ;;  %v4495_v27 = vld [vmem:[#allocation15 + $0x5] ss:$0 sm:$0xff] }
 0x455   : > { %1884 = vmatpush.bf16.msrb.mxu2 %v3086_v38  ;;  %3138 = vmatpush.bf16.msrb.mxu3 %v3086_v38 }
 0x456   : > { %v1645_v19 = vmul.f32 %v4407_v8, %v1628_v24  ;;  %2387 = vperm.xlu1 %3267, %v4495_v27  }
 0x458   : > { %v4486_v2 = vadd.f32 %v4413_v11, %v1645_v19  ;;  %v2391_v19 = vadd.s32 8, %v4491_v14 }
 0x459   : > { %1885 = vmatpush.bf16.msrb.mxu2 %v3085_v29  ;;  %3139 = vmatpush.bf16.msrb.mxu3 %v3085_v29 }
 0x45a   : > { %v1674_v31 = vpack.c.bf16 %v4486_v2, %v4483_v17  ;;  %3268 = vset.pattern.permute.xlu2 %v2391_v19 }
 0x45c   : > { %1767 = vmatmul.bf16.gmra.mxu1 %v1674_v31 }
 0x45d   : > { %1886 = vmatpush.bf16.msrb.mxu2 %v3084_v36  ;;  %3140 = vmatpush.bf16.msrb.mxu3 %v3084_v36 }
 0x461   : > { %1887 = vmatpush.bf16.msrb.mxu2 %v3083_v46  ;;  %3141 = vmatpush.bf16.msrb.mxu3 %v3083_v46 }
 0x462   : > { %2393 = vperm.xlu2 %3268, %v4495_v27  }
 0x465   : > { %1888 = vmatpush.bf16.msrb.mxu2 %v3082_v28  ;;  %3142 = vmatpush.bf16.msrb.mxu3 %v3082_v28 }
 0x469   : > { %1889 = vmatpush.bf16.msrb.mxu2 %v3081_v55  ;;  %3143 = vmatpush.bf16.msrb.mxu3 %v3081_v55 }
 0x486   : > { %v1414_v32 = vpop.xlane.xlu2 %1413 }
 0x487   : > { %v1437_v34 = vmul.f32 0.03125, %v1414_v32 }
 0x489   : > { %v1453_v6 = vadd.f32 1e-05, %v1437_v34 }
 0x48b   : > { %3405 = vrsqrt.f32 %v1453_v6  ;;  %vm1547_vm10 = vweird.f32 %v1453_v6 }
 0x48e   : > { %v1416_v15 = vpop.xlane.xlu0 %1415 }
 0x48f   : > { %v1438_v18 = vmul.f32 0.03125, %v1416_v15  ;;  %v4508_v15 = vld [vmem:[#allocation15 + $0x6] ss:$0 sm:$0xff] }
 0x491   : > { %v3406_v33 = vpop.eup %3405  ;;  %v1454_v39 = vadd.f32 1e-05, %v1438_v18 }
 0x492   : > { %v1542_v25 = vmul.f32 %v3406_v33, %v1453_v6  ;;  %vm1548_vm9 = vweird.f32 %v3406_v33 }
 0x493   : > { %3407 = vrsqrt.f32 %v1454_v39  ;;  %vm1549_vm11 = vmor %vm1547_vm10, %vm1548_vm9  ;;  %vm1557_vm13 = vweird.f32 %v1454_v39 }
 0x494   : > { %v1543_v48 = vmul.f32 %v3406_v33, %v1542_v25 }
 0x496   : > { %v1544_v60 = vmul.f32 0.5, %v1543_v48  ;;  %v1418_v0 = vpop.xlane.xlu1 %1417 }
 0x497   : > { %v1439_v7 = vmul.f32 0.03125, %v1418_v0 }
 0x498   : > { %v1545_v61 = vsub.f32 1.5, %v1544_v60 }
 0x499   : > { %v3408_v43 = vpop.eup %3407  ;;  %v1455_v49 = vadd.f32 1e-05, %v1439_v7 }
 0x49a   : > { %v1546_v40 = vmul.f32 %v3406_v33, %v1545_v61  ;;  %v1552_v23 = vmul.f32 %v3408_v43, %v1454_v39  ;;  %vm1558_vm12 = vweird.f32 %v3408_v43 }
 0x49b   : > { %3409 = vrsqrt.f32 %v1455_v49  ;;  %vm1559_vm14 = vmor %vm1557_vm13, %vm1558_vm12  ;;  %vm1567_vm0 = vweird.f32 %v1455_v49 }
 0x49c   : > { %v1553_v1 = vmul.f32 %v3408_v43, %v1552_v23  ;;  %v1550_v12 = vsel %vm1549_vm11, %v3406_v33, %v1546_v40  ;;  %v2409_v33 = vadd.s32 32, %v4491_v14 }
 0x49d   : > { %v1629_v22 = vmul.f32 %v1550_v12, %v4392_v41 }
 0x49e   : > { %v1554_v56 = vmul.f32 0.5, %v1553_v1  ;;  %v1420_v51 = vpop.xlane.xlu2 %1419  ;;  %3271 = vset.pattern.permute.xlu1 %v2409_v33 }
 0x49f   : > { %v1440_v62 = vmul.f32 0.03125, %v1420_v51  ;;  %v1646_v21 = vmul.f32 %v4407_v8, %v1629_v22 }
 0x4a0   : > { %v1555_v4 = vsub.f32 1.5, %v1554_v56 }
 0x4a1   : > { %v3410_v63 = vpop.eup %3409  ;;  %v1456_v50 = vadd.f32 1e-05, %v1440_v62  ;;  %v4503_v36 = vadd.f32 %v4413_v11, %v1646_v21 }
 0x4a2   : > { %v1556_v35 = vmul.f32 %v3408_v43, %v1555_v4  ;;  %v1562_v20 = vmul.f32 %v3410_v63, %v1455_v49  ;;  %vm1568_vm15 = vweird.f32 %v3410_v63 }
 0x4a3   : > { %3411 = vrsqrt.f32 %v1456_v50  ;;  %vm1569_vm1 = vmor %vm1567_vm0, %vm1568_vm15  ;;  %vm1577_vm3 = vweird.f32 %v1456_v50 }
 0x4a4   : > { %v1560_v54 = vsel %vm1559_vm14, %v3408_v43, %v1556_v35  ;;  %v1563_v42 = vmul.f32 %v3410_v63, %v1562_v20  ;;  %v2403_v35 = vadd.s32 24, %v4491_v14 }
 0x4a5   : > { %v1630_v24 = vmul.f32 %v1560_v54, %v4398_v58 }
 0x4a6   : > { %v1564_v31 = vmul.f32 0.5, %v1563_v42  ;;  %v1422_v9 = vpop.xlane.xlu0 %1421  ;;  %2411 = vperm.xlu1 %3271, %v4495_v27   ;;  %3270 = vset.pattern.permute.xlu2 %v2403_v35 }
 0x4a7   : > { %v1441_v41 = vmul.f32 0.03125, %v1422_v9  ;;  %v1647_v37 = vmul.f32 %v4407_v8, %v1630_v24 }
 0x4a8   : > { %v1565_v38 = vsub.f32 1.5, %v1564_v31 }
 0x4a9   : > { %v1753_v29 = vpop.f32.mrf.mxu1  ;;  %v3412_v32 = vpop.eup %3411  ;;  %v1457_v34 = vadd.f32 1e-05, %v1441_v41  ;;  %v4506_v58 = vadd.f32 %v4413_v11, %v1647_v37 }
 0x4aa   : > { %v1566_v6 = vmul.f32 %v3410_v63, %v1565_v38  ;;  %v1572_v46 = vmul.f32 %v3412_v32, %v1456_v50  ;;  %v1754_v48 = vadd.f32 %v4508_v15, %v1753_v29  ;;  %vm1578_vm2 = vweird.f32 %v3412_v32 }
 0x4ab   : > { %3413 = vrsqrt.f32 %v1457_v34  ;;  %v1675_v18 = vpack.c.bf16 %v4506_v58, %v4503_v36  ;;  %vm1579_vm4 = vmor %vm1577_vm3, %vm1578_vm2  ;;  %vm1587_vm6 = vweird.f32 %v1457_v34  ;;  %v2421_v29 = vadd.s32 48, %v4491_v14 }
 0x4ac   : > { %v1573_v28 = vmul.f32 %v3412_v32, %v1572_v46  ;;  %v1570_v39 = vsel %vm1569_vm1, %v3410_v63, %v1566_v6  ;;  %v1793_v12 = vmax.f32 %v1754_v48, 0.0 }
 0x4ad   : > { %1772 = vmatmul.bf16.gmra.mxu1 %v1675_v18  ;;  %v1631_v43 = vmul.f32 %v1570_v39, %v4405_v57 }
 0x4ae   : > { %v1574_v25 = vmul.f32 0.5, %v1573_v28  ;;  %v1424_v55 = vpop.xlane.xlu1 %1423  ;;  %3273 = vset.pattern.permute.xlu1 %v2421_v29  ;;  %2405 = vperm.xlu2 %3270, %v4495_v27  }
 0x4af   : > { %v1442_v60 = vmul.f32 0.03125, %v1424_v55  ;;  %v1648_v22 = vmul.f32 %v4407_v8, %v1631_v43  ;;  %v2415_v43 = vadd.s32 40, %v4491_v14 }
 0x4b0   : > { %v1575_v0 = vsub.f32 1.5, %v1574_v25 }
 0x4b1   : > { %v1755_v7 = vpop.f32.mrf.mxu1  ;;  %v3414_v61 = vpop.eup %3413  ;;  %v1458_v49 = vadd.f32 1e-05, %v1442_v60 }
 0x4b2   : > { %v1756_v40 = vadd.f32 %v4508_v15, %v1755_v7  ;;  %v1576_v23 = vmul.f32 %v3412_v32, %v1575_v0  ;;  %v1582_v1 = vmul.f32 %v3414_v61, %v1457_v34  ;;  %vm1588_vm5 = vweird.f32 %v3414_v61 }
 0x4b3   : > { %3415 = vrsqrt.f32 %v1458_v49  ;;  %vm1589_vm7 = vmor %vm1587_vm6, %vm1588_vm5  ;;  %vm1597_vm9 = vweird.f32 %v1458_v49 }
 0x4b4   : > { %v1794_v56 = vmax.f32 %v1756_v40, 0.0  ;;  %v1580_v51 = vsel %vm1579_vm4, %v3412_v32, %v1576_v23  ;;  %v1583_v62 = vmul.f32 %v3414_v61, %v1582_v1 }
 0x4b5   : > { %v1632_v4 = vmul.f32 %v1580_v51, %v4418_v13  ;;  %v4523_v13 = vadd.f32 %v4413_v11, %v1648_v22 }
 0x4b6   : > { %v1809_v63 = vpack.c.bf16 %v1794_v56, %v1793_v12  ;;  %v1584_v57 = vmul.f32 0.5, %v1583_v62  ;;  %v1426_v20 = vpop.xlane.xlu2 %1425  ;;  %2423 = vperm.xlu1 %3273, %v4495_v27   ;;  %3272 = vset.pattern.permute.xlu2 %v2415_v43 }
 0x4b7   : > { %v1443_v54 = vmul.f32 0.03125, %v1426_v20  ;;  %v1649_v50 = vmul.f32 %v4407_v8, %v1632_v4  ;;  %v2397_v4 = vadd.s32 16, %v4491_v14  ;;  %v2433_v20 = vadd.s32 64, %v4491_v14 }
 0x4b8   : > { %1890 = vmatmul.bf16.vlgmr.msrb.gmra.mxu2 %v1809_v63  ;;  %v1585_v42 = vsub.f32 1.5, %v1584_v57 }
 0x4b9   : > { %v1758_v24 = vpop.f32.mrf.mxu1  ;;  %v3416_v21 = vpop.eup %3415  ;;  %v1459_v19 = vadd.f32 1e-05, %v1443_v54  ;;  %v4526_v31 = vadd.f32 %v4413_v11, %v1649_v50  ;;  %3269 = vset.pattern.permute.xlu0 %v2397_v4  ;;  %v4583_v4 = vld [vmem:[#allocation15 + $0x4] ss:$0 sm:$0xff] }
 0x4ba   : > { %v1586_v9 = vmul.f32 %v3414_v61, %v1585_v42  ;;  %v1592_v41 = vmul.f32 %v3416_v21, %v1458_v49  ;;  %v1759_v18 = vadd.f32 %v4508_v15, %v1758_v24  ;;  %vm1598_vm8 = vweird.f32 %v3416_v21 }
 0x4bb   : > { %3417 = vrsqrt.f32 %v1459_v19  ;;  %v1676_v37 = vpack.c.bf16 %v4526_v31, %v4523_v13  ;;  %vm1599_vm10 = vmor %vm1597_vm9, %vm1598_vm8  ;;  %vm1607_vm12 = vweird.f32 %v1459_v19 }
 0x4bc   : > { %v1593_v38 = vmul.f32 %v3416_v21, %v1592_v41  ;;  %v1590_v32 = vsel %vm1589_vm7, %v3414_v61, %v1586_v9  ;;  %v1795_v7 = vmax.f32 %v1759_v18, 0.0 }
 0x4bd   : > { %1777 = vmatmul.bf16.gmra.mxu1 %v1676_v37  ;;  %v1633_v34 = vmul.f32 %v1590_v32, %v4432_v26 }
 0x4be   : > { %v1594_v6 = vmul.f32 0.5, %v1593_v38  ;;  %v1428_v46 = vpop.xlane.xlu0 %1427  ;;  %3275 = vset.pattern.permute.xlu1 %v2433_v20  ;;  %2417 = vperm.xlu2 %3272, %v4495_v27  }
 0x4bf   : > { %v1444_v28 = vmul.f32 0.03125, %v1428_v46  ;;  %v1650_v56 = vmul.f32 %v4407_v8, %v1633_v34 }
 0x4c0   : > { %v1595_v33 = vsub.f32 1.5, %v1594_v6  ;;  %v2427_v6 = vadd.s32 56, %v4491_v14 }
 0x4c1   : > { %v1760_v39 = vpop.f32.mrf.mxu1  ;;  %v3418_v25 = vpop.eup %3417  ;;  %v1460_v55 = vadd.f32 1e-05, %v1444_v28  ;;  %v4542_v22 = vadd.f32 %v4413_v11, %v1650_v56  ;;  %2399 = vperm.xlu0 %3269, %v4495_v27  }
 0x4c2   : > { %v1761_v48 = vadd.f32 %v4508_v15, %v1760_v39  ;;  %v1596_v60 = vmul.f32 %v3416_v21, %v1595_v33  ;;  %v1602_v0 = vmul.f32 %v3418_v25, %v1459_v19  ;;  %vm1608_vm11 = vweird.f32 %v3418_v25 }
 0x4c3   : > { %3419 = vrsqrt.f32 %v1460_v55  ;;  %vm1609_vm13 = vmor %vm1607_vm12, %vm1608_vm11  ;;  %vm1617_vm15 = vweird.f32 %v1460_v55  ;;  %v2439_v39 = vadd.s32 72, %v4491_v14 }
 0x4c4   : > { %v1796_v61 = vmax.f32 %v1761_v48, 0.0  ;;  %v1600_v40 = vsel %vm1599_vm10, %v3416_v21, %v1596_v60  ;;  %v1603_v23 = vmul.f32 %v3418_v25, %v1602_v0 }
 0x4c5   : > { %v1634_v1 = vmul.f32 %v1600_v40, %v4442_v16  ;;  %v2463_v40 = vadd.s32 104, %v4491_v14 }
 0x4c6   : > { %v1810_v12 = vpack.c.bf16 %v1796_v61, %v1795_v7  ;;  %v1604_v26 = vmul.f32 0.5, %v1603_v23  ;;  %2435 = vperm.xlu1 %3275, %v4495_v27   ;;  %3274 = vset.pattern.permute.xlu2 %v2427_v6  ;;  %v2445_v61 = vadd.s32 80, %v4491_v14  ;;  %v2457_v23 = vadd.s32 96, %v4491_v14 }
 0x4c7   : > { %v1651_v49 = vmul.f32 %v4407_v8, %v1634_v1 }
 0x4c8   : > { %1895 = vmatmul.bf16.gmra.mxu2 %v1810_v12  ;;  %v1605_v51 = vsub.f32 1.5, %v1604_v26 }
 0x4c9   : > { %v1763_v62 = vpop.f32.mrf.mxu1  ;;  %v3420_v63 = vpop.eup %3419  ;;  %v4545_v16 = vadd.f32 %v4413_v11, %v1651_v49  ;;  %3276 = vset.pattern.permute.xlu0 %v2439_v39 }
 0x4ca   : > { %v1606_v35 = vmul.f32 %v3418_v25, %v1605_v51  ;;  %v1612_v57 = vmul.f32 %v3420_v63, %v1460_v55  ;;  %v1764_v21 = vadd.f32 %v4508_v15, %v1763_v62  ;;  %vm1618_vm14 = vweird.f32 %v3420_v63 }
 0x4cb   : > { %v1677_v54 = vpack.c.bf16 %v4545_v16, %v4542_v22  ;;  %vm1619_vm0 = vmor %vm1617_vm15, %vm1618_vm14 }
 0x4cc   : > { %v1613_v50 = vmul.f32 %v3420_v63, %v1612_v57  ;;  %v1610_v42 = vsel %vm1609_vm13, %v3418_v25, %v1606_v35  ;;  %v1797_v19 = vmax.f32 %v1764_v21, 0.0 }
 0x4cd   : > { %1782 = vmatmul.bf16.gmra.mxu1 %v1677_v54  ;;  %v1635_v37 = vmul.f32 %v1610_v42, %v4456_v53 }
 0x4ce   : > { %v1614_v24 = vmul.f32 0.5, %v1613_v50  ;;  %2429 = vperm.xlu2 %3274, %v4495_v27  }
 0x4cf   : > { %v1652_v33 = vmul.f32 %v4407_v8, %v1635_v37 }
 0x4d0   : > { %v1615_v9 = vsub.f32 1.5, %v1614_v24 }
 0x4d1   : > { %v1765_v41 = vpop.f32.mrf.mxu1  ;;  %v4562_v34 = vadd.f32 %v4413_v11, %v1652_v33  ;;  %2441 = vperm.xlu0 %3276, %v4495_v27  }
 0x4d2   : > { %v1766_v38 = vadd.f32 %v4508_v15, %v1765_v41  ;;  %v1616_v29 = vmul.f32 %v3420_v63, %v1615_v9 }
 0x4d4   : > { %v1798_v32 = vmax.f32 %v1766_v38, 0.0  ;;  %v1620_v46 = vsel %vm1619_vm0, %v3420_v63, %v1616_v29 }
 0x4d5   : > { %v1636_v18 = vmul.f32 %v1620_v46, %v4466_v52  ;;  %v2451_v52 = vadd.s32 88, %v4491_v14 }
 0x4d6   : > { %v1811_v28 = vpack.c.bf16 %v1798_v32, %v1797_v19  ;;  %3277 = vset.pattern.permute.xlu2 %v2445_v61 }
 0x4d7   : > { %v1653_v53 = vmul.f32 %v4407_v8, %v1636_v18  ;;  %3278 = vset.pattern.permute.xlu1 %v2451_v52 }
 0x4d8   : > { %1900 = vmatmul.bf16.gmra.mxu2 %v1811_v28 }
 0x4d9   : > { %v1768_v25 = vpop.f32.mrf.mxu1  ;;  %v4565_v55 = vadd.f32 %v4413_v11, %v1653_v53 }
 0x4da   : > { %v1769_v8 = vadd.f32 %v4508_v15, %v1768_v25 }
 0x4db   : > { %v1678_v48 = vpack.c.bf16 %v4565_v55, %v4562_v34 }
 0x4dc   : > { %v1799_v7 = vmax.f32 %v1769_v8, 0.0 }
 0x4dd   : > { %1787 = vmatmul.bf16.gmra.mxu1 %v1678_v48 }
 0x4de   : > { %2447 = vperm.xlu2 %3277, %v4495_v27  }
 0x4df   : > { %2453 = vperm.xlu1 %3278, %v4495_v27  }
 0x4e1   : > { %v1770_v60 = vpop.f32.mrf.mxu1 }
 0x4e2   : > { %v1771_v0 = vadd.f32 %v4508_v15, %v1770_v60 }
 0x4e4   : > { %v1800_v11 = vmax.f32 %v1771_v0, 0.0 }
 0x4e6   : > { %v1812_v43 = vpack.c.bf16 %v1800_v11, %v1799_v7  ;;  %3279 = vset.pattern.permute.xlu2 %v2457_v23 }
 0x4e7   : > { %3280 = vset.pattern.permute.xlu1 %v2463_v40 }
 0x4e8   : > { %1905 = vmatmul.bf16.gmra.mxu2 %v1812_v43 }
 0x4ee   : > { %2459 = vperm.xlu2 %3279, %v4495_v27  }
 0x4ef   : > { %2465 = vperm.xlu1 %3280, %v4495_v27  }
 0x52a   : > { %v1773_v1 = vpop.f32.mrf.mxu1 }
 0x52b   : > { %v1774_v12 = vadd.f32 %v4508_v15, %v1773_v1 }
 0x52d   : > { %v1801_v49 = vmax.f32 %v1774_v12, 0.0 }
 0x532   : > { %v1775_v56 = vpop.f32.mrf.mxu1 }
 0x533   : > { %v1776_v26 = vadd.f32 %v4508_v15, %v1775_v56 }
 0x535   : > { %v1802_v51 = vmax.f32 %v1776_v26, 0.0 }
 0x537   : > { %v1813_v62 = vpack.c.bf16 %v1802_v51, %v1801_v49 }
 0x539   : > { %1910 = vmatmul.bf16.gmra.mxu2 %v1813_v62 }
 0x53a   : > { %v1778_v63 = vpop.f32.mrf.mxu1 }
 0x53b   : > { %v1891_v35 = vpop.f32.mrf.mxu2  ;;  %v1779_v54 = vadd.f32 %v4508_v15, %v1778_v63 }
 0x53c   : > { %v1892_v57 = vadd.f32 %v4583_v4, %v1891_v35 }
 0x53d   : > { %v1803_v9 = vmax.f32 %v1779_v54, 0.0 }
 0x53e   : > { %v4587_v20 = vadd.f32 %v1892_v57, %v4421_v30 }
 0x540   : > { %1947 = vadd.xlane.f32.xlu1 %v4587_v20 }
 0x542   : > { %v1780_v50 = vpop.f32.mrf.mxu1 }
 0x543   : > { %v1893_v42 = vpop.f32.mrf.mxu2  ;;  %v1781_v24 = vadd.f32 %v4508_v15, %v1780_v50  ;;  %v2475_v50 = vadd.s32 120, %v4491_v14 }
 0x544   : > { %v1894_v21 = vadd.f32 %v4583_v4, %v1893_v42 }
 0x545   : > { %v1804_v41 = vmax.f32 %v1781_v24, 0.0  ;;  %3282 = vset.pattern.permute.xlu2 %v2475_v50  ;;  %v4653_v24 = vpop.permute.xlu0 %2399 }
 0x546   : > { %v4594_v37 = vadd.f32 %v1894_v21, %v4424_v5  ;;  %v4655_v21 = vpop.permute.xlu1 %2387 }
 0x547   : > { %v1814_v38 = vpack.c.bf16 %v1804_v41, %v1803_v9 }
 0x548   : > { %1949 = vadd.xlane.f32.xlu2 %v4594_v37 }
 0x549   : > { %1915 = vmatmul.bf16.vlgmr.msrb.gmra.mxu3 %v1814_v38 }
 0x54a   : > { %v1783_v30 = vpop.f32.mrf.mxu1 }
 0x54b   : > { %v1896_v29 = vpop.f32.mrf.mxu2  ;;  %v1784_v6 = vadd.f32 %v4508_v15, %v1783_v30 }
 0x54c   : > { %v1897_v19 = vadd.f32 %v4583_v4, %v1896_v29 }
 0x54d   : > { %v1805_v33 = vmax.f32 %v1784_v6, 0.0  ;;  %v4665_v29 = vpop.permute.xlu0 %2441 }
 0x54e   : > { %v4599_v32 = vadd.f32 %v1897_v19, %v4445_v3 }
 0x550   : > { %1951 = vadd.xlane.f32.xlu0 %v4599_v32 }
 0x552   : > { %v1785_v46 = vpop.f32.mrf.mxu1 }
 0x553   : > { %v1898_v18 = vpop.f32.mrf.mxu2  ;;  %v1786_v5 = vadd.f32 %v4508_v15, %v1785_v46 }
 0x554   : > { %v1899_v28 = vadd.f32 %v4583_v4, %v1898_v18 }
 0x555   : > { %v1806_v53 = vmax.f32 %v1786_v5, 0.0 }
 0x556   : > { %v4606_v39 = vadd.f32 %v1899_v28, %v4448_v45 }
 0x557   : > { %v1815_v25 = vpack.c.bf16 %v1806_v53, %v1805_v33 }
 0x558   : > { %1953 = vadd.xlane.f32.xlu1 %v4606_v39 }
 0x559   : > { %1920 = vmatmul.bf16.gmra.mxu3 %v1815_v25 }
 0x55a   : > { %v1788_v3 = vpop.f32.mrf.mxu1 }
 0x55b   : > { %v1901_v52 = vpop.f32.mrf.mxu2  ;;  %v1789_v60 = vadd.f32 %v4508_v15, %v1788_v3 }
 0x55c   : > { %v1902_v48 = vadd.f32 %v4583_v4, %v1901_v52 }
 0x55d   : > { %v1807_v61 = vmax.f32 %v1789_v60, 0.0 }
 0x55e   : > { %v4611_v8 = vadd.f32 %v1902_v48, %v4469_v47 }
 0x560   : > { %1955 = vadd.xlane.f32.xlu2 %v4611_v8 }
 0x562   : > { %v1790_v0 = vpop.f32.mrf.mxu1 }
 0x563   : > { %v1903_v7 = vpop.f32.mrf.mxu2  ;;  %v1791_v45 = vadd.f32 %v4508_v15, %v1790_v0 }
 0x564   : > { %v1904_v11 = vadd.f32 %v4583_v4, %v1903_v7 }
 0x565   : > { %v1808_v43 = vmax.f32 %v1791_v45, 0.0 }
 0x566   : > { %v4618_v40 = vadd.f32 %v1904_v11, %v4472_v44 }
 0x567   : > { %v1816_v23 = vpack.c.bf16 %v1808_v43, %v1807_v61 }
 0x568   : > { %1957 = vadd.xlane.f32.xlu0 %v4618_v40 }
 0x569   : > { %1925 = vmatmul.bf16.gmra.mxu3 %v1816_v23 }
 0x56b   : > { %v1906_v47 = vpop.f32.mrf.mxu2 }
 0x56c   : > { %v1907_v1 = vadd.f32 %v4583_v4, %v1906_v47 }
 0x56e   : > { %v4623_v12 = vadd.f32 %v1907_v1, %v4483_v17 }
 0x570   : > { %1959 = vadd.xlane.f32.xlu1 %v4623_v12 }
 0x573   : > { %v1908_v15 = vpop.f32.mrf.mxu2 }
 0x574   : > { %v1909_v56 = vadd.f32 %v4583_v4, %v1908_v15 }
 0x576   : > { %v4628_v26 = vadd.f32 %v1909_v56, %v4486_v2 }
 0x578   : > { %1961 = vadd.xlane.f32.xlu2 %v4628_v26 }
 0x5bc   : > { %v1911_v44 = vpop.f32.mrf.mxu2 }
 0x5bd   : > { %v1912_v49 = vadd.f32 %v4583_v4, %v1911_v44 }
 0x5bf   : > { %v4633_v51 = vadd.f32 %v1912_v49, %v4503_v36 }
 0x5c1   : > { %1963 = vadd.xlane.f32.xlu0 %v4633_v51 }
 0x5c3   : > { %v1952_v5 = vpop.xlane.xlu0 %1951 }
 0x5c4   : > { %v1913_v17 = vpop.f32.mrf.mxu2  ;;  %v1981_v33 = vmul.f32 0.03125, %v1952_v5 }
 0x5c5   : > { %v1914_v62 = vadd.f32 %v4583_v4, %v1913_v17 }
 0x5c6   : > { %v1997_v3 = vsub.f32 %v4599_v32, %v1981_v33 }
 0x5c7   : > { %v4638_v63 = vadd.f32 %v1914_v62, %v4506_v58  ;;  %v2469_v58 = vadd.s32 112, %v4491_v14  ;;  %v4667_v14 = vpop.permute.xlu1 %2411 }
 0x5c8   : > { %v4693_v0 = vmul.f32 %v4316_v10, %v1997_v3 }
 0x5c9   : > { %1965 = vadd.xlane.f32.xlu1 %v4638_v63  ;;  %3281 = vset.pattern.permute.xlu0 %v2469_v58 }
 0x5cc   : > { %v1916_v2 = vpop.f32.mrf.mxu3 }
 0x5cd   : > { %v1917_v35 = vadd.f32 %v4583_v4, %v1916_v2 }
 0x5cf   : > { %v4643_v57 = vadd.f32 %v1917_v35, %v4523_v13  ;;  %v4679_v28 = vpop.permute.xlu1 %2423 }
 0x5d1   : > { %1967 = vadd.xlane.f32.xlu2 %v4643_v57 }
 0x5d4   : > { %v1918_v36 = vpop.f32.mrf.mxu3 }
 0x5d5   : > { %v1919_v54 = vadd.f32 %v4583_v4, %v1918_v36 }
 0x5d7   : > { %v4649_v42 = vadd.f32 %v1919_v54, %v4526_v31  ;;  %v4662_v31 = vpop.permute.xlu2 %2393 }
 0x5d9   : > { %1969 = vadd.xlane.f32.xlu0 %v4649_v42 }
 0x5db   : > { %v1958_v48 = vpop.xlane.xlu0 %1957 }
 0x5dc   : > { %v1921_v13 = vpop.f32.mrf.mxu3  ;;  %v1984_v60 = vmul.f32 0.03125, %v1958_v48 }
 0x5dd   : > { %v1922_v9 = vadd.f32 %v4583_v4, %v1921_v13 }
 0x5de   : > { %v2000_v7 = vsub.f32 %v4618_v40, %v1984_v60 }
 0x5df   : > { %v4659_v41 = vadd.f32 %v1922_v9, %v4542_v22  ;;  %v4673_v6 = vpop.permute.xlu2 %2405 }
 0x5e1   : > { %1971 = vadd.xlane.f32.xlu1 %v4659_v41 }
 0x5e4   : > { %v1923_v38 = vpop.f32.mrf.mxu3 }
 0x5e5   : > { %v1924_v30 = vadd.f32 %v4583_v4, %v1923_v38 }
 0x5e7   : > { %v4670_v19 = vadd.f32 %v1924_v30, %v4545_v16  ;;  %v4683_v25 = vpop.permute.xlu2 %2417 }
 0x5e9   : > { %1973 = vadd.xlane.f32.xlu2 %v4670_v19 }
 0x5ec   : > { %v1926_v22 = vpop.f32.mrf.mxu3 }
 0x5ed   : > { %v1927_v46 = vadd.f32 %v4583_v4, %v1926_v22 }
 0x5ef   : > { %v4677_v18 = vadd.f32 %v1927_v46, %v4562_v34  ;;  %v4690_v34 = vpop.permute.xlu1 %2435  ;;  %v4698_v45 = vpop.permute.xlu2 %2429 }
 0x5f1   : > { %1975 = vadd.xlane.f32.xlu0 %v4677_v18 }
 0x5f4   : > { %v1928_v53 = vpop.f32.mrf.mxu3 }
 0x5f5   : > { %v1929_v16 = vadd.f32 %v4583_v4, %v1928_v53  ;;  %v2029_v4 = vmul.f32 %v4693_v0, %v4693_v0 }
 0x5f7   : > { %v4687_v52 = vadd.f32 %v1929_v16, %v4565_v55  ;;  %v4702_v55 = vmul.f32 %v4316_v10, %v2000_v7  ;;  %v4704_v32 = vpop.permute.xlu1 %2453  ;;  %v4709_v61 = vpop.permute.xlu2 %2447 }
 0x5f9   : > { %1977 = vadd.xlane.f32.xlu1 %v4687_v52  ;;  %v2032_v11 = vmul.f32 %v4702_v55, %v4702_v55 }
 0x5ff   : > { %v4711_v43 = vpop.permute.xlu1 %2465  ;;  %v4713_v40 = vpop.permute.xlu2 %2459 }
 0x601   : > { %2477 = vperm.xlu2 %3282, %v4495_v27   ;;  %2047 = vadd.xlane.f32.xlu1 %v2029_v4 }
 0x605   : > { %2471 = vperm.xlu0 %3281, %v4495_v27  }
 0x607   : > { %v1948_v23 = vpop.xlane.xlu1 %1947  ;;  %v1950_v1 = vpop.xlane.xlu2 %1949 }
 0x608   : > { %v1979_v47 = vmul.f32 0.03125, %v1948_v23  ;;  %v1980_v56 = vmul.f32 0.03125, %v1950_v1 }
 0x609   : > { %2053 = vadd.xlane.f32.xlu1 %v2032_v11 }
 0x60a   : > { %v1995_v15 = vsub.f32 %v4587_v20, %v1979_v47  ;;  %v1996_v17 = vsub.f32 %v4594_v37, %v1980_v56 }
 0x60c   : > { %v4717_v27 = vmul.f32 %v4316_v10, %v1995_v15  ;;  %v4724_v50 = vmul.f32 %v4316_v10, %v1996_v17 }
 0x60e   : > { %v2027_v35 = vmul.f32 %v4717_v27, %v4717_v27  ;;  %v2028_v37 = vmul.f32 %v4724_v50, %v4724_v50 }
 0x60f   : > { %v1954_v44 = vpop.xlane.xlu1 %1953  ;;  %v1956_v62 = vpop.xlane.xlu2 %1955 }
 0x610   : > { %v1982_v49 = vmul.f32 0.03125, %v1954_v44  ;;  %v1983_v36 = vmul.f32 0.03125, %v1956_v62 }
 0x612   : > { %v1998_v2 = vsub.f32 %v4606_v39, %v1982_v49  ;;  %v1999_v13 = vsub.f32 %v4611_v8, %v1983_v36 }
 0x614   : > { %v4727_v58 = vmul.f32 %v4316_v10, %v1998_v2  ;;  %v4736_v22 = vmul.f32 %v4316_v10, %v1999_v13 }
 0x616   : > { %v2030_v38 = vmul.f32 %v4727_v58, %v4727_v58  ;;  %v2031_v53 = vmul.f32 %v4736_v22, %v4736_v22 }
 0x617   : > { %v1960_v54 = vpop.xlane.xlu1 %1959  ;;  %v1962_v9 = vpop.xlane.xlu2 %1961 }
 0x618   : > { %v1985_v20 = vmul.f32 0.03125, %v1960_v54  ;;  %v1986_v30 = vmul.f32 0.03125, %v1962_v9 }
 0x61a   : > { %v2001_v39 = vsub.f32 %v4623_v12, %v1985_v20  ;;  %v2002_v8 = vsub.f32 %v4628_v26, %v1986_v30 }
 0x61c   : > { %v4739_v5 = vmul.f32 %v4316_v10, %v2001_v39  ;;  %v4751_v48 = vmul.f32 %v4316_v10, %v2002_v8 }
 0x61e   : > { %v2033_v16 = vmul.f32 %v4739_v5, %v4739_v5 }
 0x62a   : > { %2043 = vadd.xlane.f32.xlu2 %v2027_v35 }
 0x62f   : > { %2045 = vadd.xlane.f32.xlu0 %v2028_v37 }
 0x632   : > { %2049 = vadd.xlane.f32.xlu2 %v2030_v38 }
 0x634   : > { %v1964_v46 = vpop.xlane.xlu0 %1963 }
 0x635   : > { %v1987_v33 = vmul.f32 0.03125, %v1964_v46 }
 0x637   : > { %v2003_v12 = vsub.f32 %v4633_v51, %v1987_v33  ;;  %2051 = vadd.xlane.f32.xlu0 %v2031_v53  ;;  %v2034_v51 = vmul.f32 %v4751_v48, %v4751_v48 }
 0x639   : > { %v4748_v3 = vmul.f32 %v4316_v10, %v2003_v12 }
 0x63a   : > { %2055 = vadd.xlane.f32.xlu2 %v2033_v16 }
 0x63b   : > { %v2035_v26 = vmul.f32 %v4748_v3, %v4748_v3 }
 0x63c   : > { %v1966_v60 = vpop.xlane.xlu1 %1965 }
 0x63d   : > { %v1988_v7 = vmul.f32 0.03125, %v1966_v60  ;;  %2059 = vadd.xlane.f32.xlu1 %v2035_v26 }
 0x63f   : > { %v2004_v4 = vsub.f32 %v4638_v63, %v1988_v7  ;;  %2057 = vadd.xlane.f32.xlu0 %v2034_v51 }
 0x641   : > { %v4759_v11 = vmul.f32 %v4316_v10, %v2004_v4 }
 0x643   : > { %v2036_v23 = vmul.f32 %v4759_v11, %v4759_v11 }
 0x644   : > { %v1968_v47 = vpop.xlane.xlu2 %1967 }
 0x645   : > { %v1989_v1 = vmul.f32 0.03125, %v1968_v47  ;;  %2061 = vadd.xlane.f32.xlu2 %v2036_v23 }
 0x647   : > { %v2005_v15 = vsub.f32 %v4643_v57, %v1989_v1 }
 0x649   : > { %v4765_v56 = vmul.f32 %v4316_v10, %v2005_v15 }
 0x64b   : > { %v2037_v44 = vmul.f32 %v4765_v56, %v4765_v56 }
 0x64c   : > { %v1970_v49 = vpop.xlane.xlu0 %1969 }
 0x64d   : > { %v1990_v63 = vmul.f32 0.03125, %v1970_v49  ;;  %2063 = vadd.xlane.f32.xlu0 %v2037_v44 }
 0x64f   : > { %v2006_v17 = vsub.f32 %v4649_v42, %v1990_v63  ;;  %v4799_v63 = vld [vmem:[#allocation15 + $0x2] ss:$0 sm:$0xff] }
 0x651   : > { %v4771_v62 = vmul.f32 %v4316_v10, %v2006_v17 }
 0x653   : > { %v2038_v2 = vmul.f32 %v4771_v62, %v4771_v62 }
 0x654   : > { %v1972_v35 = vpop.xlane.xlu1 %1971 }
 0x655   : > { %v1991_v36 = vmul.f32 0.03125, %v1972_v35  ;;  %2065 = vadd.xlane.f32.xlu1 %v2038_v2 }
 0x657   : > { %v2007_v57 = vsub.f32 %v4659_v41, %v1991_v36  ;;  %v4802_v36 = vld [vmem:[#allocation15 + $0x3] ss:$0 sm:$0xff] }
 0x659   : > { %v4777_v54 = vmul.f32 %v4316_v10, %v2007_v57 }
 0x65b   : > { %v2039_v20 = vmul.f32 %v4777_v54, %v4777_v54 }
 0x65c   : > { %v1974_v13 = vpop.xlane.xlu2 %1973 }
 0x65d   : > { %v1992_v37 = vmul.f32 0.03125, %v1974_v13  ;;  %2067 = vadd.xlane.f32.xlu2 %v2039_v20 }
 0x65f   : > { %v2008_v42 = vsub.f32 %v4670_v19, %v1992_v37  ;;  %v2319_v37 = vld [vmem:[#allocation13 + $0x10] sm:$0xff] }
 0x661   : > { %v4783_v9 = vmul.f32 %v4316_v10, %v2008_v42 }
 0x663   : > { %v2040_v39 = vmul.f32 %v4783_v9, %v4783_v9 }
 0x664   : > { %v1976_v38 = vpop.xlane.xlu0 %1975 }
 0x665   : > { %v1993_v30 = vmul.f32 0.03125, %v1976_v38  ;;  %2069 = vadd.xlane.f32.xlu0 %v2040_v39 }
 0x667   : > { %v2009_v41 = vsub.f32 %v4677_v18, %v1993_v30 }
 0x669   : > { %v4789_v46 = vmul.f32 %v4316_v10, %v2009_v41 }
 0x66b   : > { %v2041_v8 = vmul.f32 %v4789_v46, %v4789_v46 }
 0x66c   : > { %v1978_v33 = vpop.xlane.xlu1 %1977 }
 0x66d   : > { %v1994_v53 = vmul.f32 0.03125, %v1978_v33  ;;  %2071 = vadd.xlane.f32.xlu1 %v2041_v8  ;;  %v4807_v8 = vpop.permute.xlu2 %2477  ;;  %v2322_v33 = vld [vmem:[#allocation13 + $0x28] sm:$0xff] }
 0x66f   : > { %v2010_v19 = vsub.f32 %v4687_v52, %v1994_v53 }
 0x671   : > { %v4795_v12 = vmul.f32 %v4316_v10, %v2010_v19 }
 0x673   : > { %v2042_v16 = vmul.f32 %v4795_v12, %v4795_v12 }
 0x674   : > { %v2048_v26 = vpop.xlane.xlu1 %2047 }
 0x675   : > { %v2077_v60 = vmul.f32 0.03125, %v2048_v26  ;;  %2073 = vadd.xlane.f32.xlu2 %v2042_v16 }
 0x677   : > { %v2093_v18 = vadd.f32 1e-05, %v2077_v60  ;;  %v4811_v16 = vpop.permute.xlu0 %2471 }
 0x679   : > { %3421 = vrsqrt.f32 %v2093_v18  ;;  %vm2133_vm2 = vweird.f32 %v2093_v18 }
 0x67c   : > { %v2054_v7 = vpop.xlane.xlu1 %2053 }
 0x67d   : > { %v2080_v51 = vmul.f32 0.03125, %v2054_v7 }
 0x67f   : > { %v3422_v4 = vpop.eup %3421  ;;  %v2096_v23 = vadd.f32 1e-05, %v2080_v51 }
 0x680   : > { %v2128_v47 = vmul.f32 %v3422_v4, %v2093_v18  ;;  %vm2134_vm1 = vweird.f32 %v3422_v4 }
 0x681   : > { %3423 = vrsqrt.f32 %v2096_v23  ;;  %vm2135_vm3 = vmor %vm2133_vm2, %vm2134_vm1  ;;  %vm2163_vm5 = vweird.f32 %v2096_v23 }
 0x682   : > { %v2129_v1 = vmul.f32 %v3422_v4, %v2128_v47 }
 0x684   : > { %v2130_v15 = vmul.f32 0.5, %v2129_v1 }
 0x686   : > { %v2131_v52 = vsub.f32 1.5, %v2130_v15 }
 0x687   : > { %v3424_v10 = vpop.eup %3423 }
 0x688   : > { %v2132_v44 = vmul.f32 %v3422_v4, %v2131_v52  ;;  %v2158_v49 = vmul.f32 %v3424_v10, %v2096_v23  ;;  %vm2164_vm4 = vweird.f32 %v3424_v10 }
 0x689   : > { %vm2165_vm6 = vmor %vm2163_vm5, %vm2164_vm4 }
 0x68a   : > { %v2159_v17 = vmul.f32 %v3424_v10, %v2158_v49  ;;  %v2136_v2 = vsel %vm2135_vm3, %v3422_v4, %v2132_v44 }
 0x68b   : > { %v2269_v35 = vmul.f32 %v2136_v2, %v4693_v0 }
 0x68c   : > { %v2160_v57 = vmul.f32 0.5, %v2159_v17 }
 0x68d   : > { %v2286_v20 = vmul.f32 %v4799_v63, %v2269_v35 }
 0x68e   : > { %v2161_v13 = vsub.f32 1.5, %v2160_v57 }
 0x68f   : > { %v2303_v42 = vadd.f32 %v4802_v36, %v2286_v20 }
 0x690   : > { %v2162_v39 = vmul.f32 %v3424_v10, %v2161_v13 }
 0x691   : > { %v2335_v38 = vmul.f32 %v2319_v37, %v2303_v42 }
 0x692   : > { %v2166_v30 = vsel %vm2165_vm6, %v3424_v10, %v2162_v39 }
 0x693   : > { %2353 = vadd.xlane.f32.xlu2 %v2335_v38  ;;  %v2272_v41 = vmul.f32 %v2166_v30, %v4702_v55 }
 0x695   : > { %v2289_v0 = vmul.f32 %v4799_v63, %v2272_v41 }
 0x697   : > { %v2306_v53 = vadd.f32 %v4802_v36, %v2289_v0 }
 0x699   : > { %v2338_v19 = vmul.f32 %v2322_v33, %v2306_v53 }
 0x69b   : > { %2359 = vadd.xlane.f32.xlu2 %v2338_v19 }
 0x69d   : > { %v2044_v26 = vpop.xlane.xlu2 %2043 }
 0x69e   : > { %v2075_v60 = vmul.f32 0.03125, %v2044_v26 }
 0x6a0   : > { %v2091_v18 = vadd.f32 1e-05, %v2075_v60 }
 0x6a2   : > { %3425 = vrsqrt.f32 %v2091_v18  ;;  %v2046_v7 = vpop.xlane.xlu0 %2045  ;;  %vm2113_vm8 = vweird.f32 %v2091_v18 }
 0x6a3   : > { %v2076_v51 = vmul.f32 0.03125, %v2046_v7 }
 0x6a5   : > { %v2092_v4 = vadd.f32 1e-05, %v2076_v51  ;;  %v2050_v23 = vpop.xlane.xlu2 %2049 }
 0x6a6   : > { %v2078_v55 = vmul.f32 0.03125, %v2050_v23 }
 0x6a7   : > { %3427 = vrsqrt.f32 %v2092_v4  ;;  %vm2123_vm11 = vweird.f32 %v2092_v4 }
 0x6a8   : > { %v3426_v47 = vpop.eup %3425  ;;  %v2094_v1 = vadd.f32 1e-05, %v2078_v55 }
 0x6a9   : > { %v2108_v15 = vmul.f32 %v3426_v47, %v2091_v18  ;;  %vm2114_vm7 = vweird.f32 %v3426_v47 }
 0x6aa   : > { %3429 = vrsqrt.f32 %v2094_v1  ;;  %v2052_v52 = vpop.xlane.xlu0 %2051  ;;  %vm2115_vm9 = vmor %vm2113_vm8, %vm2114_vm7  ;;  %vm2143_vm14 = vweird.f32 %v2094_v1 }
 0x6ab   : > { %v2109_v10 = vmul.f32 %v3426_v47, %v2108_v15  ;;  %v2079_v44 = vmul.f32 0.03125, %v2052_v52 }
 0x6ad   : > { %v3428_v49 = vpop.eup %3427  ;;  %v2110_v17 = vmul.f32 0.5, %v2109_v10  ;;  %v4813_v2 = vadd.f32 1e-05, %v2079_v44  ;;  %v2056_v35 = vpop.xlane.xlu2 %2055 }
 0x6ae   : > { %v2118_v57 = vmul.f32 %v3428_v49, %v2092_v4  ;;  %v2081_v20 = vmul.f32 0.03125, %v2056_v35  ;;  %vm2124_vm10 = vweird.f32 %v3428_v49 }
 0x6af   : > { %v2111_v13 = vsub.f32 1.5, %v2110_v17  ;;  %3431 = vrsqrt.f32 %v4813_v2  ;;  %vm4830_vm12 = vmor %vm2123_vm11, %vm2124_vm10  ;;  %vm2153_vm1 = vweird.f32 %v4813_v2 }
 0x6b0   : > { %v3430_v37 = vpop.eup %3429  ;;  %v2119_v42 = vmul.f32 %v3428_v49, %v2118_v57  ;;  %v4816_v39 = vadd.f32 1e-05, %v2081_v20  ;;  %v2060_v38 = vpop.xlane.xlu1 %2059 }
 0x6b1   : > { %v2112_v30 = vmul.f32 %v3426_v47, %v2111_v13  ;;  %v2138_v41 = vmul.f32 %v3430_v37, %v2094_v1  ;;  %v2083_v0 = vmul.f32 0.03125, %v2060_v38  ;;  %vm2144_vm13 = vweird.f32 %v3430_v37 }
 0x6b2   : > { %v2120_v33 = vmul.f32 0.5, %v2119_v42  ;;  %3433 = vrsqrt.f32 %v4816_v39  ;;  %v2058_v53 = vpop.xlane.xlu0 %2057  ;;  %vm4843_vm15 = vmor %vm2143_vm14, %vm2144_vm13  ;;  %vm2173_vm4 = vweird.f32 %v4816_v39 }
 0x6b3   : > { %v2139_v19 = vmul.f32 %v3430_v37, %v2138_v41  ;;  %v4819_v26 = vadd.f32 1e-05, %v2083_v0  ;;  %v2082_v60 = vmul.f32 0.03125, %v2058_v53  ;;  %v2116_v7 = vsel %vm2115_vm9, %v3426_v47, %v2112_v30  ;;  %v2318_v47 = vld [vmem:[#allocation13 + $0x8] sm:$0xff] }
 0x6b4   : > { %v2121_v51 = vsub.f32 1.5, %v2120_v33  ;;  %v2267_v23 = vmul.f32 %v2116_v7, %v4717_v27  ;;  %v2317_v27 = vld [vmem:[#allocation13] sm:$0xff] }
 0x6b5   : > { %v4822_v55 = vpop.eup %3431  ;;  %v2140_v15 = vmul.f32 0.5, %v2139_v19  ;;  %3435 = vrsqrt.f32 %v4819_v26  ;;  %v4825_v18 = vadd.f32 1e-05, %v2082_v60  ;;  %vm2193_vm7 = vweird.f32 %v4819_v26 }
 0x6b6   : > { %v2122_v52 = vmul.f32 %v3428_v49, %v2121_v51  ;;  %v2148_v10 = vmul.f32 %v4822_v55, %v4813_v2  ;;  %v2284_v44 = vmul.f32 %v4799_v63, %v2267_v23  ;;  %vm2154_vm0 = vweird.f32 %v4822_v55 }
 0x6b7   : > { %v2141_v17 = vsub.f32 1.5, %v2140_v15  ;;  %3437 = vrsqrt.f32 %v4825_v18  ;;  %vm4864_vm2 = vmor %vm2153_vm1, %vm2154_vm0  ;;  %vm2183_vm10 = vweird.f32 %v4825_v18 }
 0x6b8   : > { %v4835_v35 = vpop.eup %3433  ;;  %v2149_v57 = vmul.f32 %v4822_v55, %v2148_v10  ;;  %v2062_v20 = vpop.xlane.xlu2 %2061  ;;  %v2301_v4 = vadd.f32 %v4802_v36, %v2284_v44  ;;  %v2126_v13 = vsel %vm4830_vm12, %v3428_v49, %v2122_v52 }
 0x6b9   : > { %v2142_v42 = vmul.f32 %v3430_v37, %v2141_v17  ;;  %v2168_v38 = vmul.f32 %v4835_v35, %v4816_v39  ;;  %v2084_v30 = vmul.f32 0.03125, %v2062_v20  ;;  %v2268_v53 = vmul.f32 %v2126_v13, %v4724_v50  ;;  %v2320_v13 = vld [vmem:[#allocation13 + $0x18] sm:$0xff] }
 0x6ba   : > { %v2150_v0 = vmul.f32 0.5, %v2149_v57  ;;  %v2333_v33 = vmul.f32 %v2317_v27, %v2301_v4  ;;  %vm2174_vm3 = vweird.f32 %v4835_v35 }
 0x6bb   : > { %v3436_v19 = vpop.eup %3435  ;;  %v2169_v60 = vmul.f32 %v4835_v35, %v2168_v38  ;;  %v4849_v7 = vadd.f32 1e-05, %v2084_v30  ;;  %v2146_v1 = vsel %vm4843_vm15, %v3430_v37, %v2142_v42  ;;  %v2285_v23 = vmul.f32 %v4799_v63, %v2268_v53  ;;  %vm4878_vm5 = vmor %vm2173_vm4, %vm2174_vm3 }
 0x6bc   : > { %v2151_v49 = vsub.f32 1.5, %v2150_v0  ;;  %v2188_v51 = vmul.f32 %v3436_v19, %v4819_v26  ;;  %2349 = vadd.xlane.f32.xlu0 %v2333_v33  ;;  %v2270_v50 = vmul.f32 %v2146_v1, %v4727_v58  ;;  %vm2194_vm6 = vweird.f32 %v3436_v19 }
 0x6bd   : > { %v4856_v15 = vpop.eup %3437  ;;  %v2170_v52 = vmul.f32 0.5, %v2169_v60  ;;  %3439 = vrsqrt.f32 %v4849_v7  ;;  %v2302_v57 = vadd.f32 %v4802_v36, %v2285_v23  ;;  %vm2195_vm9 = vmor %vm2193_vm7, %vm2194_vm6  ;;  %vm2203_vm13 = vweird.f32 %v4849_v7 }
 0x6be   : > { %v2152_v10 = vmul.f32 %v4822_v55, %v2151_v49  ;;  %v2189_v37 = vmul.f32 %v3436_v19, %v2188_v51  ;;  %v2178_v44 = vmul.f32 %v4856_v15, %v4825_v18  ;;  %v2287_v58 = vmul.f32 %v4799_v63, %v2270_v50 }
 0x6bf   : > { %v2171_v27 = vsub.f32 1.5, %v2170_v52  ;;  %v2334_v41 = vmul.f32 %v2318_v47, %v2302_v57  ;;  %vm2184_vm8 = vweird.f32 %v4856_v15 }
 0x6c0   : > { %v2190_v20 = vmul.f32 0.5, %v2189_v37  ;;  %v2179_v2 = vmul.f32 %v4856_v15, %v2178_v44  ;;  %v2064_v4 = vpop.xlane.xlu0 %2063  ;;  %v2156_v42 = vsel %vm4864_vm2, %v4822_v55, %v2152_v10  ;;  %v2304_v0 = vadd.f32 %v4802_v36, %v2287_v58  ;;  %vm2185_vm11 = vmor %vm2183_vm10, %vm2184_vm8 }
 0x6c1   : > { %v2172_v38 = vmul.f32 %v4835_v35, %v2171_v27  ;;  %v2085_v30 = vmul.f32 0.03125, %v2064_v4  ;;  %v2271_v60 = vmul.f32 %v2156_v42, %v4736_v22  ;;  %2351 = vadd.xlane.f32.xlu1 %v2334_v41 }
 0x6c2   : > { %v2191_v39 = vsub.f32 1.5, %v2190_v20  ;;  %v2180_v53 = vmul.f32 0.5, %v2179_v2  ;;  %v2336_v55 = vmul.f32 %v2320_v13, %v2304_v0  ;;  %v2323_v20 = vld [vmem:[#allocation13 + $0x30] sm:$0xff] }
 0x6c3   : > { %v3440_v1 = vpop.eup %3439  ;;  %v4884_v49 = vadd.f32 1e-05, %v2085_v30  ;;  %v2176_v51 = vsel %vm4878_vm5, %v4835_v35, %v2172_v38  ;;  %v2288_v22 = vmul.f32 %v4799_v63, %v2271_v60  ;;  %v2321_v35 = vld [vmem:[#allocation13 + $0x20] sm:$0xff]  ;;  %v2324_v60 = vld [vmem:[#allocation13 + $0x38] sm:$0xff] }
 0x6c4   : > { %v2192_v23 = vmul.f32 %v3436_v19, %v2191_v39  ;;  %v2181_v52 = vsub.f32 1.5, %v2180_v53  ;;  %v2198_v50 = vmul.f32 %v3440_v1, %v4849_v7  ;;  %2355 = vadd.xlane.f32.xlu0 %v2336_v55  ;;  %v2273_v26 = vmul.f32 %v2176_v51, %v4739_v5 }
 0x6c5   : > { %3441 = vrsqrt.f32 %v4884_v49  ;;  %v2305_v47 = vadd.f32 %v4802_v36, %v2288_v22  ;;  %vm2204_vm12 = vweird.f32 %v3440_v1  ;;  %vm2213_vm0 = vweird.f32 %v4884_v49 }
 0x6c6   : > { %v2182_v10 = vmul.f32 %v4856_v15, %v2181_v52  ;;  %v2199_v37 = vmul.f32 %v3440_v1, %v2198_v50  ;;  %v2196_v44 = vsel %vm2195_vm9, %v3436_v19, %v2192_v23  ;;  %v2290_v17 = vmul.f32 %v4799_v63, %v2273_v26  ;;  %v2325_v19 = vld [vmem:[#allocation13 + $0x40] sm:$0xff]  ;;  %vm2205_vm14 = vmor %vm2203_vm13, %vm2204_vm12 }
 0x6c7   : > { %v2275_v27 = vmul.f32 %v2196_v44, %v4748_v3  ;;  %v2337_v4 = vmul.f32 %v2321_v35, %v2305_v47 }
 0x6c8   : > { %v2200_v57 = vmul.f32 0.5, %v2199_v37  ;;  %v2066_v58 = vpop.xlane.xlu1 %2065  ;;  %v2186_v2 = vsel %vm2185_vm11, %v4856_v15, %v2182_v10  ;;  %v2307_v13 = vadd.f32 %v4802_v36, %v2290_v17  ;;  %v2326_v37 = vld [vmem:[#allocation13 + $0x48] sm:$0xff] }
 0x6c9   : > { %v2086_v5 = vmul.f32 0.03125, %v2066_v58  ;;  %v2292_v18 = vmul.f32 %v4799_v63, %v2275_v27  ;;  %v2274_v38 = vmul.f32 %v2186_v2, %v4751_v48  ;;  %2357 = vadd.xlane.f32.xlu1 %v2337_v4 }
 0x6ca   : > { %v2201_v42 = vsub.f32 1.5, %v2200_v57  ;;  %v2339_v3 = vmul.f32 %v2323_v20, %v2307_v13 }
 0x6cb   : > { %v3442_v30 = vpop.eup %3441  ;;  %v2102_v41 = vadd.f32 1e-05, %v2086_v5  ;;  %v2309_v0 = vadd.f32 %v4802_v36, %v2292_v18  ;;  %v2291_v39 = vmul.f32 %v4799_v63, %v2274_v38  ;;  %v2327_v18 = vld [vmem:[#allocation13 + $0x50] sm:$0xff] }
 0x6cc   : > { %v2202_v33 = vmul.f32 %v3440_v1, %v2201_v42  ;;  %v2208_v15 = vmul.f32 %v3442_v30, %v4884_v49  ;;  %2361 = vadd.xlane.f32.xlu0 %v2339_v3  ;;  %vm2214_vm15 = vweird.f32 %v3442_v30 }
 0x6cd   : > { %3443 = vrsqrt.f32 %v2102_v41  ;;  %v2341_v53 = vmul.f32 %v2325_v19, %v2309_v0  ;;  %v2308_v48 = vadd.f32 %v4802_v36, %v2291_v39  ;;  %vm2215_vm1 = vmor %vm2213_vm0, %vm2214_vm15  ;;  %vm2223_vm3 = vweird.f32 %v2102_v41 }
 0x6ce   : > { %v2209_v55 = vmul.f32 %v3442_v30, %v2208_v15  ;;  %v2206_v51 = vsel %vm2205_vm14, %v3440_v1, %v2202_v33 }
 0x6cf   : > { %2365 = vadd.xlane.f32.xlu2 %v2341_v53  ;;  %v2276_v23 = vmul.f32 %v2206_v51, %v4759_v11  ;;  %v2340_v22 = vmul.f32 %v2324_v60, %v2308_v48  ;;  %v2328_v48 = vld [vmem:[#allocation13 + $0x58] sm:$0xff] }
 0x6d0   : > { %v2210_v52 = vmul.f32 0.5, %v2209_v55  ;;  %v2068_v50 = vpop.xlane.xlu2 %2067 }
 0x6d1   : > { %v2087_v7 = vmul.f32 0.03125, %v2068_v50  ;;  %v2293_v26 = vmul.f32 %v4799_v63, %v2276_v23  ;;  %2363 = vadd.xlane.f32.xlu1 %v2340_v22 }
 0x6d2   : > { %v2211_v10 = vsub.f32 1.5, %v2210_v52 }
 0x6d3   : > { %v3444_v35 = vpop.eup %3443  ;;  %v2103_v44 = vadd.f32 1e-05, %v2087_v7  ;;  %v2310_v47 = vadd.f32 %v4802_v36, %v2293_v26 }
 0x6d4   : > { %v2212_v17 = vmul.f32 %v3442_v30, %v2211_v10  ;;  %v2218_v1 = vmul.f32 %v3444_v35, %v2102_v41  ;;  %vm2224_vm2 = vweird.f32 %v3444_v35 }
 0x6d5   : > { %3445 = vrsqrt.f32 %v2103_v44  ;;  %v2342_v11 = vmul.f32 %v2326_v37, %v2310_v47  ;;  %vm2225_vm4 = vmor %vm2223_vm3, %vm2224_vm2  ;;  %vm2233_vm6 = vweird.f32 %v2103_v44  ;;  %vm2582_vm2 = vcmask 195712  }
 0x6d6   : > { %v2219_v27 = vmul.f32 %v3444_v35, %v2218_v1  ;;  %v2216_v57 = vsel %vm2215_vm1, %v3442_v30, %v2212_v17  ;;  %v2329_v1 = vld [vmem:[#allocation13 + $0x60] sm:$0xff]  ;;  %vm2578_vm1 = vcmask 130112   ;;  %vm2586_vm3 = vcmask 261312  }
 0x6d7   : > { %2367 = vadd.xlane.f32.xlu0 %v2342_v11  ;;  %v2277_v58 = vmul.f32 %v2216_v57, %v4765_v56 }
 0x6d8   : > { %v2220_v20 = vmul.f32 0.5, %v2219_v27  ;;  %v2070_v2 = vpop.xlane.xlu0 %2069 }
 0x6d9   : > { %v2088_v5 = vmul.f32 0.03125, %v2070_v2  ;;  %v2294_v4 = vmul.f32 %v4799_v63, %v2277_v58 }
 0x6da   : > { %v2221_v13 = vsub.f32 1.5, %v2220_v20 }
 0x6db   : > { %v3446_v42 = vpop.eup %3445  ;;  %v2104_v19 = vadd.f32 1e-05, %v2088_v5  ;;  %v2311_v49 = vadd.f32 %v4802_v36, %v2294_v4 }
 0x6dc   : > { %v2222_v38 = vmul.f32 %v3444_v35, %v2221_v13  ;;  %v2228_v3 = vmul.f32 %v3446_v42, %v2103_v44  ;;  %vm2234_vm5 = vweird.f32 %v3446_v42 }
 0x6dd   : > { %3447 = vrsqrt.f32 %v2104_v19  ;;  %v2343_v30 = vmul.f32 %v2327_v18, %v2311_v49  ;;  %vm2235_vm7 = vmor %vm2233_vm6, %vm2234_vm5  ;;  %vm2243_vm9 = vweird.f32 %v2104_v19  ;;  %vm2594_vm5 = vcmask 392512  }
 0x6de   : > { %v2229_v0 = vmul.f32 %v3446_v42, %v2228_v3  ;;  %v2226_v56 = vsel %vm2225_vm4, %v3444_v35, %v2222_v38  ;;  %vm2590_vm4 = vcmask 326912   ;;  %vm2598_vm6 = vcmask 458112  }
 0x6df   : > { %2369 = vadd.xlane.f32.xlu1 %v2343_v30  ;;  %v2278_v33 = vmul.f32 %v2226_v56, %v4771_v62 }
 0x6e0   : > { %v2230_v15 = vmul.f32 0.5, %v2229_v0  ;;  %v2072_v39 = vpop.xlane.xlu1 %2071 }
 0x6e1   : > { %v2089_v53 = vmul.f32 0.03125, %v2072_v39  ;;  %v2295_v60 = vmul.f32 %v4799_v63, %v2278_v33 }
 0x6e2   : > { %v2231_v55 = vsub.f32 1.5, %v2230_v15 }
 0x6e3   : > { %v3448_v51 = vpop.eup %3447  ;;  %v2105_v23 = vadd.f32 1e-05, %v2089_v53  ;;  %v2312_v41 = vadd.f32 %v4802_v36, %v2295_v60  ;;  %v2331_v53 = vld [vmem:[#allocation13 + $0x70] sm:$0xff] }
 0x6e4   : > { %v2232_v52 = vmul.f32 %v3446_v42, %v2231_v55  ;;  %v2238_v50 = vmul.f32 %v3448_v51, %v2104_v19  ;;  %vm2244_vm8 = vweird.f32 %v3448_v51 }
 0x6e5   : > { %3449 = vrsqrt.f32 %v2105_v23  ;;  %v2344_v22 = vmul.f32 %v2328_v48, %v2312_v41  ;;  %vm2245_vm10 = vmor %vm2243_vm9, %vm2244_vm8  ;;  %vm2253_vm12 = vweird.f32 %v2105_v23  ;;  %vm2606_vm8 = vcmask 589312  }
 0x6e6   : > { %v2239_v7 = vmul.f32 %v3448_v51, %v2238_v50  ;;  %v2236_v62 = vsel %vm2235_vm7, %v3446_v42, %v2232_v52  ;;  %v2330_v42 = vld [vmem:[#allocation13 + $0x68] sm:$0xff]  ;;  %v2332_v52 = vld [vmem:[#allocation13 + $0x78] sm:$0xff]  ;;  %vm2602_vm7 = vcmask 523712   ;;  %vm2610_vm9 = vcmask 654912  }
 0x6e7   : > { %2371 = vadd.xlane.f32.xlu2 %v2344_v22  ;;  %v2279_v26 = vmul.f32 %v2236_v62, %v4777_v54  ;;  %v3793_v22 = vmov 0  }
 0x6e8   : > { %v2240_v10 = vmul.f32 0.5, %v2239_v7  ;;  %v2074_v37 = vpop.xlane.xlu2 %2073  ;;  %3283 = vset.pattern.permute.xlu1 %v3793_v22  ;;  %3284 = vset.pattern.permute.xlu2 %v3793_v22 }
 0x6e9   : > { %v2090_v35 = vmul.f32 0.03125, %v2074_v37  ;;  %v2296_v47 = vmul.f32 %v4799_v63, %v2279_v26  ;;  %3285 = vset.pattern.permute.xlu0 %v3793_v22  ;;  %v2604_v22 = vadd.s32 4294967232, %v4313_v59 }
 0x6ea   : > { %v2241_v17 = vsub.f32 1.5, %v2240_v10 }
 0x6eb   : > { %v3450_v11 = vpop.eup %3449  ;;  %v2106_v27 = vadd.f32 1e-05, %v2090_v35  ;;  %v2313_v44 = vadd.f32 %v4802_v36, %v2296_v47 }
 0x6ec   : > { %v2242_v57 = vmul.f32 %v3448_v51, %v2241_v17  ;;  %v2248_v58 = vmul.f32 %v3450_v11, %v2105_v23  ;;  %vm2254_vm11 = vweird.f32 %v3450_v11 }
 0x6ed   : > { %3451 = vrsqrt.f32 %v2106_v27  ;;  %v2345_v20 = vmul.f32 %v2329_v1, %v2313_v44  ;;  %vm2255_vm13 = vmor %vm2253_vm12, %vm2254_vm11  ;;  %vm2263_vm15 = vweird.f32 %v2106_v27  ;;  %vm2618_vm11 = vcmask 786112  }
 0x6ee   : > { %v2249_v2 = vmul.f32 %v3450_v11, %v2248_v58  ;;  %v2246_v54 = vsel %vm2245_vm10, %v3448_v51, %v2242_v57  ;;  %vm2614_vm10 = vcmask 720512   ;;  %vm2622_vm12 = vcmask 851712  }
 0x6ef   : > { %2373 = vadd.xlane.f32.xlu0 %v2345_v20  ;;  %v2280_v5 = vmul.f32 %v2246_v54, %v4783_v9 }
 0x6f0   : > { %v2250_v4 = vmul.f32 0.5, %v2249_v2 }
 0x6f1   : > { %v2297_v13 = vmul.f32 %v4799_v63, %v2280_v5 }
 0x6f2   : > { %v2251_v18 = vsub.f32 1.5, %v2250_v4 }
 0x6f3   : > { %v3452_v49 = vpop.eup %3451  ;;  %v2314_v38 = vadd.f32 %v4802_v36, %v2297_v13 }
 0x6f4   : > { %v2252_v3 = vmul.f32 %v3450_v11, %v2251_v18  ;;  %v2258_v19 = vmul.f32 %v3452_v49, %v2106_v27  ;;  %vm2264_vm14 = vweird.f32 %v3452_v49 }
 0x6f5   : > { %v2346_v30 = vmul.f32 %v2330_v42, %v2314_v38  ;;  %vm2265_vm0 = vmor %vm2263_vm15, %vm2264_vm14  ;;  %vm2630_vm14 = vcmask 982912   ;;  %vm2634_vm15 = vcmask 1048512  }
 0x6f6   : > { %v2259_v0 = vmul.f32 %v3452_v49, %v2258_v19  ;;  %v2256_v56 = vsel %vm2255_vm13, %v3450_v11, %v2252_v3  ;;  %v2584_v3 = vadd.s32 4294967272, %v4313_v59  ;;  %vm2626_vm13 = vcmask 917312  }
 0x6f7   : > { %2375 = vadd.xlane.f32.xlu1 %v2346_v30  ;;  %v2281_v33 = vmul.f32 %v2256_v56, %v4789_v46  ;;  %v2592_v56 = vadd.s32 4294967256, %v4313_v59 }
 0x6f8   : > { %v2260_v9 = vmul.f32 0.5, %v2259_v0 }
 0x6f9   : > { %v2298_v15 = vmul.f32 %v4799_v63, %v2281_v33  ;;  %v2588_v33 = vadd.s32 4294967264, %v4313_v59 }
 0x6fa   : > { %v2261_v39 = vsub.f32 1.5, %v2260_v9 }
 0x6fb   : > { %v2315_v60 = vadd.f32 %v4802_v36, %v2298_v15 }
 0x6fc   : > { %v2262_v55 = vmul.f32 %v3452_v49, %v2261_v39 }
 0x6fd   : > { %v2347_v48 = vmul.f32 %v2331_v53, %v2315_v60  ;;  %v2600_v60 = vadd.s32 4294967240, %v4313_v59 }
 0x6fe   : > { %v2266_v51 = vsel %vm2265_vm0, %v3452_v49, %v2262_v55  ;;  %v2576_v49 = vadd.s32 4294967288, %v4313_v59 }
 0x6ff   : > { %2377 = vadd.xlane.f32.xlu2 %v2347_v48  ;;  %v2282_v23 = vmul.f32 %v2266_v51, %v4795_v12  ;;  %v2596_v48 = vadd.s32 4294967248, %v4313_v59 }
 0x701   : > { %v2299_v41 = vmul.f32 %v4799_v63, %v2282_v23 }
 0x703   : > { %v2316_v46 = vadd.f32 %v4802_v36, %v2299_v41 }
 0x705   : > { %v2348_v50 = vmul.f32 %v2332_v52, %v2316_v46 }
 0x706   : > { %v2354_v62 = vpop.xlane.xlu2 %2353 }
 0x707   : > { %2379 = vadd.xlane.f32.xlu0 %v2348_v50  ;;  %v2497_v12 = vadd.f32 %v4653_v24, %v2354_v62 }
 0x70e   : > { %v2360_v36 = vpop.xlane.xlu2 %2359 }
 0x70f   : > { %v2500_v1 = vadd.f32 %v4683_v25, %v2360_v36 }
 0x72f   : > { %v2350_v7 = vpop.xlane.xlu0 %2349 }
 0x730   : > { %v2495_v26 = vadd.f32 %v4655_v21, %v2350_v7 }
 0x732   : > { %2528 = vperm.xlu1 %3283, %v2495_v26   ;;  %v2612_v26 = vadd.s32 4294967216, %v4313_v59 }
 0x734   : > { %v2352_v10 = vpop.xlane.xlu1 %2351 }
 0x735   : > { %v2496_v37 = vadd.f32 %v4662_v31, %v2352_v10  ;;  %v2608_v10 = vadd.s32 4294967224, %v4313_v59 }
 0x737   : > { %v2356_v63 = vpop.xlane.xlu0 %2355  ;;  %2531 = vperm.xlu2 %3284, %v2496_v37  }
 0x738   : > { %v2498_v35 = vadd.f32 %v4673_v6, %v2356_v63 }
 0x73a   : > { %2534 = vperm.xlu1 %3283, %v2497_v12   ;;  %2537 = vperm.xlu0 %3285, %v2498_v35   ;;  %v2616_v12 = vadd.s32 4294967208, %v4313_v59 }
 0x73c   : > { %v2358_v47 = vpop.xlane.xlu1 %2357 }
 0x73d   : > { %v2499_v17 = vadd.f32 %v4667_v14, %v2358_v47 }
 0x73f   : > { %2540 = vperm.xlu2 %3284, %v2499_v17   ;;  %v2362_v31 = vpop.xlane.xlu0 %2361 }
 0x740   : > { %v2501_v27 = vadd.f32 %v4679_v28, %v2362_v31  ;;  %v2620_v31 = vadd.s32 4294967200, %v4313_v59 }
 0x742   : > { %2543 = vperm.xlu1 %3283, %v2500_v1   ;;  %v2366_v21 = vpop.xlane.xlu2 %2365 }
 0x743   : > { %v2503_v11 = vadd.f32 %v4690_v34, %v2366_v21 }
 0x744   : > { %v2364_v24 = vpop.xlane.xlu1 %2363 }
 0x745   : > { %2552 = vperm.xlu0 %3285, %v2503_v11   ;;  %v2502_v6 = vadd.f32 %v4698_v45, %v2364_v24  ;;  %v2624_v11 = vadd.s32 4294967192, %v4313_v59 }
 0x747   : > { %2546 = vperm.xlu2 %3284, %v2501_v27  }
 0x74a   : > { %2549 = vperm.xlu1 %3283, %v2502_v6   ;;  %v2368_v44 = vpop.xlane.xlu0 %2367 }
 0x74b   : > { %v2504_v57 = vadd.f32 %v4665_v29, %v2368_v44  ;;  %v2628_v44 = vadd.s32 4294967184, %v4313_v59 }
 0x74f   : > { %2555 = vperm.xlu2 %3284, %v2504_v57  }
 0x752   : > { %v2370_v14 = vpop.xlane.xlu1 %2369 }
 0x753   : > { %v2505_v25 = vadd.f32 %v4709_v61, %v2370_v14  ;;  %v2632_v14 = vadd.s32 4294967176, %v4313_v59 }
 0x755   : > { %2558 = vperm.xlu1 %3283, %v2505_v25  }
 0x75a   : > { %v2372_v58 = vpop.xlane.xlu2 %2371 }
 0x75b   : > { %v2506_v34 = vadd.f32 %v4704_v32, %v2372_v58 }
 0x75d   : > { %2561 = vperm.xlu0 %3285, %v2506_v34  }
 0x762   : > { %v2374_v20 = vpop.xlane.xlu0 %2373 }
 0x763   : > { %v2507_v2 = vadd.f32 %v4713_v40, %v2374_v20  ;;  %v2580_v40 = vadd.s32 4294967280, %v4313_v59 }
 0x765   : > { %2564 = vperm.xlu2 %3284, %v2507_v2  }
 0x76a   : > { %v2376_v28 = vpop.xlane.xlu1 %2375 }
 0x76b   : > { %v2508_v45 = vadd.f32 %v4711_v43, %v2376_v28 }
 0x76d   : > { %2567 = vperm.xlu1 %3283, %v2508_v45  }
 0x772   : > { %v2378_v54 = vpop.xlane.xlu2 %2377 }
 0x773   : > { %v2509_v29 = vadd.f32 %v4811_v16, %v2378_v54 }
 0x775   : > { %2570 = vperm.xlu0 %3285, %v2509_v29  }
 0x77a   : > { %v2380_v5 = vpop.xlane.xlu0 %2379 }
 0x77b   : > { %v2510_v61 = vadd.f32 %v4807_v8, %v2380_v5 }
 0x77d   : > { %2573 = vperm.xlu2 %3284, %v2510_v61  }
 0x791   : > { %v2532_v13 = vpop.permute.xlu2 %2531 }
 0x792   : > { %v2577_v30 = vperm.slane %v2532_v13, %v2576_v49 }
 0x799   : > { %v2541_v18 = vpop.permute.xlu2 %2540 }
 0x79a   : > { %v2589_v55 = vperm.slane %v2541_v18, %v2588_v33 }
 0x7a1   : > { %v2547_v38 = vpop.permute.xlu2 %2546 }
 0x7a2   : > { %v2597_v50 = vperm.slane %v2547_v38, %v2596_v48 }
 0x7a4   : > { %v2529_v4 = vpop.permute.xlu1 %2528 }
 0x7a5   : > { %v2575_v43 = vperm.slane %v2529_v4, %v4313_v59 }
 0x7a7   : > { %v2579_v8 = vsel %vm2578_vm1, %v2577_v30, %v2575_v43 }
 0x7a9   : > { %v2556_v51 = vpop.permute.xlu2 %2555 }
 0x7aa   : > { %v2609_v1 = vperm.slane %v2556_v51, %v2608_v10 }
 0x7ac   : > { %v2535_v32 = vpop.permute.xlu1 %2534  ;;  %v2538_v16 = vpop.permute.xlu0 %2537 }
 0x7ad   : > { %v2581_v19 = vperm.slane %v2535_v32, %v2580_v40  ;;  %v2585_v0 = vperm.slane %v2538_v16, %v2584_v3 }
 0x7af   : > { %v2583_v9 = vsel %vm2582_vm2, %v2581_v19, %v2579_v8 }
 0x7b0   : > { %v2587_v39 = vsel %vm2586_vm3, %v2585_v0, %v2583_v9 }
 0x7b1   : > { %v2591_v41 = vsel %vm2590_vm4, %v2589_v55, %v2587_v39 }
 0x7b4   : > { %v2544_v42 = vpop.permute.xlu1 %2543 }
 0x7b5   : > { %v2593_v53 = vperm.slane %v2544_v42, %v2592_v56 }
 0x7b7   : > { %v2553_v23 = vpop.permute.xlu0 %2552  ;;  %v2595_v52 = vsel %vm2594_vm5, %v2593_v53, %v2591_v41 }
 0x7b8   : > { %v2599_v62 = vsel %vm2598_vm6, %v2597_v50, %v2595_v52  ;;  %v2605_v63 = vperm.slane %v2553_v23, %v2604_v22 }
 0x7bc   : > { %v2550_v15 = vpop.permute.xlu1 %2549 }
 0x7bd   : > { %v2601_v46 = vperm.slane %v2550_v15, %v2600_v60 }
 0x7bf   : > { %v2603_v37 = vsel %vm2602_vm7, %v2601_v46, %v2599_v62  ;;  %v2565_v35 = vpop.permute.xlu2 %2564 }
 0x7c0   : > { %v2607_v47 = vsel %vm2606_vm8, %v2605_v63, %v2603_v37  ;;  %v2621_v58 = vperm.slane %v2565_v35, %v2620_v31 }
 0x7c1   : > { %v2611_v27 = vsel %vm2610_vm9, %v2609_v1, %v2607_v47 }
 0x7c7   : > { %v2559_v7 = vpop.permute.xlu1 %2558 }
 0x7c8   : > { %v2613_v17 = vperm.slane %v2559_v7, %v2612_v26 }
 0x7ca   : > { %v2615_v6 = vsel %vm2614_vm10, %v2613_v17, %v2611_v27 }
 0x7cf   : > { %v2562_v36 = vpop.permute.xlu0 %2561 }
 0x7d0   : > { %v2617_v21 = vperm.slane %v2562_v36, %v2616_v12 }
 0x7d2   : > { %v2619_v57 = vsel %vm2618_vm11, %v2617_v21, %v2615_v6 }
 0x7d3   : > { %v2623_v2 = vsel %vm2622_vm12, %v2621_v58, %v2619_v57 }
 0x7d7   : > { %v2574_v34 = vpop.permute.xlu2 %2573 }
 0x7d8   : > { %v2633_v45 = vperm.slane %v2574_v34, %v2632_v14 }
 0x7df   : > { %v2568_v24 = vpop.permute.xlu1 %2567 }
 0x7e0   : > { %v2625_v25 = vperm.slane %v2568_v24, %v2624_v11 }
 0x7e2   : > { %v2627_v54 = vsel %vm2626_vm13, %v2625_v25, %v2623_v2 }
 0x7e7   : > { %v2571_v20 = vpop.permute.xlu0 %2570 }
 0x7e8   : > { %v2629_v28 = vperm.slane %v2571_v20, %v2628_v44 }
 0x7ea   : > { %v2631_v29 = vsel %vm2630_vm14, %v2629_v28, %v2627_v54 }
 0x7eb   : > { %v2635_v59 = vsel %vm2634_vm15, %v2633_v45, %v2631_v29 }
 0x7ec   : > { %2637 = vst [vmem:[%s435_s15] sm:$0x1] %v2635_v59 }
 0x7ed   : > { %3720 = shalt.err (!%p3717_p9)
}
 0x7ee   : > { %3174 = dma.vmem_to_hbm [thread:$0]  (%p3957_p0), %s2650_s17, 16, %s2652_s21, %s2639_s12  }
 0x7ef PF: > { %s2663_s0 = sand.u32 1, %s3767_s27   ;;  %p5032_p10 = scmp.ge.s32.totalorder %s3779_s30, 2 }
 0x7f0   : > { %s2664_s1 = scalar_lea.sflag [#allocation5], %s2663_s0 }
 0x7f1   : > { %p3203_p11 = pnand %p5032_p10, %p3963_p6 }
 0x7f3   : > { %p3204_p12 = pneg %p3203_p11 }
 0x7f5   : > { %3762 = dma.done.wait (%p3204_p12), %s2664_s1, 16  }
 0x7f6   : > { %3764 = vsyncadd (%p3204_p12), %s2664_s1, 4294967280  ;;  %p22_p2 = scmp.ge.s32.totalorder %s3933_s16, 4   ;;  %s5033_s27 = smov %s3771_s28 }
 0x7f7   : > { %s5034_s28 = smov %s3775_s29  ;;  %s5035_s29 = smov %s3945_s22 }
 0x7f8   : > { %s5036_s30 = smov %s3933_s16  ;;  %24 = sbr.rel (!%p22_p2) target bundleno = 12 (0xc), region = 124 }
 0x7fd   :  { %2669 = vsyncpa [#allocation4], 1 }
 0x7fe   :  { %2671 = vsyncpa [#allocation4 + $0x1], 1 }
 0x7ff   :  { %2672 = vsyncpa [#allocation7], 1 }
 0x800   :  { %2673 = vsyncpa [#allocation11], 1 }
 0x801   :  { %2674 = vsyncpa [#allocation14], 1 }
 0x802   :  { %2675 = vsyncpa [#allocation5], 1 }
 0x803   :  { %2677 = vsyncpa [#allocation5 + $0x1], 1 }

// kernel: tpu_custom_call.1
= control target key start
LH: loop header
LB: loop body
LE: loop exit
PB: predicated region body
PF: predicated region fallthrough
CT: control target
= control target key end

     0   :  { %s4996_s0 = inlined_call_operand.hbm [shape: bf16[128,128], index: 0, kind: input, shape index: {}]   ;;  %s4997_s1 = inlined_call_operand.hbm [shape: f32[128,128], index: 1, kind: input, shape index: {}]   ;;  %s4998_s2 = inlined_call_operand.hbm [shape: bf16[2,128,256], index: 2, kind: input, shape index: {}]   ;;  %s4999_s3 = inlined_call_operand.hbm [shape: bf16[128,128], index: 3, kind: input, shape index: {}]   ;;  %s5000_s4 = inlined_call_operand.hbm [shape: bf16[128,128], index: 4, kind: input, shape index: {}]   ;;  %s5001_s5 = inlined_call_operand.hbm [shape: bf16[128,128], index: 5, kind: input, shape index: {}]   ;;  %s5002_s6 = inlined_call_operand.hbm [shape: f32[128,128], index: 6, kind: input, shape index: {}]   ;;  %s5003_s7 = inlined_call_operand.hbm [shape: f32[8,128], index: 7, kind: input, shape index: {}]   ;;  %s5004_s8 = inlined_call_operand.hbm [shape: f32[2,1,128], index: 8, kind: output, shape index: {}]  }
   0x1   :  { %5007 = sst [smem:[#allocation24_spill]] %s4996_s0 }
   0x2   :  { %5008 = sst [smem:[#allocation25_spill]] %s4997_s1 }
   0x3   :  { %5009 = sst [smem:[#allocation26_spill]] %s4999_s3 }
   0x4   :  { %5010 = sst [smem:[#allocation27_spill]] %s5000_s4 }
   0x5   :  { %13 = vsyncpa [#allocation4], 0 }
   0x6   :  { %14 = vsyncpa [#allocation7], 0 }
   0x7   :  { %15 = vsyncpa [#allocation11], 0 }
   0x8   :  { %16 = vsyncpa [#allocation14], 0 }
   0x9   :  { %17 = vsyncpa [#allocation5], 0 }
   0xa   :  { %19 = vsyncpa [#allocation5 + $0x1], 0  ;;  %s3839_s27 = smov 0   ;;  %s3841_s28 = smov 0  }
   0xb   :  { %s3843_s29 = smov 0   ;;  %s3845_s30 = smov 0  }
   0xc LB: > { %s5011_s0 = sld [smem:[#allocation24_spill]]  ;;  %s3863_s12 = sadd.s32 4294967295, %s3779_s30   ;;  %s3779_s30 = sphi %s3845_s30, %s5036_s30   ;;  %s3775_s29 = sphi %s3843_s29, %s5035_s29   ;;  %s3771_s28 = sphi %s3841_s28, %s5034_s28   ;;  %s3767_s27 = sphi %s3839_s27, %s5033_s27  }
   0xd   : > { %p2784_p0 = scmp.ge.s32.totalorder %s3779_s30, 1  ;;  %p88_p1 = scmp.eq.s32.totalorder %s3863_s12, 0 }
   0xe   : > { %p229_p2 = scmp.lt.s32.totalorder %s3779_s30, 3  ;;  %s3781_s14 = smov [#allocation3]  }
   0xf   : > { %s242_s15 = sshll.u32 %s3781_s14, 4  ;;  %s5013_s1 = sld [smem:[#allocation25_spill]]  ;;  %s243_s15 = int_to_ptr.vmem [resolvable:$true] %s242_s15 }
  0x10   : > { %p3868_p3 = pnand %p2784_p0, %p229_p2  ;;  %s3782_s20 = smov [#allocation6]  }
  0x11   : > { %s256_s21 = sshll.u32 %s3782_s20, 4  ;;  %s3783_s22 = smov 64   ;;  %s257_s21 = int_to_ptr.vmem [resolvable:$true] %s256_s21 }
  0x12   : > { %s240_s11 = sshll.u32 %s5011_s0, 4  ;;  %p3176_p4 = pneg %p3868_p3  ;;  %s241_s11 = int_to_ptr.hbm [resolvable:$true] %s240_s11 }
  0x13   : > { %s3784_s23 = smov 4   ;;  %s5005_s24 = smov 128  }
  0x14   : > { %p3880_p6 = pnand %p3176_p4, %p88_p1  ;;  %s5006_s25 = smov 8  }
  0x15   : > { %s254_s18 = sshll.u32 %s5013_s1, 4  ;;  %s5015_s4 = sld [smem:[#allocation27_spill]]  ;;  %s255_s18 = int_to_ptr.hbm [resolvable:$true] %s254_s18 }
  0x16   : > { %3179 = dma.hbm_to_vmem [thread:$0]  (!%p3880_p6), %s241_s11, 1024, %s243_s15, [#allocation4], %s3783_s22, %s3783_s22, %s3784_s23  }
  0x17   : > { %3182 = dma.hbm_to_vmem [thread:$0]  (!%p3880_p6), %s255_s18, 2048, %s257_s21, [#allocation7], %s5005_s24, %s5005_s24, %s5006_s25  }
  0x18   : > { %s3787_s14 = smov [#allocation10]   ;;  %s310_s15 = sshll.u32 %s5002_s6, 4  ;;  %s311_s15 = int_to_ptr.hbm [resolvable:$true] %s310_s15 }
  0x19   : > { %s284_s16 = sshll.u32 %s3787_s14, 4  ;;  %s3788_s18 = smov [#allocation13]   ;;  %s285_s16 = int_to_ptr.vmem [resolvable:$true] %s284_s16 }
  0x1a   : > { %s312_s20 = sshll.u32 %s3788_s18, 4  ;;  %s5016_s3 = sld [smem:[#allocation26_spill]]  ;;  %s313_s20 = int_to_ptr.vmem [resolvable:$true] %s312_s20 }
  0x1b   : > { %s282_s10 = sshll.u32 %s5015_s4, 4  ;;  %s325_s26 = sshll.u32 %s5003_s7, 4  ;;  %s283_s10 = int_to_ptr.hbm [resolvable:$true] %s282_s10  ;;  %s326_s26 = int_to_ptr.hbm [resolvable:$true] %s325_s26 }
  0x1c   : > { %3188 = dma.hbm_to_vmem [thread:$0]  (!%p3880_p6), %s283_s10, 1024, %s285_s16, [#allocation11], %s3783_s22, %s3783_s22, %s3784_s23  }
  0x1d   : > { %3194 = dma.hbm_to_vmem [thread:$0]  (!%p3880_p6), %s311_s15, 2048, %s313_s20, [#allocation14], %s5005_s24, %s5005_s24, %s5006_s25  }
  0x1e   : > { %s296_s10 = sshll.u32 %s5001_s5, 4  ;;  %s3789_s16 = smov [#allocation9]   ;;  %s297_s10 = int_to_ptr.hbm [resolvable:$true] %s296_s10 }
  0x1f   : > { %s270_s11 = sshll.u32 %s3789_s16, 4  ;;  %s3790_s15 = smov [#allocation12]   ;;  %s271_s11 = int_to_ptr.vmem [resolvable:$true] %s270_s11 }
  0x20   : > { %s268_s9 = sshll.u32 %s5016_s3, 4  ;;  %s298_s18 = sshll.u32 %s3790_s15, 4  ;;  %s269_s9 = int_to_ptr.hbm [resolvable:$true] %s268_s9  ;;  %s299_s18 = int_to_ptr.vmem [resolvable:$true] %s298_s18 }
  0x21   : > { %3185 = dma.hbm_to_vmem [thread:$0]  (!%p3880_p6), %s269_s9, 1024, %s271_s11, [#allocation7], %s3783_s22, %s3783_s22, %s3784_s23  }
  0x22   : > { %3191 = dma.hbm_to_vmem [thread:$0]  (!%p3880_p6), %s297_s10, 1024, %s299_s18, [#allocation11], %s3783_s22, %s3783_s22, %s3784_s23  }
  0x23   : > { %s3791_s9 = smov [#allocation15]   ;;  %s2783_s17 = sadd.s32 4294967294, %s3779_s30  }
  0x24   : > { %s327_s14 = sshll.u32 %s3791_s9, 4  ;;  %s3933_s16 = sadd.s32 1, %s3779_s30   ;;  %s328_s14 = int_to_ptr.vmem [resolvable:$true] %s327_s14 }
  0x25   : > { %3197 = dma.hbm_to_vmem [thread:$0]  (!%p3880_p6), %s326_s26, 128, %s328_s14, [#allocation14]  }
  0x26   : > { %s74_s11 = sadd.s32 1, %s3775_s29  ;;  %s71_s15 = ssub.s32 %s3779_s30, %s3933_s16 }
  0x27   : > { %p81_p7 = scmp.ne.s32.totalorder %s3775_s29, %s3771_s28  ;;  %p72_p8 = scmp.eq.s32.totalorder %s71_s15, 0 }
  0x28   : > { %p82_p9 = scmp.eq.s32.totalorder %s3779_s30, 0  ;;  %p87_p10 = scmp.ne.s32.totalorder %s3771_s28, %s3767_s27 }
  0x29   : > { %p216_p11 = scmp.eq.s32.totalorder %s3863_s12, 1  ;;  %p222_p2 = scmp.eq.s32.totalorder %s2783_s17, 1 }
  0x2a   : > { %s3945_s22 = scalar_select %p72_p8, %s3775_s29, %s74_s11  }
  0x2b   : > { %p3947_p12 = por %p82_p9, %p81_p7  ;;  %p3953_p13 = por %p88_p1, %p87_p10 }
  0x2c   : > { %p3957_p0 = por %p216_p11, %p81_p7  ;;  %p3213_p4 = scmp.lt.s32.totalorder %s3779_s30, 2 }
  0x2d   : > { %s338_s18 = sand.u32 1, %s3779_s30   ;;  %p3963_p6 = por %p222_p2, %p87_p10 }
  0x2e   : > { %s340_s21 = sand.u32 1, %s3775_s29   ;;  %s3032_s26 = sshll.u32 %s3779_s30, 7 }
  0x2f   : > { %s2793_s9 = sshll.u32 %s340_s21, 7  ;;  %s347_s15 = scalar_lea.hbm %s4998_s2, %s3032_s26 }
  0x30   : > { %s348_s24 = sshll.u32 %s347_s15, 4  ;;  %s342_s25 = scalar_lea.vmem [#allocation8], %s2793_s9  ;;  %s349_s24 = int_to_ptr.hbm [resolvable:$true] %s348_s24 }
  0x31   : > { %s350_s0 = sshll.u32 %s342_s25, 4  ;;  %p3974_p7 = pnand %p3213_p4, %p3947_p12  ;;  %s351_s0 = int_to_ptr.vmem [resolvable:$true] %s350_s0 }
  0x32   : > { %s339_s1 = scalar_lea.sflag [#allocation4], %s338_s18  ;;  %s3663_s3 = sshra.s32 %s349_s24, 4  ;;  %s3664_s3 = int_to_ptr.hbm [resolvable:$true] %s3663_s3 }
  0x33   : > { %s3665_s4 = scalar_lea.hbm %s3664_s3, 128  ;;  %p3667_p9 = pneg %p3974_p7 }
  0x34   : > { %p3666_p8 = scmp.ne.s32.totalorder %s3664_s3, %s3665_s4  ;;  %s3670_s25 = scalar_lea.hbm %s4998_s2, 256 }
  0x35   : > { %p3671_p12 = scmp.lt.s32.totalorder %s3664_s3, %s4998_s2  ;;  %p3672_p2 = scmp.lt.s32.totalorder %s3670_s25, %s3665_s4 }
  0x36   : > { %p3668_p10 = pnand %p3667_p9, %p3666_p8 }
  0x37   : > { %p3673_p4 = por %p3672_p2, %p3671_p12 }
  0x38   : > { %p3669_p11 = pneg %p3668_p10 }
  0x3a   : > { %p3674_p5 = pnand %p3673_p4, %p3669_p11 }
  0x3c   : > { %3677 = shalt.err (!%p3674_p5)
}
  0x3d   : > { %s5022_s18 = smov 8   ;;  %s5023_s14 = smov 128  }
  0x3e   : > { %3201 = dma.hbm_to_vmem [thread:$0]  (!%p3974_p7), %s349_s24, 2048, %s351_s0, %s339_s1, %s5023_s14, %s5023_s14, %s5022_s18  }
  0x3f   : > { %362 = sbr.rel (%p3868_p3) target bundleno = 2031 (0x7ef), region = 52 }
  0x44   : > { %3738 = dma.done.wait (%p88_p1), [#allocation4], 1024  }
  0x45   : > { %3740 = vsyncadd (%p88_p1), [#allocation4], 4294966272 }
  0x46   : > { %3742 = dma.done.wait (%p88_p1), [#allocation7], 2048  }
  0x47   : > { %3744 = vsyncadd (%p88_p1), [#allocation7], 4294965248  ;;  %s374_s3 = sand.u32 1, %s3863_s12   ;;  %s4003_s0 = sand.u32 1, %s3771_s28  }
  0x48   : > { %s2799_s1 = sshll.u32 %s4003_s0, 7  ;;  %s375_s4 = scalar_lea.sflag [#allocation4], %s374_s3 }
  0x49   : > { %s4006_s13 = scalar_lea.vmem [#allocation8], %s2799_s1 }
  0x4a   : > { %3746 = dma.done.wait (%p3953_p13), %s375_s4, 2048  }
  0x4b   : > { %3748 = vsyncadd (%p3953_p13), %s375_s4, 4294965248 }
  0x4c   : > { %3750 = dma.done.wait (%p88_p1), [#allocation7], 1024  }
  0x4d   : > { %3752 = vsyncadd (%p88_p1), [#allocation7], 4294966272 }
  0x4e   : > { %3754 = dma.done.wait (%p88_p1), [#allocation11], 2048  }
  0x4f   : > { %3756 = vsyncadd (%p88_p1), [#allocation11], 4294965248 }
  0x50   : > { %3758 = dma.done.wait (%p88_p1), [#allocation14], 2176  }
  0x51   : > { %3760 = vsyncadd (%p88_p1), [#allocation14], 4294965120  ;;  %v2895_v0 = vld [vmem:[%s4006_s13 + $0x70] sm:$0xf]  ;;  %v3056_v1 = vld [vmem:[%s4006_s13 + $0x74] sm:$0xf0]  ;;  %s2647_s11 = scalar_lea.hbm %s5004_s8, %s3863_s12 }
  0x52   : > { %v3055_v2 = vld [vmem:[%s4006_s13 + $0x74] sm:$0xf]  ;;  %v2896_v3 = vor.u32 %v3056_v1, %v2895_v0  ;;  %v2897_v4 = vld [vmem:[%s4006_s13 + $0x78] sm:$0xf0]  ;;  %v2887_v5 = vld [vmem:[%s4006_s13 + $0x60] sm:$0xf] }
  0x53   : > { %v3054_v6 = vld [vmem:[%s4006_s13 + $0x64] sm:$0xf0]  ;;  %v2900_v7 = vor.u32 %v3055_v2, %v2897_v4  ;;  %v3053_v8 = vld [vmem:[%s4006_s13 + $0x64] sm:$0xf]  ;;  %v2889_v9 = vld [vmem:[%s4006_s13 + $0x68] sm:$0xf0] }
  0x54   : > { %603 = vmatpush.bf16.msra.mxu0 %v2896_v3  ;;  %v2888_v10 = vor.u32 %v3054_v6, %v2887_v5  ;;  %957 = vmatpush.bf16.xpose.msra.mxu2 %v2896_v3  ;;  %v2892_v11 = vor.u32 %v3053_v8, %v2889_v9  ;;  %v2879_v12 = vld [vmem:[%s4006_s13 + $0x50] sm:$0xf]  ;;  %v3052_v13 = vld [vmem:[%s4006_s13 + $0x54] sm:$0xf0]  ;;  %v3051_v14 = vld [vmem:[%s4006_s13 + $0x54] sm:$0xf] }
  0x55   : > { %652 = vmatpush.bf16.msra.mxu1 %v2900_v7  ;;  %1006 = vmatpush.bf16.xpose.msra.mxu3 %v2900_v7  ;;  %v2881_v15 = vld [vmem:[%s4006_s13 + $0x58] sm:$0xf0]  ;;  %v2880_v16 = vor.u32 %v3052_v13, %v2879_v12  ;;  %v2871_v18 = vld [vmem:[%s4006_s13 + $0x40] sm:$0xf]  ;;  %v3050_v19 = vld [vmem:[%s4006_s13 + $0x44] sm:$0xf0] }
  0x56   : > { %v2884_v17 = vor.u32 %v3051_v14, %v2881_v15  ;;  %v3049_v20 = vld [vmem:[%s4006_s13 + $0x44] sm:$0xf]  ;;  %v2873_v21 = vld [vmem:[%s4006_s13 + $0x48] sm:$0xf0]  ;;  %v2863_v22 = vld [vmem:[%s4006_s13 + $0x30] sm:$0xf]  ;;  %v2872_v24 = vor.u32 %v3050_v19, %v2871_v18 }
  0x57   : > { %v3048_v23 = vld [vmem:[%s4006_s13 + $0x34] sm:$0xf0]  ;;  %v3047_v25 = vld [vmem:[%s4006_s13 + $0x34] sm:$0xf]  ;;  %v2876_v26 = vor.u32 %v3049_v20, %v2873_v21  ;;  %v2865_v27 = vld [vmem:[%s4006_s13 + $0x38] sm:$0xf0] }
  0x58   : > { %604 = vmatpush.bf16.msra.mxu0 %v2888_v10  ;;  %v2864_v28 = vor.u32 %v3048_v23, %v2863_v22  ;;  %v2868_v29 = vor.u32 %v3047_v25, %v2865_v27  ;;  %v2855_v30 = vld [vmem:[%s4006_s13 + $0x20] sm:$0xf]  ;;  %v3046_v31 = vld [vmem:[%s4006_s13 + $0x24] sm:$0xf0]  ;;  %v3045_v32 = vld [vmem:[%s4006_s13 + $0x24] sm:$0xf] }
  0x59   : > { %653 = vmatpush.bf16.msra.mxu1 %v2892_v11  ;;  %v2857_v33 = vld [vmem:[%s4006_s13 + $0x28] sm:$0xf0]  ;;  %v2856_v34 = vor.u32 %v3046_v31, %v2855_v30  ;;  %v2847_v36 = vld [vmem:[%s4006_s13 + $0x10] sm:$0xf]  ;;  %v3044_v37 = vld [vmem:[%s4006_s13 + $0x14] sm:$0xf0] }
  0x5a   : > { %v2860_v35 = vor.u32 %v3045_v32, %v2857_v33  ;;  %v3043_v38 = vld [vmem:[%s4006_s13 + $0x14] sm:$0xf]  ;;  %v2849_v39 = vld [vmem:[%s4006_s13 + $0x18] sm:$0xf0]  ;;  %v2848_v40 = vor.u32 %v3044_v37, %v2847_v36  ;;  %v2839_v42 = vld [vmem:[%s4006_s13] sm:$0xf] }
  0x5b   : > { %v2852_v41 = vor.u32 %v3043_v38, %v2849_v39  ;;  %v3042_v43 = vld [vmem:[%s4006_s13 + $0x4] sm:$0xf0]  ;;  %v3041_v44 = vld [vmem:[%s4006_s13 + $0x4] sm:$0xf]  ;;  %v2841_v45 = vld [vmem:[%s4006_s13 + $0x8] sm:$0xf0] }
  0x5c   : > { %605 = vmatpush.bf16.msra.mxu0 %v2880_v16  ;;  %958 = vmatpush.bf16.xpose.msra.mxu2 %v2888_v10  ;;  %v2840_v46 = vor.u32 %v3042_v43, %v2839_v42  ;;  %v2844_v47 = vor.u32 %v3041_v44, %v2841_v45  ;;  %v3033_v48 = vld [vmem:[#allocation3] sm:$0xff]  ;;  %v3034_v49 = vld [vmem:[#allocation3 + $0x8] sm:$0xff]  ;;  %v3035_v50 = vld [vmem:[#allocation3 + $0x10] sm:$0xff]  ;;  %s435_s15 = scalar_lea.vmem [#allocation16], %s4003_s0  ;;  %s2651_s21 = sshll.u32 %s2647_s11, 4  ;;  %s2652_s21 = int_to_ptr.hbm [resolvable:$true] %s2651_s21 }
  0x5d   : > { %654 = vmatpush.bf16.msra.mxu1 %v2884_v17  ;;  %1007 = vmatpush.bf16.xpose.msra.mxu3 %v2892_v11  ;;  %v3036_v51 = vld [vmem:[#allocation3 + $0x18] sm:$0xff]  ;;  %v3037_v52 = vld [vmem:[#allocation3 + $0x20] sm:$0xff]  ;;  %v3038_v53 = vld [vmem:[#allocation3 + $0x28] sm:$0xff]  ;;  %s2649_s17 = sshll.u32 %s435_s15, 4  ;;  %s2639_s12 = scalar_lea.sflag [#allocation5], %s4003_s0  ;;  %s2650_s17 = int_to_ptr.vmem [resolvable:$true] %s2649_s17 }
  0x5e   : > { %v3039_v54 = vld [vmem:[#allocation3 + $0x30] sm:$0xff]  ;;  %v3040_v61 = vld [vmem:[#allocation3 + $0x38] sm:$0xff]  ;;  %s3707_s26 = sshra.s32 %s2652_s21, 4  ;;  %s3713_s18 = scalar_lea.hbm %s5004_s8, 2  ;;  %s3708_s26 = int_to_ptr.hbm [resolvable:$true] %s3707_s26 }
  0x5f   : > { %s3709_s25 = scalar_lea.hbm %s3708_s26, 1  ;;  %p3714_p13 = scmp.lt.s32.totalorder %s3708_s26, %s5004_s8 }
  0x60   : > { %606 = vmatpush.bf16.msra.mxu0 %v2872_v24  ;;  %p3710_p1 = scmp.ne.s32.totalorder %s3708_s26, %s3709_s25  ;;  %p3715_p7 = scmp.lt.s32.totalorder %s3713_s18, %s3709_s25 }
  0x61   : > { %655 = vmatpush.bf16.msra.mxu1 %v2876_v26 }
  0x62   : > { %p3711_p3 = pnand %p3710_p1, %p3957_p0  ;;  %p3716_p8 = por %p3715_p7, %p3714_p13 }
  0x64   : > { %607 = vmatpush.bf16.msra.mxu0 %v2864_v28  ;;  %959 = vmatpush.bf16.xpose.msra.mxu2 %v2880_v16  ;;  %p3712_p5 = pneg %p3711_p3 }
  0x65   : > { %656 = vmatpush.bf16.msra.mxu1 %v2868_v29  ;;  %1008 = vmatpush.bf16.xpose.msra.mxu3 %v2884_v17 }
  0x66   : > { %p3717_p9 = pnand %p3716_p8, %p3712_p5 }
  0x68   : > { %608 = vmatpush.bf16.msra.mxu0 %v2856_v34 }
  0x69   : > { %657 = vmatpush.bf16.msra.mxu1 %v2860_v35 }
  0x6c   : > { %609 = vmatpush.bf16.msra.mxu0 %v2848_v40  ;;  %960 = vmatpush.bf16.xpose.msra.mxu2 %v2872_v24 }
  0x6d   : > { %658 = vmatpush.bf16.msra.mxu1 %v2852_v41  ;;  %1009 = vmatpush.bf16.xpose.msra.mxu3 %v2876_v26 }
  0x70   : > { %610 = vmatpush.bf16.msra.mxu0 %v2840_v46 }
  0x71   : > { %659 = vmatpush.bf16.msra.mxu1 %v2844_v47 }
  0x73   : > { %611 = vmatmul.bf16.vlgmr.msra.gmra.mxu0 %v3033_v48 }
  0x74   : > { %660 = vmatmul.bf16.vlgmr.msra.gmra.mxu1 %v3033_v48  ;;  %961 = vmatpush.bf16.xpose.msra.mxu2 %v2864_v28 }
  0x75   : > { %1010 = vmatpush.bf16.xpose.msra.mxu3 %v2868_v29 }
  0x7c   : > { %962 = vmatpush.bf16.xpose.msra.mxu2 %v2856_v34 }
  0x7d   : > { %1011 = vmatpush.bf16.xpose.msra.mxu3 %v2860_v35 }
  0x83   : > { %616 = vmatmul.bf16.gmra.mxu0 %v3034_v49 }
  0x84   : > { %665 = vmatmul.bf16.gmra.mxu1 %v3034_v49  ;;  %963 = vmatpush.bf16.xpose.msra.mxu2 %v2848_v40 }
  0x85   : > { %1012 = vmatpush.bf16.xpose.msra.mxu3 %v2852_v41 }
  0x8c   : > { %964 = vmatpush.bf16.xpose.msra.mxu2 %v2840_v46 }
  0x8d   : > { %1013 = vmatpush.bf16.xpose.msra.mxu3 %v2844_v47 }
  0x93   : > { %621 = vmatmul.bf16.gmra.mxu0 %v3035_v50 }
  0x94   : > { %670 = vmatmul.bf16.gmra.mxu1 %v3035_v50 }
  0xa3   : > { %626 = vmatmul.bf16.gmra.mxu0 %v3036_v51 }
  0xa4   : > { %675 = vmatmul.bf16.gmra.mxu1 %v3036_v51 }
  0xb3   : > { %631 = vmatmul.bf16.gmra.mxu0 %v3037_v52 }
  0xb4   : > { %680 = vmatmul.bf16.gmra.mxu1 %v3037_v52 }
  0xc3   : > { %636 = vmatmul.bf16.gmra.mxu0 %v3038_v53 }
  0xc4   : > { %685 = vmatmul.bf16.gmra.mxu1 %v3038_v53 }
  0xd3   : > { %641 = vmatmul.bf16.gmra.mxu0 %v3039_v54 }
  0xd4   : > { %690 = vmatmul.bf16.gmra.mxu1 %v3039_v54 }
  0xe3   : > { %646 = vmatmul.bf16.gmra.mxu0 %v3040_v61 }
  0xe4   : > { %695 = vmatmul.bf16.gmra.mxu1 %v3040_v61 }
  0xf0   : > { %v612_v55 = vpop.f32.mrf.mxu0 }
  0xf1   : > { %v661_v56 = vpop.f32.mrf.mxu1 }
  0xf2   : > { %v701_v57 = vmax.f32 %v612_v55, %v661_v56 }
  0xf4   : > { %702 = vmax.xlane.f32.xlu0 %v701_v57 }
  0xf8   : > { %v614_v58 = vpop.f32.mrf.mxu0 }
  0xf9   : > { %v663_v59 = vpop.f32.mrf.mxu1 }
  0xfa   : > { %v704_v60 = vmax.f32 %v614_v58, %v663_v59 }
  0xfc   : > { %705 = vmax.xlane.f32.xlu0 %v704_v60 }
 0x100   : > { %v617_v62 = vpop.f32.mrf.mxu0 }
 0x101   : > { %v666_v63 = vpop.f32.mrf.mxu1 }
 0x102   : > { %v707_v0 = vmax.f32 %v617_v62, %v666_v63 }
 0x104   : > { %708 = vmax.xlane.f32.xlu1 %v707_v0 }
 0x108   : > { %v4056_v1 = vpop.f32.mrf.mxu0 }
 0x109   : > { %v4058_v2 = vpop.f32.mrf.mxu1 }
 0x10a   : > { %v710_v3 = vmax.f32 %v4056_v1, %v4058_v2 }
 0x10c   : > { %711 = vmax.xlane.f32.xlu1 %v710_v3 }
 0x110   : > { %v4062_v4 = vpop.f32.mrf.mxu0 }
 0x111   : > { %v4064_v5 = vpop.f32.mrf.mxu1 }
 0x112   : > { %v713_v6 = vmax.f32 %v4062_v4, %v4064_v5 }
 0x114   : > { %714 = vmax.xlane.f32.xlu2 %v713_v6 }
 0x118   : > { %v4068_v7 = vpop.f32.mrf.mxu0 }
 0x119   : > { %v4070_v8 = vpop.f32.mrf.mxu1 }
 0x11a   : > { %v716_v9 = vmax.f32 %v4068_v7, %v4070_v8 }
 0x11c   : > { %717 = vmax.xlane.f32.xlu2 %v716_v9 }
 0x120   : > { %v4074_v10 = vpop.f32.mrf.mxu0 }
 0x121   : > { %v4076_v11 = vpop.f32.mrf.mxu1 }
 0x122   : > { %v719_v12 = vmax.f32 %v4074_v10, %v4076_v11 }
 0x124   : > { %720 = vmax.xlane.f32.xlu0 %v719_v12 }
 0x128   : > { %v4080_v13 = vpop.f32.mrf.mxu0 }
 0x129   : > { %v4082_v14 = vpop.f32.mrf.mxu1 }
 0x12a   : > { %v722_v15 = vmax.f32 %v4080_v13, %v4082_v14 }
 0x12c   : > { %723 = vmax.xlane.f32.xlu1 %v722_v15 }
 0x130   : > { %v4086_v16 = vpop.f32.mrf.mxu0 }
 0x131   : > { %v4088_v17 = vpop.f32.mrf.mxu1 }
 0x132   : > { %v725_v18 = vmax.f32 %v4086_v16, %v4088_v17 }
 0x134   : > { %726 = vmax.xlane.f32.xlu1 %v725_v18 }
 0x138   : > { %v4092_v24 = vpop.f32.mrf.mxu0 }
 0x139   : > { %v4094_v25 = vpop.f32.mrf.mxu1 }
 0x13a   : > { %v728_v44 = vmax.f32 %v4092_v24, %v4094_v25 }
 0x140   : > { %v4102_v34 = vpop.f32.mrf.mxu0 }
 0x141   : > { %v4104_v36 = vpop.f32.mrf.mxu1 }
 0x142   : > { %v731_v53 = vmax.f32 %v4102_v34, %v4104_v36 }
 0x148   : > { %v4116_v48 = vpop.f32.mrf.mxu0 }
 0x149   : > { %v4118_v49 = vpop.f32.mrf.mxu1 }
 0x151   : > { %v4136_v0 = vpop.f32.mrf.mxu1 }
 0x167   : > { %v703_v19 = vpop.xlane.xlu0 %702 }
 0x168   : > { %v749_v20 = vsub.f32 %v612_v55, %v703_v19  ;;  %v750_v21 = vsub.f32 %v661_v56, %v703_v19 }
 0x16a   : > { %v781_v22 = vmul.f32 1.442695, %v749_v20  ;;  %v783_v23 = vmul.f32 1.442695, %v750_v21  ;;  %v4154_v21 = vpop.f32.mrf.mxu1 }
 0x16c   : > { %3293 = vpow2.f32 %v781_v22 }
 0x16d   : > { %3295 = vpow2.f32 %v783_v23 }
 0x16f   : > { %v706_v26 = vpop.xlane.xlu0 %705 }
 0x170   : > { %v751_v27 = vsub.f32 %v614_v58, %v706_v26  ;;  %v752_v28 = vsub.f32 %v663_v59, %v706_v26 }
 0x172   : > { %v4096_v29 = vpop.eup %3293  ;;  %v785_v30 = vmul.f32 1.442695, %v751_v27  ;;  %v787_v31 = vmul.f32 1.442695, %v752_v28 }
 0x173   : > { %v4098_v32 = vpop.eup %3295 }
 0x174   : > { %3297 = vpow2.f32 %v785_v30  ;;  %v845_v33 = vadd.f32 %v4098_v32, %v4096_v29 }
 0x175   : > { %3299 = vpow2.f32 %v787_v31 }
 0x176   : > { %846 = vadd.xlane.f32.xlu2 %v845_v33 }
 0x177   : > { %v709_v35 = vpop.xlane.xlu1 %708 }
 0x178   : > { %v753_v37 = vsub.f32 %v617_v62, %v709_v35  ;;  %v754_v38 = vsub.f32 %v666_v63, %v709_v35  ;;  %v4132_v62 = vpop.f32.mrf.mxu0 }
 0x179   : > { %v737_v15 = vmax.f32 %v4132_v62, %v4136_v0 }
 0x17a   : > { %v4106_v39 = vpop.eup %3297  ;;  %v789_v40 = vmul.f32 1.442695, %v753_v37  ;;  %v791_v41 = vmul.f32 1.442695, %v754_v38 }
 0x17b   : > { %v4108_v42 = vpop.eup %3299 }
 0x17c   : > { %3301 = vpow2.f32 %v789_v40  ;;  %v848_v43 = vadd.f32 %v4108_v42, %v4106_v39 }
 0x17d   : > { %3303 = vpow2.f32 %v791_v41 }
 0x17e   : > { %849 = vadd.xlane.f32.xlu0 %v848_v43  ;;  %729 = vmax.xlane.f32.xlu2 %v728_v44 }
 0x17f   : > { %v712_v45 = vpop.xlane.xlu1 %711 }
 0x180   : > { %v755_v46 = vsub.f32 %v4056_v1, %v712_v45  ;;  %v756_v47 = vsub.f32 %v4058_v2, %v712_v45  ;;  %v734_v2 = vmax.f32 %v4116_v48, %v4118_v49  ;;  %v4150_v19 = vpop.f32.mrf.mxu0 }
 0x181   : > { %v740_v31 = vmax.f32 %v4150_v19, %v4154_v21 }
 0x182   : > { %v4120_v50 = vpop.eup %3301  ;;  %v793_v51 = vmul.f32 1.442695, %v755_v46  ;;  %v795_v52 = vmul.f32 1.442695, %v756_v47 }
 0x183   : > { %v4124_v54 = vpop.eup %3303 }
 0x184   : > { %3305 = vpow2.f32 %v793_v51  ;;  %v851_v55 = vadd.f32 %v4124_v54, %v4120_v50 }
 0x185   : > { %3307 = vpow2.f32 %v795_v52 }
 0x186   : > { %852 = vadd.xlane.f32.xlu0 %v851_v55  ;;  %732 = vmax.xlane.f32.xlu2 %v731_v53 }
 0x187   : > { %v715_v56 = vpop.xlane.xlu2 %714 }
 0x188   : > { %v757_v57 = vsub.f32 %v4062_v4, %v715_v56  ;;  %v758_v58 = vsub.f32 %v4064_v5, %v715_v56  ;;  %v4166_v33 = vpop.f32.mrf.mxu0 }
 0x18a   : > { %v4130_v59 = vpop.eup %3305  ;;  %v797_v60 = vmul.f32 1.442695, %v757_v57  ;;  %v799_v61 = vmul.f32 1.442695, %v758_v58 }
 0x18b   : > { %v4134_v63 = vpop.eup %3307 }
 0x18c   : > { %3309 = vpow2.f32 %v797_v60  ;;  %v854_v1 = vadd.f32 %v4134_v63, %v4130_v59 }
 0x18d   : > { %3311 = vpow2.f32 %v799_v61 }
 0x18e   : > { %855 = vadd.xlane.f32.xlu1 %v854_v1  ;;  %735 = vmax.xlane.f32.xlu0 %v734_v2 }
 0x18f   : > { %v718_v3 = vpop.xlane.xlu2 %717 }
 0x190   : > { %v759_v4 = vsub.f32 %v4068_v7, %v718_v3  ;;  %v760_v5 = vsub.f32 %v4070_v8, %v718_v3  ;;  %v4182_v47 = vpop.f32.mrf.mxu0 }
 0x192   : > { %v4144_v6 = vpop.eup %3309  ;;  %v801_v9 = vmul.f32 1.442695, %v759_v4  ;;  %v803_v12 = vmul.f32 1.442695, %v760_v5 }
 0x193   : > { %v4148_v18 = vpop.eup %3311 }
 0x194   : > { %3313 = vpow2.f32 %v801_v9  ;;  %v857_v20 = vadd.f32 %v4148_v18, %v4144_v6 }
 0x195   : > { %3315 = vpow2.f32 %v803_v12 }
 0x196   : > { %858 = vadd.xlane.f32.xlu1 %v857_v20  ;;  %738 = vmax.xlane.f32.xlu0 %v737_v15 }
 0x197   : > { %v721_v7 = vpop.xlane.xlu0 %720 }
 0x198   : > { %v761_v8 = vsub.f32 %v4074_v10, %v721_v7  ;;  %v762_v22 = vsub.f32 %v4076_v11, %v721_v7  ;;  %v4168_v10 = vpop.f32.mrf.mxu1 }
 0x199   : > { %v743_v43 = vmax.f32 %v4166_v33, %v4168_v10 }
 0x19a   : > { %v4158_v23 = vpop.eup %3313  ;;  %v805_v26 = vmul.f32 1.442695, %v761_v8  ;;  %v807_v27 = vmul.f32 1.442695, %v762_v22 }
 0x19b   : > { %v4160_v28 = vpop.eup %3315 }
 0x19c   : > { %3317 = vpow2.f32 %v805_v26  ;;  %v860_v30 = vadd.f32 %v4160_v28, %v4158_v23 }
 0x19d   : > { %3319 = vpow2.f32 %v807_v27 }
 0x19e   : > { %861 = vadd.xlane.f32.xlu2 %v860_v30  ;;  %741 = vmax.xlane.f32.xlu1 %v740_v31 }
 0x19f   : > { %v724_v11 = vpop.xlane.xlu1 %723 }
 0x1a0   : > { %v763_v35 = vsub.f32 %v4080_v13, %v724_v11  ;;  %v764_v37 = vsub.f32 %v4082_v14, %v724_v11  ;;  %v4184_v51 = vpop.f32.mrf.mxu1 }
 0x1a1   : > { %v746_v58 = vmax.f32 %v4182_v47, %v4184_v51 }
 0x1a2   : > { %v4172_v38 = vpop.eup %3317  ;;  %v809_v40 = vmul.f32 1.442695, %v763_v35  ;;  %v811_v41 = vmul.f32 1.442695, %v764_v37 }
 0x1a3   : > { %v4176_v44 = vpop.eup %3319 }
 0x1a4   : > { %3321 = vpow2.f32 %v809_v40  ;;  %v863_v45 = vadd.f32 %v4176_v44, %v4172_v38 }
 0x1a5   : > { %3323 = vpow2.f32 %v811_v41 }
 0x1a6   : > { %864 = vadd.xlane.f32.xlu2 %v863_v45  ;;  %744 = vmax.xlane.f32.xlu1 %v743_v43 }
 0x1a7   : > { %v727_v46 = vpop.xlane.xlu1 %726 }
 0x1a8   : > { %v765_v13 = vsub.f32 %v4086_v16, %v727_v46  ;;  %v766_v14 = vsub.f32 %v4088_v17, %v727_v46 }
 0x1aa   : > { %v4186_v52 = vpop.eup %3321  ;;  %v813_v53 = vmul.f32 1.442695, %v765_v13  ;;  %v815_v55 = vmul.f32 1.442695, %v766_v14 }
 0x1ab   : > { %v4188_v56 = vpop.eup %3323 }
 0x1ac   : > { %3325 = vpow2.f32 %v813_v53  ;;  %v866_v57 = vadd.f32 %v4188_v56, %v4186_v52 }
 0x1ad   : > { %3327 = vpow2.f32 %v815_v55 }
 0x1ae   : > { %867 = vadd.xlane.f32.xlu0 %v866_v57  ;;  %747 = vmax.xlane.f32.xlu2 %v746_v58 }
 0x1b2   : > { %v4194_v16 = vpop.eup %3325 }
 0x1b3   : > { %v4196_v17 = vpop.eup %3327 }
 0x1b4   : > { %v869_v60 = vadd.f32 %v4196_v17, %v4194_v16 }
 0x1b6   : > { %870 = vadd.xlane.f32.xlu0 %v869_v60 }
 0x1e9   : > { %v847_v61 = vpop.xlane.xlu2 %846 }
 0x1ea   : > { %3329 = vrcp.f32 %v847_v61 }
 0x1f0   : > { %v3330_v12 = vpop.eup %3329 }
 0x1f1   : > { %v850_v1 = vpop.xlane.xlu0 %849  ;;  %v730_v2 = vpop.xlane.xlu2 %729  ;;  %v909_v8 = vmul.f32 %v3330_v12, %v4096_v29  ;;  %v910_v26 = vmul.f32 %v3330_v12, %v4098_v32  ;;  %v3072_v32 = vld [vmem:[#allocation9 + $0x38] sm:$0xff] }
 0x1f2   : > { %3331 = vrcp.f32 %v850_v1  ;;  %v767_v3 = vsub.f32 %v4092_v24, %v730_v2  ;;  %v768_v4 = vsub.f32 %v4094_v25, %v730_v2  ;;  %1231 = vmatpush.bf16.msrb.mxu0 %v3072_v32  ;;  %v3071_v2 = vld [vmem:[#allocation9 + $0x30] sm:$0xff] }
 0x1f4   : > { %v817_v5 = vmul.f32 1.442695, %v767_v3  ;;  %v819_v9 = vmul.f32 1.442695, %v768_v4 }
 0x1f6   : > { %3333 = vpow2.f32 %v817_v5  ;;  %1232 = vmatpush.bf16.msrb.mxu0 %v3071_v2 }
 0x1f7   : > { %3335 = vpow2.f32 %v819_v9 }
 0x1f8   : > { %v3332_v15 = vpop.eup %3331 }
 0x1f9   : > { %v853_v20 = vpop.xlane.xlu0 %852  ;;  %v733_v7 = vpop.xlane.xlu2 %732  ;;  %v911_v22 = vmul.f32 %v3332_v15, %v4106_v39  ;;  %v912_v27 = vmul.f32 %v3332_v15, %v4108_v42 }
 0x1fa   : > { %v769_v24 = vsub.f32 %v4102_v34, %v733_v7  ;;  %v770_v25 = vsub.f32 %v4104_v36, %v733_v7 }
 0x1fb   : > { %v941_v30 = vpack.c.bf16 %v911_v22, %v909_v8  ;;  %v942_v31 = vpack.c.bf16 %v912_v27, %v910_v26 }
 0x1fc   : > { %v4208_v11 = vpop.eup %3333  ;;  %v821_v35 = vmul.f32 1.442695, %v769_v24  ;;  %v823_v37 = vmul.f32 1.442695, %v770_v25  ;;  %v3068_v25 = vld [vmem:[#allocation9 + $0x18] sm:$0xff] }
 0x1fd   : > { %v4210_v40 = vpop.eup %3335  ;;  %965 = vmatmul.bf16.vlgmr.msra.gmra.mxu2 %v941_v30  ;;  %1014 = vmatmul.bf16.vlgmr.msra.gmra.mxu3 %v942_v31 }
 0x1fe   : > { %3337 = vpow2.f32 %v821_v35  ;;  %v872_v29 = vadd.f32 %v4210_v40, %v4208_v11 }
 0x1ff   : > { %3339 = vpow2.f32 %v823_v37 }
 0x200   : > { %3341 = vrcp.f32 %v853_v20  ;;  %873 = vadd.xlane.f32.xlu1 %v872_v29  ;;  %v3069_v20 = vld [vmem:[#allocation9 + $0x20] sm:$0xff] }
 0x201   : > { %v856_v34 = vpop.xlane.xlu1 %855  ;;  %v736_v36 = vpop.xlane.xlu0 %735 }
 0x202   : > { %3343 = vrcp.f32 %v856_v34  ;;  %v771_v39 = vsub.f32 %v4116_v48, %v736_v36  ;;  %v772_v42 = vsub.f32 %v4118_v49, %v736_v36  ;;  %v3067_v36 = vld [vmem:[#allocation9 + $0x10] sm:$0xff] }
 0x204   : > { %v4216_v41 = vpop.eup %3337  ;;  %v825_v43 = vmul.f32 1.442695, %v771_v39  ;;  %v827_v45 = vmul.f32 1.442695, %v772_v42 }
 0x205   : > { %v4218_v46 = vpop.eup %3339 }
 0x206   : > { %v3342_v13 = vpop.eup %3341  ;;  %3345 = vpow2.f32 %v825_v43  ;;  %v875_v14 = vadd.f32 %v4218_v46, %v4216_v41 }
 0x207   : > { %3347 = vpow2.f32 %v827_v45  ;;  %v913_v48 = vmul.f32 %v3342_v13, %v4120_v50  ;;  %v914_v58 = vmul.f32 %v3342_v13, %v4124_v54  ;;  %v3070_v54 = vld [vmem:[#allocation9 + $0x28] sm:$0xff] }
 0x208   : > { %v3344_v53 = vpop.eup %3343  ;;  %876 = vadd.xlane.f32.xlu2 %v875_v14  ;;  %1233 = vmatpush.bf16.msrb.mxu0 %v3070_v54 }
 0x209   : > { %v859_v55 = vpop.xlane.xlu1 %858  ;;  %v739_v57 = vpop.xlane.xlu0 %738  ;;  %v915_v49 = vmul.f32 %v3344_v53, %v4130_v59  ;;  %v916_v60 = vmul.f32 %v3344_v53, %v4134_v63 }
 0x20a   : > { %v773_v61 = vsub.f32 %v4132_v62, %v739_v57  ;;  %v774_v1 = vsub.f32 %v4136_v0, %v739_v57 }
 0x20b   : > { %v943_v3 = vpack.c.bf16 %v915_v49, %v913_v48  ;;  %v944_v4 = vpack.c.bf16 %v916_v60, %v914_v58 }
 0x20c   : > { %v4228_v5 = vpop.eup %3345  ;;  %v829_v9 = vmul.f32 1.442695, %v773_v61  ;;  %v831_v12 = vmul.f32 1.442695, %v774_v1  ;;  %1234 = vmatpush.bf16.msrb.mxu0 %v3069_v20 }
 0x20d   : > { %v4230_v15 = vpop.eup %3347  ;;  %970 = vmatmul.bf16.gmra.mxu2 %v943_v3  ;;  %1019 = vmatmul.bf16.gmra.mxu3 %v944_v4 }
 0x20e   : > { %3349 = vpow2.f32 %v829_v9  ;;  %v878_v50 = vadd.f32 %v4230_v15, %v4228_v5 }
 0x20f   : > { %3351 = vpow2.f32 %v831_v12  ;;  %v3066_v12 = vld [vmem:[#allocation9 + $0x8] sm:$0xff] }
 0x210   : > { %3353 = vrcp.f32 %v859_v55  ;;  %879 = vadd.xlane.f32.xlu0 %v878_v50  ;;  %1235 = vmatpush.bf16.msrb.mxu0 %v3068_v25 }
 0x211   : > { %v862_v59 = vpop.xlane.xlu2 %861  ;;  %v742_v62 = vpop.xlane.xlu1 %741 }
 0x212   : > { %3355 = vrcp.f32 %v862_v59  ;;  %v775_v63 = vsub.f32 %v4150_v19, %v742_v62  ;;  %v776_v0 = vsub.f32 %v4154_v21, %v742_v62 }
 0x214   : > { %v4236_v7 = vpop.eup %3349  ;;  %v833_v8 = vmul.f32 1.442695, %v775_v63  ;;  %v835_v22 = vmul.f32 1.442695, %v776_v0  ;;  %1236 = vmatpush.bf16.msrb.mxu0 %v3067_v36 }
 0x215   : > { %v4238_v26 = vpop.eup %3351 }
 0x216   : > { %v3354_v27 = vpop.eup %3353  ;;  %3357 = vpow2.f32 %v833_v8  ;;  %v881_v24 = vadd.f32 %v4238_v26, %v4236_v7 }
 0x217   : > { %3359 = vpow2.f32 %v835_v22  ;;  %v917_v31 = vmul.f32 %v3354_v27, %v4144_v6  ;;  %v918_v37 = vmul.f32 %v3354_v27, %v4148_v18 }
 0x218   : > { %v3356_v30 = vpop.eup %3355  ;;  %882 = vadd.xlane.f32.xlu1 %v881_v24  ;;  %1237 = vmatpush.bf16.msrb.mxu0 %v3066_v12 }
 0x219   : > { %v865_v19 = vpop.xlane.xlu2 %864  ;;  %v745_v21 = vpop.xlane.xlu1 %744  ;;  %v919_v35 = vmul.f32 %v3356_v30, %v4158_v23  ;;  %v920_v29 = vmul.f32 %v3356_v30, %v4160_v28 }
 0x21a   : > { %v777_v32 = vsub.f32 %v4166_v33, %v745_v21  ;;  %v778_v34 = vsub.f32 %v4168_v10, %v745_v21 }
 0x21b   : > { %v945_v39 = vpack.c.bf16 %v919_v35, %v917_v31  ;;  %v946_v42 = vpack.c.bf16 %v920_v29, %v918_v37 }
 0x21c   : > { %v4248_v43 = vpop.eup %3357  ;;  %v837_v45 = vmul.f32 1.442695, %v777_v32  ;;  %v839_v13 = vmul.f32 1.442695, %v778_v34 }
 0x21d   : > { %v4250_v14 = vpop.eup %3359  ;;  %975 = vmatmul.bf16.gmra.mxu2 %v945_v39  ;;  %1024 = vmatmul.bf16.gmra.mxu3 %v946_v42 }
 0x21e   : > { %3361 = vpow2.f32 %v837_v45  ;;  %v884_v6 = vadd.f32 %v4250_v14, %v4248_v43 }
 0x21f   : > { %3363 = vpow2.f32 %v839_v13 }
 0x220   : > { %3365 = vrcp.f32 %v865_v19  ;;  %885 = vadd.xlane.f32.xlu2 %v884_v6 }
 0x221   : > { %v868_v18 = vpop.xlane.xlu0 %867  ;;  %v748_v23 = vpop.xlane.xlu2 %747 }
 0x222   : > { %3367 = vrcp.f32 %v868_v18  ;;  %v779_v28 = vsub.f32 %v4182_v47, %v748_v23  ;;  %v780_v33 = vsub.f32 %v4184_v51, %v748_v23 }
 0x224   : > { %v4256_v10 = vpop.eup %3361  ;;  %v841_v53 = vmul.f32 1.442695, %v779_v28  ;;  %v843_v55 = vmul.f32 1.442695, %v780_v33 }
 0x225   : > { %v4258_v57 = vpop.eup %3363 }
 0x226   : > { %v3366_v48 = vpop.eup %3365  ;;  %3369 = vpow2.f32 %v841_v53  ;;  %v887_v49 = vadd.f32 %v4258_v57, %v4256_v10 }
 0x227   : > { %3371 = vpow2.f32 %v843_v55  ;;  %v921_v60 = vmul.f32 %v3366_v48, %v4172_v38  ;;  %v922_v51 = vmul.f32 %v3366_v48, %v4176_v44  ;;  %v3065_v38 = vld [vmem:[#allocation9] sm:$0xff] }
 0x228   : > { %v3368_v58 = vpop.eup %3367  ;;  %888 = vadd.xlane.f32.xlu0 %v887_v49  ;;  %1238 = vmatpush.bf16.msrb.mxu0 %v3065_v38 }
 0x229   : > { %v923_v47 = vmul.f32 %v3368_v58, %v4186_v52  ;;  %v924_v61 = vmul.f32 %v3368_v58, %v4188_v56  ;;  %v871_v52 = vpop.xlane.xlu0 %870 }
 0x22a   : > { %3373 = vrcp.f32 %v871_v52 }
 0x22b   : > { %v947_v1 = vpack.c.bf16 %v923_v47, %v921_v60  ;;  %v948_v2 = vpack.c.bf16 %v924_v61, %v922_v51 }
 0x22c   : > { %v4266_v3 = vpop.eup %3369 }
 0x22d   : > { %v4268_v4 = vpop.eup %3371  ;;  %980 = vmatmul.bf16.gmra.mxu2 %v947_v1  ;;  %1029 = vmatmul.bf16.gmra.mxu3 %v948_v2 }
 0x22e   : > { %v890_v9 = vadd.f32 %v4268_v4, %v4266_v3 }
 0x230   : > { %891 = vadd.xlane.f32.xlu1 %v890_v9  ;;  %v3374_v56 = vpop.eup %3373 }
 0x231   : > { %v925_v54 = vmul.f32 %v3374_v56, %v4194_v16  ;;  %v926_v62 = vmul.f32 %v3374_v56, %v4196_v17 }
 0x273   : > { %v874_v44 = vpop.xlane.xlu1 %873 }
 0x274   : > { %3375 = vrcp.f32 %v874_v44 }
 0x27a   : > { %v3376_v50 = vpop.eup %3375 }
 0x27b   : > { %v927_v59 = vmul.f32 %v3376_v50, %v4208_v11  ;;  %v928_v63 = vmul.f32 %v3376_v50, %v4210_v40  ;;  %v877_v8 = vpop.xlane.xlu2 %876 }
 0x27c   : > { %3377 = vrcp.f32 %v877_v8 }
 0x27d   : > { %v949_v0 = vpack.c.bf16 %v927_v59, %v925_v54  ;;  %v950_v20 = vpack.c.bf16 %v928_v63, %v926_v62 }
 0x27f   : > { %985 = vmatmul.bf16.gmra.mxu2 %v949_v0  ;;  %1034 = vmatmul.bf16.gmra.mxu3 %v950_v20 }
 0x280   : > { %v966_v22 = vpop.f32.mrf.mxu2  ;;  %v1015_v27 = vpop.f32.mrf.mxu3 }
 0x281   : > { %v1016_v16 = vadd.f32 %v1015_v27, %v966_v22 }
 0x282   : > { %v3378_v25 = vpop.eup %3377 }
 0x283   : > { %v880_v24 = vpop.xlane.xlu0 %879  ;;  %v929_v17 = vmul.f32 %v3378_v25, %v4216_v41  ;;  %v930_v35 = vmul.f32 %v3378_v25, %v4218_v46 }
 0x284   : > { %3379 = vrcp.f32 %v880_v24 }
 0x288   : > { %v968_v30 = vpop.f32.mrf.mxu2  ;;  %v1017_v19 = vpop.f32.mrf.mxu3 }
 0x289   : > { %v1018_v21 = vadd.f32 %v1017_v19, %v968_v30  ;;  %v1087_v30 = vld [vmem:[#allocation6] sm:$0xff] }
 0x28a   : > { %v3380_v11 = vpop.eup %3379 }
 0x28b   : > { %v3092_v31 = vpack.c.bf16 %v1018_v21, %v1016_v16  ;;  %v931_v40 = vmul.f32 %v3380_v11, %v4228_v5  ;;  %v932_v37 = vmul.f32 %v3380_v11, %v4230_v15  ;;  %v883_v34 = vpop.xlane.xlu1 %882 }
 0x28c   : > { %3381 = vrcp.f32 %v883_v34 }
 0x28d   : > { %3093 = vst [vmem:[#allocation2 + $0x30] sm:$0xff] %v3092_v31   ;;  %v951_v29 = vpack.c.bf16 %v931_v40, %v929_v17  ;;  %v952_v32 = vpack.c.bf16 %v932_v37, %v930_v35  ;;  %v1088_v31 = vld [vmem:[#allocation6 + $0x8] sm:$0xff] }
 0x28f   : > { %990 = vmatmul.bf16.gmra.mxu2 %v951_v29  ;;  %1039 = vmatmul.bf16.gmra.mxu3 %v952_v32 }
 0x290   : > { %v971_v36 = vpop.f32.mrf.mxu2  ;;  %v1020_v39 = vpop.f32.mrf.mxu3 }
 0x291   : > { %v1021_v6 = vadd.f32 %v1020_v39, %v971_v36  ;;  %v1089_v39 = vld [vmem:[#allocation6 + $0x10] sm:$0xff] }
 0x292   : > { %v3382_v41 = vpop.eup %3381 }
 0x293   : > { %v886_v42 = vpop.xlane.xlu2 %885  ;;  %v933_v15 = vmul.f32 %v3382_v41, %v4236_v7  ;;  %v934_v33 = vmul.f32 %v3382_v41, %v4238_v26 }
 0x294   : > { %3383 = vrcp.f32 %v886_v42  ;;  %v3057_v45 = vld [vmem:[#allocation2 + $0x30] sm:$0xff] }
 0x295   : > { %1239 = vmatmul.bf16.vlgmr.msrb.gmra.mxu0 %v3057_v45 }
 0x298   : > { %v973_v13 = vpop.f32.mrf.mxu2  ;;  %v1022_v5 = vpop.f32.mrf.mxu3 }
 0x299   : > { %v1023_v46 = vadd.f32 %v1022_v5, %v973_v13 }
 0x29a   : > { %v3384_v18 = vpop.eup %3383 }
 0x29b   : > { %v3097_v23 = vpack.c.bf16 %v1023_v46, %v1021_v6  ;;  %v935_v28 = vmul.f32 %v3384_v18, %v4248_v43  ;;  %v936_v53 = vmul.f32 %v3384_v18, %v4250_v14  ;;  %v889_v49 = vpop.xlane.xlu0 %888  ;;  %v1090_v6 = vld [vmem:[#allocation6 + $0x18] sm:$0xff] }
 0x29c   : > { %3385 = vrcp.f32 %v889_v49 }
 0x29d   : > { %3129 = vst [vmem:[#allocation2] sm:$0xff] %v3097_v23   ;;  %v953_v55 = vpack.c.bf16 %v935_v28, %v933_v15  ;;  %v954_v48 = vpack.c.bf16 %v936_v53, %v934_v33 }
 0x29f   : > { %995 = vmatmul.bf16.gmra.mxu2 %v953_v55  ;;  %1044 = vmatmul.bf16.gmra.mxu3 %v954_v48  ;;  %v1091_v55 = vld [vmem:[#allocation6 + $0x20] sm:$0xff] }
 0x2a0   : > { %v976_v58 = vpop.f32.mrf.mxu2  ;;  %v1025_v60 = vpop.f32.mrf.mxu3 }
 0x2a1   : > { %v1026_v1 = vadd.f32 %v1025_v60, %v976_v58 }
 0x2a2   : > { %v3386_v7 = vpop.eup %3385 }
 0x2a3   : > { %v892_v47 = vpop.xlane.xlu1 %891  ;;  %v937_v14 = vmul.f32 %v3386_v7, %v4256_v10  ;;  %v938_v38 = vmul.f32 %v3386_v7, %v4258_v57 }
 0x2a4   : > { %3387 = vrcp.f32 %v892_v47  ;;  %v3058_v51 = vld [vmem:[#allocation2] sm:$0xff] }
 0x2a5   : > { %1244 = vmatmul.bf16.gmra.mxu0 %v3058_v51  ;;  %v1092_v51 = vld [vmem:[#allocation6 + $0x28] sm:$0xff] }
 0x2a8   : > { %v978_v61 = vpop.f32.mrf.mxu2  ;;  %v1027_v43 = vpop.f32.mrf.mxu3 }
 0x2a9   : > { %v1028_v26 = vadd.f32 %v1027_v43, %v978_v61 }
 0x2aa   : > { %v3388_v2 = vpop.eup %3387 }
 0x2ab   : > { %v3102_v9 = vpack.c.bf16 %v1028_v26, %v1026_v1  ;;  %v939_v12 = vmul.f32 %v3388_v2, %v4266_v3  ;;  %v940_v52 = vmul.f32 %v3388_v2, %v4268_v4 }
 0x2ad   : > { %3130 = vst [vmem:[#allocation2 + $0x18] sm:$0xff] %v3102_v9   ;;  %v955_v44 = vpack.c.bf16 %v939_v12, %v937_v14  ;;  %v956_v56 = vpack.c.bf16 %v940_v52, %v938_v38  ;;  %v1093_v9 = vld [vmem:[#allocation6 + $0x30] sm:$0xff] }
 0x2af   : > { %1000 = vmatmul.bf16.gmra.mxu2 %v955_v44  ;;  %1049 = vmatmul.bf16.gmra.mxu3 %v956_v56  ;;  %v1094_v44 = vld [vmem:[#allocation6 + $0x38] sm:$0xff] }
 0x2b0   : > { %v981_v50 = vpop.f32.mrf.mxu2  ;;  %v1030_v54 = vpop.f32.mrf.mxu3 }
 0x2b1   : > { %v1031_v0 = vadd.f32 %v1030_v54, %v981_v50  ;;  %v1360_v54 = vlaneseq }
 0x2b4   : > { %v3059_v59 = vld [vmem:[#allocation2 + $0x18] sm:$0xff] }
 0x2b5   : > { %1249 = vmatmul.bf16.gmra.mxu0 %v3059_v59  ;;  %v4313_v59 = vand.u32 127, %v1360_v54 }
 0x2b7   : > { %vm1362_vm0 = vcmp.lt.s32.totalorder %v4313_v59, 32 }
 0x2b8   : > { %v983_v62 = vpop.f32.mrf.mxu2  ;;  %v1032_v63 = vpop.f32.mrf.mxu3 }
 0x2b9   : > { %v1033_v10 = vadd.f32 %v1032_v63, %v983_v62 }
 0x2bb   : > { %v3107_v20 = vpack.c.bf16 %v1033_v10, %v1031_v0  ;;  %v3792_v0 = vmov 0.0  }
 0x2bc   : > { %v4316_v10 = vsel %vm1362_vm0, 1.0, %v3792_v0 }
 0x2bd   : > { %3131 = vst [vmem:[#allocation2 + $0x10] sm:$0xff] %v3107_v20  }
 0x2c4   : > { %v3060_v3 = vld [vmem:[#allocation2 + $0x10] sm:$0xff] }
 0x2c5   : > { %1254 = vmatmul.bf16.gmra.mxu0 %v3060_v3 }
 0x302   : > { %v986_v57 = vpop.f32.mrf.mxu2  ;;  %v1035_v8 = vpop.f32.mrf.mxu3 }
 0x303   : > { %v1036_v27 = vadd.f32 %v1035_v8, %v986_v57 }
 0x30a   : > { %v988_v4 = vpop.f32.mrf.mxu2  ;;  %v1037_v22 = vpop.f32.mrf.mxu3 }
 0x30b   : > { %v1038_v24 = vadd.f32 %v1037_v22, %v988_v4  ;;  %v1095_v22 = vld [vmem:[#allocation6 + $0x40] sm:$0xff] }
 0x30d   : > { %v3112_v25 = vpack.c.bf16 %v1038_v24, %v1036_v27 }
 0x30f   : > { %3132 = vst [vmem:[#allocation2 + $0x8] sm:$0xff] %v3112_v25  }
 0x312   : > { %v991_v19 = vpop.f32.mrf.mxu2  ;;  %v1040_v16 = vpop.f32.mrf.mxu3 }
 0x313   : > { %v1240_v21 = vpop.f32.mrf.mxu0  ;;  %v1041_v37 = vadd.f32 %v1040_v16, %v991_v19 }
 0x314   : > { %v4288_v11 = vadd.f32 %v1240_v21, %v1087_v30 }
 0x316   : > { %1296 = vadd.xlane.f32.xlu2 %v4288_v11  ;;  %v3061_v17 = vld [vmem:[#allocation2 + $0x8] sm:$0xff] }
 0x317   : > { %1259 = vmatmul.bf16.gmra.mxu0 %v3061_v17 }
 0x31a   : > { %v993_v40 = vpop.f32.mrf.mxu2  ;;  %v1042_v35 = vpop.f32.mrf.mxu3 }
 0x31b   : > { %v1043_v29 = vadd.f32 %v1042_v35, %v993_v40  ;;  %v1242_v32 = vpop.f32.mrf.mxu0 }
 0x31c   : > { %v4291_v34 = vadd.f32 %v1242_v32, %v1088_v31 }
 0x31d   : > { %v3117_v36 = vpack.c.bf16 %v1043_v29, %v1041_v37 }
 0x31e   : > { %1298 = vadd.xlane.f32.xlu0 %v4291_v34 }
 0x31f   : > { %3133 = vst [vmem:[#allocation2 + $0x20] sm:$0xff] %v3117_v36  }
 0x322   : > { %v996_v42 = vpop.f32.mrf.mxu2  ;;  %v1045_v45 = vpop.f32.mrf.mxu3 }
 0x323   : > { %v1245_v41 = vpop.f32.mrf.mxu0  ;;  %v1046_v15 = vadd.f32 %v1045_v45, %v996_v42 }
 0x324   : > { %v4294_v13 = vadd.f32 %v1245_v41, %v1089_v39 }
 0x326   : > { %1300 = vadd.xlane.f32.xlu1 %v4294_v13  ;;  %v3062_v5 = vld [vmem:[#allocation2 + $0x20] sm:$0xff] }
 0x327   : > { %1264 = vmatmul.bf16.gmra.mxu0 %v3062_v5 }
 0x32a   : > { %v998_v46 = vpop.f32.mrf.mxu2  ;;  %v1047_v18 = vpop.f32.mrf.mxu3 }
 0x32b   : > { %v1048_v23 = vadd.f32 %v1047_v18, %v998_v46  ;;  %v1247_v28 = vpop.f32.mrf.mxu0 }
 0x32c   : > { %v4297_v33 = vadd.f32 %v1247_v28, %v1090_v6  ;;  %v1098_v6 = vld [vmem:[#allocation6 + $0x58] sm:$0xff] }
 0x32d   : > { %v3122_v53 = vpack.c.bf16 %v1048_v23, %v1046_v15 }
 0x32e   : > { %1302 = vadd.xlane.f32.xlu2 %v4297_v33 }
 0x32f   : > { %3134 = vst [vmem:[#allocation2 + $0x28] sm:$0xff] %v3122_v53  }
 0x332   : > { %v1001_v48 = vpop.f32.mrf.mxu2  ;;  %v1050_v49 = vpop.f32.mrf.mxu3 }
 0x333   : > { %v1250_v58 = vpop.f32.mrf.mxu0  ;;  %v1051_v43 = vadd.f32 %v1050_v49, %v1001_v48  ;;  %v3079_v48 = vld [vmem:[#allocation10 + $0x30] sm:$0xff]  ;;  %v1099_v49 = vld [vmem:[#allocation6 + $0x60] sm:$0xff] }
 0x334   : > { %v4300_v60 = vadd.f32 %v1250_v58, %v1091_v55 }
 0x336   : > { %1304 = vadd.xlane.f32.xlu0 %v4300_v60  ;;  %v3063_v47 = vld [vmem:[#allocation2 + $0x28] sm:$0xff] }
 0x337   : > { %1269 = vmatmul.bf16.gmra.mxu0 %v3063_v47 }
 0x33a   : > { %v1003_v7 = vpop.f32.mrf.mxu2  ;;  %v1052_v61 = vpop.f32.mrf.mxu3 }
 0x33b   : > { %v1053_v1 = vadd.f32 %v1052_v61, %v1003_v7  ;;  %v1252_v26 = vpop.f32.mrf.mxu0 }
 0x33c   : > { %v4303_v2 = vadd.f32 %v1252_v26, %v1092_v51 }
 0x33d   : > { %v3127_v14 = vpack.c.bf16 %v1053_v1, %v1051_v43  ;;  %v1100_v1 = vld [vmem:[#allocation6 + $0x68] sm:$0xff] }
 0x33e   : > { %1306 = vadd.xlane.f32.xlu1 %v4303_v2 }
 0x33f   : > { %3135 = vst [vmem:[#allocation2 + $0x38] sm:$0xff] %v3127_v14  }
 0x343   : > { %v1255_v12 = vpop.f32.mrf.mxu0 }
 0x344   : > { %v4306_v38 = vadd.f32 %v1255_v12, %v1093_v9 }
 0x346   : > { %1308 = vadd.xlane.f32.xlu2 %v4306_v38  ;;  %v3064_v52 = vld [vmem:[#allocation2 + $0x38] sm:$0xff] }
 0x347   : > { %1274 = vmatmul.bf16.gmra.mxu0 %v3064_v52 }
 0x34b   : > { %v1257_v56 = vpop.f32.mrf.mxu0 }
 0x34c   : > { %v4309_v50 = vadd.f32 %v1257_v56, %v1094_v44  ;;  %v1101_v56 = vld [vmem:[#allocation6 + $0x70] sm:$0xff] }
 0x34e   : > { %1310 = vadd.xlane.f32.xlu0 %v4309_v50 }
 0x389   : > { %v1297_v62 = vpop.xlane.xlu2 %1296 }
 0x38a   : > { %v1328_v63 = vmul.f32 0.03125, %v1297_v62 }
 0x38c   : > { %v1344_v20 = vsub.f32 %v4288_v11, %v1328_v63  ;;  %v1096_v11 = vld [vmem:[#allocation6 + $0x48] sm:$0xff] }
 0x38e   : > { %v4320_v3 = vmul.f32 %v4316_v10, %v1344_v20 }
 0x390   : > { %v1381_v57 = vmul.f32 %v4320_v3, %v4320_v3 }
 0x391   : > { %v1299_v8 = vpop.xlane.xlu0 %1298 }
 0x392   : > { %v1329_v4 = vmul.f32 0.03125, %v1299_v8  ;;  %1397 = vadd.xlane.f32.xlu1 %v1381_v57  ;;  %v1102_v57 = vld [vmem:[#allocation6 + $0x78] sm:$0xff] }
 0x394   : > { %v1345_v27 = vsub.f32 %v4291_v34, %v1329_v4  ;;  %v1260_v24 = vpop.f32.mrf.mxu0  ;;  %v1097_v34 = vld [vmem:[#allocation6 + $0x50] sm:$0xff] }
 0x395   : > { %v4325_v25 = vadd.f32 %v1260_v24, %v1095_v22  ;;  %v3078_v22 = vld [vmem:[#allocation10 + $0x28] sm:$0xff]  ;;  %v3075_v24 = vld [vmem:[#allocation10 + $0x10] sm:$0xff] }
 0x396   : > { %v4328_v30 = vmul.f32 %v4316_v10, %v1345_v27  ;;  %v3076_v27 = vld [vmem:[#allocation10 + $0x18] sm:$0xff] }
 0x397   : > { %1312 = vadd.xlane.f32.xlu0 %v4325_v25 }
 0x398   : > { %v1382_v19 = vmul.f32 %v4328_v30, %v4328_v30 }
 0x399   : > { %v1301_v16 = vpop.xlane.xlu1 %1300 }
 0x39a   : > { %v1330_v21 = vmul.f32 0.03125, %v1301_v16  ;;  %1399 = vadd.xlane.f32.xlu2 %v1382_v19  ;;  %v3074_v19 = vld [vmem:[#allocation10 + $0x8] sm:$0xff] }
 0x39c   : > { %v1346_v17 = vsub.f32 %v4294_v13, %v1330_v21  ;;  %v1262_v31 = vpop.f32.mrf.mxu0 }
 0x39d   : > { %v4334_v40 = vadd.f32 %v1262_v31, %v1096_v11 }
 0x39e   : > { %v4337_v35 = vmul.f32 %v4316_v10, %v1346_v17  ;;  %v3073_v17 = vld [vmem:[#allocation10] sm:$0xff] }
 0x39f   : > { %1314 = vadd.xlane.f32.xlu1 %v4334_v40 }
 0x3a0   : > { %v1383_v37 = vmul.f32 %v4337_v35, %v4337_v35 }
 0x3a1   : > { %v1303_v29 = vpop.xlane.xlu2 %1302 }
 0x3a2   : > { %v1331_v32 = vmul.f32 0.03125, %v1303_v29  ;;  %1401 = vadd.xlane.f32.xlu2 %v1383_v37 }
 0x3a4   : > { %v1347_v36 = vsub.f32 %v4297_v33, %v1331_v32  ;;  %v1265_v39 = vpop.f32.mrf.mxu0  ;;  %v3080_v33 = vld [vmem:[#allocation10 + $0x38] sm:$0xff] }
 0x3a5   : > { %v4343_v42 = vadd.f32 %v1265_v39, %v1097_v34  ;;  %1744 = vmatpush.bf16.msrb.mxu1 %v3080_v33 }
 0x3a6   : > { %v4346_v45 = vmul.f32 %v4316_v10, %v1347_v36 }
 0x3a7   : > { %1316 = vadd.xlane.f32.xlu1 %v4343_v42 }
 0x3a8   : > { %v1384_v41 = vmul.f32 %v4346_v45, %v4346_v45 }
 0x3a9   : > { %v1305_v13 = vpop.xlane.xlu0 %1304  ;;  %1745 = vmatpush.bf16.msrb.mxu1 %v3079_v48 }
 0x3aa   : > { %v1332_v5 = vmul.f32 0.03125, %v1305_v13  ;;  %1403 = vadd.xlane.f32.xlu0 %v1384_v41 }
 0x3ac   : > { %v1348_v46 = vsub.f32 %v4300_v60, %v1332_v5  ;;  %v1267_v18 = vpop.f32.mrf.mxu0 }
 0x3ad   : > { %v4352_v15 = vadd.f32 %v1267_v18, %v1098_v6  ;;  %1746 = vmatpush.bf16.msrb.mxu1 %v3078_v22 }
 0x3ae   : > { %v4355_v23 = vmul.f32 %v4316_v10, %v1348_v46 }
 0x3af   : > { %1318 = vadd.xlane.f32.xlu2 %v4352_v15 }
 0x3b0   : > { %v1385_v28 = vmul.f32 %v4355_v23, %v4355_v23 }
 0x3b1   : > { %v1307_v53 = vpop.xlane.xlu1 %1306 }
 0x3b2   : > { %v1333_v55 = vmul.f32 0.03125, %v1307_v53  ;;  %1405 = vadd.xlane.f32.xlu0 %v1385_v28 }
 0x3b4   : > { %v1349_v58 = vsub.f32 %v4303_v2, %v1333_v55  ;;  %v1270_v60 = vpop.f32.mrf.mxu0 }
 0x3b5   : > { %v4361_v47 = vadd.f32 %v1270_v60, %v1099_v49 }
 0x3b6   : > { %v4364_v51 = vmul.f32 %v4316_v10, %v1349_v58 }
 0x3b7   : > { %1320 = vadd.xlane.f32.xlu2 %v4361_v47 }
 0x3b8   : > { %v1386_v7 = vmul.f32 %v4364_v51, %v4364_v51 }
 0x3b9   : > { %v1309_v61 = vpop.xlane.xlu2 %1308 }
 0x3ba   : > { %v1334_v43 = vmul.f32 0.03125, %v1309_v61  ;;  %1407 = vadd.xlane.f32.xlu1 %v1386_v7 }
 0x3bc   : > { %v1350_v26 = vsub.f32 %v4306_v38, %v1334_v43  ;;  %v1272_v14 = vpop.f32.mrf.mxu0 }
 0x3bd   : > { %v4370_v2 = vadd.f32 %v1272_v14, %v1100_v1 }
 0x3be   : > { %v4373_v9 = vmul.f32 %v4316_v10, %v1350_v26 }
 0x3bf   : > { %1322 = vadd.xlane.f32.xlu0 %v4370_v2 }
 0x3c0   : > { %v1387_v12 = vmul.f32 %v4373_v9, %v4373_v9 }
 0x3c1   : > { %v1311_v52 = vpop.xlane.xlu0 %1310 }
 0x3c2   : > { %v1335_v44 = vmul.f32 0.03125, %v1311_v52  ;;  %1409 = vadd.xlane.f32.xlu1 %v1387_v12 }
 0x3c4   : > { %v1351_v62 = vsub.f32 %v4309_v50, %v1335_v44  ;;  %v1275_v63 = vpop.f32.mrf.mxu0  ;;  %v3077_v50 = vld [vmem:[#allocation10 + $0x20] sm:$0xff] }
 0x3c5   : > { %v4379_v0 = vadd.f32 %v1275_v63, %v1101_v56  ;;  %1747 = vmatpush.bf16.msrb.mxu1 %v3077_v50 }
 0x3c6   : > { %v4382_v38 = vmul.f32 %v4316_v10, %v1351_v62 }
 0x3c7   : > { %1324 = vadd.xlane.f32.xlu0 %v4379_v0 }
 0x3c8   : > { %v1388_v20 = vmul.f32 %v4382_v38, %v4382_v38 }
 0x3c9   : > { %1748 = vmatpush.bf16.msrb.mxu1 %v3076_v27 }
 0x3ca   : > { %1411 = vadd.xlane.f32.xlu2 %v1388_v20 }
 0x3cc   : > { %v1277_v8 = vpop.f32.mrf.mxu0 }
 0x3cd   : > { %v4387_v4 = vadd.f32 %v1277_v8, %v1102_v57  ;;  %1749 = vmatpush.bf16.msrb.mxu1 %v3075_v24  ;;  %v4407_v8 = vld [vmem:[#allocation15] ss:$0 sm:$0xff] }
 0x3cf   : > { %1326 = vadd.xlane.f32.xlu1 %v4387_v4 }
 0x3d1   : > { %1750 = vmatpush.bf16.msrb.mxu1 %v3074_v19 }
 0x3d5   : > { %1751 = vmatpush.bf16.msrb.mxu1 %v3073_v17 }
 0x405   : > { %v1398_v16 = vpop.xlane.xlu1 %1397 }
 0x406   : > { %v1429_v21 = vmul.f32 0.03125, %v1398_v16 }
 0x408   : > { %v1445_v11 = vadd.f32 1e-05, %v1429_v21 }
 0x40a   : > { %3389 = vrsqrt.f32 %v1445_v11  ;;  %v1313_v31 = vpop.xlane.xlu0 %1312  ;;  %vm1467_vm2 = vweird.f32 %v1445_v11 }
 0x40b   : > { %v1336_v37 = vmul.f32 0.03125, %v1313_v31 }
 0x40d   : > { %v1400_v29 = vpop.xlane.xlu2 %1399  ;;  %v1352_v32 = vsub.f32 %v4325_v25, %v1336_v37 }
 0x40e   : > { %v1430_v34 = vmul.f32 0.03125, %v1400_v29 }
 0x40f   : > { %v4392_v41 = vmul.f32 %v4316_v10, %v1352_v32 }
 0x410   : > { %v3390_v36 = vpop.eup %3389  ;;  %v1446_v39 = vadd.f32 1e-05, %v1430_v34 }
 0x411   : > { %v1462_v13 = vmul.f32 %v3390_v36, %v1445_v11  ;;  %v1389_v5 = vmul.f32 %v4392_v41, %v4392_v41  ;;  %vm1468_vm1 = vweird.f32 %v3390_v36  ;;  %v4413_v11 = vld [vmem:[#allocation15 + $0x1] ss:$0 sm:$0xff] }
 0x412   : > { %3391 = vrsqrt.f32 %v1446_v39  ;;  %v1315_v46 = vpop.xlane.xlu1 %1314  ;;  %vm1469_vm3 = vmor %vm1467_vm2, %vm1468_vm1  ;;  %vm1477_vm5 = vweird.f32 %v1446_v39 }
 0x413   : > { %v1463_v6 = vmul.f32 %v3390_v36, %v1462_v13  ;;  %v1337_v18 = vmul.f32 0.03125, %v1315_v46  ;;  %1413 = vadd.xlane.f32.xlu2 %v1389_v5 }
 0x415   : > { %v1464_v28 = vmul.f32 0.5, %v1463_v6  ;;  %v1402_v33 = vpop.xlane.xlu2 %1401  ;;  %v1353_v53 = vsub.f32 %v4334_v40, %v1337_v18 }
 0x416   : > { %v1431_v25 = vmul.f32 0.03125, %v1402_v33 }
 0x417   : > { %v1465_v55 = vsub.f32 1.5, %v1464_v28  ;;  %v4398_v58 = vmul.f32 %v4316_v10, %v1353_v53 }
 0x418   : > { %v3392_v48 = vpop.eup %3391  ;;  %v1447_v49 = vadd.f32 1e-05, %v1431_v25 }
 0x419   : > { %v1466_v60 = vmul.f32 %v3390_v36, %v1465_v55  ;;  %v1472_v7 = vmul.f32 %v3392_v48, %v1446_v39  ;;  %v1390_v61 = vmul.f32 %v4398_v58, %v4398_v58  ;;  %vm1478_vm4 = vweird.f32 %v3392_v48 }
 0x41a   : > { %3393 = vrsqrt.f32 %v1447_v49  ;;  %v1317_v1 = vpop.xlane.xlu1 %1316  ;;  %vm1479_vm6 = vmor %vm1477_vm5, %vm1478_vm4  ;;  %vm1487_vm8 = vweird.f32 %v1447_v49 }
 0x41b   : > { %v1473_v43 = vmul.f32 %v3392_v48, %v1472_v7  ;;  %v1338_v26 = vmul.f32 0.03125, %v1317_v1  ;;  %1415 = vadd.xlane.f32.xlu0 %v1390_v61  ;;  %v1470_v40 = vsel %vm1469_vm3, %v3390_v36, %v1466_v60 }
 0x41c   : > { %v1621_v63 = vmul.f32 %v1470_v40, %v4320_v3 }
 0x41d   : > { %v1474_v14 = vmul.f32 0.5, %v1473_v43  ;;  %v1404_v12 = vpop.xlane.xlu0 %1403  ;;  %v1354_v52 = vsub.f32 %v4343_v42, %v1338_v26 }
 0x41e   : > { %v1432_v44 = vmul.f32 0.03125, %v1404_v12  ;;  %v1638_v21 = vmul.f32 %v4407_v8, %v1621_v63 }
 0x41f   : > { %v1475_v56 = vsub.f32 1.5, %v1474_v14  ;;  %v4405_v57 = vmul.f32 %v4316_v10, %v1354_v52 }
 0x420   : > { %v3394_v62 = vpop.eup %3393  ;;  %v1448_v20 = vadd.f32 1e-05, %v1432_v44 }
 0x421   : > { %v1476_v22 = vmul.f32 %v3392_v48, %v1475_v56  ;;  %v1482_v50 = vmul.f32 %v3394_v62, %v1447_v49  ;;  %v1391_v42 = vmul.f32 %v4405_v57, %v4405_v57  ;;  %vm1488_vm7 = vweird.f32 %v3394_v62 }
 0x422   : > { %3395 = vrsqrt.f32 %v1448_v20  ;;  %v1319_v19 = vpop.xlane.xlu2 %1318  ;;  %vm1489_vm9 = vmor %vm1487_vm8, %vm1488_vm7  ;;  %vm1497_vm11 = vweird.f32 %v1448_v20 }
 0x423   : > { %v1480_v27 = vsel %vm1479_vm6, %v3392_v48, %v1476_v22  ;;  %v1483_v24 = vmul.f32 %v3394_v62, %v1482_v50  ;;  %v1339_v3 = vmul.f32 0.03125, %v1319_v19  ;;  %1417 = vadd.xlane.f32.xlu1 %v1391_v42 }
 0x424   : > { %v1622_v16 = vmul.f32 %v1480_v27, %v4328_v30  ;;  %v4421_v30 = vadd.f32 %v4413_v11, %v1638_v21 }
 0x425   : > { %v1484_v17 = vmul.f32 0.5, %v1483_v24  ;;  %v1406_v31 = vpop.xlane.xlu0 %1405  ;;  %v1355_v37 = vsub.f32 %v4352_v15, %v1339_v3 }
 0x426   : > { %v1433_v29 = vmul.f32 0.03125, %v1406_v31  ;;  %v1639_v32 = vmul.f32 %v4407_v8, %v1622_v16 }
 0x427   : > { %v1485_v34 = vsub.f32 1.5, %v1484_v17  ;;  %v4418_v13 = vmul.f32 %v4316_v10, %v1355_v37 }
 0x428   : > { %v3396_v36 = vpop.eup %3395  ;;  %v1449_v39 = vadd.f32 1e-05, %v1433_v29  ;;  %v4424_v5 = vadd.f32 %v4413_v11, %v1639_v32 }
 0x429   : > { %v1486_v6 = vmul.f32 %v3394_v62, %v1485_v34  ;;  %v1492_v46 = vmul.f32 %v3396_v36, %v1448_v20  ;;  %v1392_v15 = vmul.f32 %v4418_v13, %v4418_v13  ;;  %vm1498_vm10 = vweird.f32 %v3396_v36 }
 0x42a   : > { %3397 = vrsqrt.f32 %v1449_v39  ;;  %v1671_v18 = vpack.c.bf16 %v4424_v5, %v4421_v30  ;;  %v1321_v33 = vpop.xlane.xlu2 %1320  ;;  %vm1499_vm12 = vmor %vm1497_vm11, %vm1498_vm10  ;;  %vm1507_vm14 = vweird.f32 %v1449_v39 }
 0x42b   : > { %v1493_v28 = vmul.f32 %v3396_v36, %v1492_v46  ;;  %v1340_v53 = vmul.f32 0.03125, %v1321_v33  ;;  %1419 = vadd.xlane.f32.xlu2 %v1392_v15  ;;  %v1490_v48 = vsel %vm1489_vm9, %v3394_v62, %v1486_v6 }
 0x42c   : > { %1752 = vmatmul.bf16.vlgmr.msrb.gmra.mxu1 %v1671_v18  ;;  %v1623_v49 = vmul.f32 %v1490_v48, %v4337_v35 }
 0x42d   : > { %v1494_v25 = vmul.f32 0.5, %v1493_v28  ;;  %v1408_v55 = vpop.xlane.xlu1 %1407  ;;  %v1356_v60 = vsub.f32 %v4361_v47, %v1340_v53 }
 0x42e   : > { %v1434_v7 = vmul.f32 0.03125, %v1408_v55  ;;  %v1640_v63 = vmul.f32 %v4407_v8, %v1623_v49 }
 0x42f   : > { %v1495_v61 = vsub.f32 1.5, %v1494_v25  ;;  %v4432_v26 = vmul.f32 %v4316_v10, %v1356_v60 }
 0x430   : > { %v3398_v43 = vpop.eup %3397  ;;  %v1450_v1 = vadd.f32 1e-05, %v1434_v7  ;;  %v4445_v3 = vadd.f32 %v4413_v11, %v1640_v63 }
 0x431   : > { %v1496_v40 = vmul.f32 %v3396_v36, %v1495_v61  ;;  %v1502_v14 = vmul.f32 %v3398_v43, %v1449_v39  ;;  %v1393_v12 = vmul.f32 %v4432_v26, %v4432_v26  ;;  %vm1508_vm13 = vweird.f32 %v3398_v43 }
 0x432   : > { %3399 = vrsqrt.f32 %v1450_v1  ;;  %v1323_v47 = vpop.xlane.xlu0 %1322  ;;  %vm1509_vm15 = vmor %vm1507_vm14, %vm1508_vm13  ;;  %vm1517_vm1 = vweird.f32 %v1450_v1 }
 0x433   : > { %v1503_v52 = vmul.f32 %v3398_v43, %v1502_v14  ;;  %v1500_v44 = vsel %vm1499_vm12, %v3396_v36, %v1496_v40  ;;  %v1341_v56 = vmul.f32 0.03125, %v1323_v47  ;;  %1421 = vadd.xlane.f32.xlu0 %v1393_v12 }
 0x434   : > { %v1624_v62 = vmul.f32 %v1500_v44, %v4346_v45 }
 0x435   : > { %v1504_v22 = vmul.f32 0.5, %v1503_v52  ;;  %v1410_v50 = vpop.xlane.xlu1 %1409  ;;  %v1357_v35 = vsub.f32 %v4370_v2, %v1341_v56 }
 0x436   : > { %v1435_v20 = vmul.f32 0.03125, %v1410_v50  ;;  %v1641_v42 = vmul.f32 %v4407_v8, %v1624_v62 }
 0x437   : > { %v1505_v27 = vsub.f32 1.5, %v1504_v22  ;;  %v4442_v16 = vmul.f32 %v4316_v10, %v1357_v35 }
 0x438   : > { %v3400_v24 = vpop.eup %3399  ;;  %v1451_v19 = vadd.f32 1e-05, %v1435_v20  ;;  %v4448_v45 = vadd.f32 %v4413_v11, %v1641_v42 }
 0x439   : > { %v1506_v21 = vmul.f32 %v3398_v43, %v1505_v27  ;;  %v1512_v17 = vmul.f32 %v3400_v24, %v1450_v1  ;;  %v1394_v2 = vmul.f32 %v4442_v16, %v4442_v16  ;;  %vm1518_vm0 = vweird.f32 %v3400_v24 }
 0x43a   : > { %3401 = vrsqrt.f32 %v1451_v19  ;;  %v1672_v31 = vpack.c.bf16 %v4448_v45, %v4445_v3  ;;  %v1325_v29 = vpop.xlane.xlu0 %1324  ;;  %vm1519_vm2 = vmor %vm1517_vm1, %vm1518_vm0  ;;  %vm1527_vm4 = vweird.f32 %v1451_v19 }
 0x43b   : > { %v1513_v37 = vmul.f32 %v3400_v24, %v1512_v17  ;;  %v1342_v32 = vmul.f32 0.03125, %v1325_v29  ;;  %1423 = vadd.xlane.f32.xlu1 %v1394_v2  ;;  %v1510_v6 = vsel %vm1509_vm15, %v3398_v43, %v1506_v21  ;;  %v3085_v29 = vld [vmem:[#allocation12 + $0x20] sm:$0xff] }
 0x43c   : > { %1757 = vmatmul.bf16.gmra.mxu1 %v1672_v31  ;;  %v1625_v39 = vmul.f32 %v1510_v6, %v4355_v23 }
 0x43d   : > { %v1514_v34 = vmul.f32 0.5, %v1513_v37  ;;  %v1412_v36 = vpop.xlane.xlu2 %1411  ;;  %v1358_v46 = vsub.f32 %v4379_v0, %v1342_v32  ;;  %v3087_v37 = vld [vmem:[#allocation12 + $0x30] sm:$0xff] }
 0x43e   : > { %v1436_v15 = vmul.f32 0.03125, %v1412_v36  ;;  %v1642_v49 = vmul.f32 %v4407_v8, %v1625_v39  ;;  %v3084_v36 = vld [vmem:[#allocation12 + $0x18] sm:$0xff] }
 0x43f   : > { %v1515_v18 = vsub.f32 1.5, %v1514_v34  ;;  %v4456_v53 = vmul.f32 %v4316_v10, %v1358_v46  ;;  %v3083_v46 = vld [vmem:[#allocation12 + $0x10] sm:$0xff] }
 0x440   : > { %v3402_v28 = vpop.eup %3401  ;;  %v1452_v33 = vadd.f32 1e-05, %v1436_v15  ;;  %v4469_v47 = vadd.f32 %v4413_v11, %v1642_v49 }
 0x441   : > { %v1516_v25 = vmul.f32 %v3400_v24, %v1515_v18  ;;  %v1522_v55 = vmul.f32 %v3402_v28, %v1451_v19  ;;  %v1395_v48 = vmul.f32 %v4456_v53, %v4456_v53  ;;  %vm1528_vm3 = vweird.f32 %v3402_v28 }
 0x442   : > { %3403 = vrsqrt.f32 %v1452_v33  ;;  %v1327_v0 = vpop.xlane.xlu1 %1326  ;;  %vm1529_vm5 = vmor %vm1527_vm4, %vm1528_vm3  ;;  %vm1537_vm7 = vweird.f32 %v1452_v33 }
 0x443   : > { %v1523_v60 = vmul.f32 %v3402_v28, %v1522_v55  ;;  %v1520_v7 = vsel %vm1519_vm2, %v3400_v24, %v1516_v25  ;;  %v1343_v61 = vmul.f32 0.03125, %v1327_v0  ;;  %1425 = vadd.xlane.f32.xlu2 %v1395_v48  ;;  %v3081_v55 = vld [vmem:[#allocation12] sm:$0xff] }
 0x444   : > { %v1626_v43 = vmul.f32 %v1520_v7, %v4364_v51 }
 0x445   : > { %v1524_v40 = vmul.f32 0.5, %v1523_v60  ;;  %v1359_v23 = vsub.f32 %v4387_v4, %v1343_v61 }
 0x446   : > { %v1643_v1 = vmul.f32 %v4407_v8, %v1626_v43 }
 0x447   : > { %v1525_v14 = vsub.f32 1.5, %v1524_v40  ;;  %v4466_v52 = vmul.f32 %v4316_v10, %v1359_v23 }
 0x448   : > { %v3404_v12 = vpop.eup %3403  ;;  %v4472_v44 = vadd.f32 %v4413_v11, %v1643_v1 }
 0x449   : > { %v1526_v56 = vmul.f32 %v3402_v28, %v1525_v14  ;;  %v1532_v51 = vmul.f32 %v3404_v12, %v1452_v33  ;;  %v1396_v62 = vmul.f32 %v4466_v52, %v4466_v52  ;;  %vm1538_vm6 = vweird.f32 %v3404_v12 }
 0x44a   : > { %v1673_v4 = vpack.c.bf16 %v4472_v44, %v4469_v47  ;;  %vm1539_vm8 = vmor %vm1537_vm7, %vm1538_vm6  ;;  %v4491_v14 = vshrl.u32 %v1360_v54, 7 }
 0x44b   : > { %v1533_v63 = vmul.f32 %v3404_v12, %v1532_v51  ;;  %1427 = vadd.xlane.f32.xlu0 %v1396_v62  ;;  %v1530_v50 = vsel %vm1529_vm5, %v3402_v28, %v1526_v56  ;;  %v3082_v28 = vld [vmem:[#allocation12 + $0x8] sm:$0xff] }
 0x44c   : > { %1762 = vmatmul.bf16.gmra.mxu1 %v1673_v4  ;;  %v1627_v20 = vmul.f32 %v1530_v50, %v4373_v9  ;;  %v3088_v9 = vld [vmem:[#allocation12 + $0x38] sm:$0xff]  ;;  %3267 = vset.pattern.permute.xlu1 %v4491_v14 }
 0x44d   : > { %v1534_v22 = vmul.f32 0.5, %v1533_v63  ;;  %1882 = vmatpush.bf16.msrb.mxu2 %v3088_v9  ;;  %3136 = vmatpush.bf16.msrb.mxu3 %v3088_v9 }
 0x44e   : > { %v1644_v21 = vmul.f32 %v4407_v8, %v1627_v20 }
 0x44f   : > { %v1535_v35 = vsub.f32 1.5, %v1534_v22 }
 0x450   : > { %v4483_v17 = vadd.f32 %v4413_v11, %v1644_v21 }
 0x451   : > { %v1536_v42 = vmul.f32 %v3404_v12, %v1535_v35  ;;  %1883 = vmatpush.bf16.msrb.mxu2 %v3087_v37  ;;  %3137 = vmatpush.bf16.msrb.mxu3 %v3087_v37 }
 0x453   : > { %v1540_v27 = vsel %vm1539_vm8, %v3404_v12, %v1536_v42 }
 0x454   : > { %v1628_v24 = vmul.f32 %v1540_v27, %v4382_v38  ;;  %v3086_v38 = vld [vmem:[#allocation12 + $0x28] sm:$0xff]  ;;  %v4495_v27 = vld [vmem:[#allocation15 + $0x5] ss:$0 sm:$0xff] }
 0x455   : > { %1884 = vmatpush.bf16.msrb.mxu2 %v3086_v38  ;;  %3138 = vmatpush.bf16.msrb.mxu3 %v3086_v38 }
 0x456   : > { %v1645_v19 = vmul.f32 %v4407_v8, %v1628_v24  ;;  %2387 = vperm.xlu1 %3267, %v4495_v27  }
 0x458   : > { %v4486_v2 = vadd.f32 %v4413_v11, %v1645_v19  ;;  %v2391_v19 = vadd.s32 8, %v4491_v14 }
 0x459   : > { %1885 = vmatpush.bf16.msrb.mxu2 %v3085_v29  ;;  %3139 = vmatpush.bf16.msrb.mxu3 %v3085_v29 }
 0x45a   : > { %v1674_v31 = vpack.c.bf16 %v4486_v2, %v4483_v17  ;;  %3268 = vset.pattern.permute.xlu2 %v2391_v19 }
 0x45c   : > { %1767 = vmatmul.bf16.gmra.mxu1 %v1674_v31 }
 0x45d   : > { %1886 = vmatpush.bf16.msrb.mxu2 %v3084_v36  ;;  %3140 = vmatpush.bf16.msrb.mxu3 %v3084_v36 }
 0x461   : > { %1887 = vmatpush.bf16.msrb.mxu2 %v3083_v46  ;;  %3141 = vmatpush.bf16.msrb.mxu3 %v3083_v46 }
 0x462   : > { %2393 = vperm.xlu2 %3268, %v4495_v27  }
 0x465   : > { %1888 = vmatpush.bf16.msrb.mxu2 %v3082_v28  ;;  %3142 = vmatpush.bf16.msrb.mxu3 %v3082_v28 }
 0x469   : > { %1889 = vmatpush.bf16.msrb.mxu2 %v3081_v55  ;;  %3143 = vmatpush.bf16.msrb.mxu3 %v3081_v55 }
 0x486   : > { %v1414_v32 = vpop.xlane.xlu2 %1413 }
 0x487   : > { %v1437_v34 = vmul.f32 0.03125, %v1414_v32 }
 0x489   : > { %v1453_v6 = vadd.f32 1e-05, %v1437_v34 }
 0x48b   : > { %3405 = vrsqrt.f32 %v1453_v6  ;;  %vm1547_vm10 = vweird.f32 %v1453_v6 }
 0x48e   : > { %v1416_v15 = vpop.xlane.xlu0 %1415 }
 0x48f   : > { %v1438_v18 = vmul.f32 0.03125, %v1416_v15  ;;  %v4508_v15 = vld [vmem:[#allocation15 + $0x6] ss:$0 sm:$0xff] }
 0x491   : > { %v3406_v33 = vpop.eup %3405  ;;  %v1454_v39 = vadd.f32 1e-05, %v1438_v18 }
 0x492   : > { %v1542_v25 = vmul.f32 %v3406_v33, %v1453_v6  ;;  %vm1548_vm9 = vweird.f32 %v3406_v33 }
 0x493   : > { %3407 = vrsqrt.f32 %v1454_v39  ;;  %vm1549_vm11 = vmor %vm1547_vm10, %vm1548_vm9  ;;  %vm1557_vm13 = vweird.f32 %v1454_v39 }
 0x494   : > { %v1543_v48 = vmul.f32 %v3406_v33, %v1542_v25 }
 0x496   : > { %v1544_v60 = vmul.f32 0.5, %v1543_v48  ;;  %v1418_v0 = vpop.xlane.xlu1 %1417 }
 0x497   : > { %v1439_v7 = vmul.f32 0.03125, %v1418_v0 }
 0x498   : > { %v1545_v61 = vsub.f32 1.5, %v1544_v60 }
 0x499   : > { %v3408_v43 = vpop.eup %3407  ;;  %v1455_v49 = vadd.f32 1e-05, %v1439_v7 }
 0x49a   : > { %v1546_v40 = vmul.f32 %v3406_v33, %v1545_v61  ;;  %v1552_v23 = vmul.f32 %v3408_v43, %v1454_v39  ;;  %vm1558_vm12 = vweird.f32 %v3408_v43 }
 0x49b   : > { %3409 = vrsqrt.f32 %v1455_v49  ;;  %vm1559_vm14 = vmor %vm1557_vm13, %vm1558_vm12  ;;  %vm1567_vm0 = vweird.f32 %v1455_v49 }
 0x49c   : > { %v1553_v1 = vmul.f32 %v3408_v43, %v1552_v23  ;;  %v1550_v12 = vsel %vm1549_vm11, %v3406_v33, %v1546_v40  ;;  %v2409_v33 = vadd.s32 32, %v4491_v14 }
 0x49d   : > { %v1629_v22 = vmul.f32 %v1550_v12, %v4392_v41 }
 0x49e   : > { %v1554_v56 = vmul.f32 0.5, %v1553_v1  ;;  %v1420_v51 = vpop.xlane.xlu2 %1419  ;;  %3271 = vset.pattern.permute.xlu1 %v2409_v33 }
 0x49f   : > { %v1440_v62 = vmul.f32 0.03125, %v1420_v51  ;;  %v1646_v21 = vmul.f32 %v4407_v8, %v1629_v22 }
 0x4a0   : > { %v1555_v4 = vsub.f32 1.5, %v1554_v56 }
 0x4a1   : > { %v3410_v63 = vpop.eup %3409  ;;  %v1456_v50 = vadd.f32 1e-05, %v1440_v62  ;;  %v4503_v36 = vadd.f32 %v4413_v11, %v1646_v21 }
 0x4a2   : > { %v1556_v35 = vmul.f32 %v3408_v43, %v1555_v4  ;;  %v1562_v20 = vmul.f32 %v3410_v63, %v1455_v49  ;;  %vm1568_vm15 = vweird.f32 %v3410_v63 }
 0x4a3   : > { %3411 = vrsqrt.f32 %v1456_v50  ;;  %vm1569_vm1 = vmor %vm1567_vm0, %vm1568_vm15  ;;  %vm1577_vm3 = vweird.f32 %v1456_v50 }
 0x4a4   : > { %v1560_v54 = vsel %vm1559_vm14, %v3408_v43, %v1556_v35  ;;  %v1563_v42 = vmul.f32 %v3410_v63, %v1562_v20  ;;  %v2403_v35 = vadd.s32 24, %v4491_v14 }
 0x4a5   : > { %v1630_v24 = vmul.f32 %v1560_v54, %v4398_v58 }
 0x4a6   : > { %v1564_v31 = vmul.f32 0.5, %v1563_v42  ;;  %v1422_v9 = vpop.xlane.xlu0 %1421  ;;  %2411 = vperm.xlu1 %3271, %v4495_v27   ;;  %3270 = vset.pattern.permute.xlu2 %v2403_v35 }
 0x4a7   : > { %v1441_v41 = vmul.f32 0.03125, %v1422_v9  ;;  %v1647_v37 = vmul.f32 %v4407_v8, %v1630_v24 }
 0x4a8   : > { %v1565_v38 = vsub.f32 1.5, %v1564_v31 }
 0x4a9   : > { %v1753_v29 = vpop.f32.mrf.mxu1  ;;  %v3412_v32 = vpop.eup %3411  ;;  %v1457_v34 = vadd.f32 1e-05, %v1441_v41  ;;  %v4506_v58 = vadd.f32 %v4413_v11, %v1647_v37 }
 0x4aa   : > { %v1566_v6 = vmul.f32 %v3410_v63, %v1565_v38  ;;  %v1572_v46 = vmul.f32 %v3412_v32, %v1456_v50  ;;  %v1754_v48 = vadd.f32 %v4508_v15, %v1753_v29  ;;  %vm1578_vm2 = vweird.f32 %v3412_v32 }
 0x4ab   : > { %3413 = vrsqrt.f32 %v1457_v34  ;;  %v1675_v18 = vpack.c.bf16 %v4506_v58, %v4503_v36  ;;  %vm1579_vm4 = vmor %vm1577_vm3, %vm1578_vm2  ;;  %vm1587_vm6 = vweird.f32 %v1457_v34  ;;  %v2421_v29 = vadd.s32 48, %v4491_v14 }
 0x4ac   : > { %v1573_v28 = vmul.f32 %v3412_v32, %v1572_v46  ;;  %v1570_v39 = vsel %vm1569_vm1, %v3410_v63, %v1566_v6  ;;  %v1793_v12 = vmax.f32 %v1754_v48, 0.0 }
 0x4ad   : > { %1772 = vmatmul.bf16.gmra.mxu1 %v1675_v18  ;;  %v1631_v43 = vmul.f32 %v1570_v39, %v4405_v57 }
 0x4ae   : > { %v1574_v25 = vmul.f32 0.5, %v1573_v28  ;;  %v1424_v55 = vpop.xlane.xlu1 %1423  ;;  %3273 = vset.pattern.permute.xlu1 %v2421_v29  ;;  %2405 = vperm.xlu2 %3270, %v4495_v27  }
 0x4af   : > { %v1442_v60 = vmul.f32 0.03125, %v1424_v55  ;;  %v1648_v22 = vmul.f32 %v4407_v8, %v1631_v43  ;;  %v2415_v43 = vadd.s32 40, %v4491_v14 }
 0x4b0   : > { %v1575_v0 = vsub.f32 1.5, %v1574_v25 }
 0x4b1   : > { %v1755_v7 = vpop.f32.mrf.mxu1  ;;  %v3414_v61 = vpop.eup %3413  ;;  %v1458_v49 = vadd.f32 1e-05, %v1442_v60 }
 0x4b2   : > { %v1756_v40 = vadd.f32 %v4508_v15, %v1755_v7  ;;  %v1576_v23 = vmul.f32 %v3412_v32, %v1575_v0  ;;  %v1582_v1 = vmul.f32 %v3414_v61, %v1457_v34  ;;  %vm1588_vm5 = vweird.f32 %v3414_v61 }
 0x4b3   : > { %3415 = vrsqrt.f32 %v1458_v49  ;;  %vm1589_vm7 = vmor %vm1587_vm6, %vm1588_vm5  ;;  %vm1597_vm9 = vweird.f32 %v1458_v49 }
 0x4b4   : > { %v1794_v56 = vmax.f32 %v1756_v40, 0.0  ;;  %v1580_v51 = vsel %vm1579_vm4, %v3412_v32, %v1576_v23  ;;  %v1583_v62 = vmul.f32 %v3414_v61, %v1582_v1 }
 0x4b5   : > { %v1632_v4 = vmul.f32 %v1580_v51, %v4418_v13  ;;  %v4523_v13 = vadd.f32 %v4413_v11, %v1648_v22 }
 0x4b6   : > { %v1809_v63 = vpack.c.bf16 %v1794_v56, %v1793_v12  ;;  %v1584_v57 = vmul.f32 0.5, %v1583_v62  ;;  %v1426_v20 = vpop.xlane.xlu2 %1425  ;;  %2423 = vperm.xlu1 %3273, %v4495_v27   ;;  %3272 = vset.pattern.permute.xlu2 %v2415_v43 }
 0x4b7   : > { %v1443_v54 = vmul.f32 0.03125, %v1426_v20  ;;  %v1649_v50 = vmul.f32 %v4407_v8, %v1632_v4  ;;  %v2397_v4 = vadd.s32 16, %v4491_v14  ;;  %v2433_v20 = vadd.s32 64, %v4491_v14 }
 0x4b8   : > { %1890 = vmatmul.bf16.vlgmr.msrb.gmra.mxu2 %v1809_v63  ;;  %v1585_v42 = vsub.f32 1.5, %v1584_v57 }
 0x4b9   : > { %v1758_v24 = vpop.f32.mrf.mxu1  ;;  %v3416_v21 = vpop.eup %3415  ;;  %v1459_v19 = vadd.f32 1e-05, %v1443_v54  ;;  %v4526_v31 = vadd.f32 %v4413_v11, %v1649_v50  ;;  %3269 = vset.pattern.permute.xlu0 %v2397_v4  ;;  %v4583_v4 = vld [vmem:[#allocation15 + $0x4] ss:$0 sm:$0xff] }
 0x4ba   : > { %v1586_v9 = vmul.f32 %v3414_v61, %v1585_v42  ;;  %v1592_v41 = vmul.f32 %v3416_v21, %v1458_v49  ;;  %v1759_v18 = vadd.f32 %v4508_v15, %v1758_v24  ;;  %vm1598_vm8 = vweird.f32 %v3416_v21 }
 0x4bb   : > { %3417 = vrsqrt.f32 %v1459_v19  ;;  %v1676_v37 = vpack.c.bf16 %v4526_v31, %v4523_v13  ;;  %vm1599_vm10 = vmor %vm1597_vm9, %vm1598_vm8  ;;  %vm1607_vm12 = vweird.f32 %v1459_v19 }
 0x4bc   : > { %v1593_v38 = vmul.f32 %v3416_v21, %v1592_v41  ;;  %v1590_v32 = vsel %vm1589_vm7, %v3414_v61, %v1586_v9  ;;  %v1795_v7 = vmax.f32 %v1759_v18, 0.0 }
 0x4bd   : > { %1777 = vmatmul.bf16.gmra.mxu1 %v1676_v37  ;;  %v1633_v34 = vmul.f32 %v1590_v32, %v4432_v26 }
 0x4be   : > { %v1594_v6 = vmul.f32 0.5, %v1593_v38  ;;  %v1428_v46 = vpop.xlane.xlu0 %1427  ;;  %3275 = vset.pattern.permute.xlu1 %v2433_v20  ;;  %2417 = vperm.xlu2 %3272, %v4495_v27  }
 0x4bf   : > { %v1444_v28 = vmul.f32 0.03125, %v1428_v46  ;;  %v1650_v56 = vmul.f32 %v4407_v8, %v1633_v34 }
 0x4c0   : > { %v1595_v33 = vsub.f32 1.5, %v1594_v6  ;;  %v2427_v6 = vadd.s32 56, %v4491_v14 }
 0x4c1   : > { %v1760_v39 = vpop.f32.mrf.mxu1  ;;  %v3418_v25 = vpop.eup %3417  ;;  %v1460_v55 = vadd.f32 1e-05, %v1444_v28  ;;  %v4542_v22 = vadd.f32 %v4413_v11, %v1650_v56  ;;  %2399 = vperm.xlu0 %3269, %v4495_v27  }
 0x4c2   : > { %v1761_v48 = vadd.f32 %v4508_v15, %v1760_v39  ;;  %v1596_v60 = vmul.f32 %v3416_v21, %v1595_v33  ;;  %v1602_v0 = vmul.f32 %v3418_v25, %v1459_v19  ;;  %vm1608_vm11 = vweird.f32 %v3418_v25 }
 0x4c3   : > { %3419 = vrsqrt.f32 %v1460_v55  ;;  %vm1609_vm13 = vmor %vm1607_vm12, %vm1608_vm11  ;;  %vm1617_vm15 = vweird.f32 %v1460_v55  ;;  %v2439_v39 = vadd.s32 72, %v4491_v14 }
 0x4c4   : > { %v1796_v61 = vmax.f32 %v1761_v48, 0.0  ;;  %v1600_v40 = vsel %vm1599_vm10, %v3416_v21, %v1596_v60  ;;  %v1603_v23 = vmul.f32 %v3418_v25, %v1602_v0 }
 0x4c5   : > { %v1634_v1 = vmul.f32 %v1600_v40, %v4442_v16  ;;  %v2463_v40 = vadd.s32 104, %v4491_v14 }
 0x4c6   : > { %v1810_v12 = vpack.c.bf16 %v1796_v61, %v1795_v7  ;;  %v1604_v26 = vmul.f32 0.5, %v1603_v23  ;;  %2435 = vperm.xlu1 %3275, %v4495_v27   ;;  %3274 = vset.pattern.permute.xlu2 %v2427_v6  ;;  %v2445_v61 = vadd.s32 80, %v4491_v14  ;;  %v2457_v23 = vadd.s32 96, %v4491_v14 }
 0x4c7   : > { %v1651_v49 = vmul.f32 %v4407_v8, %v1634_v1 }
 0x4c8   : > { %1895 = vmatmul.bf16.gmra.mxu2 %v1810_v12  ;;  %v1605_v51 = vsub.f32 1.5, %v1604_v26 }
 0x4c9   : > { %v1763_v62 = vpop.f32.mrf.mxu1  ;;  %v3420_v63 = vpop.eup %3419  ;;  %v4545_v16 = vadd.f32 %v4413_v11, %v1651_v49  ;;  %3276 = vset.pattern.permute.xlu0 %v2439_v39 }
 0x4ca   : > { %v1606_v35 = vmul.f32 %v3418_v25, %v1605_v51  ;;  %v1612_v57 = vmul.f32 %v3420_v63, %v1460_v55  ;;  %v1764_v21 = vadd.f32 %v4508_v15, %v1763_v62  ;;  %vm1618_vm14 = vweird.f32 %v3420_v63 }
 0x4cb   : > { %v1677_v54 = vpack.c.bf16 %v4545_v16, %v4542_v22  ;;  %vm1619_vm0 = vmor %vm1617_vm15, %vm1618_vm14 }
 0x4cc   : > { %v1613_v50 = vmul.f32 %v3420_v63, %v1612_v57  ;;  %v1610_v42 = vsel %vm1609_vm13, %v3418_v25, %v1606_v35  ;;  %v1797_v19 = vmax.f32 %v1764_v21, 0.0 }
 0x4cd   : > { %1782 = vmatmul.bf16.gmra.mxu1 %v1677_v54  ;;  %v1635_v37 = vmul.f32 %v1610_v42, %v4456_v53 }
 0x4ce   : > { %v1614_v24 = vmul.f32 0.5, %v1613_v50  ;;  %2429 = vperm.xlu2 %3274, %v4495_v27  }
 0x4cf   : > { %v1652_v33 = vmul.f32 %v4407_v8, %v1635_v37 }
 0x4d0   : > { %v1615_v9 = vsub.f32 1.5, %v1614_v24 }
 0x4d1   : > { %v1765_v41 = vpop.f32.mrf.mxu1  ;;  %v4562_v34 = vadd.f32 %v4413_v11, %v1652_v33  ;;  %2441 = vperm.xlu0 %3276, %v4495_v27  }
 0x4d2   : > { %v1766_v38 = vadd.f32 %v4508_v15, %v1765_v41  ;;  %v1616_v29 = vmul.f32 %v3420_v63, %v1615_v9 }
 0x4d4   : > { %v1798_v32 = vmax.f32 %v1766_v38, 0.0  ;;  %v1620_v46 = vsel %vm1619_vm0, %v3420_v63, %v1616_v29 }
 0x4d5   : > { %v1636_v18 = vmul.f32 %v1620_v46, %v4466_v52  ;;  %v2451_v52 = vadd.s32 88, %v4491_v14 }
 0x4d6   : > { %v1811_v28 = vpack.c.bf16 %v1798_v32, %v1797_v19  ;;  %3277 = vset.pattern.permute.xlu2 %v2445_v61 }
 0x4d7   : > { %v1653_v53 = vmul.f32 %v4407_v8, %v1636_v18  ;;  %3278 = vset.pattern.permute.xlu1 %v2451_v52 }
 0x4d8   : > { %1900 = vmatmul.bf16.gmra.mxu2 %v1811_v28 }
 0x4d9   : > { %v1768_v25 = vpop.f32.mrf.mxu1  ;;  %v4565_v55 = vadd.f32 %v4413_v11, %v1653_v53 }
 0x4da   : > { %v1769_v8 = vadd.f32 %v4508_v15, %v1768_v25 }
 0x4db   : > { %v1678_v48 = vpack.c.bf16 %v4565_v55, %v4562_v34 }
 0x4dc   : > { %v1799_v7 = vmax.f32 %v1769_v8, 0.0 }
 0x4dd   : > { %1787 = vmatmul.bf16.gmra.mxu1 %v1678_v48 }
 0x4de   : > { %2447 = vperm.xlu2 %3277, %v4495_v27  }
 0x4df   : > { %2453 = vperm.xlu1 %3278, %v4495_v27  }
 0x4e1   : > { %v1770_v60 = vpop.f32.mrf.mxu1 }
 0x4e2   : > { %v1771_v0 = vadd.f32 %v4508_v15, %v1770_v60 }
 0x4e4   : > { %v1800_v11 = vmax.f32 %v1771_v0, 0.0 }
 0x4e6   : > { %v1812_v43 = vpack.c.bf16 %v1800_v11, %v1799_v7  ;;  %3279 = vset.pattern.permute.xlu2 %v2457_v23 }
 0x4e7   : > { %3280 = vset.pattern.permute.xlu1 %v2463_v40 }
 0x4e8   : > { %1905 = vmatmul.bf16.gmra.mxu2 %v1812_v43 }
 0x4ee   : > { %2459 = vperm.xlu2 %3279, %v4495_v27  }
 0x4ef   : > { %2465 = vperm.xlu1 %3280, %v4495_v27  }
 0x52a   : > { %v1773_v1 = vpop.f32.mrf.mxu1 }
 0x52b   : > { %v1774_v12 = vadd.f32 %v4508_v15, %v1773_v1 }
 0x52d   : > { %v1801_v49 = vmax.f32 %v1774_v12, 0.0 }
 0x532   : > { %v1775_v56 = vpop.f32.mrf.mxu1 }
 0x533   : > { %v1776_v26 = vadd.f32 %v4508_v15, %v1775_v56 }
 0x535   : > { %v1802_v51 = vmax.f32 %v1776_v26, 0.0 }
 0x537   : > { %v1813_v62 = vpack.c.bf16 %v1802_v51, %v1801_v49 }
 0x539   : > { %1910 = vmatmul.bf16.gmra.mxu2 %v1813_v62 }
 0x53a   : > { %v1778_v63 = vpop.f32.mrf.mxu1 }
 0x53b   : > { %v1891_v35 = vpop.f32.mrf.mxu2  ;;  %v1779_v54 = vadd.f32 %v4508_v15, %v1778_v63 }
 0x53c   : > { %v1892_v57 = vadd.f32 %v4583_v4, %v1891_v35 }
 0x53d   : > { %v1803_v9 = vmax.f32 %v1779_v54, 0.0 }
 0x53e   : > { %v4587_v20 = vadd.f32 %v1892_v57, %v4421_v30 }
 0x540   : > { %1947 = vadd.xlane.f32.xlu1 %v4587_v20 }
 0x542   : > { %v1780_v50 = vpop.f32.mrf.mxu1 }
 0x543   : > { %v1893_v42 = vpop.f32.mrf.mxu2  ;;  %v1781_v24 = vadd.f32 %v4508_v15, %v1780_v50  ;;  %v2475_v50 = vadd.s32 120, %v4491_v14 }
 0x544   : > { %v1894_v21 = vadd.f32 %v4583_v4, %v1893_v42 }
 0x545   : > { %v1804_v41 = vmax.f32 %v1781_v24, 0.0  ;;  %3282 = vset.pattern.permute.xlu2 %v2475_v50  ;;  %v4653_v24 = vpop.permute.xlu0 %2399 }
 0x546   : > { %v4594_v37 = vadd.f32 %v1894_v21, %v4424_v5  ;;  %v4655_v21 = vpop.permute.xlu1 %2387 }
 0x547   : > { %v1814_v38 = vpack.c.bf16 %v1804_v41, %v1803_v9 }
 0x548   : > { %1949 = vadd.xlane.f32.xlu2 %v4594_v37 }
 0x549   : > { %1915 = vmatmul.bf16.vlgmr.msrb.gmra.mxu3 %v1814_v38 }
 0x54a   : > { %v1783_v30 = vpop.f32.mrf.mxu1 }
 0x54b   : > { %v1896_v29 = vpop.f32.mrf.mxu2  ;;  %v1784_v6 = vadd.f32 %v4508_v15, %v1783_v30 }
 0x54c   : > { %v1897_v19 = vadd.f32 %v4583_v4, %v1896_v29 }
 0x54d   : > { %v1805_v33 = vmax.f32 %v1784_v6, 0.0  ;;  %v4665_v29 = vpop.permute.xlu0 %2441 }
 0x54e   : > { %v4599_v32 = vadd.f32 %v1897_v19, %v4445_v3 }
 0x550   : > { %1951 = vadd.xlane.f32.xlu0 %v4599_v32 }
 0x552   : > { %v1785_v46 = vpop.f32.mrf.mxu1 }
 0x553   : > { %v1898_v18 = vpop.f32.mrf.mxu2  ;;  %v1786_v5 = vadd.f32 %v4508_v15, %v1785_v46 }
 0x554   : > { %v1899_v28 = vadd.f32 %v4583_v4, %v1898_v18 }
 0x555   : > { %v1806_v53 = vmax.f32 %v1786_v5, 0.0 }
 0x556   : > { %v4606_v39 = vadd.f32 %v1899_v28, %v4448_v45 }
 0x557   : > { %v1815_v25 = vpack.c.bf16 %v1806_v53, %v1805_v33 }
 0x558   : > { %1953 = vadd.xlane.f32.xlu1 %v4606_v39 }
 0x559   : > { %1920 = vmatmul.bf16.gmra.mxu3 %v1815_v25 }
 0x55a   : > { %v1788_v3 = vpop.f32.mrf.mxu1 }
 0x55b   : > { %v1901_v52 = vpop.f32.mrf.mxu2  ;;  %v1789_v60 = vadd.f32 %v4508_v15, %v1788_v3 }
 0x55c   : > { %v1902_v48 = vadd.f32 %v4583_v4, %v1901_v52 }
 0x55d   : > { %v1807_v61 = vmax.f32 %v1789_v60, 0.0 }
 0x55e   : > { %v4611_v8 = vadd.f32 %v1902_v48, %v4469_v47 }
 0x560   : > { %1955 = vadd.xlane.f32.xlu2 %v4611_v8 }
 0x562   : > { %v1790_v0 = vpop.f32.mrf.mxu1 }
 0x563   : > { %v1903_v7 = vpop.f32.mrf.mxu2  ;;  %v1791_v45 = vadd.f32 %v4508_v15, %v1790_v0 }
 0x564   : > { %v1904_v11 = vadd.f32 %v4583_v4, %v1903_v7 }
 0x565   : > { %v1808_v43 = vmax.f32 %v1791_v45, 0.0 }
 0x566   : > { %v4618_v40 = vadd.f32 %v1904_v11, %v4472_v44 }
 0x567   : > { %v1816_v23 = vpack.c.bf16 %v1808_v43, %v1807_v61 }
 0x568   : > { %1957 = vadd.xlane.f32.xlu0 %v4618_v40 }
 0x569   : > { %1925 = vmatmul.bf16.gmra.mxu3 %v1816_v23 }
 0x56b   : > { %v1906_v47 = vpop.f32.mrf.mxu2 }
 0x56c   : > { %v1907_v1 = vadd.f32 %v4583_v4, %v1906_v47 }
 0x56e   : > { %v4623_v12 = vadd.f32 %v1907_v1, %v4483_v17 }
 0x570   : > { %1959 = vadd.xlane.f32.xlu1 %v4623_v12 }
 0x573   : > { %v1908_v15 = vpop.f32.mrf.mxu2 }
 0x574   : > { %v1909_v56 = vadd.f32 %v4583_v4, %v1908_v15 }
 0x576   : > { %v4628_v26 = vadd.f32 %v1909_v56, %v4486_v2 }
 0x578   : > { %1961 = vadd.xlane.f32.xlu2 %v4628_v26 }
 0x5bc   : > { %v1911_v44 = vpop.f32.mrf.mxu2 }
 0x5bd   : > { %v1912_v49 = vadd.f32 %v4583_v4, %v1911_v44 }
 0x5bf   : > { %v4633_v51 = vadd.f32 %v1912_v49, %v4503_v36 }
 0x5c1   : > { %1963 = vadd.xlane.f32.xlu0 %v4633_v51 }
 0x5c3   : > { %v1952_v5 = vpop.xlane.xlu0 %1951 }
 0x5c4   : > { %v1913_v17 = vpop.f32.mrf.mxu2  ;;  %v1981_v33 = vmul.f32 0.03125, %v1952_v5 }
 0x5c5   : > { %v1914_v62 = vadd.f32 %v4583_v4, %v1913_v17 }
 0x5c6   : > { %v1997_v3 = vsub.f32 %v4599_v32, %v1981_v33 }
 0x5c7   : > { %v4638_v63 = vadd.f32 %v1914_v62, %v4506_v58  ;;  %v2469_v58 = vadd.s32 112, %v4491_v14  ;;  %v4667_v14 = vpop.permute.xlu1 %2411 }
 0x5c8   : > { %v4693_v0 = vmul.f32 %v4316_v10, %v1997_v3 }
 0x5c9   : > { %1965 = vadd.xlane.f32.xlu1 %v4638_v63  ;;  %3281 = vset.pattern.permute.xlu0 %v2469_v58 }
 0x5cc   : > { %v1916_v2 = vpop.f32.mrf.mxu3 }
 0x5cd   : > { %v1917_v35 = vadd.f32 %v4583_v4, %v1916_v2 }
 0x5cf   : > { %v4643_v57 = vadd.f32 %v1917_v35, %v4523_v13  ;;  %v4679_v28 = vpop.permute.xlu1 %2423 }
 0x5d1   : > { %1967 = vadd.xlane.f32.xlu2 %v4643_v57 }
 0x5d4   : > { %v1918_v36 = vpop.f32.mrf.mxu3 }
 0x5d5   : > { %v1919_v54 = vadd.f32 %v4583_v4, %v1918_v36 }
 0x5d7   : > { %v4649_v42 = vadd.f32 %v1919_v54, %v4526_v31  ;;  %v4662_v31 = vpop.permute.xlu2 %2393 }
 0x5d9   : > { %1969 = vadd.xlane.f32.xlu0 %v4649_v42 }
 0x5db   : > { %v1958_v48 = vpop.xlane.xlu0 %1957 }
 0x5dc   : > { %v1921_v13 = vpop.f32.mrf.mxu3  ;;  %v1984_v60 = vmul.f32 0.03125, %v1958_v48 }
 0x5dd   : > { %v1922_v9 = vadd.f32 %v4583_v4, %v1921_v13 }
 0x5de   : > { %v2000_v7 = vsub.f32 %v4618_v40, %v1984_v60 }
 0x5df   : > { %v4659_v41 = vadd.f32 %v1922_v9, %v4542_v22  ;;  %v4673_v6 = vpop.permute.xlu2 %2405 }
 0x5e1   : > { %1971 = vadd.xlane.f32.xlu1 %v4659_v41 }
 0x5e4   : > { %v1923_v38 = vpop.f32.mrf.mxu3 }
 0x5e5   : > { %v1924_v30 = vadd.f32 %v4583_v4, %v1923_v38 }
 0x5e7   : > { %v4670_v19 = vadd.f32 %v1924_v30, %v4545_v16  ;;  %v4683_v25 = vpop.permute.xlu2 %2417 }
 0x5e9   : > { %1973 = vadd.xlane.f32.xlu2 %v4670_v19 }
 0x5ec   : > { %v1926_v22 = vpop.f32.mrf.mxu3 }
 0x5ed   : > { %v1927_v46 = vadd.f32 %v4583_v4, %v1926_v22 }
 0x5ef   : > { %v4677_v18 = vadd.f32 %v1927_v46, %v4562_v34  ;;  %v4690_v34 = vpop.permute.xlu1 %2435  ;;  %v4698_v45 = vpop.permute.xlu2 %2429 }
 0x5f1   : > { %1975 = vadd.xlane.f32.xlu0 %v4677_v18 }
 0x5f4   : > { %v1928_v53 = vpop.f32.mrf.mxu3 }
 0x5f5   : > { %v1929_v16 = vadd.f32 %v4583_v4, %v1928_v53  ;;  %v2029_v4 = vmul.f32 %v4693_v0, %v4693_v0 }
 0x5f7   : > { %v4687_v52 = vadd.f32 %v1929_v16, %v4565_v55  ;;  %v4702_v55 = vmul.f32 %v4316_v10, %v2000_v7  ;;  %v4704_v32 = vpop.permute.xlu1 %2453  ;;  %v4709_v61 = vpop.permute.xlu2 %2447 }
 0x5f9   : > { %1977 = vadd.xlane.f32.xlu1 %v4687_v52  ;;  %v2032_v11 = vmul.f32 %v4702_v55, %v4702_v55 }
 0x5ff   : > { %v4711_v43 = vpop.permute.xlu1 %2465  ;;  %v4713_v40 = vpop.permute.xlu2 %2459 }
 0x601   : > { %2477 = vperm.xlu2 %3282, %v4495_v27   ;;  %2047 = vadd.xlane.f32.xlu1 %v2029_v4 }
 0x605   : > { %2471 = vperm.xlu0 %3281, %v4495_v27  }
 0x607   : > { %v1948_v23 = vpop.xlane.xlu1 %1947  ;;  %v1950_v1 = vpop.xlane.xlu2 %1949 }
 0x608   : > { %v1979_v47 = vmul.f32 0.03125, %v1948_v23  ;;  %v1980_v56 = vmul.f32 0.03125, %v1950_v1 }
 0x609   : > { %2053 = vadd.xlane.f32.xlu1 %v2032_v11 }
 0x60a   : > { %v1995_v15 = vsub.f32 %v4587_v20, %v1979_v47  ;;  %v1996_v17 = vsub.f32 %v4594_v37, %v1980_v56 }
 0x60c   : > { %v4717_v27 = vmul.f32 %v4316_v10, %v1995_v15  ;;  %v4724_v50 = vmul.f32 %v4316_v10, %v1996_v17 }
 0x60e   : > { %v2027_v35 = vmul.f32 %v4717_v27, %v4717_v27  ;;  %v2028_v37 = vmul.f32 %v4724_v50, %v4724_v50 }
 0x60f   : > { %v1954_v44 = vpop.xlane.xlu1 %1953  ;;  %v1956_v62 = vpop.xlane.xlu2 %1955 }
 0x610   : > { %v1982_v49 = vmul.f32 0.03125, %v1954_v44  ;;  %v1983_v36 = vmul.f32 0.03125, %v1956_v62 }
 0x612   : > { %v1998_v2 = vsub.f32 %v4606_v39, %v1982_v49  ;;  %v1999_v13 = vsub.f32 %v4611_v8, %v1983_v36 }
 0x614   : > { %v4727_v58 = vmul.f32 %v4316_v10, %v1998_v2  ;;  %v4736_v22 = vmul.f32 %v4316_v10, %v1999_v13 }
 0x616   : > { %v2030_v38 = vmul.f32 %v4727_v58, %v4727_v58  ;;  %v2031_v53 = vmul.f32 %v4736_v22, %v4736_v22 }
 0x617   : > { %v1960_v54 = vpop.xlane.xlu1 %1959  ;;  %v1962_v9 = vpop.xlane.xlu2 %1961 }
 0x618   : > { %v1985_v20 = vmul.f32 0.03125, %v1960_v54  ;;  %v1986_v30 = vmul.f32 0.03125, %v1962_v9 }
 0x61a   : > { %v2001_v39 = vsub.f32 %v4623_v12, %v1985_v20  ;;  %v2002_v8 = vsub.f32 %v4628_v26, %v1986_v30 }
 0x61c   : > { %v4739_v5 = vmul.f32 %v4316_v10, %v2001_v39  ;;  %v4751_v48 = vmul.f32 %v4316_v10, %v2002_v8 }
 0x61e   : > { %v2033_v16 = vmul.f32 %v4739_v5, %v4739_v5 }
 0x62a   : > { %2043 = vadd.xlane.f32.xlu2 %v2027_v35 }
 0x62f   : > { %2045 = vadd.xlane.f32.xlu0 %v2028_v37 }
 0x632   : > { %2049 = vadd.xlane.f32.xlu2 %v2030_v38 }
 0x634   : > { %v1964_v46 = vpop.xlane.xlu0 %1963 }
 0x635   : > { %v1987_v33 = vmul.f32 0.03125, %v1964_v46 }
 0x637   : > { %v2003_v12 = vsub.f32 %v4633_v51, %v1987_v33  ;;  %2051 = vadd.xlane.f32.xlu0 %v2031_v53  ;;  %v2034_v51 = vmul.f32 %v4751_v48, %v4751_v48 }
 0x639   : > { %v4748_v3 = vmul.f32 %v4316_v10, %v2003_v12 }
 0x63a   : > { %2055 = vadd.xlane.f32.xlu2 %v2033_v16 }
 0x63b   : > { %v2035_v26 = vmul.f32 %v4748_v3, %v4748_v3 }
 0x63c   : > { %v1966_v60 = vpop.xlane.xlu1 %1965 }
 0x63d   : > { %v1988_v7 = vmul.f32 0.03125, %v1966_v60  ;;  %2059 = vadd.xlane.f32.xlu1 %v2035_v26 }
 0x63f   : > { %v2004_v4 = vsub.f32 %v4638_v63, %v1988_v7  ;;  %2057 = vadd.xlane.f32.xlu0 %v2034_v51 }
 0x641   : > { %v4759_v11 = vmul.f32 %v4316_v10, %v2004_v4 }
 0x643   : > { %v2036_v23 = vmul.f32 %v4759_v11, %v4759_v11 }
 0x644   : > { %v1968_v47 = vpop.xlane.xlu2 %1967 }
 0x645   : > { %v1989_v1 = vmul.f32 0.03125, %v1968_v47  ;;  %2061 = vadd.xlane.f32.xlu2 %v2036_v23 }
 0x647   : > { %v2005_v15 = vsub.f32 %v4643_v57, %v1989_v1 }
 0x649   : > { %v4765_v56 = vmul.f32 %v4316_v10, %v2005_v15 }
 0x64b   : > { %v2037_v44 = vmul.f32 %v4765_v56, %v4765_v56 }
 0x64c   : > { %v1970_v49 = vpop.xlane.xlu0 %1969 }
 0x64d   : > { %v1990_v63 = vmul.f32 0.03125, %v1970_v49  ;;  %2063 = vadd.xlane.f32.xlu0 %v2037_v44 }
 0x64f   : > { %v2006_v17 = vsub.f32 %v4649_v42, %v1990_v63  ;;  %v4799_v63 = vld [vmem:[#allocation15 + $0x2] ss:$0 sm:$0xff] }
 0x651   : > { %v4771_v62 = vmul.f32 %v4316_v10, %v2006_v17 }
 0x653   : > { %v2038_v2 = vmul.f32 %v4771_v62, %v4771_v62 }
 0x654   : > { %v1972_v35 = vpop.xlane.xlu1 %1971 }
 0x655   : > { %v1991_v36 = vmul.f32 0.03125, %v1972_v35  ;;  %2065 = vadd.xlane.f32.xlu1 %v2038_v2 }
 0x657   : > { %v2007_v57 = vsub.f32 %v4659_v41, %v1991_v36  ;;  %v4802_v36 = vld [vmem:[#allocation15 + $0x3] ss:$0 sm:$0xff] }
 0x659   : > { %v4777_v54 = vmul.f32 %v4316_v10, %v2007_v57 }
 0x65b   : > { %v2039_v20 = vmul.f32 %v4777_v54, %v4777_v54 }
 0x65c   : > { %v1974_v13 = vpop.xlane.xlu2 %1973 }
 0x65d   : > { %v1992_v37 = vmul.f32 0.03125, %v1974_v13  ;;  %2067 = vadd.xlane.f32.xlu2 %v2039_v20 }
 0x65f   : > { %v2008_v42 = vsub.f32 %v4670_v19, %v1992_v37  ;;  %v2319_v37 = vld [vmem:[#allocation13 + $0x10] sm:$0xff] }
 0x661   : > { %v4783_v9 = vmul.f32 %v4316_v10, %v2008_v42 }
 0x663   : > { %v2040_v39 = vmul.f32 %v4783_v9, %v4783_v9 }
 0x664   : > { %v1976_v38 = vpop.xlane.xlu0 %1975 }
 0x665   : > { %v1993_v30 = vmul.f32 0.03125, %v1976_v38  ;;  %2069 = vadd.xlane.f32.xlu0 %v2040_v39 }
 0x667   : > { %v2009_v41 = vsub.f32 %v4677_v18, %v1993_v30 }
 0x669   : > { %v4789_v46 = vmul.f32 %v4316_v10, %v2009_v41 }
 0x66b   : > { %v2041_v8 = vmul.f32 %v4789_v46, %v4789_v46 }
 0x66c   : > { %v1978_v33 = vpop.xlane.xlu1 %1977 }
 0x66d   : > { %v1994_v53 = vmul.f32 0.03125, %v1978_v33  ;;  %2071 = vadd.xlane.f32.xlu1 %v2041_v8  ;;  %v4807_v8 = vpop.permute.xlu2 %2477  ;;  %v2322_v33 = vld [vmem:[#allocation13 + $0x28] sm:$0xff] }
 0x66f   : > { %v2010_v19 = vsub.f32 %v4687_v52, %v1994_v53 }
 0x671   : > { %v4795_v12 = vmul.f32 %v4316_v10, %v2010_v19 }
 0x673   : > { %v2042_v16 = vmul.f32 %v4795_v12, %v4795_v12 }
 0x674   : > { %v2048_v26 = vpop.xlane.xlu1 %2047 }
 0x675   : > { %v2077_v60 = vmul.f32 0.03125, %v2048_v26  ;;  %2073 = vadd.xlane.f32.xlu2 %v2042_v16 }
 0x677   : > { %v2093_v18 = vadd.f32 1e-05, %v2077_v60  ;;  %v4811_v16 = vpop.permute.xlu0 %2471 }
 0x679   : > { %3421 = vrsqrt.f32 %v2093_v18  ;;  %vm2133_vm2 = vweird.f32 %v2093_v18 }
 0x67c   : > { %v2054_v7 = vpop.xlane.xlu1 %2053 }
 0x67d   : > { %v2080_v51 = vmul.f32 0.03125, %v2054_v7 }
 0x67f   : > { %v3422_v4 = vpop.eup %3421  ;;  %v2096_v23 = vadd.f32 1e-05, %v2080_v51 }
 0x680   : > { %v2128_v47 = vmul.f32 %v3422_v4, %v2093_v18  ;;  %vm2134_vm1 = vweird.f32 %v3422_v4 }
 0x681   : > { %3423 = vrsqrt.f32 %v2096_v23  ;;  %vm2135_vm3 = vmor %vm2133_vm2, %vm2134_vm1  ;;  %vm2163_vm5 = vweird.f32 %v2096_v23 }
 0x682   : > { %v2129_v1 = vmul.f32 %v3422_v4, %v2128_v47 }
 0x684   : > { %v2130_v15 = vmul.f32 0.5, %v2129_v1 }
 0x686   : > { %v2131_v52 = vsub.f32 1.5, %v2130_v15 }
 0x687   : > { %v3424_v10 = vpop.eup %3423 }
 0x688   : > { %v2132_v44 = vmul.f32 %v3422_v4, %v2131_v52  ;;  %v2158_v49 = vmul.f32 %v3424_v10, %v2096_v23  ;;  %vm2164_vm4 = vweird.f32 %v3424_v10 }
 0x689   : > { %vm2165_vm6 = vmor %vm2163_vm5, %vm2164_vm4 }
 0x68a   : > { %v2159_v17 = vmul.f32 %v3424_v10, %v2158_v49  ;;  %v2136_v2 = vsel %vm2135_vm3, %v3422_v4, %v2132_v44 }
 0x68b   : > { %v2269_v35 = vmul.f32 %v2136_v2, %v4693_v0 }
 0x68c   : > { %v2160_v57 = vmul.f32 0.5, %v2159_v17 }
 0x68d   : > { %v2286_v20 = vmul.f32 %v4799_v63, %v2269_v35 }
 0x68e   : > { %v2161_v13 = vsub.f32 1.5, %v2160_v57 }
 0x68f   : > { %v2303_v42 = vadd.f32 %v4802_v36, %v2286_v20 }
 0x690   : > { %v2162_v39 = vmul.f32 %v3424_v10, %v2161_v13 }
 0x691   : > { %v2335_v38 = vmul.f32 %v2319_v37, %v2303_v42 }
 0x692   : > { %v2166_v30 = vsel %vm2165_vm6, %v3424_v10, %v2162_v39 }
 0x693   : > { %2353 = vadd.xlane.f32.xlu2 %v2335_v38  ;;  %v2272_v41 = vmul.f32 %v2166_v30, %v4702_v55 }
 0x695   : > { %v2289_v0 = vmul.f32 %v4799_v63, %v2272_v41 }
 0x697   : > { %v2306_v53 = vadd.f32 %v4802_v36, %v2289_v0 }
 0x699   : > { %v2338_v19 = vmul.f32 %v2322_v33, %v2306_v53 }
 0x69b   : > { %2359 = vadd.xlane.f32.xlu2 %v2338_v19 }
 0x69d   : > { %v2044_v26 = vpop.xlane.xlu2 %2043 }
 0x69e   : > { %v2075_v60 = vmul.f32 0.03125, %v2044_v26 }
 0x6a0   : > { %v2091_v18 = vadd.f32 1e-05, %v2075_v60 }
 0x6a2   : > { %3425 = vrsqrt.f32 %v2091_v18  ;;  %v2046_v7 = vpop.xlane.xlu0 %2045  ;;  %vm2113_vm8 = vweird.f32 %v2091_v18 }
 0x6a3   : > { %v2076_v51 = vmul.f32 0.03125, %v2046_v7 }
 0x6a5   : > { %v2092_v4 = vadd.f32 1e-05, %v2076_v51  ;;  %v2050_v23 = vpop.xlane.xlu2 %2049 }
 0x6a6   : > { %v2078_v55 = vmul.f32 0.03125, %v2050_v23 }
 0x6a7   : > { %3427 = vrsqrt.f32 %v2092_v4  ;;  %vm2123_vm11 = vweird.f32 %v2092_v4 }
 0x6a8   : > { %v3426_v47 = vpop.eup %3425  ;;  %v2094_v1 = vadd.f32 1e-05, %v2078_v55 }
 0x6a9   : > { %v2108_v15 = vmul.f32 %v3426_v47, %v2091_v18  ;;  %vm2114_vm7 = vweird.f32 %v3426_v47 }
 0x6aa   : > { %3429 = vrsqrt.f32 %v2094_v1  ;;  %v2052_v52 = vpop.xlane.xlu0 %2051  ;;  %vm2115_vm9 = vmor %vm2113_vm8, %vm2114_vm7  ;;  %vm2143_vm14 = vweird.f32 %v2094_v1 }
 0x6ab   : > { %v2109_v10 = vmul.f32 %v3426_v47, %v2108_v15  ;;  %v2079_v44 = vmul.f32 0.03125, %v2052_v52 }
 0x6ad   : > { %v3428_v49 = vpop.eup %3427  ;;  %v2110_v17 = vmul.f32 0.5, %v2109_v10  ;;  %v4813_v2 = vadd.f32 1e-05, %v2079_v44  ;;  %v2056_v35 = vpop.xlane.xlu2 %2055 }
 0x6ae   : > { %v2118_v57 = vmul.f32 %v3428_v49, %v2092_v4  ;;  %v2081_v20 = vmul.f32 0.03125, %v2056_v35  ;;  %vm2124_vm10 = vweird.f32 %v3428_v49 }
 0x6af   : > { %v2111_v13 = vsub.f32 1.5, %v2110_v17  ;;  %3431 = vrsqrt.f32 %v4813_v2  ;;  %vm4830_vm12 = vmor %vm2123_vm11, %vm2124_vm10  ;;  %vm2153_vm1 = vweird.f32 %v4813_v2 }
 0x6b0   : > { %v3430_v37 = vpop.eup %3429  ;;  %v2119_v42 = vmul.f32 %v3428_v49, %v2118_v57  ;;  %v4816_v39 = vadd.f32 1e-05, %v2081_v20  ;;  %v2060_v38 = vpop.xlane.xlu1 %2059 }
 0x6b1   : > { %v2112_v30 = vmul.f32 %v3426_v47, %v2111_v13  ;;  %v2138_v41 = vmul.f32 %v3430_v37, %v2094_v1  ;;  %v2083_v0 = vmul.f32 0.03125, %v2060_v38  ;;  %vm2144_vm13 = vweird.f32 %v3430_v37 }
 0x6b2   : > { %v2120_v33 = vmul.f32 0.5, %v2119_v42  ;;  %3433 = vrsqrt.f32 %v4816_v39  ;;  %v2058_v53 = vpop.xlane.xlu0 %2057  ;;  %vm4843_vm15 = vmor %vm2143_vm14, %vm2144_vm13  ;;  %vm2173_vm4 = vweird.f32 %v4816_v39 }
 0x6b3   : > { %v2139_v19 = vmul.f32 %v3430_v37, %v2138_v41  ;;  %v4819_v26 = vadd.f32 1e-05, %v2083_v0  ;;  %v2082_v60 = vmul.f32 0.03125, %v2058_v53  ;;  %v2116_v7 = vsel %vm2115_vm9, %v3426_v47, %v2112_v30  ;;  %v2318_v47 = vld [vmem:[#allocation13 + $0x8] sm:$0xff] }
 0x6b4   : > { %v2121_v51 = vsub.f32 1.5, %v2120_v33  ;;  %v2267_v23 = vmul.f32 %v2116_v7, %v4717_v27  ;;  %v2317_v27 = vld [vmem:[#allocation13] sm:$0xff] }
 0x6b5   : > { %v4822_v55 = vpop.eup %3431  ;;  %v2140_v15 = vmul.f32 0.5, %v2139_v19  ;;  %3435 = vrsqrt.f32 %v4819_v26  ;;  %v4825_v18 = vadd.f32 1e-05, %v2082_v60  ;;  %vm2193_vm7 = vweird.f32 %v4819_v26 }
 0x6b6   : > { %v2122_v52 = vmul.f32 %v3428_v49, %v2121_v51  ;;  %v2148_v10 = vmul.f32 %v4822_v55, %v4813_v2  ;;  %v2284_v44 = vmul.f32 %v4799_v63, %v2267_v23  ;;  %vm2154_vm0 = vweird.f32 %v4822_v55 }
 0x6b7   : > { %v2141_v17 = vsub.f32 1.5, %v2140_v15  ;;  %3437 = vrsqrt.f32 %v4825_v18  ;;  %vm4864_vm2 = vmor %vm2153_vm1, %vm2154_vm0  ;;  %vm2183_vm10 = vweird.f32 %v4825_v18 }
 0x6b8   : > { %v4835_v35 = vpop.eup %3433  ;;  %v2149_v57 = vmul.f32 %v4822_v55, %v2148_v10  ;;  %v2062_v20 = vpop.xlane.xlu2 %2061  ;;  %v2301_v4 = vadd.f32 %v4802_v36, %v2284_v44  ;;  %v2126_v13 = vsel %vm4830_vm12, %v3428_v49, %v2122_v52 }
 0x6b9   : > { %v2142_v42 = vmul.f32 %v3430_v37, %v2141_v17  ;;  %v2168_v38 = vmul.f32 %v4835_v35, %v4816_v39  ;;  %v2084_v30 = vmul.f32 0.03125, %v2062_v20  ;;  %v2268_v53 = vmul.f32 %v2126_v13, %v4724_v50  ;;  %v2320_v13 = vld [vmem:[#allocation13 + $0x18] sm:$0xff] }
 0x6ba   : > { %v2150_v0 = vmul.f32 0.5, %v2149_v57  ;;  %v2333_v33 = vmul.f32 %v2317_v27, %v2301_v4  ;;  %vm2174_vm3 = vweird.f32 %v4835_v35 }
 0x6bb   : > { %v3436_v19 = vpop.eup %3435  ;;  %v2169_v60 = vmul.f32 %v4835_v35, %v2168_v38  ;;  %v4849_v7 = vadd.f32 1e-05, %v2084_v30  ;;  %v2146_v1 = vsel %vm4843_vm15, %v3430_v37, %v2142_v42  ;;  %v2285_v23 = vmul.f32 %v4799_v63, %v2268_v53  ;;  %vm4878_vm5 = vmor %vm2173_vm4, %vm2174_vm3 }
 0x6bc   : > { %v2151_v49 = vsub.f32 1.5, %v2150_v0  ;;  %v2188_v51 = vmul.f32 %v3436_v19, %v4819_v26  ;;  %2349 = vadd.xlane.f32.xlu0 %v2333_v33  ;;  %v2270_v50 = vmul.f32 %v2146_v1, %v4727_v58  ;;  %vm2194_vm6 = vweird.f32 %v3436_v19 }
 0x6bd   : > { %v4856_v15 = vpop.eup %3437  ;;  %v2170_v52 = vmul.f32 0.5, %v2169_v60  ;;  %3439 = vrsqrt.f32 %v4849_v7  ;;  %v2302_v57 = vadd.f32 %v4802_v36, %v2285_v23  ;;  %vm2195_vm9 = vmor %vm2193_vm7, %vm2194_vm6  ;;  %vm2203_vm13 = vweird.f32 %v4849_v7 }
 0x6be   : > { %v2152_v10 = vmul.f32 %v4822_v55, %v2151_v49  ;;  %v2189_v37 = vmul.f32 %v3436_v19, %v2188_v51  ;;  %v2178_v44 = vmul.f32 %v4856_v15, %v4825_v18  ;;  %v2287_v58 = vmul.f32 %v4799_v63, %v2270_v50 }
 0x6bf   : > { %v2171_v27 = vsub.f32 1.5, %v2170_v52  ;;  %v2334_v41 = vmul.f32 %v2318_v47, %v2302_v57  ;;  %vm2184_vm8 = vweird.f32 %v4856_v15 }
 0x6c0   : > { %v2190_v20 = vmul.f32 0.5, %v2189_v37  ;;  %v2179_v2 = vmul.f32 %v4856_v15, %v2178_v44  ;;  %v2064_v4 = vpop.xlane.xlu0 %2063  ;;  %v2156_v42 = vsel %vm4864_vm2, %v4822_v55, %v2152_v10  ;;  %v2304_v0 = vadd.f32 %v4802_v36, %v2287_v58  ;;  %vm2185_vm11 = vmor %vm2183_vm10, %vm2184_vm8 }
 0x6c1   : > { %v2172_v38 = vmul.f32 %v4835_v35, %v2171_v27  ;;  %v2085_v30 = vmul.f32 0.03125, %v2064_v4  ;;  %v2271_v60 = vmul.f32 %v2156_v42, %v4736_v22  ;;  %2351 = vadd.xlane.f32.xlu1 %v2334_v41 }
 0x6c2   : > { %v2191_v39 = vsub.f32 1.5, %v2190_v20  ;;  %v2180_v53 = vmul.f32 0.5, %v2179_v2  ;;  %v2336_v55 = vmul.f32 %v2320_v13, %v2304_v0  ;;  %v2323_v20 = vld [vmem:[#allocation13 + $0x30] sm:$0xff] }
 0x6c3   : > { %v3440_v1 = vpop.eup %3439  ;;  %v4884_v49 = vadd.f32 1e-05, %v2085_v30  ;;  %v2176_v51 = vsel %vm4878_vm5, %v4835_v35, %v2172_v38  ;;  %v2288_v22 = vmul.f32 %v4799_v63, %v2271_v60  ;;  %v2321_v35 = vld [vmem:[#allocation13 + $0x20] sm:$0xff]  ;;  %v2324_v60 = vld [vmem:[#allocation13 + $0x38] sm:$0xff] }
 0x6c4   : > { %v2192_v23 = vmul.f32 %v3436_v19, %v2191_v39  ;;  %v2181_v52 = vsub.f32 1.5, %v2180_v53  ;;  %v2198_v50 = vmul.f32 %v3440_v1, %v4849_v7  ;;  %2355 = vadd.xlane.f32.xlu0 %v2336_v55  ;;  %v2273_v26 = vmul.f32 %v2176_v51, %v4739_v5 }
 0x6c5   : > { %3441 = vrsqrt.f32 %v4884_v49  ;;  %v2305_v47 = vadd.f32 %v4802_v36, %v2288_v22  ;;  %vm2204_vm12 = vweird.f32 %v3440_v1  ;;  %vm2213_vm0 = vweird.f32 %v4884_v49 }
 0x6c6   : > { %v2182_v10 = vmul.f32 %v4856_v15, %v2181_v52  ;;  %v2199_v37 = vmul.f32 %v3440_v1, %v2198_v50  ;;  %v2196_v44 = vsel %vm2195_vm9, %v3436_v19, %v2192_v23  ;;  %v2290_v17 = vmul.f32 %v4799_v63, %v2273_v26  ;;  %v2325_v19 = vld [vmem:[#allocation13 + $0x40] sm:$0xff]  ;;  %vm2205_vm14 = vmor %vm2203_vm13, %vm2204_vm12 }
 0x6c7   : > { %v2275_v27 = vmul.f32 %v2196_v44, %v4748_v3  ;;  %v2337_v4 = vmul.f32 %v2321_v35, %v2305_v47 }
 0x6c8   : > { %v2200_v57 = vmul.f32 0.5, %v2199_v37  ;;  %v2066_v58 = vpop.xlane.xlu1 %2065  ;;  %v2186_v2 = vsel %vm2185_vm11, %v4856_v15, %v2182_v10  ;;  %v2307_v13 = vadd.f32 %v4802_v36, %v2290_v17  ;;  %v2326_v37 = vld [vmem:[#allocation13 + $0x48] sm:$0xff] }
 0x6c9   : > { %v2086_v5 = vmul.f32 0.03125, %v2066_v58  ;;  %v2292_v18 = vmul.f32 %v4799_v63, %v2275_v27  ;;  %v2274_v38 = vmul.f32 %v2186_v2, %v4751_v48  ;;  %2357 = vadd.xlane.f32.xlu1 %v2337_v4 }
 0x6ca   : > { %v2201_v42 = vsub.f32 1.5, %v2200_v57  ;;  %v2339_v3 = vmul.f32 %v2323_v20, %v2307_v13 }
 0x6cb   : > { %v3442_v30 = vpop.eup %3441  ;;  %v2102_v41 = vadd.f32 1e-05, %v2086_v5  ;;  %v2309_v0 = vadd.f32 %v4802_v36, %v2292_v18  ;;  %v2291_v39 = vmul.f32 %v4799_v63, %v2274_v38  ;;  %v2327_v18 = vld [vmem:[#allocation13 + $0x50] sm:$0xff] }
 0x6cc   : > { %v2202_v33 = vmul.f32 %v3440_v1, %v2201_v42  ;;  %v2208_v15 = vmul.f32 %v3442_v30, %v4884_v49  ;;  %2361 = vadd.xlane.f32.xlu0 %v2339_v3  ;;  %vm2214_vm15 = vweird.f32 %v3442_v30 }
 0x6cd   : > { %3443 = vrsqrt.f32 %v2102_v41  ;;  %v2341_v53 = vmul.f32 %v2325_v19, %v2309_v0  ;;  %v2308_v48 = vadd.f32 %v4802_v36, %v2291_v39  ;;  %vm2215_vm1 = vmor %vm2213_vm0, %vm2214_vm15  ;;  %vm2223_vm3 = vweird.f32 %v2102_v41 }
 0x6ce   : > { %v2209_v55 = vmul.f32 %v3442_v30, %v2208_v15  ;;  %v2206_v51 = vsel %vm2205_vm14, %v3440_v1, %v2202_v33 }
 0x6cf   : > { %2365 = vadd.xlane.f32.xlu2 %v2341_v53  ;;  %v2276_v23 = vmul.f32 %v2206_v51, %v4759_v11  ;;  %v2340_v22 = vmul.f32 %v2324_v60, %v2308_v48  ;;  %v2328_v48 = vld [vmem:[#allocation13 + $0x58] sm:$0xff] }
 0x6d0   : > { %v2210_v52 = vmul.f32 0.5, %v2209_v55  ;;  %v2068_v50 = vpop.xlane.xlu2 %2067 }
 0x6d1   : > { %v2087_v7 = vmul.f32 0.03125, %v2068_v50  ;;  %v2293_v26 = vmul.f32 %v4799_v63, %v2276_v23  ;;  %2363 = vadd.xlane.f32.xlu1 %v2340_v22 }
 0x6d2   : > { %v2211_v10 = vsub.f32 1.5, %v2210_v52 }
 0x6d3   : > { %v3444_v35 = vpop.eup %3443  ;;  %v2103_v44 = vadd.f32 1e-05, %v2087_v7  ;;  %v2310_v47 = vadd.f32 %v4802_v36, %v2293_v26 }
 0x6d4   : > { %v2212_v17 = vmul.f32 %v3442_v30, %v2211_v10  ;;  %v2218_v1 = vmul.f32 %v3444_v35, %v2102_v41  ;;  %vm2224_vm2 = vweird.f32 %v3444_v35 }
 0x6d5   : > { %3445 = vrsqrt.f32 %v2103_v44  ;;  %v2342_v11 = vmul.f32 %v2326_v37, %v2310_v47  ;;  %vm2225_vm4 = vmor %vm2223_vm3, %vm2224_vm2  ;;  %vm2233_vm6 = vweird.f32 %v2103_v44  ;;  %vm2582_vm2 = vcmask 195712  }
 0x6d6   : > { %v2219_v27 = vmul.f32 %v3444_v35, %v2218_v1  ;;  %v2216_v57 = vsel %vm2215_vm1, %v3442_v30, %v2212_v17  ;;  %v2329_v1 = vld [vmem:[#allocation13 + $0x60] sm:$0xff]  ;;  %vm2578_vm1 = vcmask 130112   ;;  %vm2586_vm3 = vcmask 261312  }
 0x6d7   : > { %2367 = vadd.xlane.f32.xlu0 %v2342_v11  ;;  %v2277_v58 = vmul.f32 %v2216_v57, %v4765_v56 }
 0x6d8   : > { %v2220_v20 = vmul.f32 0.5, %v2219_v27  ;;  %v2070_v2 = vpop.xlane.xlu0 %2069 }
 0x6d9   : > { %v2088_v5 = vmul.f32 0.03125, %v2070_v2  ;;  %v2294_v4 = vmul.f32 %v4799_v63, %v2277_v58 }
 0x6da   : > { %v2221_v13 = vsub.f32 1.5, %v2220_v20 }
 0x6db   : > { %v3446_v42 = vpop.eup %3445  ;;  %v2104_v19 = vadd.f32 1e-05, %v2088_v5  ;;  %v2311_v49 = vadd.f32 %v4802_v36, %v2294_v4 }
 0x6dc   : > { %v2222_v38 = vmul.f32 %v3444_v35, %v2221_v13  ;;  %v2228_v3 = vmul.f32 %v3446_v42, %v2103_v44  ;;  %vm2234_vm5 = vweird.f32 %v3446_v42 }
 0x6dd   : > { %3447 = vrsqrt.f32 %v2104_v19  ;;  %v2343_v30 = vmul.f32 %v2327_v18, %v2311_v49  ;;  %vm2235_vm7 = vmor %vm2233_vm6, %vm2234_vm5  ;;  %vm2243_vm9 = vweird.f32 %v2104_v19  ;;  %vm2594_vm5 = vcmask 392512  }
 0x6de   : > { %v2229_v0 = vmul.f32 %v3446_v42, %v2228_v3  ;;  %v2226_v56 = vsel %vm2225_vm4, %v3444_v35, %v2222_v38  ;;  %vm2590_vm4 = vcmask 326912   ;;  %vm2598_vm6 = vcmask 458112  }
 0x6df   : > { %2369 = vadd.xlane.f32.xlu1 %v2343_v30  ;;  %v2278_v33 = vmul.f32 %v2226_v56, %v4771_v62 }
 0x6e0   : > { %v2230_v15 = vmul.f32 0.5, %v2229_v0  ;;  %v2072_v39 = vpop.xlane.xlu1 %2071 }
 0x6e1   : > { %v2089_v53 = vmul.f32 0.03125, %v2072_v39  ;;  %v2295_v60 = vmul.f32 %v4799_v63, %v2278_v33 }
 0x6e2   : > { %v2231_v55 = vsub.f32 1.5, %v2230_v15 }
 0x6e3   : > { %v3448_v51 = vpop.eup %3447  ;;  %v2105_v23 = vadd.f32 1e-05, %v2089_v53  ;;  %v2312_v41 = vadd.f32 %v4802_v36, %v2295_v60  ;;  %v2331_v53 = vld [vmem:[#allocation13 + $0x70] sm:$0xff] }
 0x6e4   : > { %v2232_v52 = vmul.f32 %v3446_v42, %v2231_v55  ;;  %v2238_v50 = vmul.f32 %v3448_v51, %v2104_v19  ;;  %vm2244_vm8 = vweird.f32 %v3448_v51 }
 0x6e5   : > { %3449 = vrsqrt.f32 %v2105_v23  ;;  %v2344_v22 = vmul.f32 %v2328_v48, %v2312_v41  ;;  %vm2245_vm10 = vmor %vm2243_vm9, %vm2244_vm8  ;;  %vm2253_vm12 = vweird.f32 %v2105_v23  ;;  %vm2606_vm8 = vcmask 589312  }
 0x6e6   : > { %v2239_v7 = vmul.f32 %v3448_v51, %v2238_v50  ;;  %v2236_v62 = vsel %vm2235_vm7, %v3446_v42, %v2232_v52  ;;  %v2330_v42 = vld [vmem:[#allocation13 + $0x68] sm:$0xff]  ;;  %v2332_v52 = vld [vmem:[#allocation13 + $0x78] sm:$0xff]  ;;  %vm2602_vm7 = vcmask 523712   ;;  %vm2610_vm9 = vcmask 654912  }
 0x6e7   : > { %2371 = vadd.xlane.f32.xlu2 %v2344_v22  ;;  %v2279_v26 = vmul.f32 %v2236_v62, %v4777_v54  ;;  %v3793_v22 = vmov 0  }
 0x6e8   : > { %v2240_v10 = vmul.f32 0.5, %v2239_v7  ;;  %v2074_v37 = vpop.xlane.xlu2 %2073  ;;  %3283 = vset.pattern.permute.xlu1 %v3793_v22  ;;  %3284 = vset.pattern.permute.xlu2 %v3793_v22 }
 0x6e9   : > { %v2090_v35 = vmul.f32 0.03125, %v2074_v37  ;;  %v2296_v47 = vmul.f32 %v4799_v63, %v2279_v26  ;;  %3285 = vset.pattern.permute.xlu0 %v3793_v22  ;;  %v2604_v22 = vadd.s32 4294967232, %v4313_v59 }
 0x6ea   : > { %v2241_v17 = vsub.f32 1.5, %v2240_v10 }
 0x6eb   : > { %v3450_v11 = vpop.eup %3449  ;;  %v2106_v27 = vadd.f32 1e-05, %v2090_v35  ;;  %v2313_v44 = vadd.f32 %v4802_v36, %v2296_v47 }
 0x6ec   : > { %v2242_v57 = vmul.f32 %v3448_v51, %v2241_v17  ;;  %v2248_v58 = vmul.f32 %v3450_v11, %v2105_v23  ;;  %vm2254_vm11 = vweird.f32 %v3450_v11 }
 0x6ed   : > { %3451 = vrsqrt.f32 %v2106_v27  ;;  %v2345_v20 = vmul.f32 %v2329_v1, %v2313_v44  ;;  %vm2255_vm13 = vmor %vm2253_vm12, %vm2254_vm11  ;;  %vm2263_vm15 = vweird.f32 %v2106_v27  ;;  %vm2618_vm11 = vcmask 786112  }
 0x6ee   : > { %v2249_v2 = vmul.f32 %v3450_v11, %v2248_v58  ;;  %v2246_v54 = vsel %vm2245_vm10, %v3448_v51, %v2242_v57  ;;  %vm2614_vm10 = vcmask 720512   ;;  %vm2622_vm12 = vcmask 851712  }
 0x6ef   : > { %2373 = vadd.xlane.f32.xlu0 %v2345_v20  ;;  %v2280_v5 = vmul.f32 %v2246_v54, %v4783_v9 }
 0x6f0   : > { %v2250_v4 = vmul.f32 0.5, %v2249_v2 }
 0x6f1   : > { %v2297_v13 = vmul.f32 %v4799_v63, %v2280_v5 }
 0x6f2   : > { %v2251_v18 = vsub.f32 1.5, %v2250_v4 }
 0x6f3   : > { %v3452_v49 = vpop.eup %3451  ;;  %v2314_v38 = vadd.f32 %v4802_v36, %v2297_v13 }
 0x6f4   : > { %v2252_v3 = vmul.f32 %v3450_v11, %v2251_v18  ;;  %v2258_v19 = vmul.f32 %v3452_v49, %v2106_v27  ;;  %vm2264_vm14 = vweird.f32 %v3452_v49 }
 0x6f5   : > { %v2346_v30 = vmul.f32 %v2330_v42, %v2314_v38  ;;  %vm2265_vm0 = vmor %vm2263_vm15, %vm2264_vm14  ;;  %vm2630_vm14 = vcmask 982912   ;;  %vm2634_vm15 = vcmask 1048512  }
 0x6f6   : > { %v2259_v0 = vmul.f32 %v3452_v49, %v2258_v19  ;;  %v2256_v56 = vsel %vm2255_vm13, %v3450_v11, %v2252_v3  ;;  %v2584_v3 = vadd.s32 4294967272, %v4313_v59  ;;  %vm2626_vm13 = vcmask 917312  }
 0x6f7   : > { %2375 = vadd.xlane.f32.xlu1 %v2346_v30  ;;  %v2281_v33 = vmul.f32 %v2256_v56, %v4789_v46  ;;  %v2592_v56 = vadd.s32 4294967256, %v4313_v59 }
 0x6f8   : > { %v2260_v9 = vmul.f32 0.5, %v2259_v0 }
 0x6f9   : > { %v2298_v15 = vmul.f32 %v4799_v63, %v2281_v33  ;;  %v2588_v33 = vadd.s32 4294967264, %v4313_v59 }
 0x6fa   : > { %v2261_v39 = vsub.f32 1.5, %v2260_v9 }
 0x6fb   : > { %v2315_v60 = vadd.f32 %v4802_v36, %v2298_v15 }
 0x6fc   : > { %v2262_v55 = vmul.f32 %v3452_v49, %v2261_v39 }
 0x6fd   : > { %v2347_v48 = vmul.f32 %v2331_v53, %v2315_v60  ;;  %v2600_v60 = vadd.s32 4294967240, %v4313_v59 }
 0x6fe   : > { %v2266_v51 = vsel %vm2265_vm0, %v3452_v49, %v2262_v55  ;;  %v2576_v49 = vadd.s32 4294967288, %v4313_v59 }
 0x6ff   : > { %2377 = vadd.xlane.f32.xlu2 %v2347_v48  ;;  %v2282_v23 = vmul.f32 %v2266_v51, %v4795_v12  ;;  %v2596_v48 = vadd.s32 4294967248, %v4313_v59 }
 0x701   : > { %v2299_v41 = vmul.f32 %v4799_v63, %v2282_v23 }
 0x703   : > { %v2316_v46 = vadd.f32 %v4802_v36, %v2299_v41 }
 0x705   : > { %v2348_v50 = vmul.f32 %v2332_v52, %v2316_v46 }
 0x706   : > { %v2354_v62 = vpop.xlane.xlu2 %2353 }
 0x707   : > { %2379 = vadd.xlane.f32.xlu0 %v2348_v50  ;;  %v2497_v12 = vadd.f32 %v4653_v24, %v2354_v62 }
 0x70e   : > { %v2360_v36 = vpop.xlane.xlu2 %2359 }
 0x70f   : > { %v2500_v1 = vadd.f32 %v4683_v25, %v2360_v36 }
 0x72f   : > { %v2350_v7 = vpop.xlane.xlu0 %2349 }
 0x730   : > { %v2495_v26 = vadd.f32 %v4655_v21, %v2350_v7 }
 0x732   : > { %2528 = vperm.xlu1 %3283, %v2495_v26   ;;  %v2612_v26 = vadd.s32 4294967216, %v4313_v59 }
 0x734   : > { %v2352_v10 = vpop.xlane.xlu1 %2351 }
 0x735   : > { %v2496_v37 = vadd.f32 %v4662_v31, %v2352_v10  ;;  %v2608_v10 = vadd.s32 4294967224, %v4313_v59 }
 0x737   : > { %v2356_v63 = vpop.xlane.xlu0 %2355  ;;  %2531 = vperm.xlu2 %3284, %v2496_v37  }
 0x738   : > { %v2498_v35 = vadd.f32 %v4673_v6, %v2356_v63 }
 0x73a   : > { %2534 = vperm.xlu1 %3283, %v2497_v12   ;;  %2537 = vperm.xlu0 %3285, %v2498_v35   ;;  %v2616_v12 = vadd.s32 4294967208, %v4313_v59 }
 0x73c   : > { %v2358_v47 = vpop.xlane.xlu1 %2357 }
 0x73d   : > { %v2499_v17 = vadd.f32 %v4667_v14, %v2358_v47 }
 0x73f   : > { %2540 = vperm.xlu2 %3284, %v2499_v17   ;;  %v2362_v31 = vpop.xlane.xlu0 %2361 }
 0x740   : > { %v2501_v27 = vadd.f32 %v4679_v28, %v2362_v31  ;;  %v2620_v31 = vadd.s32 4294967200, %v4313_v59 }
 0x742   : > { %2543 = vperm.xlu1 %3283, %v2500_v1   ;;  %v2366_v21 = vpop.xlane.xlu2 %2365 }
 0x743   : > { %v2503_v11 = vadd.f32 %v4690_v34, %v2366_v21 }
 0x744   : > { %v2364_v24 = vpop.xlane.xlu1 %2363 }
 0x745   : > { %2552 = vperm.xlu0 %3285, %v2503_v11   ;;  %v2502_v6 = vadd.f32 %v4698_v45, %v2364_v24  ;;  %v2624_v11 = vadd.s32 4294967192, %v4313_v59 }
 0x747   : > { %2546 = vperm.xlu2 %3284, %v2501_v27  }
 0x74a   : > { %2549 = vperm.xlu1 %3283, %v2502_v6   ;;  %v2368_v44 = vpop.xlane.xlu0 %2367 }
 0x74b   : > { %v2504_v57 = vadd.f32 %v4665_v29, %v2368_v44  ;;  %v2628_v44 = vadd.s32 4294967184, %v4313_v59 }
 0x74f   : > { %2555 = vperm.xlu2 %3284, %v2504_v57  }
 0x752   : > { %v2370_v14 = vpop.xlane.xlu1 %2369 }
 0x753   : > { %v2505_v25 = vadd.f32 %v4709_v61, %v2370_v14  ;;  %v2632_v14 = vadd.s32 4294967176, %v4313_v59 }
 0x755   : > { %2558 = vperm.xlu1 %3283, %v2505_v25  }
 0x75a   : > { %v2372_v58 = vpop.xlane.xlu2 %2371 }
 0x75b   : > { %v2506_v34 = vadd.f32 %v4704_v32, %v2372_v58 }
 0x75d   : > { %2561 = vperm.xlu0 %3285, %v2506_v34  }
 0x762   : > { %v2374_v20 = vpop.xlane.xlu0 %2373 }
 0x763   : > { %v2507_v2 = vadd.f32 %v4713_v40, %v2374_v20  ;;  %v2580_v40 = vadd.s32 4294967280, %v4313_v59 }
 0x765   : > { %2564 = vperm.xlu2 %3284, %v2507_v2  }
 0x76a   : > { %v2376_v28 = vpop.xlane.xlu1 %2375 }
 0x76b   : > { %v2508_v45 = vadd.f32 %v4711_v43, %v2376_v28 }
 0x76d   : > { %2567 = vperm.xlu1 %3283, %v2508_v45  }
 0x772   : > { %v2378_v54 = vpop.xlane.xlu2 %2377 }
 0x773   : > { %v2509_v29 = vadd.f32 %v4811_v16, %v2378_v54 }
 0x775   : > { %2570 = vperm.xlu0 %3285, %v2509_v29  }
 0x77a   : > { %v2380_v5 = vpop.xlane.xlu0 %2379 }
 0x77b   : > { %v2510_v61 = vadd.f32 %v4807_v8, %v2380_v5 }
 0x77d   : > { %2573 = vperm.xlu2 %3284, %v2510_v61  }
 0x791   : > { %v2532_v13 = vpop.permute.xlu2 %2531 }
 0x792   : > { %v2577_v30 = vperm.slane %v2532_v13, %v2576_v49 }
 0x799   : > { %v2541_v18 = vpop.permute.xlu2 %2540 }
 0x79a   : > { %v2589_v55 = vperm.slane %v2541_v18, %v2588_v33 }
 0x7a1   : > { %v2547_v38 = vpop.permute.xlu2 %2546 }
 0x7a2   : > { %v2597_v50 = vperm.slane %v2547_v38, %v2596_v48 }
 0x7a4   : > { %v2529_v4 = vpop.permute.xlu1 %2528 }
 0x7a5   : > { %v2575_v43 = vperm.slane %v2529_v4, %v4313_v59 }
 0x7a7   : > { %v2579_v8 = vsel %vm2578_vm1, %v2577_v30, %v2575_v43 }
 0x7a9   : > { %v2556_v51 = vpop.permute.xlu2 %2555 }
 0x7aa   : > { %v2609_v1 = vperm.slane %v2556_v51, %v2608_v10 }
 0x7ac   : > { %v2535_v32 = vpop.permute.xlu1 %2534  ;;  %v2538_v16 = vpop.permute.xlu0 %2537 }
 0x7ad   : > { %v2581_v19 = vperm.slane %v2535_v32, %v2580_v40  ;;  %v2585_v0 = vperm.slane %v2538_v16, %v2584_v3 }
 0x7af   : > { %v2583_v9 = vsel %vm2582_vm2, %v2581_v19, %v2579_v8 }
 0x7b0   : > { %v2587_v39 = vsel %vm2586_vm3, %v2585_v0, %v2583_v9 }
 0x7b1   : > { %v2591_v41 = vsel %vm2590_vm4, %v2589_v55, %v2587_v39 }
 0x7b4   : > { %v2544_v42 = vpop.permute.xlu1 %2543 }
 0x7b5   : > { %v2593_v53 = vperm.slane %v2544_v42, %v2592_v56 }
 0x7b7   : > { %v2553_v23 = vpop.permute.xlu0 %2552  ;;  %v2595_v52 = vsel %vm2594_vm5, %v2593_v53, %v2591_v41 }
 0x7b8   : > { %v2599_v62 = vsel %vm2598_vm6, %v2597_v50, %v2595_v52  ;;  %v2605_v63 = vperm.slane %v2553_v23, %v2604_v22 }
 0x7bc   : > { %v2550_v15 = vpop.permute.xlu1 %2549 }
 0x7bd   : > { %v2601_v46 = vperm.slane %v2550_v15, %v2600_v60 }
 0x7bf   : > { %v2603_v37 = vsel %vm2602_vm7, %v2601_v46, %v2599_v62  ;;  %v2565_v35 = vpop.permute.xlu2 %2564 }
 0x7c0   : > { %v2607_v47 = vsel %vm2606_vm8, %v2605_v63, %v2603_v37  ;;  %v2621_v58 = vperm.slane %v2565_v35, %v2620_v31 }
 0x7c1   : > { %v2611_v27 = vsel %vm2610_vm9, %v2609_v1, %v2607_v47 }
 0x7c7   : > { %v2559_v7 = vpop.permute.xlu1 %2558 }
 0x7c8   : > { %v2613_v17 = vperm.slane %v2559_v7, %v2612_v26 }
 0x7ca   : > { %v2615_v6 = vsel %vm2614_vm10, %v2613_v17, %v2611_v27 }
 0x7cf   : > { %v2562_v36 = vpop.permute.xlu0 %2561 }
 0x7d0   : > { %v2617_v21 = vperm.slane %v2562_v36, %v2616_v12 }
 0x7d2   : > { %v2619_v57 = vsel %vm2618_vm11, %v2617_v21, %v2615_v6 }
 0x7d3   : > { %v2623_v2 = vsel %vm2622_vm12, %v2621_v58, %v2619_v57 }
 0x7d7   : > { %v2574_v34 = vpop.permute.xlu2 %2573 }
 0x7d8   : > { %v2633_v45 = vperm.slane %v2574_v34, %v2632_v14 }
 0x7df   : > { %v2568_v24 = vpop.permute.xlu1 %2567 }
 0x7e0   : > { %v2625_v25 = vperm.slane %v2568_v24, %v2624_v11 }
 0x7e2   : > { %v2627_v54 = vsel %vm2626_vm13, %v2625_v25, %v2623_v2 }
 0x7e7   : > { %v2571_v20 = vpop.permute.xlu0 %2570 }
 0x7e8   : > { %v2629_v28 = vperm.slane %v2571_v20, %v2628_v44 }
 0x7ea   : > { %v2631_v29 = vsel %vm2630_vm14, %v2629_v28, %v2627_v54 }
 0x7eb   : > { %v2635_v59 = vsel %vm2634_vm15, %v2633_v45, %v2631_v29 }
 0x7ec   : > { %2637 = vst [vmem:[%s435_s15] sm:$0x1] %v2635_v59 }
 0x7ed   : > { %3720 = shalt.err (!%p3717_p9)
}
 0x7ee   : > { %3174 = dma.vmem_to_hbm [thread:$0]  (%p3957_p0), %s2650_s17, 16, %s2652_s21, %s2639_s12  }
 0x7ef PF: > { %s2663_s0 = sand.u32 1, %s3767_s27   ;;  %p5032_p10 = scmp.ge.s32.totalorder %s3779_s30, 2 }
 0x7f0   : > { %s2664_s1 = scalar_lea.sflag [#allocation5], %s2663_s0 }
 0x7f1   : > { %p3203_p11 = pnand %p5032_p10, %p3963_p6 }
 0x7f3   : > { %p3204_p12 = pneg %p3203_p11 }
 0x7f5   : > { %3762 = dma.done.wait (%p3204_p12), %s2664_s1, 16  }
 0x7f6   : > { %3764 = vsyncadd (%p3204_p12), %s2664_s1, 4294967280  ;;  %p22_p2 = scmp.ge.s32.totalorder %s3933_s16, 4   ;;  %s5033_s27 = smov %s3771_s28 }
 0x7f7   : > { %s5034_s28 = smov %s3775_s29  ;;  %s5035_s29 = smov %s3945_s22 }
 0x7f8   : > { %s5036_s30 = smov %s3933_s16  ;;  %24 = sbr.rel (!%p22_p2) target bundleno = 12 (0xc), region = 124 }
 0x7fd   :  { %2669 = vsyncpa [#allocation4], 1 }
 0x7fe   :  { %2671 = vsyncpa [#allocation4 + $0x1], 1 }
 0x7ff   :  { %2672 = vsyncpa [#allocation7], 1 }
 0x800   :  { %2673 = vsyncpa [#allocation11], 1 }
 0x801   :  { %2674 = vsyncpa [#allocation14], 1 }
 0x802   :  { %2675 = vsyncpa [#allocation5], 1 }
 0x803   :  { %2677 = vsyncpa [#allocation5 + $0x1], 1 }

</bundles_post_ra>
